<compile_context>
chip_gen: v7x
topology: tpu7x:2x2x1
jax: 0.10.0
libtpu: 0.0.40
codegen_flags: <defaults>
</compile_context>

<pallas_src>
import jax
import jax.numpy as jnp
from jax import lax
from jax.experimental import pallas as pl
from jax.experimental.pallas import tpu as pltpu

# ---------------- hyper-parameters implied by the module ----------------
IMAGE = 84
PATCH = 14
GRID_HW = IMAGE // PATCH            # 6
N_TOK = GRID_HW * GRID_HW           # 36 tokens
DIM = 192
DEPTH = 12
HEADS = 3
DIM_HEAD = 64                       # SimpleViT default
MLP_DIM = DIM * 4                   # 768
SCALE = DIM_HEAD ** -0.5
LN_EPS = 1e-5
NEG_INF = -1e30


# ---------------- in-kernel math helpers (f32 on VPU/EUP) ----------------
def _layernorm(x, w, b):
    mu = jnp.mean(x, axis=-1, keepdims=True)
    var = jnp.mean((x - mu) ** 2, axis=-1, keepdims=True)
    return (x - mu) * jax.lax.rsqrt(var + LN_EPS) * w + b


def _gelu(x):
    # tanh-form GELU (single EUP tanh) per perf review; max |err| vs torch's
    # exact erf GELU ~1e-3, i.e. below the bf16-matmul noise floor.
    c = 0.7978845608028654          # sqrt(2/pi)
    return 0.5 * x * (1.0 + jnp.tanh(c * (x + 0.044715 * x * x * x)))


# ---------------- fused ViT kernel ----------------
def _vit_kernel(patches, pos_emb, amask,
                pe_ln1_w, pe_ln1_b, pe_w, pe_b, pe_ln2_w, pe_ln2_b,
                lna_w, lna_b, wq, wk, wv, wo,
                lnm_w, lnm_b, w1, b1, w2, b2,
                hd_ln_w, hd_ln_b, hd_w, hd_b,
                o_ref, x_ref):
    layer = pl.program_id(1)
    M = x_ref.shape[0]                                   # BB * N_TOK rows
    bf16 = jnp.bfloat16

    # ---- depth step 0: obs norm + patch embedding (LN -> Linear -> LN) + pos-emb
    @pl.when(layer == 0)
    def _():
        p = patches[...] / 255.0 - 0.5
        h = _layernorm(p, pe_ln1_w[...], pe_ln1_b[...])
        h = jnp.dot(h.astype(bf16), pe_w[...],
                    preferred_element_type=jnp.float32) + pe_b[...]
        h = _layernorm(h, pe_ln2_w[...], pe_ln2_b[...])
        x_ref[...] = h + pos_emb[...]

    # ---- transformer block `layer` ----
    x = x_ref[...]                                       # (M, DIM) f32

    # attention: pre-norm, per-head weights, block-diagonal masked softmax
    xn = _layernorm(x, lna_w[0], lna_b[0]).astype(bf16)
    attn_out = jnp.zeros((M, DIM), jnp.float32)
    for h in range(HEADS):                               # static loop, 3 heads
        qh = jnp.dot(xn, wq[0, h], preferred_element_type=jnp.float32)
        kh = jnp.dot(xn, wk[0, h], preferred_element_type=jnp.float32)
        vh = jnp.dot(xn, wv[0, h], preferred_element_type=jnp.float32)
        # q @ k^T over the packed batch (contracting dim 1 of both -> no
        # explicit transpose); cross-image entries masked additively.
        s = lax.dot_general(qh.astype(bf16), kh.astype(bf16),
                            (((1,), (1,)), ((), ())),
                            preferred_element_type=jnp.float32)
        s = s * SCALE + amask[...]
        s = s - jnp.max(s, axis=-1, keepdims=True)
        e = jnp.exp(s)
        probs = e * pl.reciprocal(jnp.sum(e, axis=-1, keepdims=True), approx=True)
        oh = jnp.dot(probs.astype(bf16), vh.astype(bf16),
                     preferred_element_type=jnp.float32)          # (M, DIM_HEAD)
        attn_out = attn_out + jnp.dot(oh.astype(bf16), wo[0, h],
                                      preferred_element_type=jnp.float32)
    x = x + attn_out

    # feed-forward: pre-norm, Linear -> GELU -> Linear
    xn = _layernorm(x, lnm_w[0], lnm_b[0]).astype(bf16)
    hid = jnp.dot(xn, w1[0], preferred_element_type=jnp.float32) + b1[0]
    hid = _gelu(hid)
    mlp = jnp.dot(hid.astype(bf16), w2[0],
                  preferred_element_type=jnp.float32) + b2[0]
    x = x + mlp
    x_ref[...] = x

    # ---- final depth step: LayerNorm + Linear(192 -> 1) head (VPU mul + reduce)
    @pl.when(layer == DEPTH - 1)
    def _():
        xh = _layernorm(x, hd_ln_w[...], hd_ln_b[...])
        o_ref[...] = jnp.sum(xh * hd_w[...], axis=-1, keepdims=True) + hd_b[...]


# ---------------- plain-JAX glue ----------------
def patchify(obs):
    # Rearrange('b c (h p1) (w p2) -> b (h w) (p1 p2 c)', p1=p2=14)
    B, C, H, W = obs.shape
    gh, gw = H // PATCH, W // PATCH
    x = obs.reshape(B, C, gh, PATCH, gw, PATCH)
    x = x.transpose(0, 2, 4, 3, 5, 1)                    # b h w p1 p2 c
    return x.reshape(B, gh * gw, PATCH * PATCH * C)


def posemb_sincos_2d(h=GRID_HW, w=GRID_HW, dim=DIM, temperature=10000.0):
    y, x = jnp.meshgrid(jnp.arange(h, dtype=jnp.float32),
                        jnp.arange(w, dtype=jnp.float32), indexing="ij")
    omega = jnp.arange(dim // 4, dtype=jnp.float32) / (dim // 4 - 1)
    omega = 1.0 / (temperature ** omega)
    y = y.reshape(-1)[:, None] * omega[None, :]
    x = x.reshape(-1)[:, None] * omega[None, :]
    return jnp.concatenate([jnp.sin(x), jnp.cos(x), jnp.sin(y), jnp.cos(y)], axis=1)


def _pick_bb(B):
    # Pack up to 8 batch elements per grid step so matmuls see M = BB*36 rows,
    # but prefer >= 2 batch blocks so v7x's two TensorCores both get work.
    divs = [bb for bb in (8, 4, 2) if B % bb == 0]
    for bb in divs:
        if B // bb >= 2:
            return bb
    if divs:
        return divs[0]
    return B                    # odd batch: single full-extent block (still legal)


def init_params(key, in_dim):
    # Deterministic synthetic weights (shapes follow SimpleViT); matmul weights
    # are stored in bf16, LN/bias params and the tiny head stay f32.
    pd = in_dim * PATCH * PATCH
    keys = iter(jax.random.split(key, 16))

    def lin(shape):
        return (0.02 * jax.random.normal(next(keys), shape, jnp.float32)
                ).astype(jnp.bfloat16)

    return {
        "pos_emb": posemb_sincos_2d(),                    # (36, 192) f32
        "pe_ln1_w": jnp.ones((1, pd), jnp.float32),
        "pe_ln1_b": jnp.zeros((1, pd), jnp.float32),
        "pe_w": lin((pd, DIM)),
        "pe_b": jnp.zeros((1, DIM), jnp.float32),
        "pe_ln2_w": jnp.ones((1, DIM), jnp.float32),
        "pe_ln2_b": jnp.zeros((1, DIM), jnp.float32),
        # transformer layer stacks (leading DEPTH dim streamed by the grid)
        "lna_w": jnp.ones((DEPTH, 1, DIM), jnp.float32),
        "lna_b": jnp.zeros((DEPTH, 1, DIM), jnp.float32),
        "wq": lin((DEPTH, HEADS, DIM, DIM_HEAD)),
        "wk": lin((DEPTH, HEADS, DIM, DIM_HEAD)),
        "wv": lin((DEPTH, HEADS, DIM, DIM_HEAD)),
        "wo": lin((DEPTH, HEADS, DIM_HEAD, DIM)),
        "lnm_w": jnp.ones((DEPTH, 1, DIM), jnp.float32),
        "lnm_b": jnp.zeros((DEPTH, 1, DIM), jnp.float32),
        "w1": lin((DEPTH, DIM, MLP_DIM)),
        "b1": jnp.zeros((DEPTH, 1, MLP_DIM), jnp.float32),
        "w2": lin((DEPTH, MLP_DIM, DIM)),
        "b2": jnp.zeros((DEPTH, 1, DIM), jnp.float32),
        # head
        "head_ln_w": jnp.ones((1, DIM), jnp.float32),
        "head_ln_b": jnp.zeros((1, DIM), jnp.float32),
        "head_w": 0.02 * jax.random.normal(next(keys), (1, DIM), jnp.float32),
        "head_b": jnp.zeros((1, 1), jnp.float32),
    }


@jax.jit
def vit_discriminator_forward(obs, params):
    B = obs.shape[0]
    BB = _pick_bb(B)
    M = BB * N_TOK
    patches = patchify(obs).reshape(B * N_TOK, -1)        # (B*36, pd), raw pixels
    pd = patches.shape[-1]
    pos_emb = jnp.tile(params["pos_emb"], (BB, 1))        # (M, DIM)
    tok_b = jnp.repeat(jnp.arange(BB, dtype=jnp.int32), N_TOK)
    amask = jnp.where(tok_b[:, None] == tok_b[None, :], 0.0, NEG_INF
                      ).astype(jnp.float32)               # (M, M) block-diag mask

    def const(shape):
        nd = len(shape)
        return pl.BlockSpec(shape, lambda b, l, _nd=nd: (0,) * _nd)

    def per_layer(arr):
        nz = arr.ndim - 1
        return pl.BlockSpec((1,) + arr.shape[1:],
                            lambda b, l, _nz=nz: (l,) + (0,) * _nz)

    in_specs = [
        pl.BlockSpec((M, pd), lambda b, l: (b, 0)),       # patches (per batch-block)
        const((M, DIM)),                                  # tiled pos-emb
        const((M, M)),                                    # block-diagonal attn mask
        const((1, pd)), const((1, pd)), const((pd, DIM)),
        const((1, DIM)), const((1, DIM)), const((1, DIM)),
        per_layer(params["lna_w"]), per_layer(params["lna_b"]),
        per_layer(params["wq"]), per_layer(params["wk"]),
        per_layer(params["wv"]), per_layer(params["wo"]),
        per_layer(params["lnm_w"]), per_layer(params["lnm_b"]),
        per_layer(params["w1"]), per_layer(params["b1"]),
        per_layer(params["w2"]), per_layer(params["b2"]),
        const((1, DIM)), const((1, DIM)), const((1, DIM)), const((1, 1)),
    ]

    logits = pl.pallas_call(
        _vit_kernel,
        out_shape=jax.ShapeDtypeStruct((B * N_TOK, 1), jnp.float32),
        grid=(B // BB, DEPTH),
        in_specs=in_specs,
        out_specs=pl.BlockSpec((M, 1), lambda b, l: (b, 0)),
        scratch_shapes=[pltpu.VMEM((M, DIM), jnp.float32)],   # resident activations
        compiler_params=pltpu.CompilerParams(
            dimension_semantics=("parallel", "arbitrary")),
    )(patches, pos_emb, amask,
      params["pe_ln1_w"], params["pe_ln1_b"], params["pe_w"],
      params["pe_b"], params["pe_ln2_w"], params["pe_ln2_b"],
      params["lna_w"], params["lna_b"],
      params["wq"], params["wk"], params["wv"], params["wo"],
      params["lnm_w"], params["lnm_b"],
      params["w1"], params["b1"], params["w2"], params["b2"],
      params["head_ln_w"], params["head_ln_b"],
      params["head_w"], params["head_b"])

    # torch .squeeze(): (B, 36) for B > 1, (36,) for B == 1
    return jnp.squeeze(logits.reshape(B, N_TOK))


if __name__ == "__main__":
    key = jax.random.PRNGKey(0)
    k_obs, k_prm = jax.random.split(key)
    in_dim = 4                                  # small channel count (framestack)
    obs = jax.random.uniform(k_obs, (2, in_dim, IMAGE, IMAGE),
                             minval=0.0, maxval=255.0, dtype=jnp.float32)
    params = init_params(k_prm, in_dim)
    out = jax.block_until_ready(vit_discriminator_forward(obs, params))
    assert out.shape == (2, N_TOK), out.shape
    assert bool(jnp.all(jnp.isfinite(out)))
    print("KERNEL_OK")
</pallas_src>

<mosaic_0001>
module attributes {stable_mosaic.version = 11 : i64} {
  func.func @_vit_kernel(%arg0: i32, %arg1: i32, %arg2: memref<72x784xf32, #tpu.memory_space<vmem>>, %arg3: memref<72x192xf32, #tpu.memory_space<vmem>>, %arg4: memref<72x72xf32, #tpu.memory_space<vmem>>, %arg5: memref<1x784xf32, #tpu.memory_space<vmem>>, %arg6: memref<1x784xf32, #tpu.memory_space<vmem>>, %arg7: memref<784x192xbf16, #tpu.memory_space<vmem>>, %arg8: memref<1x192xf32, #tpu.memory_space<vmem>>, %arg9: memref<1x192xf32, #tpu.memory_space<vmem>>, %arg10: memref<1x192xf32, #tpu.memory_space<vmem>>, %arg11: memref<1x1x192xf32, #tpu.memory_space<vmem>>, %arg12: memref<1x1x192xf32, #tpu.memory_space<vmem>>, %arg13: memref<1x3x192x64xbf16, #tpu.memory_space<vmem>>, %arg14: memref<1x3x192x64xbf16, #tpu.memory_space<vmem>>, %arg15: memref<1x3x192x64xbf16, #tpu.memory_space<vmem>>, %arg16: memref<1x3x64x192xbf16, #tpu.memory_space<vmem>>, %arg17: memref<1x1x192xf32, #tpu.memory_space<vmem>>, %arg18: memref<1x1x192xf32, #tpu.memory_space<vmem>>, %arg19: memref<1x192x768xbf16, #tpu.memory_space<vmem>>, %arg20: memref<1x1x768xf32, #tpu.memory_space<vmem>>, %arg21: memref<1x768x192xbf16, #tpu.memory_space<vmem>>, %arg22: memref<1x1x192xf32, #tpu.memory_space<vmem>>, %arg23: memref<1x192xf32, #tpu.memory_space<vmem>>, %arg24: memref<1x192xf32, #tpu.memory_space<vmem>>, %arg25: memref<1x192xf32, #tpu.memory_space<vmem>>, %arg26: memref<1x1xf32, #tpu.memory_space<vmem>>, %arg27: memref<72x1xf32, #tpu.memory_space<vmem>>, %arg28: memref<72x192xf32, #tpu.memory_space<vmem>>) attributes {dimension_semantics = [#tpu.dimension_semantics<parallel>, #tpu.dimension_semantics<arbitrary>], iteration_bounds = array<i64: 1, 12>, scalar_prefetch = 0 : i64, scratch_operands = 1 : i64, tpu.core_type = #tpu.core_type<tc>, window_params = [{transform_indices = @transform_0, window_bounds = array<i64: 72, 784>}, {pipeline_mode = #tpu.pipeline_mode<synchronous>, transform_indices = @transform_1, window_bounds = array<i64: 72, 192>}, {pipeline_mode = #tpu.pipeline_mode<synchronous>, transform_indices = @transform_2, window_bounds = array<i64: 72, 72>}, {pipeline_mode = #tpu.pipeline_mode<synchronous>, transform_indices = @transform_3, window_bounds = array<i64: 1, 784>}, {pipeline_mode = #tpu.pipeline_mode<synchronous>, transform_indices = @transform_4, window_bounds = array<i64: 1, 784>}, {pipeline_mode = #tpu.pipeline_mode<synchronous>, transform_indices = @transform_5, window_bounds = array<i64: 784, 192>}, {pipeline_mode = #tpu.pipeline_mode<synchronous>, transform_indices = @transform_6, window_bounds = array<i64: 1, 192>}, {pipeline_mode = #tpu.pipeline_mode<synchronous>, transform_indices = @transform_7, window_bounds = array<i64: 1, 192>}, {pipeline_mode = #tpu.pipeline_mode<synchronous>, transform_indices = @transform_8, window_bounds = array<i64: 1, 192>}, {transform_indices = @transform_9, window_bounds = array<i64: 1, 1, 192>}, {transform_indices = @transform_10, window_bounds = array<i64: 1, 1, 192>}, {transform_indices = @transform_11, window_bounds = array<i64: 1, 3, 192, 64>}, {transform_indices = @transform_12, window_bounds = array<i64: 1, 3, 192, 64>}, {transform_indices = @transform_13, window_bounds = array<i64: 1, 3, 192, 64>}, {transform_indices = @transform_14, window_bounds = array<i64: 1, 3, 64, 192>}, {transform_indices = @transform_15, window_bounds = array<i64: 1, 1, 192>}, {transform_indices = @transform_16, window_bounds = array<i64: 1, 1, 192>}, {transform_indices = @transform_17, window_bounds = array<i64: 1, 192, 768>}, {transform_indices = @transform_18, window_bounds = array<i64: 1, 1, 768>}, {transform_indices = @transform_19, window_bounds = array<i64: 1, 768, 192>}, {transform_indices = @transform_20, window_bounds = array<i64: 1, 1, 192>}, {pipeline_mode = #tpu.pipeline_mode<synchronous>, transform_indices = @transform_21, window_bounds = array<i64: 1, 192>}, {pipeline_mode = #tpu.pipeline_mode<synchronous>, transform_indices = @transform_22, window_bounds = array<i64: 1, 192>}, {pipeline_mode = #tpu.pipeline_mode<synchronous>, transform_indices = @transform_23, window_bounds = array<i64: 1, 192>}, {pipeline_mode = #tpu.pipeline_mode<synchronous>, transform_indices = @transform_24, window_bounds = array<i64: 1, 1>}, {transform_indices = @transform_25, window_bounds = array<i64: 72, 1>}]} {
    %c0_i32 = arith.constant 0 : i32
    %0 = arith.cmpi eq, %arg1, %c0_i32 : i32
    %1 = arith.extui %0 : i1 to i32
    %c0_i32_0 = arith.constant 0 : i32
    %2 = arith.cmpi ne, %1, %c0_i32_0 : i32
    scf.if %2 {
      %c0_124 = arith.constant 0 : index
      %c0_125 = arith.constant 0 : index
      %195 = vector.load %arg2[%c0_124, %c0_125] : memref<72x784xf32, #tpu.memory_space<vmem>>, vector<72x784xf32>
      %cst_126 = arith.constant 2.550000e+02 : f32
      %196 = vector.broadcast %cst_126 : f32 to vector<72x784xf32>
      %197 = arith.divf %195, %196 : vector<72x784xf32>
      %cst_127 = arith.constant 5.000000e-01 : f32
      %198 = vector.broadcast %cst_127 : f32 to vector<72x784xf32>
      %199 = arith.subf %197, %198 : vector<72x784xf32>
      %c0_128 = arith.constant 0 : index
      %c0_129 = arith.constant 0 : index
      %200 = vector.load %arg5[%c0_128, %c0_129] : memref<1x784xf32, #tpu.memory_space<vmem>>, vector<1x784xf32>
      %c0_130 = arith.constant 0 : index
      %c0_131 = arith.constant 0 : index
      %201 = vector.load %arg6[%c0_130, %c0_131] : memref<1x784xf32, #tpu.memory_space<vmem>>, vector<1x784xf32>
      %cst_132 = arith.constant dense<0.000000e+00> : vector<72xf32>
      %202 = vector.multi_reduction <add>, %199, %cst_132 [1] : vector<72x784xf32> to vector<72xf32>
      %203 = vector.shape_cast %202 : vector<72xf32> to vector<72x1xf32>
      %cst_133 = arith.constant 7.840000e+02 : f32
      %204 = vector.broadcast %cst_133 : f32 to vector<72x1xf32>
      %205 = arith.divf %203, %204 : vector<72x1xf32>
      %206 = vector.broadcast %205 : vector<72x1xf32> to vector<72x784xf32>
      %207 = arith.subf %199, %206 : vector<72x784xf32>
      %208 = arith.mulf %207, %207 : vector<72x784xf32>
      %cst_134 = arith.constant dense<0.000000e+00> : vector<72xf32>
      %209 = vector.multi_reduction <add>, %208, %cst_134 [1] : vector<72x784xf32> to vector<72xf32>
      %210 = vector.shape_cast %209 : vector<72xf32> to vector<72x1xf32>
      %cst_135 = arith.constant 7.840000e+02 : f32
      %211 = vector.broadcast %cst_135 : f32 to vector<72x1xf32>
      %212 = arith.divf %210, %211 : vector<72x1xf32>
      %213 = vector.broadcast %205 : vector<72x1xf32> to vector<72x784xf32>
      %214 = arith.subf %199, %213 : vector<72x784xf32>
      %cst_136 = arith.constant 9.99999974E-6 : f32
      %215 = vector.broadcast %cst_136 : f32 to vector<72x1xf32>
      %216 = arith.addf %212, %215 : vector<72x1xf32>
      %217 = math.rsqrt %216 : vector<72x1xf32>
      %218 = vector.broadcast %217 : vector<72x1xf32> to vector<72x784xf32>
      %219 = arith.mulf %214, %218 : vector<72x784xf32>
      %220 = vector.broadcast %200 : vector<1x784xf32> to vector<72x784xf32>
      %221 = arith.mulf %219, %220 : vector<72x784xf32>
      %222 = vector.broadcast %201 : vector<1x784xf32> to vector<72x784xf32>
      %223 = arith.addf %221, %222 : vector<72x784xf32>
      %224 = arith.truncf %223 : vector<72x784xf32> to vector<72x784xbf16>
      %c0_137 = arith.constant 0 : index
      %c0_138 = arith.constant 0 : index
      %225 = vector.load %arg7[%c0_137, %c0_138] : memref<784x192xbf16, #tpu.memory_space<vmem>>, vector<784x192xbf16>
      %cst_139 = arith.constant dense<0.000000e+00> : vector<72x192xf32>
      %226 = tpu.matmul %224, %225, %cst_139 {dimension_numbers = #tpu.dot_dimension_numbers<[1], [0], [0], [1], [0, 0, 1, 1], [], []>} : vector<72x784xbf16>, vector<784x192xbf16>, vector<72x192xf32> -> vector<72x192xf32>
      %c0_140 = arith.constant 0 : index
      %c0_141 = arith.constant 0 : index
      %227 = vector.load %arg8[%c0_140, %c0_141] : memref<1x192xf32, #tpu.memory_space<vmem>>, vector<1x192xf32>
      %228 = vector.broadcast %227 : vector<1x192xf32> to vector<72x192xf32>
      %229 = arith.addf %226, %228 : vector<72x192xf32>
      %c0_142 = arith.constant 0 : index
      %c0_143 = arith.constant 0 : index
      %230 = vector.load %arg9[%c0_142, %c0_143] : memref<1x192xf32, #tpu.memory_space<vmem>>, vector<1x192xf32>
      %c0_144 = arith.constant 0 : index
      %c0_145 = arith.constant 0 : index
      %231 = vector.load %arg10[%c0_144, %c0_145] : memref<1x192xf32, #tpu.memory_space<vmem>>, vector<1x192xf32>
      %cst_146 = arith.constant dense<0.000000e+00> : vector<72xf32>
      %232 = vector.multi_reduction <add>, %229, %cst_146 [1] : vector<72x192xf32> to vector<72xf32>
      %233 = vector.shape_cast %232 : vector<72xf32> to vector<72x1xf32>
      %cst_147 = arith.constant 1.920000e+02 : f32
      %234 = vector.broadcast %cst_147 : f32 to vector<72x1xf32>
      %235 = arith.divf %233, %234 : vector<72x1xf32>
      %236 = vector.broadcast %235 : vector<72x1xf32> to vector<72x192xf32>
      %237 = arith.subf %229, %236 : vector<72x192xf32>
      %238 = arith.mulf %237, %237 : vector<72x192xf32>
      %cst_148 = arith.constant dense<0.000000e+00> : vector<72xf32>
      %239 = vector.multi_reduction <add>, %238, %cst_148 [1] : vector<72x192xf32> to vector<72xf32>
      %240 = vector.shape_cast %239 : vector<72xf32> to vector<72x1xf32>
      %cst_149 = arith.constant 1.920000e+02 : f32
      %241 = vector.broadcast %cst_149 : f32 to vector<72x1xf32>
      %242 = arith.divf %240, %241 : vector<72x1xf32>
      %243 = vector.broadcast %235 : vector<72x1xf32> to vector<72x192xf32>
      %244 = arith.subf %229, %243 : vector<72x192xf32>
      %cst_150 = arith.constant 9.99999974E-6 : f32
      %245 = vector.broadcast %cst_150 : f32 to vector<72x1xf32>
      %246 = arith.addf %242, %245 : vector<72x1xf32>
      %247 = math.rsqrt %246 : vector<72x1xf32>
      %248 = vector.broadcast %247 : vector<72x1xf32> to vector<72x192xf32>
      %249 = arith.mulf %244, %248 : vector<72x192xf32>
      %250 = vector.broadcast %230 : vector<1x192xf32> to vector<72x192xf32>
      %251 = arith.mulf %249, %250 : vector<72x192xf32>
      %252 = vector.broadcast %231 : vector<1x192xf32> to vector<72x192xf32>
      %253 = arith.addf %251, %252 : vector<72x192xf32>
      %c0_151 = arith.constant 0 : index
      %c0_152 = arith.constant 0 : index
      %254 = vector.load %arg3[%c0_151, %c0_152] : memref<72x192xf32, #tpu.memory_space<vmem>>, vector<72x192xf32>
      %255 = arith.addf %253, %254 : vector<72x192xf32>
      %c0_153 = arith.constant 0 : index
      %c0_154 = arith.constant 0 : index
      %256 = vector.load %arg28[%c0_153, %c0_154] : memref<72x192xf32, #tpu.memory_space<vmem>>, vector<72x192xf32>
      tpu.vector_store %arg28[%c0_153, %c0_154], %255 {strides = array<i32>} : memref<72x192xf32, #tpu.memory_space<vmem>>, vector<72x192xf32>,
    } else {
    }
    %c0 = arith.constant 0 : index
    %c0_1 = arith.constant 0 : index
    %3 = vector.load %arg28[%c0, %c0_1] : memref<72x192xf32, #tpu.memory_space<vmem>>, vector<72x192xf32>
    %c0_2 = arith.constant 0 : index
    %c0_3 = arith.constant 0 : index
    %c0_4 = arith.constant 0 : index
    %4 = vector.load %arg11[%c0_2, %c0_3, %c0_4] : memref<1x1x192xf32, #tpu.memory_space<vmem>>, vector<1x1x192xf32>
    %5 = vector.shape_cast %4 : vector<1x1x192xf32> to vector<1x192xf32>
    %c0_5 = arith.constant 0 : index
    %c0_6 = arith.constant 0 : index
    %c0_7 = arith.constant 0 : index
    %6 = vector.load %arg12[%c0_5, %c0_6, %c0_7] : memref<1x1x192xf32, #tpu.memory_space<vmem>>, vector<1x1x192xf32>
    %7 = vector.shape_cast %6 : vector<1x1x192xf32> to vector<1x192xf32>
    %cst = arith.constant dense<0.000000e+00> : vector<72xf32>
    %8 = vector.multi_reduction <add>, %3, %cst [1] : vector<72x192xf32> to vector<72xf32>
    %9 = vector.shape_cast %8 : vector<72xf32> to vector<72x1xf32>
    %cst_8 = arith.constant 1.920000e+02 : f32
    %10 = vector.broadcast %cst_8 : f32 to vector<72x1xf32>
    %11 = arith.divf %9, %10 : vector<72x1xf32>
    %12 = vector.broadcast %11 : vector<72x1xf32> to vector<72x192xf32>
    %13 = arith.subf %3, %12 : vector<72x192xf32>
    %14 = arith.mulf %13, %13 : vector<72x192xf32>
    %cst_9 = arith.constant dense<0.000000e+00> : vector<72xf32>
    %15 = vector.multi_reduction <add>, %14, %cst_9 [1] : vector<72x192xf32> to vector<72xf32>
    %16 = vector.shape_cast %15 : vector<72xf32> to vector<72x1xf32>
    %cst_10 = arith.constant 1.920000e+02 : f32
    %17 = vector.broadcast %cst_10 : f32 to vector<72x1xf32>
    %18 = arith.divf %16, %17 : vector<72x1xf32>
    %19 = vector.broadcast %11 : vector<72x1xf32> to vector<72x192xf32>
    %20 = arith.subf %3, %19 : vector<72x192xf32>
    %cst_11 = arith.constant 9.99999974E-6 : f32
    %21 = vector.broadcast %cst_11 : f32 to vector<72x1xf32>
    %22 = arith.addf %18, %21 : vector<72x1xf32>
    %23 = math.rsqrt %22 : vector<72x1xf32>
    %24 = vector.broadcast %23 : vector<72x1xf32> to vector<72x192xf32>
    %25 = arith.mulf %20, %24 : vector<72x192xf32>
    %26 = vector.broadcast %5 : vector<1x192xf32> to vector<72x192xf32>
    %27 = arith.mulf %25, %26 : vector<72x192xf32>
    %28 = vector.broadcast %7 : vector<1x192xf32> to vector<72x192xf32>
    %29 = arith.addf %27, %28 : vector<72x192xf32>
    %30 = arith.truncf %29 : vector<72x192xf32> to vector<72x192xbf16>
    %cst_12 = arith.constant 0.000000e+00 : f32
    %31 = vector.broadcast %cst_12 : f32 to vector<72x192xf32>
    %c0_13 = arith.constant 0 : index
    %c0_14 = arith.constant 0 : index
    %c0_15 = arith.constant 0 : index
    %c0_16 = arith.constant 0 : index
    %32 = vector.load %arg13[%c0_13, %c0_14, %c0_15, %c0_16] : memref<1x3x192x64xbf16, #tpu.memory_space<vmem>>, vector<1x1x192x64xbf16>
    %33 = vector.shape_cast %32 : vector<1x1x192x64xbf16> to vector<192x64xbf16>
    %cst_17 = arith.constant dense<0.000000e+00> : vector<72x64xf32>
    %34 = tpu.matmul %30, %33, %cst_17 {dimension_numbers = #tpu.dot_dimension_numbers<[1], [0], [0], [1], [0, 0, 1, 1], [], []>} : vector<72x192xbf16>, vector<192x64xbf16>, vector<72x64xf32> -> vector<72x64xf32>
    %c0_18 = arith.constant 0 : index
    %c0_19 = arith.constant 0 : index
    %c0_20 = arith.constant 0 : index
    %c0_21 = arith.constant 0 : index
    %35 = vector.load %arg14[%c0_18, %c0_19, %c0_20, %c0_21] : memref<1x3x192x64xbf16, #tpu.memory_space<vmem>>, vector<1x1x192x64xbf16>
    %36 = vector.shape_cast %35 : vector<1x1x192x64xbf16> to vector<192x64xbf16>
    %cst_22 = arith.constant dense<0.000000e+00> : vector<72x64xf32>
    %37 = tpu.matmul %30, %36, %cst_22 {dimension_numbers = #tpu.dot_dimension_numbers<[1], [0], [0], [1], [0, 0, 1, 1], [], []>} : vector<72x192xbf16>, vector<192x64xbf16>, vector<72x64xf32> -> vector<72x64xf32>
    %c0_23 = arith.constant 0 : index
    %c0_24 = arith.constant 0 : index
    %c0_25 = arith.constant 0 : index
    %c0_26 = arith.constant 0 : index
    %38 = vector.load %arg15[%c0_23, %c0_24, %c0_25, %c0_26] : memref<1x3x192x64xbf16, #tpu.memory_space<vmem>>, vector<1x1x192x64xbf16>
    %39 = vector.shape_cast %38 : vector<1x1x192x64xbf16> to vector<192x64xbf16>
    %cst_27 = arith.constant dense<0.000000e+00> : vector<72x64xf32>
    %40 = tpu.matmul %30, %39, %cst_27 {dimension_numbers = #tpu.dot_dimension_numbers<[1], [0], [0], [1], [0, 0, 1, 1], [], []>} : vector<72x192xbf16>, vector<192x64xbf16>, vector<72x64xf32> -> vector<72x64xf32>
    %41 = arith.truncf %34 : vector<72x64xf32> to vector<72x64xbf16>
    %42 = arith.truncf %37 : vector<72x64xf32> to vector<72x64xbf16>
    %cst_28 = arith.constant dense<0.000000e+00> : vector<72x72xf32>
    %43 = tpu.matmul %41, %42, %cst_28 {dimension_numbers = #tpu.dot_dimension_numbers<[1], [1], [0], [0], [0, 0, 1, 0], [], []>} : vector<72x64xbf16>, vector<72x64xbf16>, vector<72x72xf32> -> vector<72x72xf32>
    %cst_29 = arith.constant 1.250000e-01 : f32
    %44 = vector.broadcast %cst_29 : f32 to vector<72x72xf32>
    %45 = arith.mulf %43, %44 : vector<72x72xf32>
    %c0_30 = arith.constant 0 : index
    %c0_31 = arith.constant 0 : index
    %46 = vector.load %arg4[%c0_30, %c0_31] : memref<72x72xf32, #tpu.memory_space<vmem>>, vector<72x72xf32>
    %47 = arith.addf %45, %46 : vector<72x72xf32>
    %cst_32 = arith.constant dense<0xFF800000> : vector<72xf32>
    %48 = vector.multi_reduction <maximumf>, %47, %cst_32 [1] : vector<72x72xf32> to vector<72xf32>
    %49 = vector.shape_cast %48 : vector<72xf32> to vector<72x1xf32>
    %50 = vector.broadcast %49 : vector<72x1xf32> to vector<72x72xf32>
    %51 = arith.subf %47, %50 : vector<72x72xf32>
    %52 = math.exp %51 : vector<72x72xf32>
    %cst_33 = arith.constant dense<0.000000e+00> : vector<72xf32>
    %53 = vector.multi_reduction <add>, %52, %cst_33 [1] : vector<72x72xf32> to vector<72xf32>
    %54 = vector.shape_cast %53 : vector<72xf32> to vector<72x1xf32>
    %55 = tpu.reciprocal %54 {approx = true} : vector<72x1xf32> -> vector<72x1xf32>
    %56 = vector.broadcast %55 : vector<72x1xf32> to vector<72x72xf32>
    %57 = arith.mulf %52, %56 : vector<72x72xf32>
    %58 = arith.truncf %57 : vector<72x72xf32> to vector<72x72xbf16>
    %59 = arith.truncf %40 : vector<72x64xf32> to vector<72x64xbf16>
    %cst_34 = arith.constant dense<0.000000e+00> : vector<72x64xf32>
    %60 = tpu.matmul %58, %59, %cst_34 {dimension_numbers = #tpu.dot_dimension_numbers<[1], [0], [0], [1], [0, 0, 1, 1], [], []>} : vector<72x72xbf16>, vector<72x64xbf16>, vector<72x64xf32> -> vector<72x64xf32>
    %61 = arith.truncf %60 : vector<72x64xf32> to vector<72x64xbf16>
    %c0_35 = arith.constant 0 : index
    %c0_36 = arith.constant 0 : index
    %c0_37 = arith.constant 0 : index
    %c0_38 = arith.constant 0 : index
    %62 = vector.load %arg16[%c0_35, %c0_36, %c0_37, %c0_38] : memref<1x3x64x192xbf16, #tpu.memory_space<vmem>>, vector<1x1x64x192xbf16>
    %63 = vector.shape_cast %62 : vector<1x1x64x192xbf16> to vector<64x192xbf16>
    %cst_39 = arith.constant dense<0.000000e+00> : vector<72x192xf32>
    %64 = tpu.matmul %61, %63, %cst_39 {dimension_numbers = #tpu.dot_dimension_numbers<[1], [0], [0], [1], [0, 0, 1, 1], [], []>} : vector<72x64xbf16>, vector<64x192xbf16>, vector<72x192xf32> -> vector<72x192xf32>
    %65 = arith.addf %31, %64 : vector<72x192xf32>
    %c0_40 = arith.constant 0 : index
    %c1 = arith.constant 1 : index
    %c0_41 = arith.constant 0 : index
    %c0_42 = arith.constant 0 : index
    %66 = vector.load %arg13[%c0_40, %c1, %c0_41, %c0_42] : memref<1x3x192x64xbf16, #tpu.memory_space<vmem>>, vector<1x1x192x64xbf16>
    %67 = vector.shape_cast %66 : vector<1x1x192x64xbf16> to vector<192x64xbf16>
    %cst_43 = arith.constant dense<0.000000e+00> : vector<72x64xf32>
    %68 = tpu.matmul %30, %67, %cst_43 {dimension_numbers = #tpu.dot_dimension_numbers<[1], [0], [0], [1], [0, 0, 1, 1], [], []>} : vector<72x192xbf16>, vector<192x64xbf16>, vector<72x64xf32> -> vector<72x64xf32>
    %c0_44 = arith.constant 0 : index
    %c1_45 = arith.constant 1 : index
    %c0_46 = arith.constant 0 : index
    %c0_47 = arith.constant 0 : index
    %69 = vector.load %arg14[%c0_44, %c1_45, %c0_46, %c0_47] : memref<1x3x192x64xbf16, #tpu.memory_space<vmem>>, vector<1x1x192x64xbf16>
    %70 = vector.shape_cast %69 : vector<1x1x192x64xbf16> to vector<192x64xbf16>
    %cst_48 = arith.constant dense<0.000000e+00> : vector<72x64xf32>
    %71 = tpu.matmul %30, %70, %cst_48 {dimension_numbers = #tpu.dot_dimension_numbers<[1], [0], [0], [1], [0, 0, 1, 1], [], []>} : vector<72x192xbf16>, vector<192x64xbf16>, vector<72x64xf32> -> vector<72x64xf32>
    %c0_49 = arith.constant 0 : index
    %c1_50 = arith.constant 1 : index
    %c0_51 = arith.constant 0 : index
    %c0_52 = arith.constant 0 : index
    %72 = vector.load %arg15[%c0_49, %c1_50, %c0_51, %c0_52] : memref<1x3x192x64xbf16, #tpu.memory_space<vmem>>, vector<1x1x192x64xbf16>
    %73 = vector.shape_cast %72 : vector<1x1x192x64xbf16> to vector<192x64xbf16>
    %cst_53 = arith.constant dense<0.000000e+00> : vector<72x64xf32>
    %74 = tpu.matmul %30, %73, %cst_53 {dimension_numbers = #tpu.dot_dimension_numbers<[1], [0], [0], [1], [0, 0, 1, 1], [], []>} : vector<72x192xbf16>, vector<192x64xbf16>, vector<72x64xf32> -> vector<72x64xf32>
    %75 = arith.truncf %68 : vector<72x64xf32> to vector<72x64xbf16>
    %76 = arith.truncf %71 : vector<72x64xf32> to vector<72x64xbf16>
    %cst_54 = arith.constant dense<0.000000e+00> : vector<72x72xf32>
    %77 = tpu.matmul %75, %76, %cst_54 {dimension_numbers = #tpu.dot_dimension_numbers<[1], [1], [0], [0], [0, 0, 1, 0], [], []>} : vector<72x64xbf16>, vector<72x64xbf16>, vector<72x72xf32> -> vector<72x72xf32>
    %cst_55 = arith.constant 1.250000e-01 : f32
    %78 = vector.broadcast %cst_55 : f32 to vector<72x72xf32>
    %79 = arith.mulf %77, %78 : vector<72x72xf32>
    %c0_56 = arith.constant 0 : index
    %c0_57 = arith.constant 0 : index
    %80 = vector.load %arg4[%c0_56, %c0_57] : memref<72x72xf32, #tpu.memory_space<vmem>>, vector<72x72xf32>
    %81 = arith.addf %79, %80 : vector<72x72xf32>
    %cst_58 = arith.constant dense<0xFF800000> : vector<72xf32>
    %82 = vector.multi_reduction <maximumf>, %81, %cst_58 [1] : vector<72x72xf32> to vector<72xf32>
    %83 = vector.shape_cast %82 : vector<72xf32> to vector<72x1xf32>
    %84 = vector.broadcast %83 : vector<72x1xf32> to vector<72x72xf32>
    %85 = arith.subf %81, %84 : vector<72x72xf32>
    %86 = math.exp %85 : vector<72x72xf32>
    %cst_59 = arith.constant dense<0.000000e+00> : vector<72xf32>
    %87 = vector.multi_reduction <add>, %86, %cst_59 [1] : vector<72x72xf32> to vector<72xf32>
    %88 = vector.shape_cast %87 : vector<72xf32> to vector<72x1xf32>
    %89 = tpu.reciprocal %88 {approx = true} : vector<72x1xf32> -> vector<72x1xf32>
    %90 = vector.broadcast %89 : vector<72x1xf32> to vector<72x72xf32>
    %91 = arith.mulf %86, %90 : vector<72x72xf32>
    %92 = arith.truncf %91 : vector<72x72xf32> to vector<72x72xbf16>
    %93 = arith.truncf %74 : vector<72x64xf32> to vector<72x64xbf16>
    %cst_60 = arith.constant dense<0.000000e+00> : vector<72x64xf32>
    %94 = tpu.matmul %92, %93, %cst_60 {dimension_numbers = #tpu.dot_dimension_numbers<[1], [0], [0], [1], [0, 0, 1, 1], [], []>} : vector<72x72xbf16>, vector<72x64xbf16>, vector<72x64xf32> -> vector<72x64xf32>
    %95 = arith.truncf %94 : vector<72x64xf32> to vector<72x64xbf16>
    %c0_61 = arith.constant 0 : index
    %c1_62 = arith.constant 1 : index
    %c0_63 = arith.constant 0 : index
    %c0_64 = arith.constant 0 : index
    %96 = vector.load %arg16[%c0_61, %c1_62, %c0_63, %c0_64] : memref<1x3x64x192xbf16, #tpu.memory_space<vmem>>, vector<1x1x64x192xbf16>
    %97 = vector.shape_cast %96 : vector<1x1x64x192xbf16> to vector<64x192xbf16>
    %cst_65 = arith.constant dense<0.000000e+00> : vector<72x192xf32>
    %98 = tpu.matmul %95, %97, %cst_65 {dimension_numbers = #tpu.dot_dimension_numbers<[1], [0], [0], [1], [0, 0, 1, 1], [], []>} : vector<72x64xbf16>, vector<64x192xbf16>, vector<72x192xf32> -> vector<72x192xf32>
    %99 = arith.addf %65, %98 : vector<72x192xf32>
    %c0_66 = arith.constant 0 : index
    %c2 = arith.constant 2 : index
    %c0_67 = arith.constant 0 : index
    %c0_68 = arith.constant 0 : index
    %100 = vector.load %arg13[%c0_66, %c2, %c0_67, %c0_68] : memref<1x3x192x64xbf16, #tpu.memory_space<vmem>>, vector<1x1x192x64xbf16>
    %101 = vector.shape_cast %100 : vector<1x1x192x64xbf16> to vector<192x64xbf16>
    %cst_69 = arith.constant dense<0.000000e+00> : vector<72x64xf32>
    %102 = tpu.matmul %30, %101, %cst_69 {dimension_numbers = #tpu.dot_dimension_numbers<[1], [0], [0], [1], [0, 0, 1, 1], [], []>} : vector<72x192xbf16>, vector<192x64xbf16>, vector<72x64xf32> -> vector<72x64xf32>
    %c0_70 = arith.constant 0 : index
    %c2_71 = arith.constant 2 : index
    %c0_72 = arith.constant 0 : index
    %c0_73 = arith.constant 0 : index
    %103 = vector.load %arg14[%c0_70, %c2_71, %c0_72, %c0_73] : memref<1x3x192x64xbf16, #tpu.memory_space<vmem>>, vector<1x1x192x64xbf16>
    %104 = vector.shape_cast %103 : vector<1x1x192x64xbf16> to vector<192x64xbf16>
    %cst_74 = arith.constant dense<0.000000e+00> : vector<72x64xf32>
    %105 = tpu.matmul %30, %104, %cst_74 {dimension_numbers = #tpu.dot_dimension_numbers<[1], [0], [0], [1], [0, 0, 1, 1], [], []>} : vector<72x192xbf16>, vector<192x64xbf16>, vector<72x64xf32> -> vector<72x64xf32>
    %c0_75 = arith.constant 0 : index
    %c2_76 = arith.constant 2 : index
    %c0_77 = arith.constant 0 : index
    %c0_78 = arith.constant 0 : index
    %106 = vector.load %arg15[%c0_75, %c2_76, %c0_77, %c0_78] : memref<1x3x192x64xbf16, #tpu.memory_space<vmem>>, vector<1x1x192x64xbf16>
    %107 = vector.shape_cast %106 : vector<1x1x192x64xbf16> to vector<192x64xbf16>
    %cst_79 = arith.constant dense<0.000000e+00> : vector<72x64xf32>
    %108 = tpu.matmul %30, %107, %cst_79 {dimension_numbers = #tpu.dot_dimension_numbers<[1], [0], [0], [1], [0, 0, 1, 1], [], []>} : vector<72x192xbf16>, vector<192x64xbf16>, vector<72x64xf32> -> vector<72x64xf32>
    %109 = arith.truncf %102 : vector<72x64xf32> to vector<72x64xbf16>
    %110 = arith.truncf %105 : vector<72x64xf32> to vector<72x64xbf16>
    %cst_80 = arith.constant dense<0.000000e+00> : vector<72x72xf32>
    %111 = tpu.matmul %109, %110, %cst_80 {dimension_numbers = #tpu.dot_dimension_numbers<[1], [1], [0], [0], [0, 0, 1, 0], [], []>} : vector<72x64xbf16>, vector<72x64xbf16>, vector<72x72xf32> -> vector<72x72xf32>
    %cst_81 = arith.constant 1.250000e-01 : f32
    %112 = vector.broadcast %cst_81 : f32 to vector<72x72xf32>
    %113 = arith.mulf %111, %112 : vector<72x72xf32>
    %c0_82 = arith.constant 0 : index
    %c0_83 = arith.constant 0 : index
    %114 = vector.load %arg4[%c0_82, %c0_83] : memref<72x72xf32, #tpu.memory_space<vmem>>, vector<72x72xf32>
    %115 = arith.addf %113, %114 : vector<72x72xf32>
    %cst_84 = arith.constant dense<0xFF800000> : vector<72xf32>
    %116 = vector.multi_reduction <maximumf>, %115, %cst_84 [1] : vector<72x72xf32> to vector<72xf32>
    %117 = vector.shape_cast %116 : vector<72xf32> to vector<72x1xf32>
    %118 = vector.broadcast %117 : vector<72x1xf32> to vector<72x72xf32>
    %119 = arith.subf %115, %118 : vector<72x72xf32>
    %120 = math.exp %119 : vector<72x72xf32>
    %cst_85 = arith.constant dense<0.000000e+00> : vector<72xf32>
    %121 = vector.multi_reduction <add>, %120, %cst_85 [1] : vector<72x72xf32> to vector<72xf32>
    %122 = vector.shape_cast %121 : vector<72xf32> to vector<72x1xf32>
    %123 = tpu.reciprocal %122 {approx = true} : vector<72x1xf32> -> vector<72x1xf32>
    %124 = vector.broadcast %123 : vector<72x1xf32> to vector<72x72xf32>
    %125 = arith.mulf %120, %124 : vector<72x72xf32>
    %126 = arith.truncf %125 : vector<72x72xf32> to vector<72x72xbf16>
    %127 = arith.truncf %108 : vector<72x64xf32> to vector<72x64xbf16>
    %cst_86 = arith.constant dense<0.000000e+00> : vector<72x64xf32>
    %128 = tpu.matmul %126, %127, %cst_86 {dimension_numbers = #tpu.dot_dimension_numbers<[1], [0], [0], [1], [0, 0, 1, 1], [], []>} : vector<72x72xbf16>, vector<72x64xbf16>, vector<72x64xf32> -> vector<72x64xf32>
    %129 = arith.truncf %128 : vector<72x64xf32> to vector<72x64xbf16>
    %c0_87 = arith.constant 0 : index
    %c2_88 = arith.constant 2 : index
    %c0_89 = arith.constant 0 : index
    %c0_90 = arith.constant 0 : index
    %130 = vector.load %arg16[%c0_87, %c2_88, %c0_89, %c0_90] : memref<1x3x64x192xbf16, #tpu.memory_space<vmem>>, vector<1x1x64x192xbf16>
    %131 = vector.shape_cast %130 : vector<1x1x64x192xbf16> to vector<64x192xbf16>
    %cst_91 = arith.constant dense<0.000000e+00> : vector<72x192xf32>
    %132 = tpu.matmul %129, %131, %cst_91 {dimension_numbers = #tpu.dot_dimension_numbers<[1], [0], [0], [1], [0, 0, 1, 1], [], []>} : vector<72x64xbf16>, vector<64x192xbf16>, vector<72x192xf32> -> vector<72x192xf32>
    %133 = arith.addf %99, %132 : vector<72x192xf32>
    %134 = arith.addf %3, %133 : vector<72x192xf32>
    %c0_92 = arith.constant 0 : index
    %c0_93 = arith.constant 0 : index
    %c0_94 = arith.constant 0 : index
    %135 = vector.load %arg17[%c0_92, %c0_93, %c0_94] : memref<1x1x192xf32, #tpu.memory_space<vmem>>, vector<1x1x192xf32>
    %136 = vector.shape_cast %135 : vector<1x1x192xf32> to vector<1x192xf32>
    %c0_95 = arith.constant 0 : index
    %c0_96 = arith.constant 0 : index
    %c0_97 = arith.constant 0 : index
    %137 = vector.load %arg18[%c0_95, %c0_96, %c0_97] : memref<1x1x192xf32, #tpu.memory_space<vmem>>, vector<1x1x192xf32>
    %138 = vector.shape_cast %137 : vector<1x1x192xf32> to vector<1x192xf32>
    %cst_98 = arith.constant dense<0.000000e+00> : vector<72xf32>
    %139 = vector.multi_reduction <add>, %134, %cst_98 [1] : vector<72x192xf32> to vector<72xf32>
    %140 = vector.shape_cast %139 : vector<72xf32> to vector<72x1xf32>
    %cst_99 = arith.constant 1.920000e+02 : f32
    %141 = vector.broadcast %cst_99 : f32 to vector<72x1xf32>
    %142 = arith.divf %140, %141 : vector<72x1xf32>
    %143 = vector.broadcast %142 : vector<72x1xf32> to vector<72x192xf32>
    %144 = arith.subf %134, %143 : vector<72x192xf32>
    %145 = arith.mulf %144, %144 : vector<72x192xf32>
    %cst_100 = arith.constant dense<0.000000e+00> : vector<72xf32>
    %146 = vector.multi_reduction <add>, %145, %cst_100 [1] : vector<72x192xf32> to vector<72xf32>
    %147 = vector.shape_cast %146 : vector<72xf32> to vector<72x1xf32>
    %cst_101 = arith.constant 1.920000e+02 : f32
    %148 = vector.broadcast %cst_101 : f32 to vector<72x1xf32>
    %149 = arith.divf %147, %148 : vector<72x1xf32>
    %150 = vector.broadcast %142 : vector<72x1xf32> to vector<72x192xf32>
    %151 = arith.subf %134, %150 : vector<72x192xf32>
    %cst_102 = arith.constant 9.99999974E-6 : f32
    %152 = vector.broadcast %cst_102 : f32 to vector<72x1xf32>
    %153 = arith.addf %149, %152 : vector<72x1xf32>
    %154 = math.rsqrt %153 : vector<72x1xf32>
    %155 = vector.broadcast %154 : vector<72x1xf32> to vector<72x192xf32>
    %156 = arith.mulf %151, %155 : vector<72x192xf32>
    %157 = vector.broadcast %136 : vector<1x192xf32> to vector<72x192xf32>
    %158 = arith.mulf %156, %157 : vector<72x192xf32>
    %159 = vector.broadcast %138 : vector<1x192xf32> to vector<72x192xf32>
    %160 = arith.addf %158, %159 : vector<72x192xf32>
    %161 = arith.truncf %160 : vector<72x192xf32> to vector<72x192xbf16>
    %c0_103 = arith.constant 0 : index
    %c0_104 = arith.constant 0 : index
    %c0_105 = arith.constant 0 : index
    %162 = vector.load %arg19[%c0_103, %c0_104, %c0_105] : memref<1x192x768xbf16, #tpu.memory_space<vmem>>, vector<1x192x768xbf16>
    %163 = vector.shape_cast %162 : vector<1x192x768xbf16> to vector<192x768xbf16>
    %cst_106 = arith.constant dense<0.000000e+00> : vector<72x768xf32>
    %164 = tpu.matmul %161, %163, %cst_106 {dimension_numbers = #tpu.dot_dimension_numbers<[1], [0], [0], [1], [0, 0, 1, 1], [], []>} : vector<72x192xbf16>, vector<192x768xbf16>, vector<72x768xf32> -> vector<72x768xf32>
    %c0_107 = arith.constant 0 : index
    %c0_108 = arith.constant 0 : index
    %c0_109 = arith.constant 0 : index
    %165 = vector.load %arg20[%c0_107, %c0_108, %c0_109] : memref<1x1x768xf32, #tpu.memory_space<vmem>>, vector<1x1x768xf32>
    %166 = vector.shape_cast %165 : vector<1x1x768xf32> to vector<1x768xf32>
    %167 = vector.broadcast %166 : vector<1x768xf32> to vector<72x768xf32>
    %168 = arith.addf %164, %167 : vector<72x768xf32>
    %cst_110 = arith.constant 5.000000e-01 : f32
    %169 = vector.broadcast %cst_110 : f32 to vector<72x768xf32>
    %170 = arith.mulf %169, %168 : vector<72x768xf32>
    %cst_111 = arith.constant 4.471500e-02 : f32
    %171 = vector.broadcast %cst_111 : f32 to vector<72x768xf32>
    %172 = arith.mulf %171, %168 : vector<72x768xf32>
    %173 = arith.mulf %172, %168 : vector<72x768xf32>
    %174 = arith.mulf %173, %168 : vector<72x768xf32>
    %175 = arith.addf %168, %174 : vector<72x768xf32>
    %cst_112 = arith.constant 0.797884583 : f32
    %176 = vector.broadcast %cst_112 : f32 to vector<72x768xf32>
    %177 = arith.mulf %176, %175 : vector<72x768xf32>
    %178 = math.tanh %177 : vector<72x768xf32>
    %cst_113 = arith.constant 1.000000e+00 : f32
    %179 = vector.broadcast %cst_113 : f32 to vector<72x768xf32>
    %180 = arith.addf %179, %178 : vector<72x768xf32>
    %181 = arith.mulf %170, %180 : vector<72x768xf32>
    %182 = arith.truncf %181 : vector<72x768xf32> to vector<72x768xbf16>
    %c0_114 = arith.constant 0 : index
    %c0_115 = arith.constant 0 : index
    %c0_116 = arith.constant 0 : index
    %183 = vector.load %arg21[%c0_114, %c0_115, %c0_116] : memref<1x768x192xbf16, #tpu.memory_space<vmem>>, vector<1x768x192xbf16>
    %184 = vector.shape_cast %183 : vector<1x768x192xbf16> to vector<768x192xbf16>
    %cst_117 = arith.constant dense<0.000000e+00> : vector<72x192xf32>
    %185 = tpu.matmul %182, %184, %cst_117 {dimension_numbers = #tpu.dot_dimension_numbers<[1], [0], [0], [1], [0, 0, 1, 1], [], []>} : vector<72x768xbf16>, vector<768x192xbf16>, vector<72x192xf32> -> vector<72x192xf32>
    %c0_118 = arith.constant 0 : index
    %c0_119 = arith.constant 0 : index
    %c0_120 = arith.constant 0 : index
    %186 = vector.load %arg22[%c0_118, %c0_119, %c0_120] : memref<1x1x192xf32, #tpu.memory_space<vmem>>, vector<1x1x192xf32>
    %187 = vector.shape_cast %186 : vector<1x1x192xf32> to vector<1x192xf32>
    %188 = vector.broadcast %187 : vector<1x192xf32> to vector<72x192xf32>
    %189 = arith.addf %185, %188 : vector<72x192xf32>
    %190 = arith.addf %134, %189 : vector<72x192xf32>
    %c0_121 = arith.constant 0 : index
    %c0_122 = arith.constant 0 : index
    %191 = vector.load %arg28[%c0_121, %c0_122] : memref<72x192xf32, #tpu.memory_space<vmem>>, vector<72x192xf32>
    tpu.vector_store %arg28[%c0_121, %c0_122], %190 {strides = array<i32>} : memref<72x192xf32, #tpu.memory_space<vmem>>, vector<72x192xf32>,
    %c11_i32 = arith.constant 11 : i32
    %192 = arith.cmpi eq, %arg1, %c11_i32 : i32
    %193 = arith.extui %192 : i1 to i32
    %c0_i32_123 = arith.constant 0 : i32
    %194 = arith.cmpi ne, %193, %c0_i32_123 : i32
    scf.if %194 {
      %c0_124 = arith.constant 0 : index
      %c0_125 = arith.constant 0 : index
      %195 = vector.load %arg23[%c0_124, %c0_125] : memref<1x192xf32, #tpu.memory_space<vmem>>, vector<1x192xf32>
      %c0_126 = arith.constant 0 : index
      %c0_127 = arith.constant 0 : index
      %196 = vector.load %arg24[%c0_126, %c0_127] : memref<1x192xf32, #tpu.memory_space<vmem>>, vector<1x192xf32>
      %cst_128 = arith.constant dense<0.000000e+00> : vector<72xf32>
      %197 = vector.multi_reduction <add>, %190, %cst_128 [1] : vector<72x192xf32> to vector<72xf32>
      %198 = vector.shape_cast %197 : vector<72xf32> to vector<72x1xf32>
      %cst_129 = arith.constant 1.920000e+02 : f32
      %199 = vector.broadcast %cst_129 : f32 to vector<72x1xf32>
      %200 = arith.divf %198, %199 : vector<72x1xf32>
      %201 = vector.broadcast %200 : vector<72x1xf32> to vector<72x192xf32>
      %202 = arith.subf %190, %201 : vector<72x192xf32>
      %203 = arith.mulf %202, %202 : vector<72x192xf32>
      %cst_130 = arith.constant dense<0.000000e+00> : vector<72xf32>
      %204 = vector.multi_reduction <add>, %203, %cst_130 [1] : vector<72x192xf32> to vector<72xf32>
      %205 = vector.shape_cast %204 : vector<72xf32> to vector<72x1xf32>
      %cst_131 = arith.constant 1.920000e+02 : f32
      %206 = vector.broadcast %cst_131 : f32 to vector<72x1xf32>
      %207 = arith.divf %205, %206 : vector<72x1xf32>
      %208 = vector.broadcast %200 : vector<72x1xf32> to vector<72x192xf32>
      %209 = arith.subf %190, %208 : vector<72x192xf32>
      %cst_132 = arith.constant 9.99999974E-6 : f32
      %210 = vector.broadcast %cst_132 : f32 to vector<72x1xf32>
      %211 = arith.addf %207, %210 : vector<72x1xf32>
      %212 = math.rsqrt %211 : vector<72x1xf32>
      %213 = vector.broadcast %212 : vector<72x1xf32> to vector<72x192xf32>
      %214 = arith.mulf %209, %213 : vector<72x192xf32>
      %215 = vector.broadcast %195 : vector<1x192xf32> to vector<72x192xf32>
      %216 = arith.mulf %214, %215 : vector<72x192xf32>
      %217 = vector.broadcast %196 : vector<1x192xf32> to vector<72x192xf32>
      %218 = arith.addf %216, %217 : vector<72x192xf32>
      %c0_133 = arith.constant 0 : index
      %c0_134 = arith.constant 0 : index
      %219 = vector.load %arg25[%c0_133, %c0_134] : memref<1x192xf32, #tpu.memory_space<vmem>>, vector<1x192xf32>
      %220 = vector.broadcast %219 : vector<1x192xf32> to vector<72x192xf32>
      %221 = arith.mulf %218, %220 : vector<72x192xf32>
      %cst_135 = arith.constant dense<0.000000e+00> : vector<72xf32>
      %222 = vector.multi_reduction <add>, %221, %cst_135 [1] : vector<72x192xf32> to vector<72xf32>
      %223 = vector.shape_cast %222 : vector<72xf32> to vector<72x1xf32>
      %c0_136 = arith.constant 0 : index
      %c0_137 = arith.constant 0 : index
      %224 = vector.load %arg26[%c0_136, %c0_137] : memref<1x1xf32, #tpu.memory_space<vmem>>, vector<1x1xf32>
      %225 = vector.broadcast %224 : vector<1x1xf32> to vector<72x1xf32>
      %226 = arith.addf %223, %225 : vector<72x1xf32>
      %c0_138 = arith.constant 0 : index
      %c0_139 = arith.constant 0 : index
      %227 = vector.load %arg27[%c0_138, %c0_139] : memref<72x1xf32, #tpu.memory_space<vmem>>, vector<72x1xf32>
      tpu.vector_store %arg27[%c0_138, %c0_139], %226 {strides = array<i32>} : memref<72x1xf32, #tpu.memory_space<vmem>>, vector<72x1xf32>,
    } else {
    }
    return
  }
  func.func @transform_0(%arg0: i32, %arg1: i32) -> (i32, i32) {
    %c0_i32 = arith.constant 0 : i32
    %c0_i32_0 = arith.constant 0 : i32
    return %arg0, %c0_i32 : i32, i32
  }
  func.func @transform_1(%arg0: i32, %arg1: i32) -> (i32, i32) {
    %c0_i32 = arith.constant 0 : i32
    %c0_i32_0 = arith.constant 0 : i32
    %c0_i32_1 = arith.constant 0 : i32
    return %c0_i32, %c0_i32_0 : i32, i32
  }
  func.func @transform_2(%arg0: i32, %arg1: i32) -> (i32, i32) {
    %c0_i32 = arith.constant 0 : i32
    %c0_i32_0 = arith.constant 0 : i32
    %c0_i32_1 = arith.constant 0 : i32
    return %c0_i32, %c0_i32_0 : i32, i32
  }
  func.func @transform_3(%arg0: i32, %arg1: i32) -> (i32, i32) {
    %c0_i32 = arith.constant 0 : i32
    %c0_i32_0 = arith.constant 0 : i32
    %c0_i32_1 = arith.constant 0 : i32
    return %c0_i32, %c0_i32_0 : i32, i32
  }
  func.func @transform_4(%arg0: i32, %arg1: i32) -> (i32, i32) {
    %c0_i32 = arith.constant 0 : i32
    %c0_i32_0 = arith.constant 0 : i32
    %c0_i32_1 = arith.constant 0 : i32
    return %c0_i32, %c0_i32_0 : i32, i32
  }
  func.func @transform_5(%arg0: i32, %arg1: i32) -> (i32, i32) {
    %c0_i32 = arith.constant 0 : i32
    %c0_i32_0 = arith.constant 0 : i32
    %c0_i32_1 = arith.constant 0 : i32
    return %c0_i32, %c0_i32_0 : i32, i32
  }
  func.func @transform_6(%arg0: i32, %arg1: i32) -> (i32, i32) {
    %c0_i32 = arith.constant 0 : i32
    %c0_i32_0 = arith.constant 0 : i32
    %c0_i32_1 = arith.constant 0 : i32
    return %c0_i32, %c0_i32_0 : i32, i32
  }
  func.func @transform_7(%arg0: i32, %arg1: i32) -> (i32, i32) {
    %c0_i32 = arith.constant 0 : i32
    %c0_i32_0 = arith.constant 0 : i32
    %c0_i32_1 = arith.constant 0 : i32
    return %c0_i32, %c0_i32_0 : i32, i32
  }
  func.func @transform_8(%arg0: i32, %arg1: i32) -> (i32, i32) {
    %c0_i32 = arith.constant 0 : i32
    %c0_i32_0 = arith.constant 0 : i32
    %c0_i32_1 = arith.constant 0 : i32
    return %c0_i32, %c0_i32_0 : i32, i32
  }
  func.func @transform_9(%arg0: i32, %arg1: i32) -> (i32, i32, i32) {
    %c0_i32 = arith.constant 0 : i32
    %c0_i32_0 = arith.constant 0 : i32
    %c0_i32_1 = arith.constant 0 : i32
    return %arg1, %c0_i32, %c0_i32_0 : i32, i32, i32
  }
  func.func @transform_10(%arg0: i32, %arg1: i32) -> (i32, i32, i32) {
    %c0_i32 = arith.constant 0 : i32
    %c0_i32_0 = arith.constant 0 : i32
    %c0_i32_1 = arith.constant 0 : i32
    return %arg1, %c0_i32, %c0_i32_0 : i32, i32, i32
  }
  func.func @transform_11(%arg0: i32, %arg1: i32) -> (i32, i32, i32, i32) {
    %c0_i32 = arith.constant 0 : i32
    %c0_i32_0 = arith.constant 0 : i32
    %c0_i32_1 = arith.constant 0 : i32
    %c0_i32_2 = arith.constant 0 : i32
    return %arg1, %c0_i32, %c0_i32_0, %c0_i32_1 : i32, i32, i32, i32
  }
  func.func @transform_12(%arg0: i32, %arg1: i32) -> (i32, i32, i32, i32) {
    %c0_i32 = arith.constant 0 : i32
    %c0_i32_0 = arith.constant 0 : i32
    %c0_i32_1 = arith.constant 0 : i32
    %c0_i32_2 = arith.constant 0 : i32
    return %arg1, %c0_i32, %c0_i32_0, %c0_i32_1 : i32, i32, i32, i32
  }
  func.func @transform_13(%arg0: i32, %arg1: i32) -> (i32, i32, i32, i32) {
    %c0_i32 = arith.constant 0 : i32
    %c0_i32_0 = arith.constant 0 : i32
    %c0_i32_1 = arith.constant 0 : i32
    %c0_i32_2 = arith.constant 0 : i32
    return %arg1, %c0_i32, %c0_i32_0, %c0_i32_1 : i32, i32, i32, i32
  }
  func.func @transform_14(%arg0: i32, %arg1: i32) -> (i32, i32, i32, i32) {
    %c0_i32 = arith.constant 0 : i32
    %c0_i32_0 = arith.constant 0 : i32
    %c0_i32_1 = arith.constant 0 : i32
    %c0_i32_2 = arith.constant 0 : i32
    return %arg1, %c0_i32, %c0_i32_0, %c0_i32_1 : i32, i32, i32, i32
  }
  func.func @transform_15(%arg0: i32, %arg1: i32) -> (i32, i32, i32) {
    %c0_i32 = arith.constant 0 : i32
    %c0_i32_0 = arith.constant 0 : i32
    %c0_i32_1 = arith.constant 0 : i32
    return %arg1, %c0_i32, %c0_i32_0 : i32, i32, i32
  }
  func.func @transform_16(%arg0: i32, %arg1: i32) -> (i32, i32, i32) {
    %c0_i32 = arith.constant 0 : i32
    %c0_i32_0 = arith.constant 0 : i32
    %c0_i32_1 = arith.constant 0 : i32
    return %arg1, %c0_i32, %c0_i32_0 : i32, i32, i32
  }
  func.func @transform_17(%arg0: i32, %arg1: i32) -> (i32, i32, i32) {
    %c0_i32 = arith.constant 0 : i32
    %c0_i32_0 = arith.constant 0 : i32
    %c0_i32_1 = arith.constant 0 : i32
    return %arg1, %c0_i32, %c0_i32_0 : i32, i32, i32
  }
  func.func @transform_18(%arg0: i32, %arg1: i32) -> (i32, i32, i32) {
    %c0_i32 = arith.constant 0 : i32
    %c0_i32_0 = arith.constant 0 : i32
    %c0_i32_1 = arith.constant 0 : i32
    return %arg1, %c0_i32, %c0_i32_0 : i32, i32, i32
  }
  func.func @transform_19(%arg0: i32, %arg1: i32) -> (i32, i32, i32) {
    %c0_i32 = arith.constant 0 : i32
    %c0_i32_0 = arith.constant 0 : i32
    %c0_i32_1 = arith.constant 0 : i32
    return %arg1, %c0_i32, %c0_i32_0 : i32, i32, i32
  }
  func.func @transform_20(%arg0: i32, %arg1: i32) -> (i32, i32, i32) {
    %c0_i32 = arith.constant 0 : i32
    %c0_i32_0 = arith.constant 0 : i32
    %c0_i32_1 = arith.constant 0 : i32
    return %arg1, %c0_i32, %c0_i32_0 : i32, i32, i32
  }
  func.func @transform_21(%arg0: i32, %arg1: i32) -> (i32, i32) {
    %c0_i32 = arith.constant 0 : i32
    %c0_i32_0 = arith.constant 0 : i32
    %c0_i32_1 = arith.constant 0 : i32
    return %c0_i32, %c0_i32_0 : i32, i32
  }
  func.func @transform_22(%arg0: i32, %arg1: i32) -> (i32, i32) {
    %c0_i32 = arith.constant 0 : i32
    %c0_i32_0 = arith.constant 0 : i32
    %c0_i32_1 = arith.constant 0 : i32
    return %c0_i32, %c0_i32_0 : i32, i32
  }
  func.func @transform_23(%arg0: i32, %arg1: i32) -> (i32, i32) {
    %c0_i32 = arith.constant 0 : i32
    %c0_i32_0 = arith.constant 0 : i32
    %c0_i32_1 = arith.constant 0 : i32
    return %c0_i32, %c0_i32_0 : i32, i32
  }
  func.func @transform_24(%arg0: i32, %arg1: i32) -> (i32, i32) {
    %c0_i32 = arith.constant 0 : i32
    %c0_i32_0 = arith.constant 0 : i32
    %c0_i32_1 = arith.constant 0 : i32
    return %c0_i32, %c0_i32_0 : i32, i32
  }
  func.func @transform_25(%arg0: i32, %arg1: i32) -> (i32, i32) {
    %c0_i32 = arith.constant 0 : i32
    %c0_i32_0 = arith.constant 0 : i32
    return %arg0, %c0_i32 : i32, i32
  }
}

</mosaic_0001>

<bundles_post_ra>
// kernel: tile.9
= control target key start
LH: loop header
LB: loop body
LE: loop exit
PB: predicated region body
PF: predicated region fallthrough
CT: control target
= control target key end

     0   :  { %vm4_vm0 = vcmask 523264   ;;  %s320_s0 = inlined_call_operand.vmem [shape: f32[2,36,192], index: 0, kind: input, shape index: {}]   ;;  %s321_s1 = inlined_call_operand.vmem [shape: f32[72,192], index: 1, kind: output, shape index: {}]  }
   0x1   :  { %v106_v0 = vld [vmem:[%s320_s0 + $0x8] sm:$0xff]   ;;  %v108_v1 = vld [vmem:[%s320_s0 + $0x18] sm:$0xff]   ;;  %v60_v10 = vld [vmem:[%s320_s0] sm:$0xff]  }
   0x2   :  { %v110_v2 = vld [vmem:[%s320_s0 + $0x28] sm:$0xff]   ;;  %107 = vst.msk [vmem:[%s321_s1 + $0x8] sm:$0xff] %vm4_vm0, %v106_v0   ;;  %109 = vst.msk [vmem:[%s321_s1 + $0x18] sm:$0xff] %vm4_vm0, %v108_v1   ;;  %v112_v3 = vld [vmem:[%s320_s0 + $0x38] sm:$0xff]  }
   0x3   :  { %111 = vst.msk [vmem:[%s321_s1 + $0x28] sm:$0xff] %vm4_vm0, %v110_v2   ;;  %v114_v4 = vld [vmem:[%s320_s0 + $0x48] sm:$0xf]   ;;  %v116_v5 = vld [vmem:[%s320_s0 + $0x58] sm:$0xff]   ;;  %113 = vst.msk [vmem:[%s321_s1 + $0x38] sm:$0xff] %vm4_vm0, %v112_v3  }
   0x4   :  { %115 = vst.msk [vmem:[%s321_s1 + $0x48] sm:$0xf] %vm4_vm0, %v114_v4   ;;  %117 = vst.msk [vmem:[%s321_s1 + $0x4c] sm:$0xf] %vm4_vm0, %v116_v5   ;;  %v119_v6 = vld [vmem:[%s320_s0 + $0x68] sm:$0xff]   ;;  %v122_v7 = vld [vmem:[%s320_s0 + $0x78] sm:$0xff]  }
   0x5   :  { %118 = vst.msk [vmem:[%s321_s1 + $0x54] sm:$0xf0] %vm4_vm0, %v116_v5   ;;  %v125_v8 = vld [vmem:[%s320_s0 + $0x88] sm:$0xff]   ;;  %120 = vst.msk [vmem:[%s321_s1 + $0x5c] sm:$0xf] %vm4_vm0, %v119_v6   ;;  %v130_v11 = vld [vmem:[%s320_s0 + $0x10] sm:$0xff]  }
   0x6   :  { %121 = vst.msk [vmem:[%s321_s1 + $0x64] sm:$0xf0] %vm4_vm0, %v119_v6   ;;  %123 = vst.msk [vmem:[%s321_s1 + $0x6c] sm:$0xf] %vm4_vm0, %v122_v7   ;;  %v128_v9 = vld [vmem:[%s320_s0 + $0x98] sm:$0xf]  }
   0x7   :  { %124 = vst.msk [vmem:[%s321_s1 + $0x74] sm:$0xf0] %vm4_vm0, %v122_v7   ;;  %126 = vst.msk [vmem:[%s321_s1 + $0x7c] sm:$0xf] %vm4_vm0, %v125_v8   ;;  %v132_v12 = vld [vmem:[%s320_s0 + $0x20] sm:$0xff]   ;;  %v134_v13 = vld [vmem:[%s320_s0 + $0x30] sm:$0xff]  }
   0x8   :  { %127 = vst.msk [vmem:[%s321_s1 + $0x84] sm:$0xf0] %vm4_vm0, %v125_v8   ;;  %129 = vst.msk [vmem:[%s321_s1 + $0x8c] sm:$0xf] %vm4_vm0, %v128_v9   ;;  %v136_v14 = vld [vmem:[%s320_s0 + $0x40] sm:$0xf]  }
   0x9   :  { %61 = vst [vmem:[%s321_s1] sm:$0xff] %v60_v10   ;;  %131 = vst [vmem:[%s321_s1 + $0x10] sm:$0xff] %v130_v11   ;;  %v138_v15 = vld [vmem:[%s320_s0 + $0x50] sm:$0xff]   ;;  %v141_v16 = vld [vmem:[%s320_s0 + $0x60] sm:$0xff]  }
   0xa   :  { %133 = vst [vmem:[%s321_s1 + $0x20] sm:$0xff] %v132_v12   ;;  %135 = vst [vmem:[%s321_s1 + $0x30] sm:$0xff] %v134_v13   ;;  %v144_v17 = vld [vmem:[%s320_s0 + $0x70] sm:$0xff]   ;;  %v147_v18 = vld [vmem:[%s320_s0 + $0x80] sm:$0xff]  }
   0xb   :  { %137 = vst [vmem:[%s321_s1 + $0x40] sm:$0xf] %v136_v14   ;;  %139 = vst [vmem:[%s321_s1 + $0x44] sm:$0xf] %v138_v15   ;;  %v150_v19 = vld [vmem:[%s320_s0 + $0x90] sm:$0xf]  }
   0xc   :  { %140 = vst [vmem:[%s321_s1 + $0x4c] sm:$0xf0] %v138_v15   ;;  %142 = vst [vmem:[%s321_s1 + $0x54] sm:$0xf] %v141_v16  }
   0xd   :  { %143 = vst [vmem:[%s321_s1 + $0x5c] sm:$0xf0] %v141_v16   ;;  %145 = vst [vmem:[%s321_s1 + $0x64] sm:$0xf] %v144_v17  }
   0xe   :  { %146 = vst [vmem:[%s321_s1 + $0x6c] sm:$0xf0] %v144_v17   ;;  %148 = vst [vmem:[%s321_s1 + $0x74] sm:$0xf] %v147_v18  }
   0xf   :  { %149 = vst [vmem:[%s321_s1 + $0x7c] sm:$0xf0] %v147_v18   ;;  %151 = vst [vmem:[%s321_s1 + $0x84] sm:$0xf] %v150_v19  }

// kernel: eq.8
= control target key start
LH: loop header
LB: loop body
LE: loop exit
PB: predicated region body
PF: predicated region fallthrough
CT: control target
= control target key end

     0   :  { %vm7_vm0 = vcmask 293888   ;;  %vm13_vm1 = vcmask 589088   ;;  %s39_s0 = inlined_call_operand.vmem [shape: s32[2,36], index: 0, kind: input, shape index: {}]   ;;  %s40_s1 = inlined_call_operand.vmem [shape: s32[72], index: 1, kind: output, shape index: {}]  }
   0x1   :  { %v4_v0 = vld [vmem:[%s39_s0] sm:$0x3]  ;;  %s22_s0 = smov 36  }
   0x2   :  { %5 = vst [vmem:[#allocation1] sm:$0x3] %v4_v0 }
   0x9   :  { %v10_v1 = vld [vmem:[#allocation1 + $0x1] sm:$0x1]   ;;  %v6_v2 = vld [vmem:[#allocation1] sm:$0x1]  }
   0xa   :  { %11 = vrot.lane.b32.xlu0 %v10_v1, %s22_s0  ;;  %8 = vst.msk [vmem:[#allocation0] sm:$0x1] %vm7_vm0, %v6_v2  }
  0x7c   :  { %v12_v3 = vpop.permute.xlu0 %11  }
  0x7d   :  { %14 = vst.msk [vmem:[#allocation0] sm:$0x1] %vm13_vm1, %v12_v3  }
  0x84   :  { %v18_v4 = vld [vmem:[#allocation0] sm:$0x1] }
  0x85   :  { %20 = vst [vmem:[%s40_s1] sm:$0x1] %v18_v4 }

// kernel: vit_discriminator_forward.1
= control target key start
LH: loop header
LB: loop body
LE: loop exit
PB: predicated region body
PF: predicated region fallthrough
CT: control target
= control target key end

     0   :  { %s11391_s30 = smov 0   ;;  %s16061_s0 = inlined_call_operand.vmem [shape: f32[72,784], index: 0, kind: input, shape index: {}]   ;;  %s16062_s1 = inlined_call_operand.vmem [shape: f32[72,192], index: 1, kind: input, shape index: {}]   ;;  %s16063_s2 = inlined_call_operand.vmem [shape: f32[72,72], index: 2, kind: input, shape index: {}]   ;;  %s16064_s3 = inlined_call_operand.vmem [shape: f32[1,784], index: 3, kind: input, shape index: {}]   ;;  %s16065_s4 = inlined_call_operand.vmem [shape: f32[1,784], index: 4, kind: input, shape index: {}]   ;;  %s16066_s5 = inlined_call_operand.vmem [shape: bf16[784,192], index: 5, kind: input, shape index: {}]   ;;  %s16067_s6 = inlined_call_operand.vmem [shape: f32[1,192], index: 6, kind: input, shape index: {}]   ;;  %s16068_s7 = inlined_call_operand.vmem [shape: f32[1,192], index: 7, kind: input, shape index: {}]   ;;  %s16069_s8 = inlined_call_operand.vmem [shape: f32[1,192], index: 8, kind: input, shape index: {}]   ;;  %s16070_s9 = inlined_call_operand.vmem [shape: f32[12,1,192], index: 9, kind: input, shape index: {}]   ;;  %s16071_s10 = inlined_call_operand.vmem [shape: f32[12,1,192], index: 10, kind: input, shape index: {}]   ;;  %s16072_s11 = inlined_call_operand.vmem [shape: bf16[12,3,192,64], index: 11, kind: input, shape index: {}]   ;;  %s16073_s12 = inlined_call_operand.vmem [shape: bf16[12,3,192,64], index: 12, kind: input, shape index: {}]   ;;  %s16074_s13 = inlined_call_operand.vmem [shape: bf16[12,3,192,64], index: 13, kind: input, shape index: {}]   ;;  %s16075_s14 = inlined_call_operand.vmem [shape: bf16[12,3,64,192], index: 14, kind: input, shape index: {}]   ;;  %s16076_s15 = inlined_call_operand.vmem [shape: f32[12,1,192], index: 15, kind: input, shape index: {}]   ;;  %s16077_s16 = inlined_call_operand.vmem [shape: f32[12,1,192], index: 16, kind: input, shape index: {}]   ;;  %s16078_s17 = inlined_call_operand.vmem [shape: bf16[12,192,768], index: 17, kind: input, shape index: {}]   ;;  %s16079_s18 = inlined_call_operand.vmem [shape: f32[12,1,768], index: 18, kind: input, shape index: {}]   ;;  %s16080_s19 = inlined_call_operand.vmem [shape: bf16[12,768,192], index: 19, kind: input, shape index: {}]   ;;  %s16081_s20 = inlined_call_operand.vmem [shape: f32[12,1,192], index: 20, kind: input, shape index: {}]   ;;  %s16082_s21 = inlined_call_operand.vmem [shape: f32[1,192], index: 21, kind: input, shape index: {}]   ;;  %s16083_s22 = inlined_call_operand.vmem [shape: f32[1,192], index: 22, kind: input, shape index: {}]   ;;  %s16084_s23 = inlined_call_operand.vmem [shape: f32[1,192], index: 23, kind: input, shape index: {}]   ;;  %s16085_s24 = inlined_call_operand.<no memory space> [shape: f32[1,1], index: 24, kind: input, shape index: {}]   ;;  %s16086_s25 = inlined_call_operand.vmem [shape: f32[72,1], index: 25, kind: output, shape index: {}]  }
   0x1   :  { %16195 = sst [smem:[#allocation85_spill]] %s16061_s0  ;;  %v30_v0 = vstv %s16085_s24 }
   0x2   :  { %16196 = sst [smem:[#allocation86_spill]] %s16062_s1  ;;  %31 = vst [vmem:[#allocation3] sm:$0x1] %v30_v0 }
   0x3   :  { %16197 = sst [smem:[#allocation87_spill]] %s16063_s2 }
   0x4   :  { %16198 = sst [smem:[#allocation88_spill]] %s16064_s3 }
   0x5   :  { %16199 = sst [smem:[#allocation89_spill]] %s16065_s4 }
   0x6   :  { %16200 = sst [smem:[#allocation90_spill]] %s16066_s5 }
   0x7   :  { %16201 = sst [smem:[#allocation91_spill]] %s16067_s6  ;;  %s11389_s6 = smov 0  }
   0x8   :  { %16202 = sst [smem:[#allocation92_spill]] %s16068_s7  ;;  %s11393_s7 = smov 0  }
   0x9   :  { %16203 = sst [smem:[#allocation93_spill]] %s16069_s8 }
   0xa   :  { %16204 = sst [smem:[#allocation94_spill]] %s16070_s9 }
   0xb   :  { %16205 = sst [smem:[#allocation95_spill]] %s16072_s11 }
   0xc   :  { %16206 = sst [smem:[#allocation96_spill]] %s16073_s12 }
   0xd   :  { %16207 = sst [smem:[#allocation97_spill]] %s16074_s13 }
   0xe   :  { %16208 = sst [smem:[#allocation98_spill]] %s16082_s21 }
   0xf   :  { %16209 = sst [smem:[#allocation99_spill]] %s16083_s22 }
  0x10   :  { %16210 = sst [smem:[#allocation100_spill]] %s16084_s23 }
  0x11   :  { %16211 = sst [smem:[#allocation101_spill]] %s16086_s25 }
  0x12 LB: > { %16212 = sst [smem:[#allocation4_spill]] %s11246_s30  ;;  %s46_s24 = sadd.s32 1, %s11246_s30  ;;  %s11250_s7 = sphi %s11393_s7, %s37_s7   ;;  %s11246_s30 = sphi %s11391_s30, %s16463_s30   ;;  %s11242_s6 = sphi %s11389_s6, %s16462_s6  }
  0x13   : > { %16213 = sst [smem:[#allocation5_spill]] %s11250_s7  ;;  %p9179_p0 = scmp.ge.s32.totalorder %s11250_s7, 1 }
  0x14   : > { %p47_p1 = scmp.ge.s32.totalorder %s46_s24, 12  ;;  %p817_p2 = scmp.lt.s32.totalorder %s11250_s7, 13 }
  0x16   : > { %s16465_s24 = smov (%p47_p1, %s46_s24), 0  ;;  %p818_p3 = pnand %p9179_p0, %p817_p2 }
  0x17   : > { %16214 = sst [smem:[#allocation6_spill]] %s16465_s24 }
  0x18   : > { %821 = sbr.rel (%p818_p3) target bundleno = 5420 (0x152c), region = 120 }
  0x1f   : > { %p947_p4 = scmp.lt.s32.totalorder %s11242_s6, 11  ;;  %s16216_s11 = sld [smem:[#allocation95_spill]] }
  0x20   : > { %s16217_s12 = sld [smem:[#allocation96_spill]]  ;;  %s16218_s13 = sld [smem:[#allocation97_spill]] }
  0x21   : > { %s948_s3 = scalar_select %p947_p4, %s11242_s6, 11 }
  0x22   : > { %p9191_p5 = scmp.ne.s32.totalorder %s11242_s6, 0 }
  0x23   : > { %s11411_s26 = sshll.u32 %s948_s3, 1  ;;  %s10325_s1 = smul.u32 288, %s948_s3 }
  0x24   : > { %s10326_s8 = smul.u32 192, %s948_s3  ;;  %s982_s29 = scalar_lea.vmem %s16077_s16, %s11411_s26 }
  0x25   : > { %s11424_s24 = scalar_lea.vmem %s16216_s11, %s10325_s1  ;;  %s10327_s7 = smul.u32 576, %s948_s3 }
  0x26   : > { %s11429_s25 = scalar_lea.vmem %s16217_s12, %s10325_s1  ;;  %s11434_s21 = scalar_lea.vmem %s16218_s13, %s10325_s1 }
  0x27   : > { %s11447_s30 = scalar_lea.vmem %s16075_s14, %s10326_s8  ;;  %s10328_s11 = smul.u32 6, %s948_s3 }
  0x28   : > { %s11456_s27 = scalar_lea.vmem %s16078_s17, %s10327_s7  ;;  %s10329_s4 = smul.u32 768, %s948_s3 }
  0x29   : > { %s11461_s5 = scalar_lea.vmem %s16079_s18, %s10328_s11  ;;  %1011 = sbr.rel (%p9191_p5) target bundleno = 1043 (0x413), region = 124 }
  0x2a   : > { %s11466_s2 = scalar_lea.vmem %s16080_s19, %s10329_s4 }
  0x30   : > { %s16219_s23 = sld [smem:[#allocation85_spill]]  ;;  %vm1209_vm0 = vcmask 130048   ;;  %s16233_s4 = sld [smem:[#allocation90_spill]]  ;;  %vm2767_vm1 = vcmask 523264  }
  0x31   : > { %s16275_s8 = sld [smem:[#allocation88_spill]]  ;;  %s16276_s3 = sld [smem:[#allocation89_spill]] }
  0x32   : > { %s16309_s22 = sld [smem:[#allocation91_spill]]  ;;  %s16313_s1 = sld [smem:[#allocation93_spill]] }
  0x36   : > { %v1012_v1 = vld [vmem:[%s16219_s23] sm:$0xff]  ;;  %v1013_v2 = vld [vmem:[%s16219_s23 + $0x8] sm:$0xff]  ;;  %v1014_v3 = vld [vmem:[%s16219_s23 + $0x10] sm:$0xff] }
  0x37   : > { %v1015_v4 = vld [vmem:[%s16219_s23 + $0x18] sm:$0xff]  ;;  %v1016_v5 = vld [vmem:[%s16219_s23 + $0x20] sm:$0xff]  ;;  %v1076_v6 = vmul.f32 0.003921569, %v1012_v1  ;;  %v1017_v7 = vld [vmem:[%s16219_s23 + $0x28] sm:$0xff] }
  0x38   : > { %v1018_v8 = vld [vmem:[%s16219_s23 + $0x30] sm:$0xff]  ;;  %v1077_v9 = vmul.f32 0.003921569, %v1013_v2  ;;  %v1078_v10 = vmul.f32 0.003921569, %v1014_v3  ;;  %v1027_v18 = vld [vmem:[%s16219_s23 + $0x78] sm:$0xff] }
  0x39   : > { %v1079_v11 = vmul.f32 0.003921569, %v1015_v4  ;;  %v1080_v12 = vmul.f32 0.003921569, %v1016_v5  ;;  %v1026_v13 = vld [vmem:[%s16219_s23 + $0x70] sm:$0xff]  ;;  %v11493_v15 = vadd.f32 -0.5, %v1076_v6 }
  0x3a   : > { %v1082_v14 = vmul.f32 0.003921569, %v1018_v8  ;;  %v11495_v16 = vadd.f32 -0.5, %v1077_v9  ;;  %v11497_v17 = vadd.f32 -0.5, %v1078_v10  ;;  %v1081_v19 = vmul.f32 0.003921569, %v1017_v7 }
  0x3b   : > { %v1028_v20 = vld [vmem:[%s16219_s23 + $0x80] sm:$0xff]  ;;  %v1029_v21 = vld [vmem:[%s16219_s23 + $0x88] sm:$0xff]  ;;  %v1030_v22 = vld [vmem:[%s16219_s23 + $0x90] sm:$0xff]  ;;  %v11511_v23 = vadd.f32 -0.5, %v1079_v11  ;;  %v1090_v27 = vmul.f32 0.003921569, %v1026_v13 }
  0x3c   : > { %v1204_v24 = vadd.f32 %v11495_v16, %v11493_v15  ;;  %v1031_v25 = vld [vmem:[%s16219_s23 + $0x98] sm:$0xff]  ;;  %v1032_v26 = vld [vmem:[%s16219_s23 + $0xa0] sm:$0xff]  ;;  %v1091_v28 = vmul.f32 0.003921569, %v1027_v18  ;;  %v1092_v29 = vmul.f32 0.003921569, %v1028_v20 }
  0x3d   : > { %v1093_v30 = vmul.f32 0.003921569, %v1029_v21  ;;  %v11521_v31 = vadd.f32 -0.5, %v1080_v12  ;;  %v11523_v32 = vadd.f32 -0.5, %v1082_v14  ;;  %v1094_v34 = vmul.f32 0.003921569, %v1030_v22 }
  0x3e   : > { %v1205_v33 = vadd.f32 %v11497_v17, %v1204_v24  ;;  %v1019_v35 = vld [vmem:[%s16219_s23 + $0x38] sm:$0xff]  ;;  %v1020_v36 = vld [vmem:[%s16219_s23 + $0x40] sm:$0xff]  ;;  %v1096_v37 = vmul.f32 0.003921569, %v1032_v26  ;;  %v11532_v38 = vadd.f32 -0.5, %v1090_v27  ;;  %v11534_v39 = vadd.f32 -0.5, %v1091_v28 }
  0x3f   : > { %v11536_v40 = vadd.f32 -0.5, %v1092_v29  ;;  %v1021_v41 = vld [vmem:[%s16219_s23 + $0x48] sm:$0xff]  ;;  %v11541_v42 = vadd.f32 -0.5, %v1081_v19  ;;  %v1095_v44 = vmul.f32 0.003921569, %v1031_v25  ;;  %v11544_v45 = vadd.f32 -0.5, %v1093_v30 }
  0x40   : > { %v1206_v43 = vadd.f32 %v11511_v23, %v1205_v33  ;;  %v1022_v46 = vld [vmem:[%s16219_s23 + $0x50] sm:$0xff]  ;;  %v1023_v47 = vld [vmem:[%s16219_s23 + $0x58] sm:$0xff]  ;;  %v11552_v48 = vadd.f32 -0.5, %v1096_v37  ;;  %v1223_v49 = vadd.f32 %v11534_v39, %v11532_v38  ;;  %v1025_v50 = vld [vmem:[%s16219_s23 + $0x68] sm:$0xff]  ;;  %v1083_v51 = vmul.f32 0.003921569, %v1019_v35 }
  0x41   : > { %v1084_v52 = vmul.f32 0.003921569, %v1020_v36  ;;  %v1210_v54 = vsel %vm1209_vm0, %v11523_v32, 0.0  ;;  %v1024_v55 = vld [vmem:[%s16219_s23 + $0x60] sm:$0xff]  ;;  %v1085_v56 = vmul.f32 0.003921569, %v1021_v41 }
  0x42   : > { %v1207_v53 = vadd.f32 %v11521_v31, %v1206_v43  ;;  %v1086_v57 = vmul.f32 0.003921569, %v1022_v46  ;;  %v11565_v58 = vadd.f32 -0.5, %v1094_v34  ;;  %v1224_v59 = vadd.f32 %v11536_v40, %v1223_v49  ;;  %v1033_v62 = vld [vmem:[%s16219_s23 + $0xa8] sm:$0xff]  ;;  %v1034_v3 = vld [vmem:[%s16219_s23 + $0xb0] sm:$0xff]  ;;  %v1035_v4 = vld [vmem:[%s16219_s23 + $0xb8] sm:$0xff] }
  0x43   : > { %v1087_v60 = vmul.f32 0.003921569, %v1023_v47  ;;  %v1089_v61 = vmul.f32 0.003921569, %v1025_v50  ;;  %v11572_v0 = vadd.f32 -0.5, %v1083_v51  ;;  %v11574_v1 = vadd.f32 -0.5, %v1084_v52 }
  0x44   : > { %v1208_v63 = vadd.f32 %v11541_v42, %v1207_v53  ;;  %v11576_v2 = vadd.f32 -0.5, %v1085_v56  ;;  %v1036_v5 = vld [vmem:[%s16219_s23 + $0xc0] sm:$0xff]  ;;  %v11587_v6 = vadd.f32 -0.5, %v1095_v44  ;;  %v1225_v7 = vadd.f32 %v11544_v45, %v1224_v59  ;;  %v1037_v10 = vld [vmem:[%s16219_s23 + $0xc8] sm:$0xff]  ;;  %v1038_v14 = vld [vmem:[%s16219_s23 + $0xd0] sm:$0xff] }
  0x45   : > { %v1228_v8 = vsel %vm1209_vm0, %v11552_v48, 0.0  ;;  %v1088_v9 = vmul.f32 0.003921569, %v1024_v55  ;;  %v11595_v12 = vadd.f32 -0.5, %v1086_v57  ;;  %v1214_v13 = vadd.f32 %v11574_v1, %v11572_v0  ;;  %v1039_v18 = vld [vmem:[%s16219_s23 + $0xd8] sm:$0xff]  ;;  %v1040_v29 = vld [vmem:[%s16219_s23 + $0xe0] sm:$0xff] }
  0x46   : > { %v1211_v11 = vadd.f32 %v1210_v54, %v1208_v63  ;;  %v1097_v19 = vmul.f32 0.003921569, %v1033_v62  ;;  %v1226_v20 = vadd.f32 %v11565_v58, %v1225_v7  ;;  %v1098_v21 = vmul.f32 0.003921569, %v1034_v3  ;;  %v1041_v36 = vld [vmem:[%s16219_s23 + $0xe8] sm:$0xff]  ;;  %v1042_v37 = vld [vmem:[%s16219_s23 + $0xf0] sm:$0xff] }
  0x47   : > { %v1099_v22 = vmul.f32 0.003921569, %v1035_v4  ;;  %v1100_v24 = vmul.f32 0.003921569, %v1036_v5  ;;  %v11606_v25 = vadd.f32 -0.5, %v1087_v60  ;;  %v11608_v26 = vadd.f32 -0.5, %v1089_v61 }
  0x48   : > { %1212 = vadd.xlane.f32.xlu0 %v1211_v11  ;;  %v1215_v27 = vadd.f32 %v11576_v2, %v1214_v13  ;;  %v1101_v28 = vmul.f32 0.003921569, %v1037_v10  ;;  %v1227_v30 = vadd.f32 %v11587_v6, %v1226_v20  ;;  %v1103_v33 = vmul.f32 0.003921569, %v1039_v18  ;;  %v1043_v47 = vld [vmem:[%s16219_s23 + $0xf8] sm:$0xff]  ;;  %v1044_v53 = vld [vmem:[%s16219_s23 + $0x100] sm:$0xff] }
  0x49   : > { %v11615_v34 = vadd.f32 -0.5, %v1097_v19  ;;  %v11617_v35 = vadd.f32 -0.5, %v1098_v21  ;;  %v11625_v41 = vadd.f32 -0.5, %v1088_v9  ;;  %v1102_v44 = vmul.f32 0.003921569, %v1038_v14  ;;  %v1046_v54 = vld [vmem:[%s16219_s23 + $0x110] sm:$0xff] }
  0x4a   : > { %v1216_v43 = vadd.f32 %v11595_v12, %v1215_v27  ;;  %v11628_v46 = vadd.f32 -0.5, %v1099_v22  ;;  %v1229_v49 = vadd.f32 %v1228_v8, %v1227_v30  ;;  %v11633_v50 = vadd.f32 -0.5, %v1100_v24  ;;  %v1045_v63 = vld [vmem:[%s16219_s23 + $0x108] sm:$0xff]  ;;  %v1047_v9 = vld [vmem:[%s16219_s23 + $0x118] sm:$0xff]  ;;  %v1048_v10 = vld [vmem:[%s16219_s23 + $0x120] sm:$0xff] }
  0x4b   : > { %v11635_v51 = vadd.f32 -0.5, %v1103_v33  ;;  %v1232_v52 = vadd.f32 %v11617_v35, %v11615_v34  ;;  %v1104_v56 = vmul.f32 0.003921569, %v1040_v29  ;;  %v1105_v57 = vmul.f32 0.003921569, %v1041_v36  ;;  %v1049_v19 = vld [vmem:[%s16219_s23 + $0x128] sm:$0xff] }
  0x4c   : > { %v1217_v55 = vadd.f32 %v11606_v25, %v1216_v43  ;;  %v1106_v59 = vmul.f32 0.003921569, %v1042_v37  ;;  %1230 = vadd.xlane.f32.xlu1 %v1229_v49  ;;  %v1219_v60 = vsel %vm1209_vm0, %v11608_v26, 0.0  ;;  %v11648_v61 = vadd.f32 -0.5, %v1101_v28  ;;  %v1050_v20 = vld [vmem:[%s16219_s23 + $0x130] sm:$0xff]  ;;  %v1051_v28 = vld [vmem:[%s16219_s23 + $0x138] sm:$0xff] }
  0x4d   : > { %v1233_v62 = vadd.f32 %v11628_v46, %v1232_v52  ;;  %v1107_v3 = vmul.f32 0.003921569, %v1043_v47  ;;  %v11655_v5 = vadd.f32 -0.5, %v1102_v44  ;;  %v1108_v7 = vmul.f32 0.003921569, %v1044_v53  ;;  %v1053_v33 = vld [vmem:[%s16219_s23 + $0x148] sm:$0xff] }
  0x4e   : > { %v1218_v4 = vadd.f32 %v11625_v41, %v1217_v55  ;;  %v11657_v8 = vadd.f32 -0.5, %v1104_v56  ;;  %v1110_v13 = vmul.f32 0.003921569, %v1046_v54  ;;  %v11666_v14 = vadd.f32 -0.5, %v1105_v57  ;;  %v1052_v44 = vld [vmem:[%s16219_s23 + $0x140] sm:$0xff]  ;;  %v1054_v56 = vld [vmem:[%s16219_s23 + $0x150] sm:$0xff] }
  0x4f   : > { %v1234_v11 = vadd.f32 %v11633_v50, %v1233_v62  ;;  %v11668_v18 = vadd.f32 -0.5, %v1106_v59  ;;  %v1237_v22 = vsel %vm1209_vm0, %v11635_v51, 0.0  ;;  %v1109_v24 = vmul.f32 0.003921569, %v1045_v63  ;;  %v1055_v57 = vld [vmem:[%s16219_s23 + $0x158] sm:$0xff]  ;;  %v1056_v59 = vld [vmem:[%s16219_s23 + $0x160] sm:$0xff] }
  0x50   : > { %v1220_v21 = vadd.f32 %v1219_v60, %v1218_v4  ;;  %v11678_v27 = vadd.f32 -0.5, %v1107_v3  ;;  %v1241_v30 = vadd.f32 %v11666_v14, %v11657_v8  ;;  %v1111_v36 = vmul.f32 0.003921569, %v1047_v9  ;;  %v1057_v4 = vld [vmem:[%s16219_s23 + $0x168] sm:$0xff] }
  0x51   : > { %v1235_v29 = vadd.f32 %v11648_v61, %v1234_v11  ;;  %v1112_v37 = vmul.f32 0.003921569, %v1048_v10  ;;  %v11689_v43 = vadd.f32 -0.5, %v1108_v7  ;;  %v1113_v47 = vmul.f32 0.003921569, %v1049_v19 }
  0x52   : > { %1221 = vadd.xlane.f32.xlu0 %v1220_v21  ;;  %v1114_v49 = vmul.f32 0.003921569, %v1050_v20  ;;  %v11695_v53 = vadd.f32 -0.5, %v1110_v13  ;;  %v1242_v54 = vadd.f32 %v11668_v18, %v1241_v30  ;;  %v1115_v55 = vmul.f32 0.003921569, %v1051_v28  ;;  %v1058_v13 = vld [vmem:[%s16219_s23 + $0x170] sm:$0xff] }
  0x53   : > { %v1236_v52 = vadd.f32 %v11655_v5, %v1235_v29  ;;  %v1117_v60 = vmul.f32 0.003921569, %v1053_v33  ;;  %v11707_v62 = vadd.f32 -0.5, %v1111_v36  ;;  %v11709_v63 = vadd.f32 -0.5, %v1112_v37  ;;  %v1061_v37 = vld [vmem:[%s16219_s23 + $0x188] sm:$0xff] }
  0x54   : > { %16220 = vst [vmem:[#allocation7_spill] sm:$0xff] %v11695_v53  ;;  %v11711_v3 = vadd.f32 -0.5, %v1113_v47  ;;  %v11716_v9 = vadd.f32 -0.5, %v1109_v24  ;;  %v1243_v10 = vadd.f32 %v11678_v27, %v1242_v54  ;;  %v1116_v11 = vmul.f32 0.003921569, %v1052_v44  ;;  %v1060_v24 = vld [vmem:[%s16219_s23 + $0x180] sm:$0xff] }
  0x55   : > { %16221 = vst [vmem:[#allocation8_spill] sm:$0xff] %v11707_v62  ;;  %16222 = vst [vmem:[#allocation9_spill] sm:$0xff] %v11709_v63  ;;  %v1238_v7 = vadd.f32 %v1237_v22, %v1236_v52  ;;  %v11722_v19 = vadd.f32 -0.5, %v1114_v49  ;;  %v11724_v20 = vadd.f32 -0.5, %v1117_v60  ;;  %v1250_v21 = vadd.f32 %v11709_v63, %v11707_v62  ;;  %v1059_v22 = vld [vmem:[%s16219_s23 + $0x178] sm:$0xff]  ;;  %v1062_v54 = vld [vmem:[%s16219_s23 + $0x190] sm:$0xff] }
  0x56   : > { %16223 = vst [vmem:[#allocation10_spill] sm:$0xff] %v11711_v3  ;;  %16224 = vst [vmem:[#allocation11_spill] sm:$0xff] %v11716_v9  ;;  %v1118_v28 = vmul.f32 0.003921569, %v1054_v56  ;;  %v1244_v29 = vadd.f32 %v11689_v43, %v1243_v10  ;;  %v1119_v30 = vmul.f32 0.003921569, %v1055_v57 }
  0x57   : > { %16225 = vst [vmem:[#allocation12_spill] sm:$0xff] %v11722_v19  ;;  %16226 = vst [vmem:[#allocation13_spill] sm:$0xff] %v11724_v20  ;;  %1239 = vadd.xlane.f32.xlu1 %v1238_v7  ;;  %v1120_v33 = vmul.f32 0.003921569, %v1056_v59  ;;  %v1121_v36 = vmul.f32 0.003921569, %v1057_v4  ;;  %v1251_v49 = vadd.f32 %v11711_v3, %v1250_v21 }
  0x58   : > { %v1246_v44 = vsel %vm1209_vm0, %v11695_v53, 0.0  ;;  %v11740_v47 = vadd.f32 -0.5, %v1115_v55  ;;  %v1122_v52 = vmul.f32 0.003921569, %v1058_v13  ;;  %v1063_v56 = vld [vmem:[%s16219_s23 + $0x198] sm:$0xff]  ;;  %v1245_v57 = vadd.f32 %v11716_v9, %v1244_v29  ;;  %v1064_v55 = vld [vmem:[%s16219_s23 + $0x1a0] sm:$0xff] }
  0x59   : > { %v1124_v59 = vmul.f32 0.003921569, %v1060_v24  ;;  %v11750_v60 = vadd.f32 -0.5, %v1118_v28  ;;  %v11752_v4 = vadd.f32 -0.5, %v1119_v30  ;;  %v1065_v7 = vld [vmem:[%s16219_s23 + $0x1a8] sm:$0xff]  ;;  %v11760_v10 = vadd.f32 -0.5, %v1116_v11 }
  0x5a   : > { %16227 = vst [vmem:[#allocation14_spill] sm:$0xff] %v11740_v47  ;;  %v1252_v13 = vadd.f32 %v11722_v19, %v1251_v49  ;;  %v1255_v21 = vsel %vm1209_vm0, %v11724_v20, 0.0  ;;  %v11765_v24 = vadd.f32 -0.5, %v1120_v33  ;;  %v1067_v28 = vld [vmem:[%s16219_s23 + $0x1b8] sm:$0xff]  ;;  %v1247_v29 = vadd.f32 %v1246_v44, %v1245_v57  ;;  %v1066_v11 = vld [vmem:[%s16219_s23 + $0x1b0] sm:$0xff]  ;;  %v1068_v62 = vld [vmem:[%s16219_s23 + $0x1c0] sm:$0xff] }
  0x5b   : > { %16228 = vst [vmem:[#allocation15_spill] sm:$0xff] %v11750_v60  ;;  %16229 = vst [vmem:[#allocation16_spill] sm:$0xff] %v11752_v4  ;;  %v1123_v30 = vmul.f32 0.003921569, %v1059_v22  ;;  %v11770_v3 = vadd.f32 -0.5, %v1121_v36  ;;  %v1259_v63 = vadd.f32 %v11752_v4, %v11750_v60  ;;  %v1069_v22 = vld [vmem:[%s16219_s23 + $0x1c8] sm:$0xff] }
  0x5c   : > { %16230 = vst [vmem:[#allocation17_spill] sm:$0xff] %v11765_v24  ;;  %v1253_v49 = vadd.f32 %v11740_v47, %v1252_v13  ;;  %v1125_v20 = vmul.f32 0.003921569, %v1061_v37  ;;  %v1126_v33 = vmul.f32 0.003921569, %v1062_v54  ;;  %1248 = vadd.xlane.f32.xlu0 %v1247_v29  ;;  %v11784_v36 = vadd.f32 -0.5, %v1122_v52 }
  0x5d   : > { %v1127_v19 = vmul.f32 0.003921569, %v1063_v56  ;;  %v11786_v44 = vadd.f32 -0.5, %v1124_v59  ;;  %v1260_v57 = vadd.f32 %v11765_v24, %v1259_v63  ;;  %v1128_v4 = vmul.f32 0.003921569, %v1064_v55  ;;  %v1070_v37 = vld [vmem:[%s16219_s23 + $0x1d0] sm:$0xff] }
  0x5e   : > { %v1071_v54 = vld [vmem:[%s16219_s23 + $0x1d8] sm:$0xff]  ;;  %v1254_v56 = vadd.f32 %v11760_v10, %v1253_v49  ;;  %v1129_v13 = vmul.f32 0.003921569, %v1065_v7  ;;  %v1131_v60 = vmul.f32 0.003921569, %v1067_v28  ;;  %v11796_v29 = vadd.f32 -0.5, %v1125_v20 }
  0x5f   : > { %v11798_v52 = vadd.f32 -0.5, %v1123_v30  ;;  %v1261_v59 = vadd.f32 %v11770_v3, %v1260_v57  ;;  %v11801_v63 = vadd.f32 -0.5, %v1126_v33  ;;  %v11803_v55 = vadd.f32 -0.5, %v1127_v19  ;;  %v1072_v24 = vld [vmem:[%s16219_s23 + $0x1e0] sm:$0xff]  ;;  %v1074_v20 = vld [vmem:[%s16219_s23 + $0x1f0] sm:$0xff] }
  0x60   : > { %16231 = vst [vmem:[#allocation18_spill] sm:$0xff] %v11796_v29  ;;  %v1256_v47 = vadd.f32 %v1255_v21, %v1254_v56  ;;  %v1130_v53 = vmul.f32 0.003921569, %v1066_v11  ;;  %v11808_v9 = vadd.f32 -0.5, %v1128_v4  ;;  %v1132_v30 = vmul.f32 0.003921569, %v1068_v62 }
  0x61   : > { %16232 = vst [vmem:[#allocation19_spill] sm:$0xff] %v11801_v63  ;;  %v1262_v7 = vadd.f32 %v11784_v36, %v1261_v59  ;;  %v1268_v28 = vadd.f32 %v11801_v63, %v11796_v29  ;;  %v1133_v19 = vmul.f32 0.003921569, %v1069_v22  ;;  %v1264_v49 = vsel %vm1209_vm0, %v11786_v44, 0.0  ;;  %v1073_v59 = vld [vmem:[%s16219_s23 + $0x1e8] sm:$0xff] }
  0x62   : > { %1257 = vadd.xlane.f32.xlu1 %v1256_v47  ;;  %v1134_v33 = vmul.f32 0.003921569, %v1070_v37  ;;  %v1135_v21 = vmul.f32 0.003921569, %v1071_v54  ;;  %v11819_v11 = vadd.f32 -0.5, %v1129_v13  ;;  %v11821_v57 = vadd.f32 -0.5, %v1131_v60 }
  0x63   : > { %v1263_v4 = vadd.f32 %v11798_v52, %v1262_v7  ;;  %v1269_v56 = vadd.f32 %v11803_v55, %v1268_v28  ;;  %v1136_v62 = vmul.f32 0.003921569, %v1072_v24  ;;  %v11827_v22 = vadd.f32 -0.5, %v1132_v30 }
  0x64   : > { %v11829_v47 = vadd.f32 -0.5, %v1133_v19  ;;  %v11831_v63 = vadd.f32 -0.5, %v1134_v33  ;;  %v11833_v54 = vadd.f32 -0.5, %v1130_v53  ;;  %v1138_v60 = vmul.f32 0.003921569, %v1074_v20 }
  0x65   : > { %v1265_v37 = vadd.f32 %v1264_v49, %v1263_v4  ;;  %v1270_v13 = vadd.f32 %v11808_v9, %v1269_v56  ;;  %v1137_v7 = vmul.f32 0.003921569, %v1073_v59  ;;  %v11836_v29 = vadd.f32 -0.5, %v1135_v21 }
  0x66   : > { %v1277_v28 = vadd.f32 %v11829_v47, %v11827_v22  ;;  %v1273_v30 = vsel %vm1209_vm0, %v11821_v57, 0.0  ;;  %v11843_v19 = vadd.f32 -0.5, %v1136_v62  ;;  %v11847_v33 = vadd.f32 -0.5, %v1138_v60  ;;  %v10360_v60 = vld [vmem:[%s16233_s4] ss:$8 sps:$4 sm:$0xff]  }
  0x67   : > { %1266 = vadd.xlane.f32.xlu0 %v1265_v37  ;;  %v1271_v24 = vadd.f32 %v11819_v11, %v1270_v13  ;;  %v11849_v20 = vadd.f32 -0.5, %v1137_v7  ;;  %v10358_v13 = vld [vmem:[%s16233_s4 + $0x4] ss:$8 sps:$4 sm:$0xff]  }
  0x68   : > { %v1278_v53 = vadd.f32 %v11831_v63, %v1277_v28  ;;  %v1282_v59 = vsel %vm1209_vm0, %v11847_v33, 0.0  ;;  %v10361_v7 = vld [vmem:[%s16233_s4 + $0x204] ss:$8 sps:$4 sm:$0xff]   ;;  %v10363_v28 = vld [vmem:[%s16233_s4 + $0x200] ss:$8 sps:$4 sm:$0xff]   ;;  %2441 = vmatprep.subr.bf16.mxu1 %v10358_v13 }
  0x69   : > { %v1272_v49 = vadd.f32 %v11833_v54, %v1271_v24  ;;  %v10364_v24 = vld [vmem:[%s16233_s4 + $0x14] ss:$8 sps:$4 sm:$0xff]   ;;  %2603 = vmatprep.subr.bf16.mxu0 %v10361_v7  ;;  %2442 = vmatpush1.bf16.msra.mxu1 %v10360_v60  ;;  %v10378_v13 = vld [vmem:[%s16233_s4 + $0x30] ss:$8 sps:$4 sm:$0xff]   ;;  %v10382_v7 = vld [vmem:[%s16233_s4 + $0x44] ss:$8 sps:$4 sm:$0xff]  }
  0x6a   : > { %v1279_v21 = vadd.f32 %v11836_v29, %v1278_v53  ;;  %2604 = vmatpush1.bf16.msra.mxu0 %v10363_v28  ;;  %v10366_v53 = vld [vmem:[%s16233_s4 + $0x10] ss:$8 sps:$4 sm:$0xff]   ;;  %2443 = vmatprep.subr.bf16.mxu1 %v10364_v24  ;;  %v10385_v28 = vld [vmem:[%s16233_s4 + $0x244] ss:$8 sps:$4 sm:$0xff]   ;;  %v10384_v24 = vld [vmem:[%s16233_s4 + $0x40] ss:$8 sps:$4 sm:$0xff]  }
  0x6b   : > { %v1274_v4 = vadd.f32 %v1273_v30, %v1272_v49  ;;  %v10367_v30 = vld [vmem:[%s16233_s4 + $0x214] ss:$8 sps:$4 sm:$0xff]   ;;  %v10369_v49 = vld [vmem:[%s16233_s4 + $0x210] ss:$8 sps:$4 sm:$0xff]  }
  0x6c   : > { %v1280_v56 = vadd.f32 %v11843_v19, %v1279_v21  ;;  %2605 = vmatprep.subr.bf16.mxu0 %v10367_v30  ;;  %v10370_v21 = vld [vmem:[%s16233_s4 + $0x24] ss:$8 sps:$4 sm:$0xff]   ;;  %v10381_v60 = vld [vmem:[%s16233_s4 + $0x230] ss:$8 sps:$4 sm:$0xff]   ;;  %v10387_v30 = vld [vmem:[%s16233_s4 + $0x240] ss:$8 sps:$4 sm:$0xff]  }
  0x6d   : > { %1275 = vadd.xlane.f32.xlu1 %v1274_v4  ;;  %v10373_v4 = vld [vmem:[%s16233_s4 + $0x224] ss:$8 sps:$4 sm:$0xff]   ;;  %2444 = vmatpush1.bf16.msra.mxu1 %v10366_v53  ;;  %v10388_v53 = vld [vmem:[%s16233_s4 + $0x54] ss:$8 sps:$4 sm:$0xff]  }
  0x6e   : > { %v1281_v62 = vadd.f32 %v11849_v20, %v1280_v56  ;;  %2606 = vmatpush1.bf16.msra.mxu0 %v10369_v49  ;;  %v10372_v56 = vld [vmem:[%s16233_s4 + $0x20] ss:$8 sps:$4 sm:$0xff]   ;;  %2445 = vmatprep.subr.bf16.mxu1 %v10370_v21  ;;  %v10391_v49 = vld [vmem:[%s16233_s4 + $0x254] ss:$8 sps:$4 sm:$0xff]   ;;  %v10390_v21 = vld [vmem:[%s16233_s4 + $0x50] ss:$8 sps:$4 sm:$0xff]  }
  0x6f   : > { %2607 = vmatprep.subr.bf16.mxu0 %v10373_v4  ;;  %v10393_v4 = vld [vmem:[%s16233_s4 + $0x250] ss:$8 sps:$4 sm:$0xff]  }
  0x70   : > { %v1283_v37 = vadd.f32 %v1282_v59, %v1281_v62  ;;  %v10375_v59 = vld [vmem:[%s16233_s4 + $0x220] ss:$8 sps:$4 sm:$0xff]   ;;  %v10376_v62 = vld [vmem:[%s16233_s4 + $0x34] ss:$8 sps:$4 sm:$0xff]  }
  0x71   : > { %2446 = vmatpush1.bf16.msra.mxu1 %v10372_v56  ;;  %v10394_v56 = vld [vmem:[%s16233_s4 + $0x64] ss:$8 sps:$4 sm:$0xff]  }
  0x72   : > { %1284 = vadd.xlane.f32.xlu0 %v1283_v37  ;;  %v10379_v37 = vld [vmem:[%s16233_s4 + $0x234] ss:$8 sps:$4 sm:$0xff]   ;;  %2608 = vmatpush1.bf16.msra.mxu0 %v10375_v59  ;;  %v10397_v59 = vld [vmem:[%s16233_s4 + $0x264] ss:$8 sps:$4 sm:$0xff]  }
  0x73   : > { %2447 = vmatprep.subr.bf16.mxu1 %v10376_v62  ;;  %2609 = vmatprep.subr.bf16.mxu0 %v10379_v37  ;;  %v10396_v62 = vld [vmem:[%s16233_s4 + $0x60] ss:$8 sps:$4 sm:$0xff]  }
  0x74   : > { %v10399_v37 = vld [vmem:[%s16233_s4 + $0x260] ss:$8 sps:$4 sm:$0xff]  }
  0x75   : > { %2448 = vmatpush1.bf16.msra.mxu1 %v10378_v13  ;;  %v10400_v13 = vld [vmem:[%s16233_s4 + $0x74] ss:$8 sps:$4 sm:$0xff]  }
  0x76   : > { %2610 = vmatpush1.bf16.msra.mxu0 %v10381_v60  ;;  %2449 = vmatprep.subr.bf16.mxu1 %v10382_v7  ;;  %v10403_v60 = vld [vmem:[%s16233_s4 + $0x274] ss:$8 sps:$4 sm:$0xff]   ;;  %v10402_v7 = vld [vmem:[%s16233_s4 + $0x70] ss:$8 sps:$4 sm:$0xff]  }
  0x77   : > { %2611 = vmatprep.subr.bf16.mxu0 %v10385_v28  ;;  %v10405_v28 = vld [vmem:[%s16233_s4 + $0x270] ss:$8 sps:$4 sm:$0xff]  }
  0x79   : > { %2450 = vmatpush1.bf16.msra.mxu1 %v10384_v24  ;;  %v10406_v24 = vld [vmem:[%s16233_s4 + $0x84] ss:$8 sps:$4 sm:$0xff]  }
  0x7a   : > { %2612 = vmatpush1.bf16.msra.mxu0 %v10387_v30  ;;  %2451 = vmatprep.subr.bf16.mxu1 %v10388_v53  ;;  %v10409_v30 = vld [vmem:[%s16233_s4 + $0x284] ss:$8 sps:$4 sm:$0xff]   ;;  %v10408_v53 = vld [vmem:[%s16233_s4 + $0x80] ss:$8 sps:$4 sm:$0xff]  }
  0x7b   : > { %2613 = vmatprep.subr.bf16.mxu0 %v10391_v49  ;;  %v10411_v49 = vld [vmem:[%s16233_s4 + $0x280] ss:$8 sps:$4 sm:$0xff]  }
  0x7d   : > { %2452 = vmatpush1.bf16.msra.mxu1 %v10390_v21  ;;  %v10412_v21 = vld [vmem:[%s16233_s4 + $0x94] ss:$8 sps:$4 sm:$0xff]  }
  0x7e   : > { %2614 = vmatpush1.bf16.msra.mxu0 %v10393_v4  ;;  %2453 = vmatprep.subr.bf16.mxu1 %v10394_v56 }
  0x7f   : > { %2615 = vmatprep.subr.bf16.mxu0 %v10397_v59 }
  0x81   : > { %2454 = vmatpush1.bf16.msra.mxu1 %v10396_v62 }
  0x82   : > { %2616 = vmatpush1.bf16.msra.mxu0 %v10399_v37  ;;  %2455 = vmatprep.subr.bf16.mxu1 %v10400_v13 }
  0x83   : > { %2617 = vmatprep.subr.bf16.mxu0 %v10403_v60 }
  0x85   : > { %2456 = vmatpush1.bf16.msra.mxu1 %v10402_v7 }
  0x86   : > { %2618 = vmatpush1.bf16.msra.mxu0 %v10405_v28  ;;  %2457 = vmatprep.subr.bf16.mxu1 %v10406_v24 }
  0x87   : > { %2619 = vmatprep.subr.bf16.mxu0 %v10409_v30 }
  0x89   : > { %2458 = vmatpush1.bf16.msra.mxu1 %v10408_v53 }
  0x8a   : > { %2620 = vmatpush1.bf16.msra.mxu0 %v10411_v49  ;;  %2459 = vmatprep.subr.bf16.mxu1 %v10412_v21 }
  0xd5   : > { %v1213_v4 = vpop.xlane.xlu0 %1212 }
  0xd6   : > { %v1287_v56 = vmul.f32 0.0012755102, %v1213_v4 }
  0xd8   : > { %v11968_v59 = vsub.f32 %v11493_v15, %v1287_v56  ;;  %v11971_v62 = vsub.f32 %v11495_v16, %v1287_v56  ;;  %v11974_v37 = vsub.f32 %v11497_v17, %v1287_v56  ;;  %v11977_v13 = vsub.f32 %v11511_v23, %v1287_v56 }
  0xd9   : > { %v11980_v60 = vsub.f32 %v11521_v31, %v1287_v56  ;;  %v11983_v7 = vsub.f32 %v11523_v32, %v1287_v56  ;;  %v1231_v28 = vpop.xlane.xlu1 %1230  ;;  %v11990_v17 = vsub.f32 %v11541_v42, %v1287_v56 }
  0xda   : > { %16234 = vst [vmem:[#allocation20_spill] sm:$0xff] %v11977_v13  ;;  %v1359_v15 = vmul.f32 %v11968_v59, %v11968_v59  ;;  %v1360_v16 = vmul.f32 %v11971_v62, %v11971_v62  ;;  %v1289_v24 = vmul.f32 0.0012755102, %v1231_v28  ;;  %v1361_v23 = vmul.f32 %v11974_v37, %v11974_v37 }
  0xdb   : > { %16235 = vst [vmem:[#allocation21_spill] sm:$0xff] %v11983_v7  ;;  %v1362_v31 = vmul.f32 %v11977_v13, %v11977_v13  ;;  %v1365_v32 = vmul.f32 %v11983_v7, %v11983_v7  ;;  %v1363_v53 = vmul.f32 %v11980_v60, %v11980_v60 }
  0xdc   : > { %v1422_v30 = vadd.f32 %v1360_v16, %v1359_v15  ;;  %v12001_v49 = vsub.f32 %v11532_v38, %v1289_v24  ;;  %v12004_v21 = vsub.f32 %v11534_v39, %v1289_v24  ;;  %v12007_v42 = vsub.f32 %v11536_v40, %v1289_v24 }
  0xdd   : > { %v12010_v56 = vsub.f32 %v11544_v45, %v1289_v24  ;;  %v12013_v28 = vsub.f32 %v11565_v58, %v1289_v24  ;;  %v12016_v15 = vsub.f32 %v11587_v6, %v1289_v24  ;;  %v12019_v38 = vsub.f32 %v11552_v48, %v1289_v24 }
  0xde   : > { %16236 = vst [vmem:[#allocation22_spill] sm:$0xff] %v12001_v49  ;;  %16237 = vst [vmem:[#allocation23_spill] sm:$0xff] %v12007_v42  ;;  %v1423_v4 = vadd.f32 %v1422_v30, %v1361_v23  ;;  %v1373_v39 = vmul.f32 %v12001_v49, %v12001_v49  ;;  %v1374_v40 = vmul.f32 %v12004_v21, %v12004_v21  ;;  %v1427_v6 = vsel %vm1209_vm0, %v1365_v32, 0.0 }
  0xdf   : > { %16238 = vst [vmem:[#allocation24_spill] sm:$0xff] %v12010_v56  ;;  %v1222_v16 = vpop.xlane.xlu0 %1221  ;;  %16239 = vst [vmem:[#allocation25_spill] sm:$0xff] %v12019_v38  ;;  %v1375_v45 = vmul.f32 %v12007_v42, %v12007_v42  ;;  %v1364_v58 = vmul.f32 %v11990_v17, %v11990_v17  ;;  %v1376_v48 = vmul.f32 %v12010_v56, %v12010_v56 }
  0xe0   : > { %v1288_v23 = vmul.f32 0.0012755102, %v1222_v16  ;;  %v1424_v30 = vadd.f32 %v1423_v4, %v1362_v31  ;;  %v1377_v24 = vmul.f32 %v12013_v28, %v12013_v28  ;;  %v1379_v7 = vmul.f32 %v12019_v38, %v12019_v38 }
  0xe1   : > { %v1440_v13 = vadd.f32 %v1374_v40, %v1373_v39  ;;  %v1378_v32 = vmul.f32 %v12016_v15, %v12016_v15 }
  0xe2   : > { %v1425_v49 = vadd.f32 %v1424_v30, %v1363_v53  ;;  %v12037_v42 = vsub.f32 %v11572_v0, %v1288_v23  ;;  %v12040_v16 = vsub.f32 %v11574_v1, %v1288_v23  ;;  %v12043_v31 = vsub.f32 %v11576_v2, %v1288_v23 }
  0xe3   : > { %v1441_v4 = vadd.f32 %v1440_v13, %v1375_v45  ;;  %v12048_v56 = vsub.f32 %v11595_v12, %v1288_v23  ;;  %v12051_v38 = vsub.f32 %v11606_v25, %v1288_v23  ;;  %v1445_v0 = vsel %vm1209_vm0, %v1379_v7, 0.0 }
  0xe4   : > { %16240 = vst [vmem:[#allocation26_spill] sm:$0xff] %v12043_v31  ;;  %v1240_v53 = vpop.xlane.xlu1 %1239  ;;  %v1426_v39 = vadd.f32 %v1425_v49, %v1364_v58  ;;  %v12055_v1 = vsub.f32 %v11608_v26, %v1288_v23  ;;  %v1366_v2 = vmul.f32 %v12037_v42, %v12037_v42  ;;  %v12060_v13 = vsub.f32 %v11625_v41, %v1288_v23 }
  0xe5   : > { %16241 = vst [vmem:[#allocation27_spill] sm:$0xff] %v12048_v56  ;;  %v1290_v40 = vmul.f32 0.0012755102, %v1240_v53  ;;  %v1442_v30 = vadd.f32 %v1441_v4, %v1376_v48  ;;  %v1367_v12 = vmul.f32 %v12040_v16, %v12040_v16  ;;  %v1368_v49 = vmul.f32 %v12043_v31, %v12043_v31 }
  0xe6   : > { %16242 = vst [vmem:[#allocation28_spill] sm:$0xff] %v12055_v1  ;;  %v1428_v25 = vadd.f32 %v1427_v6, %v1426_v39  ;;  %v1369_v7 = vmul.f32 %v12048_v56, %v12048_v56  ;;  %v1370_v26 = vmul.f32 %v12051_v38, %v12051_v38  ;;  %v1372_v58 = vmul.f32 %v12055_v1, %v12055_v1 }
  0xe7   : > { %v1443_v45 = vadd.f32 %v1442_v30, %v1377_v24  ;;  %v1431_v48 = vadd.f32 %v1367_v12, %v1366_v2  ;;  %v12073_v41 = vsub.f32 %v11615_v34, %v1290_v40  ;;  %v12076_v23 = vsub.f32 %v11617_v35, %v1290_v40 }
  0xe8   : > { %1429 = vadd.xlane.f32.xlu1 %v1428_v25  ;;  %v12079_v6 = vsub.f32 %v11628_v46, %v1290_v40  ;;  %v12082_v4 = vsub.f32 %v11633_v50, %v1290_v40  ;;  %v12085_v53 = vsub.f32 %v11648_v61, %v1290_v40  ;;  %v1371_v39 = vmul.f32 %v12060_v13, %v12060_v13 }
  0xe9   : > { %v1444_v24 = vadd.f32 %v1443_v45, %v1378_v32  ;;  %v1432_v2 = vadd.f32 %v1431_v48, %v1368_v49  ;;  %v12090_v34 = vsub.f32 %v11655_v5, %v1290_v40  ;;  %v1249_v30 = vpop.xlane.xlu0 %1248  ;;  %v12093_v35 = vsub.f32 %v11635_v51, %v1290_v40 }
  0xea   : > { %16243 = vst [vmem:[#allocation29_spill] sm:$0xff] %v12079_v6  ;;  %16244 = vst [vmem:[#allocation30_spill] sm:$0xff] %v12082_v4  ;;  %v1380_v46 = vmul.f32 %v12073_v41, %v12073_v41  ;;  %v1381_v50 = vmul.f32 %v12076_v23, %v12076_v23  ;;  %v1382_v61 = vmul.f32 %v12079_v6, %v12079_v6  ;;  %v1291_v32 = vmul.f32 0.0012755102, %v1249_v30  ;;  %v16257_v6 = vld [vmem:[#allocation14_spill] sm:$0xff] }
  0xeb   : > { %16245 = vst [vmem:[#allocation31_spill] sm:$0xff] %v12093_v35  ;;  %v1446_v12 = vadd.f32 %v1445_v0, %v1444_v24  ;;  %v1433_v25 = vadd.f32 %v1432_v2, %v1369_v7  ;;  %v1436_v49 = vsel %vm1209_vm0, %v1372_v58, 0.0  ;;  %v1383_v5 = vmul.f32 %v12082_v4, %v12082_v4 }
  0xec   : > { %v1384_v51 = vmul.f32 %v12085_v53, %v12085_v53  ;;  %v1386_v40 = vmul.f32 %v12093_v35, %v12093_v35  ;;  %v1449_v45 = vadd.f32 %v1381_v50, %v1380_v46  ;;  %v12109_v1 = vsub.f32 %v11657_v8, %v1291_v32  ;;  %v16248_v8 = vld [vmem:[#allocation11_spill] sm:$0xff] }
  0xed   : > { %1447 = vadd.xlane.f32.xlu1 %v1446_v12  ;;  %v1434_v48 = vadd.f32 %v1433_v25, %v1370_v26  ;;  %v12112_v0 = vsub.f32 %v11666_v14, %v1291_v32  ;;  %v12115_v7 = vsub.f32 %v11668_v18, %v1291_v32  ;;  %v1385_v58 = vmul.f32 %v12090_v34, %v12090_v34  ;;  %v16249_v14 = vld [vmem:[#allocation7_spill] sm:$0xff] }
  0xee   : > { %v1450_v24 = vadd.f32 %v1449_v45, %v1382_v61  ;;  %v12120_v2 = vsub.f32 %v11678_v27, %v1291_v32  ;;  %v12123_v30 = vsub.f32 %v11689_v43, %v1291_v32  ;;  %v12126_v50 = vsub.f32 %v16248_v8, %v1291_v32 }
  0xef   : > { %16246 = vst [vmem:[#allocation32_spill] sm:$0xff] %v12115_v7  ;;  %v1258_v26 = vpop.xlane.xlu1 %1257  ;;  %v1435_v46 = vadd.f32 %v1434_v48, %v1371_v39  ;;  %v12129_v12 = vsub.f32 %v16249_v14, %v1291_v32  ;;  %v1387_v18 = vmul.f32 %v12109_v1, %v12109_v1  ;;  %v1388_v27 = vmul.f32 %v12112_v0, %v12112_v0  ;;  %v16252_v14 = vld [vmem:[#allocation9_spill] sm:$0xff] }
  0xf0   : > { %16247 = vst [vmem:[#allocation33_spill] sm:$0xff] %v12120_v2  ;;  %v1292_v25 = vmul.f32 0.0012755102, %v1258_v26  ;;  %v1451_v35 = vadd.f32 %v1450_v24, %v1383_v5  ;;  %v1389_v43 = vmul.f32 %v12115_v7, %v12115_v7  ;;  %v1454_v39 = vsel %vm1209_vm0, %v1386_v40, 0.0  ;;  %v16251_v24 = vld [vmem:[#allocation8_spill] sm:$0xff] }
  0xf1   : > { %16250 = vst [vmem:[#allocation11_spill] sm:$0xff] %v12129_v12  ;;  %v1437_v61 = vadd.f32 %v1436_v49, %v1435_v46  ;;  %v1390_v45 = vmul.f32 %v12120_v2, %v12120_v2  ;;  %v1391_v32 = vmul.f32 %v12123_v30, %v12123_v30  ;;  %v1393_v26 = vmul.f32 %v12129_v12, %v12129_v12  ;;  %v16253_v49 = vld [vmem:[#allocation10_spill] sm:$0xff]  ;;  %v16255_v46 = vld [vmem:[#allocation12_spill] sm:$0xff] }
  0xf2   : > { %v1452_v48 = vadd.f32 %v1451_v35, %v1384_v51  ;;  %v1458_v5 = vadd.f32 %v1388_v27, %v1387_v18  ;;  %v12145_v8 = vsub.f32 %v16251_v24, %v1292_v25  ;;  %v12148_v7 = vsub.f32 %v16252_v14, %v1292_v25  ;;  %v16258_v14 = vld [vmem:[#allocation13_spill] sm:$0xff] }
  0xf3   : > { %1438 = vadd.xlane.f32.xlu0 %v1437_v61  ;;  %v12151_v40 = vsub.f32 %v16253_v49, %v1292_v25  ;;  %v12154_v2 = vsub.f32 %v16255_v46, %v1292_v25  ;;  %v12157_v4 = vsub.f32 %v16257_v6, %v1292_v25  ;;  %v1392_v18 = vmul.f32 %v12126_v50, %v12126_v50 }
  0xf4   : > { %v1267_v35 = vpop.xlane.xlu0 %1266  ;;  %v1453_v51 = vadd.f32 %v1452_v48, %v1385_v58  ;;  %v1459_v27 = vadd.f32 %v1458_v5, %v1389_v43  ;;  %v12162_v61 = vsub.f32 %v11760_v10, %v1292_v25  ;;  %v12165_v12 = vsub.f32 %v16258_v14, %v1292_v25  ;;  %v16260_v14 = vld [vmem:[#allocation15_spill] sm:$0xff] }
  0xf5   : > { %16254 = vst [vmem:[#allocation7_spill] sm:$0xff] %v12151_v40  ;;  %16256 = vst [vmem:[#allocation8_spill] sm:$0xff] %v12154_v2  ;;  %v1293_v24 = vmul.f32 0.0012755102, %v1267_v35  ;;  %v1394_v49 = vmul.f32 %v12145_v8, %v12145_v8  ;;  %v1395_v6 = vmul.f32 %v12148_v7, %v12148_v7  ;;  %v1463_v58 = vsel %vm1209_vm0, %v1393_v26, 0.0 }
  0xf6   : > { %16259 = vst [vmem:[#allocation9_spill] sm:$0xff] %v12165_v12  ;;  %v1455_v46 = vadd.f32 %v1454_v39, %v1453_v51  ;;  %v1460_v56 = vadd.f32 %v1459_v27, %v1390_v45  ;;  %v1396_v43 = vmul.f32 %v12151_v40, %v12151_v40  ;;  %v1397_v10 = vmul.f32 %v12154_v2, %v12154_v2  ;;  %v16262_v45 = vld [vmem:[#allocation16_spill] sm:$0xff]  ;;  %v16263_v51 = vld [vmem:[#allocation17_spill] sm:$0xff] }
  0xf7   : > { %v1398_v25 = vmul.f32 %v12157_v4, %v12157_v4  ;;  %v1400_v48 = vmul.f32 %v12165_v12, %v12165_v12  ;;  %v1467_v5 = vadd.f32 %v1395_v6, %v1394_v49  ;;  %v12181_v39 = vsub.f32 %v16260_v14, %v1293_v24 }
  0xf8   : > { %1456 = vadd.xlane.f32.xlu0 %v1455_v46  ;;  %v1461_v35 = vadd.f32 %v1460_v56, %v1391_v32  ;;  %v12184_v26 = vsub.f32 %v16262_v45, %v1293_v24  ;;  %v12187_v27 = vsub.f32 %v16263_v51, %v1293_v24  ;;  %v1399_v40 = vmul.f32 %v12162_v61, %v12162_v61 }
  0xf9   : > { %16261 = vst [vmem:[#allocation10_spill] sm:$0xff] %v12181_v39  ;;  %v1468_v2 = vadd.f32 %v1467_v5, %v1396_v43  ;;  %v12192_v31 = vsub.f32 %v11770_v3, %v1293_v24  ;;  %v12195_v49 = vsub.f32 %v11784_v36, %v1293_v24  ;;  %v12198_v6 = vsub.f32 %v11798_v52, %v1293_v24  ;;  %v10414_v43 = vld [vmem:[%s16233_s4 + $0x90] ss:$8 sps:$4 sm:$0xff]   ;;  %v10415_v3 = vld [vmem:[%s16233_s4 + $0x294] ss:$8 sps:$4 sm:$0xff]  }
  0xfa   : > { %16264 = vst [vmem:[#allocation12_spill] sm:$0xff] %v12187_v27  ;;  %v1276_v56 = vpop.xlane.xlu1 %1275  ;;  %v1462_v32 = vadd.f32 %v1461_v35, %v1392_v18  ;;  %v12201_v46 = vsub.f32 %v11786_v44, %v1293_v24  ;;  %v1401_v14 = vmul.f32 %v12181_v39, %v12181_v39  ;;  %v1402_v52 = vmul.f32 %v12184_v26, %v12184_v26  ;;  %v10417_v18 = vld [vmem:[%s16233_s4 + $0x290] ss:$8 sps:$4 sm:$0xff]   ;;  %v10418_v24 = vld [vmem:[%s16233_s4 + $0xa4] ss:$8 sps:$4 sm:$0xff]  }
  0xfb   : > { %16265 = vst [vmem:[#allocation14_spill] sm:$0xff] %v12192_v31  ;;  %v1294_v36 = vmul.f32 0.0012755102, %v1276_v56  ;;  %v1469_v5 = vadd.f32 %v1468_v2, %v1397_v10  ;;  %v1403_v44 = vmul.f32 %v12187_v27, %v12187_v27  ;;  %v1472_v45 = vsel %vm1209_vm0, %v1400_v48, 0.0  ;;  %2460 = vmatpush1.bf16.msra.mxu1 %v10414_v43  ;;  %v16267_v27 = vld [vmem:[#allocation18_spill] sm:$0xff]  ;;  %2621 = vmatprep.subr.bf16.mxu0 %v10415_v3  ;;  %v16268_v48 = vld [vmem:[#allocation19_spill] sm:$0xff] }
  0xfc   : > { %16266 = vst [vmem:[#allocation13_spill] sm:$0xff] %v12201_v46  ;;  %v1464_v35 = vadd.f32 %v1463_v58, %v1462_v32  ;;  %v1404_v2 = vmul.f32 %v12192_v31, %v12192_v31  ;;  %v1405_v10 = vmul.f32 %v12195_v49, %v12195_v49  ;;  %v1406_v56 = vmul.f32 %v12198_v6, %v12198_v6 }
  0xfd   : > { %v1470_v51 = vadd.f32 %v1469_v5, %v1398_v25  ;;  %v1476_v12 = vadd.f32 %v1402_v52, %v1401_v14  ;;  %v12229_v39 = vsub.f32 %v16267_v27, %v1294_v36  ;;  %v1407_v58 = vmul.f32 %v12201_v46, %v12201_v46  ;;  %2622 = vmatpush1.bf16.msra.mxu0 %v10417_v18 }
  0xfe   : > { %1465 = vadd.xlane.f32.xlu1 %v1464_v35  ;;  %v12234_v32 = vsub.f32 %v16268_v48, %v1294_v36  ;;  %v12237_v31 = vsub.f32 %v11803_v55, %v1294_v36  ;;  %v12240_v25 = vsub.f32 %v11808_v9, %v1294_v36  ;;  %v12243_v27 = vsub.f32 %v11819_v11, %v1294_v36 }
  0xff   : > { %v1285_v43 = vpop.xlane.xlu0 %1284  ;;  %v1471_v5 = vadd.f32 %v1470_v51, %v1399_v40  ;;  %v1477_v14 = vadd.f32 %v1476_v12, %v1403_v44  ;;  %2461 = vmatprep.subr.bf16.mxu1 %v10418_v24  ;;  %v12246_v52 = vsub.f32 %v11833_v54, %v1294_v36  ;;  %v1408_v35 = vmul.f32 %v12229_v39, %v12229_v39 }
 0x100   : > { %16269 = vst [vmem:[#allocation15_spill] sm:$0xff] %v12237_v31  ;;  %16270 = vst [vmem:[#allocation16_spill] sm:$0xff] %v12240_v25  ;;  %v1295_v3 = vmul.f32 0.0012755102, %v1285_v43  ;;  %v1409_v55 = vmul.f32 %v12234_v32, %v12234_v32  ;;  %v12253_v40 = vsub.f32 %v11821_v57, %v1294_v36  ;;  %v1410_v11 = vmul.f32 %v12237_v31, %v12237_v31 }
 0x101   : > { %v1473_v9 = vadd.f32 %v1472_v45, %v1471_v5  ;;  %v1478_v48 = vadd.f32 %v1477_v14, %v1404_v2  ;;  %v1411_v12 = vmul.f32 %v12240_v25, %v12240_v25  ;;  %v1481_v57 = vsel %vm1209_vm0, %v1407_v58, 0.0  ;;  %v10421_v58 = vld [vmem:[%s16233_s4 + $0x2a4] ss:$8 sps:$4 sm:$0xff]  }
 0x102   : > { %16271 = vst [vmem:[#allocation17_spill] sm:$0xff] %v12253_v40  ;;  %v1485_v44 = vadd.f32 %v1409_v55, %v1408_v35  ;;  %v12260_v18 = vsub.f32 %v11827_v22, %v1295_v3  ;;  %v12263_v24 = vsub.f32 %v11829_v47, %v1295_v3  ;;  %v12266_v45 = vsub.f32 %v11831_v63, %v1295_v3  ;;  %v10424_v55 = vld [vmem:[%s16233_s4 + $0xb4] ss:$8 sps:$4 sm:$0xff]  }
 0x103   : > { %1474 = vadd.xlane.f32.xlu0 %v1473_v9  ;;  %v1479_v54 = vadd.f32 %v1478_v48, %v1405_v10  ;;  %v1412_v36 = vmul.f32 %v12243_v27, %v12243_v27  ;;  %v12272_v51 = vsub.f32 %v11836_v29, %v1295_v3  ;;  %v1413_v22 = vmul.f32 %v12246_v52, %v12246_v52  ;;  %v10420_v10 = vld [vmem:[%s16233_s4 + $0xa0] ss:$8 sps:$4 sm:$0xff]  }
 0x104   : > { %16272 = vst [vmem:[#allocation18_spill] sm:$0xff] %v12266_v45  ;;  %v1486_v2 = vadd.f32 %v1485_v44, %v1410_v11  ;;  %v1414_v47 = vmul.f32 %v12253_v40, %v12253_v40  ;;  %v1415_v63 = vmul.f32 %v12260_v18, %v12260_v18  ;;  %v10423_v29 = vld [vmem:[%s16233_s4 + $0x2a0] ss:$8 sps:$4 sm:$0xff]   ;;  %v12290_v5 = vsub.f32 %v11843_v19, %v1295_v3 }
 0x105   : > { %16273 = vst [vmem:[#allocation19_spill] sm:$0xff] %v12272_v51  ;;  %v1480_v43 = vadd.f32 %v1479_v54, %v1406_v56  ;;  %v1416_v14 = vmul.f32 %v12263_v24, %v12263_v24  ;;  %v1417_v35 = vmul.f32 %v12266_v45, %v12266_v45  ;;  %v12300_v48 = vsub.f32 %v11849_v20, %v1295_v3 }
 0x106   : > { %v1487_v56 = vadd.f32 %v1486_v2, %v1411_v12  ;;  %v12303_v11 = vsub.f32 %v11847_v33, %v1295_v3  ;;  %2462 = vmatpush1.bf16.msra.mxu1 %v10420_v10  ;;  %v1418_v12 = vmul.f32 %v12272_v51, %v12272_v51  ;;  %2623 = vmatprep.subr.bf16.mxu0 %v10421_v58  ;;  %v1490_v54 = vsel %vm1209_vm0, %v1414_v47, 0.0  ;;  %v10427_v47 = vld [vmem:[%s16233_s4 + $0x2b4] ss:$8 sps:$4 sm:$0xff]  }
 0x107   : > { %v1482_v9 = vadd.f32 %v1481_v57, %v1480_v43  ;;  %v1494_v44 = vadd.f32 %v1416_v14, %v1415_v63  ;;  %2463 = vmatprep.subr.bf16.mxu1 %v10424_v55  ;;  %2624 = vmatpush1.bf16.msra.mxu0 %v10423_v29  ;;  %v1419_v20 = vmul.f32 %v12290_v5, %v12290_v5  ;;  %v10429_v29 = vld [vmem:[%s16233_s4 + $0x2b0] ss:$8 sps:$4 sm:$0xff]   ;;  %v10433_v55 = vld [vmem:[%s16233_s4 + $0x2c4] ss:$8 sps:$4 sm:$0xff]  }
 0x108   : > { %16274 = vst [vmem:[#allocation34_spill] sm:$0xff] %v12303_v11  ;;  %v1488_v19 = vadd.f32 %v1487_v56, %v1412_v36  ;;  %v1421_v33 = vmul.f32 %v12303_v11, %v12303_v11  ;;  %v1420_v36 = vmul.f32 %v12300_v48, %v12300_v48  ;;  %v10430_v56 = vld [vmem:[%s16233_s4 + $0xc4] ss:$8 sps:$4 sm:$0xff]   ;;  %2625 = vmatprep.subr.bf16.mxu0 %v10427_v47  ;;  %v10450_v47 = vld [vmem:[%s16233_s4 + $0xf0] ss:$8 sps:$4 sm:$0xff]  }
 0x109   : > { %1483 = vadd.xlane.f32.xlu1 %v1482_v9  ;;  %v1495_v57 = vadd.f32 %v1494_v44, %v1417_v35  ;;  %v10432_v35 = vld [vmem:[%s16233_s4 + $0xc0] ss:$8 sps:$4 sm:$0xff]  }
 0x10a   : > { %v1489_v2 = vadd.f32 %v1488_v19, %v1413_v22  ;;  %v1499_v10 = vsel %vm1209_vm0, %v1421_v33, 0.0  ;;  %v10426_v22 = vld [vmem:[%s16233_s4 + $0xb0] ss:$8 sps:$4 sm:$0xff]   ;;  %v10435_v9 = vld [vmem:[%s16233_s4 + $0x2c0] ss:$8 sps:$4 sm:$0xff]   ;;  %v1594_v19 = vlaneseq }
 0x10b   : > { %v1496_v43 = vadd.f32 %v1495_v57, %v1418_v12  ;;  %2464 = vmatpush1.bf16.msra.mxu1 %v10426_v22  ;;  %2626 = vmatpush1.bf16.msra.mxu0 %v10429_v29  ;;  %v10436_v12 = vld [vmem:[%s16233_s4 + $0xd4] ss:$8 sps:$4 sm:$0xff]   ;;  %v12353_v57 = vld [vmem:[%s16275_s8] sm:$0x7f]  ;;  %s16314_s8 = sld [smem:[#allocation86_spill]] }
 0x10c   : > { %v1491_v3 = vadd.f32 %v1490_v54, %v1489_v2  ;;  %2465 = vmatprep.subr.bf16.mxu1 %v10430_v56  ;;  %2627 = vmatprep.subr.bf16.mxu0 %v10433_v55  ;;  %v12339_v44 = vshrl.u32 %v1594_v19, 7  ;;  %v10438_v54 = vld [vmem:[%s16233_s4 + $0xd0] ss:$8 sps:$4 sm:$0xff]   ;;  %v10439_v2 = vld [vmem:[%s16233_s4 + $0x2d4] ss:$8 sps:$4 sm:$0xff]  }
 0x10d   : > { %v1497_v63 = vadd.f32 %v1496_v43, %v1419_v20  ;;  %v10441_v20 = vld [vmem:[%s16233_s4 + $0x2d0] ss:$8 sps:$4 sm:$0xff]   ;;  %v10444_v43 = vld [vmem:[%s16233_s4 + $0xe0] ss:$8 sps:$4 sm:$0xff]   ;;  %v10448_v22 = vld [vmem:[%s16233_s4 + $0xf4] ss:$8 sps:$4 sm:$0xff]  }
 0x10e   : > { %1492 = vadd.xlane.f32.xlu0 %v1491_v3  ;;  %v1604_v33 = vsub.s32 2, %v12339_v44  ;;  %v10442_v3 = vld [vmem:[%s16233_s4 + $0xe4] ss:$8 sps:$4 sm:$0xff]   ;;  %v10451_v29 = vld [vmem:[%s16233_s4 + $0x2f4] ss:$8 sps:$4 sm:$0xff]  }
 0x10f   : > { %v1498_v58 = vadd.f32 %v1497_v63, %v1420_v36  ;;  %2466 = vmatpush1.bf16.msra.mxu1 %v10432_v35  ;;  %2628 = vmatpush1.bf16.msra.mxu0 %v10435_v9  ;;  %v12362_v36 = vld [vmem:[%s16276_s3] sm:$0x7f]  ;;  %s16312_s3 = sld [smem:[#allocation92_spill]] }
 0x110   : > { %2467 = vmatprep.subr.bf16.mxu1 %v10436_v12  ;;  %2629 = vmatprep.subr.bf16.mxu0 %v10439_v2  ;;  %v10445_v63 = vld [vmem:[%s16233_s4 + $0x2e4] ss:$8 sps:$4 sm:$0xff]   ;;  %v12386_v56 = vrot.slane %v12362_v36, %v1604_v33 }
 0x111   : > { %v1500_v14 = vadd.f32 %v1499_v10, %v1498_v58  ;;  %v10447_v10 = vld [vmem:[%s16233_s4 + $0x2e0] ss:$8 sps:$4 sm:$0xff]   ;;  %v12374_v58 = vrot.slane %v12353_v57, %v1604_v33  ;;  %v10456_v35 = vld [vmem:[%s16233_s4 + $0x104] ss:$8 sps:$4 sm:$0xff]  }
 0x112   : > { %v10477_v55 = vld [vmem:[%s16233_s4 + $0x304] ss:$8 sps:$4 sm:$0xff]  }
 0x113   : > { %1501 = vadd.xlane.f32.xlu1 %v1500_v14  ;;  %2468 = vmatpush1.bf16.msra.mxu1 %v10438_v54  ;;  %v10453_v14 = vld [vmem:[%s16233_s4 + $0x2f0] ss:$8 sps:$4 sm:$0xff]  }
 0x114   : > { %2630 = vmatpush1.bf16.msra.mxu0 %v10441_v20  ;;  %2469 = vmatprep.subr.bf16.mxu1 %v10442_v3 }
 0x115   : > { %2631 = vmatprep.subr.bf16.mxu0 %v10445_v63 }
 0x117   : > { %2470 = vmatpush1.bf16.msra.mxu1 %v10444_v43  ;;  %v12398_v43 = vsub.s32 1, %v12339_v44 }
 0x118   : > { %2632 = vmatpush1.bf16.msra.mxu0 %v10447_v10  ;;  %2471 = vmatprep.subr.bf16.mxu1 %v10448_v22  ;;  %v1616_v10 = vsub.s32 5, %v12339_v44 }
 0x119   : > { %2633 = vmatprep.subr.bf16.mxu0 %v10451_v29  ;;  %16277 = vst [vmem:[#allocation35_spill] sm:$0xff] %v12398_v43 }
 0x11a   : > { %v12441_v51 = vrot.slane %v12362_v36, %v1616_v10 }
 0x11b   : > { %2472 = vmatpush1.bf16.msra.mxu1 %v10450_v47  ;;  %v12404_v47 = vsub.s32 0, %v12339_v44 }
 0x11c   : > { %2634 = vmatpush1.bf16.msra.mxu0 %v10453_v14  ;;  %2522 = vmatprep.subr.bf16.mxu1 %v10456_v35  ;;  %v1612_v14 = vsub.s32 4, %v12339_v44 }
 0x11d   : > { %2684 = vmatprep.subr.bf16.mxu0 %v10477_v55  ;;  %16278 = vst [vmem:[#allocation36_spill] sm:$0xff] %v12404_v47  ;;  %v12445_v11 = vrot.slane %v12362_v36, %v12404_v47 }
 0x175   : > { %v1430_v9 = vpop.xlane.xlu1 %1429 }
 0x176   : > { %v1503_v19 = vmul.f32 0.0012755102, %v1430_v9  ;;  %v12411_v9 = vrot.slane %v12353_v57, %v12398_v43 }
 0x178   : > { %v1512_v12 = vadd.f32 1e-05, %v1503_v19 }
 0x17a   : > { %10505 = vrsqrt.f32 %v1512_v12  ;;  %v1448_v54 = vpop.xlane.xlu1 %1447  ;;  %v12416_v12 = vrot.slane %v12353_v57, %v1616_v10 }
 0x17b   : > { %v1505_v2 = vmul.f32 0.0012755102, %v1448_v54 }
 0x17d   : > { %v1514_v20 = vadd.f32 1e-05, %v1505_v2 }
 0x17f   : > { %10507 = vrsqrt.f32 %v1514_v20  ;;  %v12422_v20 = vrot.slane %v12353_v57, %v12404_v47 }
 0x180   : > { %v1439_v33 = vpop.xlane.xlu0 %1438 }
 0x181   : > { %v1504_v3 = vmul.f32 0.0012755102, %v1439_v33 }
 0x183   : > { %v1513_v63 = vadd.f32 1e-05, %v1504_v3  ;;  %v12429_v3 = vrot.slane %v12353_v57, %v1612_v14 }
 0x184   : > { %v12401_v22 = vpop.eup %10505 }
 0x185   : > { %10509 = vrsqrt.f32 %v1513_v63  ;;  %v1457_v29 = vpop.xlane.xlu0 %1456  ;;  %v1531_v55 = vmul.f32 %v12401_v22, %v11971_v62  ;;  %v1535_v19 = vmul.f32 %v12401_v22, %v11990_v17  ;;  %v1532_v54 = vmul.f32 %v12401_v22, %v11974_v37 }
 0x186   : > { %v1506_v35 = vmul.f32 0.0012755102, %v1457_v29  ;;  %v1530_v62 = vmul.f32 %v12401_v22, %v11968_v59  ;;  %v1534_v33 = vmul.f32 %v12401_v22, %v11980_v60  ;;  %v12435_v37 = vrot.slane %v12362_v36, %v12398_v43 }
 0x187   : > { %v1631_v17 = vmul.f32 %v12374_v58, %v1532_v54  ;;  %v1630_v63 = vmul.f32 %v12411_v9, %v1531_v55  ;;  %v1634_v59 = vmul.f32 %v12416_v12, %v1535_v19 }
 0x188   : > { %v1515_v2 = vadd.f32 1e-05, %v1506_v35  ;;  %v1629_v54 = vmul.f32 %v12422_v20, %v1530_v62  ;;  %v1633_v55 = vmul.f32 %v12429_v3, %v1534_v33 }
 0x189   : > { %v12437_v29 = vpop.eup %10507  ;;  %v12453_v43 = vadd.f32 %v12386_v56, %v1631_v17  ;;  %v1729_v19 = vadd.f32 %v12435_v37, %v1630_v63  ;;  %v1733_v62 = vadd.f32 %v12441_v51, %v1634_v59 }
 0x18a   : > { %10511 = vrsqrt.f32 %v1515_v2  ;;  %v12450_v2 = vrot.slane %v12362_v36, %v1612_v14  ;;  %v1545_v10 = vmul.f32 %v12437_v29, %v12004_v21  ;;  %v1549_v33 = vmul.f32 %v12437_v29, %v12016_v15  ;;  %v16279_v14 = vld [vmem:[#allocation22_spill] sm:$0xff] }
 0x18b   : > { %v1466_v35 = vpop.xlane.xlu1 %1465  ;;  %v1544_v40 = vmul.f32 %v12437_v29, %v16279_v14  ;;  %v1548_v17 = vmul.f32 %v12437_v29, %v12013_v28  ;;  %v1728_v15 = vadd.f32 %v12445_v11, %v1629_v54 }
 0x18c   : > { %v1507_v60 = vmul.f32 0.0012755102, %v1466_v35  ;;  %v1732_v45 = vadd.f32 %v12450_v2, %v1633_v55  ;;  %v1644_v31 = vmul.f32 %v12411_v9, %v1545_v10 }
 0x18d   : > { %v1643_v54 = vmul.f32 %v12422_v20, %v1544_v40 }
 0x18e   : > { %v1516_v46 = vadd.f32 1e-05, %v1507_v60 }
 0x18f   : > { %v12459_v47 = vpop.eup %10509 }
 0x190   : > { %10513 = vrsqrt.f32 %v1516_v46  ;;  %v1475_v63 = vpop.xlane.xlu0 %1474  ;;  %v1538_v21 = vmul.f32 %v12459_v47, %v12040_v16  ;;  %v1542_v60 = vmul.f32 %v12459_v47, %v12060_v13  ;;  %v1537_v59 = vmul.f32 %v12459_v47, %v12037_v42 }
 0x191   : > { %v1508_v35 = vmul.f32 0.0012755102, %v1475_v63  ;;  %v1541_v14 = vmul.f32 %v12459_v47, %v12051_v38  ;;  %v1648_v42 = vmul.f32 %v12416_v12, %v1549_v33 }
 0x192   : > { %v1637_v28 = vmul.f32 %v12411_v9, %v1538_v21  ;;  %v1641_v46 = vmul.f32 %v12416_v12, %v1542_v60  ;;  %v1636_v16 = vmul.f32 %v12422_v20, %v1537_v59  ;;  %v1647_v60 = vmul.f32 %v12429_v3, %v1548_v17 }
 0x193   : > { %v1517_v13 = vadd.f32 1e-05, %v1508_v35  ;;  %v1640_v25 = vmul.f32 %v12429_v3, %v1541_v14  ;;  %v10454_v14 = vld [vmem:[%s16233_s4 + $0x100] ss:$8 sps:$4 sm:$0xff]  }
 0x194   : > { %v12485_v63 = vpop.eup %10511  ;;  %v1736_v38 = vadd.f32 %v12435_v37, %v1637_v28  ;;  %v1740_v55 = vadd.f32 %v12441_v51, %v1641_v46  ;;  %v1735_v21 = vadd.f32 %v12445_v11, %v1636_v16 }
 0x195   : > { %10515 = vrsqrt.f32 %v1517_v13  ;;  %v1739_v10 = vadd.f32 %v12450_v2, %v1640_v25  ;;  %v1552_v35 = vmul.f32 %v12485_v63, %v12076_v23  ;;  %v1556_v33 = vmul.f32 %v12485_v63, %v12090_v34  ;;  %v10475_v25 = vld [vmem:[%s16233_s4 + $0x300] ss:$8 sps:$4 sm:$0xff]   ;;  %v10459_v34 = vld [vmem:[%s16233_s4 + $0x114] ss:$8 sps:$4 sm:$0xff]  }
 0x196   : > { %v1484_v40 = vpop.xlane.xlu1 %1483  ;;  %v1792_v59 = vpack.c.bf16 %v1736_v38, %v1729_v19  ;;  %v1796_v28 = vpack.c.bf16 %v1740_v55, %v1733_v62  ;;  %v1791_v46 = vpack.c.bf16 %v1735_v21, %v1728_v15  ;;  %v1551_v17 = vmul.f32 %v12485_v63, %v12073_v41 }
 0x197   : > { %v1509_v16 = vmul.f32 0.0012755102, %v1484_v40  ;;  %v1795_v23 = vpack.c.bf16 %v1739_v10, %v1732_v45  ;;  %v1651_v13 = vmul.f32 %v12411_v9, %v1552_v35  ;;  %v1655_v19 = vmul.f32 %v12416_v12, %v1556_v33 }
 0x198   : > { %2473 = vmatprep.mubr.bf16.mxu1 %v1792_v59  ;;  %2635 = vmatprep.mubr.bf16.mxu0 %v1796_v28  ;;  %v1743_v62 = vadd.f32 %v12435_v37, %v1644_v31  ;;  %v1650_v41 = vmul.f32 %v12422_v20, %v1551_v17  ;;  %v1555_v15 = vmul.f32 %v12485_v63, %v12085_v53  ;;  %v10457_v31 = vld [vmem:[%s16233_s4 + $0x110] ss:$8 sps:$4 sm:$0xff]   ;;  %v16280_v33 = vsub.s32 3, %v12339_v44 }
 0x199   : > { %v1518_v38 = vadd.f32 1e-05, %v1509_v16  ;;  %2474 = vmatmul.mubr.bf16.vlgmr.msra.gmra.mrb[0].mxu1 %v1791_v46  ;;  %2636 = vmatmul.mubr.bf16.vlgmr.msra.gmra.mrb[0].mxu0 %v1795_v23  ;;  %v1750_v45 = vadd.f32 %v12435_v37, %v1651_v13  ;;  %v1747_v55 = vadd.f32 %v12441_v51, %v1648_v42  ;;  %v1754_v21 = vadd.f32 %v12441_v51, %v1655_v19  ;;  %v10462_v46 = vld [vmem:[%s16233_s4 + $0x124] ss:$8 sps:$4 sm:$0xff]  }
 0x19a   : > { %v12516_v10 = vpop.eup %10513  ;;  %2523 = vmatpush1.bf16.msra.mxu1 %v10454_v14  ;;  %v1749_v35 = vadd.f32 %v12445_v11, %v1650_v41  ;;  %v1654_v53 = vmul.f32 %v12429_v3, %v1555_v15  ;;  %2685 = vmatpush1.bf16.msra.mxu0 %v10475_v25  ;;  %v12526_v40 = vrot.slane %v12353_v57, %v16280_v33  ;;  %v1620_v42 = vsub.s32 6, %v12339_v44 }
 0x19b   : > { %10517 = vrsqrt.f32 %v1518_v38  ;;  %v1493_v59 = vpop.xlane.xlu0 %1492  ;;  %v1799_v28 = vpack.c.bf16 %v1750_v45, %v1743_v62  ;;  %2524 = vmatprep.subr.bf16.mxu1 %v10459_v34  ;;  %v1803_v14 = vpack.c.bf16 %v1754_v21, %v1747_v55  ;;  %v1559_v17 = vmul.f32 %v12516_v10, %v12112_v0  ;;  %v10460_v0 = vld [vmem:[%s16233_s4 + $0x120] ss:$8 sps:$4 sm:$0xff]  }
 0x19c   : > { %v1510_v25 = vmul.f32 0.0012755102, %v1493_v59  ;;  %v1742_v16 = vadd.f32 %v12445_v11, %v1643_v54  ;;  %v1753_v23 = vadd.f32 %v12450_v2, %v1654_v53  ;;  %v1563_v13 = vmul.f32 %v12516_v10, %v12126_v50  ;;  %v16281_v54 = vld [vmem:[#allocation20_spill] sm:$0xff] }
 0x19d   : > { %2483 = vmatprep.mubr.bf16.mxu1 %v1799_v28  ;;  %2645 = vmatprep.mubr.bf16.mxu0 %v1803_v14  ;;  %v1746_v34 = vadd.f32 %v12450_v2, %v1647_v60  ;;  %v1558_v19 = vmul.f32 %v12516_v10, %v12109_v1  ;;  %v1562_v62 = vmul.f32 %v12516_v10, %v12123_v30 }
 0x19e   : > { %v1519_v41 = vadd.f32 1e-05, %v1510_v25  ;;  %2525 = vmatpush1.bf16.msra.mxu1 %v10457_v31  ;;  %v1533_v15 = vmul.f32 %v12401_v22, %v16281_v54  ;;  %v16282_v50 = vmov %v16280_v33  ;;  %v12556_v1 = vrot.slane %v12353_v57, %v1620_v42  ;;  %v10465_v31 = vld [vmem:[%s16233_s4 + $0x134] ss:$8 sps:$4 sm:$0xff]  }
 0x19f   : > { %v12551_v38 = vrot.slane %v12362_v36, %v16282_v50  ;;  %v12558_v30 = vpop.eup %10515  ;;  %2526 = vmatprep.subr.bf16.mxu1 %v10462_v46  ;;  %v1798_v60 = vpack.c.bf16 %v1749_v35, %v1742_v16  ;;  %v1802_v45 = vpack.c.bf16 %v1753_v23, %v1746_v34  ;;  %v1658_v55 = vmul.f32 %v12411_v9, %v1559_v17  ;;  %v16283_v25 = vld [vmem:[#allocation24_spill] sm:$0xff]  ;;  %v16284_v34 = vld [vmem:[#allocation26_spill] sm:$0xff] }
 0x1a0   : > { %v1662_v21 = vmul.f32 %v12416_v12, %v1563_v13  ;;  %10519 = vrsqrt.f32 %v1519_v41  ;;  %v1566_v53 = vmul.f32 %v12558_v30, %v12148_v7  ;;  %v1570_v57 = vmul.f32 %v12558_v30, %v12162_v61  ;;  %v1502_v59 = vpop.xlane.xlu1 %1501  ;;  %v10463_v61 = vld [vmem:[%s16233_s4 + $0x130] ss:$8 sps:$4 sm:$0xff]  }
 0x1a1   : > { %v1657_v33 = vmul.f32 %v12422_v20, %v1558_v19  ;;  %2484 = vmatmul.mubr.bf16.gmra.mrb[4].mxu1 %v1798_v60  ;;  %2646 = vmatmul.mubr.bf16.gmra.mrb[4].mxu0 %v1802_v45  ;;  %v1565_v35 = vmul.f32 %v12558_v30, %v12145_v8  ;;  %v1569_v28 = vmul.f32 %v12558_v30, %v12157_v4  ;;  %v1511_v46 = vmul.f32 0.0012755102, %v1502_v59  ;;  %v10468_v4 = vld [vmem:[%s16233_s4 + $0x144] ss:$8 sps:$4 sm:$0xff]  }
 0x1a2   : > { %v1661_v14 = vmul.f32 %v12429_v3, %v1562_v62  ;;  %2527 = vmatpush1.bf16.msra.mxu1 %v10460_v0  ;;  %v1665_v7 = vmul.f32 %v12411_v9, %v1566_v53  ;;  %v1669_v17 = vmul.f32 %v12416_v12, %v1570_v57  ;;  %v1547_v16 = vmul.f32 %v12437_v29, %v16283_v25 }
 0x1a3   : > { %v1757_v8 = vadd.f32 %v12435_v37, %v1658_v55  ;;  %2528 = vmatprep.subr.bf16.mxu1 %v10465_v31  ;;  %v1664_v23 = vmul.f32 %v12422_v20, %v1565_v35  ;;  %v1668_v13 = vmul.f32 %v12429_v3, %v1569_v28  ;;  %v1539_v19 = vmul.f32 %v12459_v47, %v16284_v34 }
 0x1a4   : > { %v1520_v62 = vadd.f32 1e-05, %v1511_v46  ;;  %v1764_v41 = vadd.f32 %v12435_v37, %v1665_v7  ;;  %v1761_v0 = vadd.f32 %v12441_v51, %v1662_v21  ;;  %v1768_v54 = vadd.f32 %v12441_v51, %v1669_v17  ;;  %v10466_v21 = vld [vmem:[%s16233_s4 + $0x140] ss:$8 sps:$4 sm:$0xff]  }
 0x1a5   : > { %v12593_v50 = vpop.eup %10517  ;;  %v1756_v60 = vadd.f32 %v12445_v11, %v1657_v33  ;;  %v1763_v45 = vadd.f32 %v12445_v11, %v1664_v23  ;;  %v1760_v55 = vadd.f32 %v12450_v2, %v1661_v14  ;;  %v1767_v31 = vadd.f32 %v12450_v2, %v1668_v13  ;;  %v10471_v14 = vld [vmem:[%s16233_s4 + $0x154] ss:$8 sps:$4 sm:$0xff]   ;;  %v16285_v46 = vld [vmem:[#allocation10_spill] sm:$0xff] }
 0x1a6   : > { %10521 = vrsqrt.f32 %v1520_v62  ;;  %v1806_v53 = vpack.c.bf16 %v1764_v41, %v1757_v8  ;;  %v1810_v57 = vpack.c.bf16 %v1768_v54, %v1761_v0  ;;  %2529 = vmatpush1.bf16.msra.mxu1 %v10463_v61  ;;  %v1573_v59 = vmul.f32 %v12593_v50, %v12184_v26  ;;  %v16286_v61 = vld [vmem:[#allocation27_spill] sm:$0xff]  ;;  %v16287_v8 = vld [vmem:[#allocation21_spill] sm:$0xff] }
 0x1a7   : > { %2530 = vmatprep.subr.bf16.mxu1 %v10468_v4  ;;  %v1805_v35 = vpack.c.bf16 %v1763_v45, %v1756_v60  ;;  %v1809_v33 = vpack.c.bf16 %v1767_v31, %v1760_v55  ;;  %v1577_v28 = vmul.f32 %v12593_v50, %v12198_v6  ;;  %v1572_v7 = vmul.f32 %v12593_v50, %v16285_v46  ;;  %v16288_v41 = vld [vmem:[#allocation23_spill] sm:$0xff]  ;;  %v10474_v54 = vld [vmem:[%s16233_s4 + $0x164] ss:$8 sps:$4 sm:$0xff]   ;;  %v16289_v45 = vld [vmem:[#allocation28_spill] sm:$0xff] }
 0x1a8   : > { %2493 = vmatprep.mubr.bf16.mxu1 %v1806_v53  ;;  %2655 = vmatprep.mubr.bf16.mxu0 %v1810_v57  ;;  %v1672_v17 = vmul.f32 %v12411_v9, %v1573_v59  ;;  %v1576_v26 = vmul.f32 %v12593_v50, %v12195_v49  ;;  %v1540_v25 = vmul.f32 %v12459_v47, %v16286_v61  ;;  %v10469_v49 = vld [vmem:[%s16233_s4 + $0x150] ss:$8 sps:$4 sm:$0xff]  }
 0x1a9   : > { %2494 = vmatmul.mubr.bf16.gmra.mrb[8].mxu1 %v1805_v35  ;;  %2656 = vmatmul.mubr.bf16.gmra.mrb[8].mxu0 %v1809_v33  ;;  %v12617_v6 = vmul.f32 %v12526_v40, %v1533_v15  ;;  %v12621_v4 = vmul.f32 %v12401_v22, %v16287_v8  ;;  %v1646_v23 = vmul.f32 %v12526_v40, %v1547_v16  ;;  %v16290_v33 = vld [vmem:[#allocation30_spill] sm:$0xff] }
 0x1aa   : > { %v12624_v13 = vpop.eup %10519  ;;  %2531 = vmatpush1.bf16.msra.mxu1 %v10466_v21  ;;  %v1676_v34 = vmul.f32 %v12416_v12, %v1577_v28  ;;  %v1671_v62 = vmul.f32 %v12422_v20, %v1572_v7  ;;  %v1638_v15 = vmul.f32 %v12374_v58, %v1539_v19  ;;  %v12634_v0 = vmul.f32 %v12437_v29, %v16288_v41 }
 0x1ab   : > { %v1580_v22 = vmul.f32 %v12624_v13, %v12234_v32  ;;  %v1584_v16 = vmul.f32 %v12624_v13, %v12246_v52  ;;  %2532 = vmatprep.subr.bf16.mxu1 %v10471_v14  ;;  %v1579_v60 = vmul.f32 %v12624_v13, %v12229_v39  ;;  %v1543_v19 = vmul.f32 %v12459_v47, %v16289_v45 }
 0x1ac   : > { %v1771_v55 = vadd.f32 %v12435_v37, %v1672_v17  ;;  %v1583_v31 = vmul.f32 %v12624_v13, %v12243_v27  ;;  %v1675_v32 = vmul.f32 %v12429_v3, %v1576_v26  ;;  %v1639_v52 = vmul.f32 %v12526_v40, %v1540_v25  ;;  %v10472_v27 = vld [vmem:[%s16233_s4 + $0x160] ss:$8 sps:$4 sm:$0xff]  }
 0x1ad   : > { %v1679_v53 = vmul.f32 %v12411_v9, %v1580_v22  ;;  %v1683_v57 = vmul.f32 %v12416_v12, %v1584_v16  ;;  %v1678_v21 = vmul.f32 %v12422_v20, %v1579_v60  ;;  %v12656_v39 = vadd.f32 %v12386_v56, %v1638_v15  ;;  %v10480_v22 = vld [vmem:[%s16233_s4 + $0x174] ss:$8 sps:$4 sm:$0xff]   ;;  %v10478_v60 = vld [vmem:[%s16233_s4 + $0x170] ss:$8 sps:$4 sm:$0xff]  }
 0x1ae   : > { %v1775_v47 = vadd.f32 %v12441_v51, %v1676_v34  ;;  %2533 = vmatpush1.bf16.msra.mxu1 %v10469_v49  ;;  %v1770_v59 = vadd.f32 %v12445_v11, %v1671_v62  ;;  %v1682_v35 = vmul.f32 %v12429_v3, %v1583_v31  ;;  %v1554_v28 = vmul.f32 %v12485_v63, %v16290_v33 }
 0x1af   : > { %v1778_v14 = vadd.f32 %v12435_v37, %v1679_v53  ;;  %v1782_v46 = vadd.f32 %v12441_v51, %v1683_v57  ;;  %2534 = vmatprep.subr.bf16.mxu1 %v10474_v54  ;;  %v1777_v7 = vadd.f32 %v12445_v11, %v1678_v21  ;;  %v1793_v17 = vpack.c.bf16 %v12656_v39, %v12453_v43  ;;  %v16308_v39 = vld [vmem:[#allocation19_spill] sm:$0xff] }
 0x1b0   : > { %v12671_v26 = vpop.eup %10521  ;;  %v1774_v61 = vadd.f32 %v12450_v2, %v1675_v32  ;;  %v1781_v25 = vadd.f32 %v12450_v2, %v1682_v35  ;;  %v1642_v8 = vmul.f32 %v12556_v1, %v1543_v19  ;;  %v1653_v34 = vmul.f32 %v12526_v40, %v1554_v28  ;;  %v16293_v28 = vld [vmem:[#allocation8_spill] sm:$0xff] }
 0x1b1   : > { %v1813_v49 = vpack.c.bf16 %v1778_v14, %v1771_v55  ;;  %v1817_v62 = vpack.c.bf16 %v1782_v46, %v1775_v47  ;;  %v1812_v15 = vpack.c.bf16 %v1777_v7, %v1770_v59  ;;  %v1587_v41 = vmul.f32 %v12671_v26, %v12263_v24  ;;  %v10483_v55 = vld [vmem:[%s16233_s4 + $0x184] ss:$8 sps:$4 sm:$0xff]  }
 0x1b2   : > { %2535 = vmatpush1.bf16.msra.mxu1 %v10472_v27  ;;  %v1816_v16 = vpack.c.bf16 %v1781_v25, %v1774_v61  ;;  %v1591_v54 = vmul.f32 %v12671_v26, %v12300_v48  ;;  %v1586_v45 = vmul.f32 %v12671_v26, %v12260_v18  ;;  %v1590_v19 = vmul.f32 %v12671_v26, %v12290_v5  ;;  %v16292_v47 = vld [vmem:[#allocation33_spill] sm:$0xff]  ;;  %v16294_v61 = vld [vmem:[#allocation32_spill] sm:$0xff] }
 0x1b3   : > { %2503 = vmatprep.mubr.bf16.mxu1 %v1813_v49  ;;  %2665 = vmatprep.mubr.bf16.mxu0 %v1817_v62  ;;  %v1686_v24 = vmul.f32 %v12411_v9, %v1587_v41  ;;  %v12696_v48 = vadd.f32 %v12551_v38, %v1646_v23  ;;  %v12699_v31 = vadd.f32 %v12551_v38, %v1653_v34  ;;  %v10489_v34 = vld [vmem:[%s16233_s4 + $0x1a4] ss:$8 sps:$4 sm:$0xff]   ;;  %v16295_v62 = vld [vmem:[#allocation7_spill] sm:$0xff] }
 0x1b4   : > { %2504 = vmatmul.mubr.bf16.gmra.mrb[12].mxu1 %v1812_v15  ;;  %2666 = vmatmul.mubr.bf16.gmra.mrb[12].mxu0 %v1816_v16  ;;  %v1690_v18 = vmul.f32 %v12416_v12, %v1591_v54  ;;  %v1685_v5 = vmul.f32 %v12422_v20, %v1586_v45  ;;  %v1689_v32 = vmul.f32 %v12429_v3, %v1590_v19  ;;  %v10481_v20 = vld [vmem:[%s16233_s4 + $0x180] ss:$8 sps:$4 sm:$0xff]   ;;  %v11252_v45 = vmov 0  }
 0x1b5   : > { %v1785_v9 = vadd.f32 %v12435_v37, %v1686_v24  ;;  %2536 = vmatprep.subr.bf16.mxu1 %v10480_v22  ;;  %v1635_v53 = vmul.f32 %v12556_v1, %v12621_v4  ;;  %v12710_v23 = vrot.slane %v12362_v36, %v1620_v42  ;;  %v1801_v57 = vpack.c.bf16 %v12699_v31, %v12696_v48  ;;  %v16291_v4 = vld [vmem:[#allocation29_spill] sm:$0xff]  ;;  %v16296_v41 = vld [vmem:[#allocation14_spill] sm:$0xff] }
 0x1b6   : > { %v1789_v12 = vadd.f32 %v12441_v51, %v1690_v18  ;;  %2537 = vmatpush1.bf16.msra.mxu1 %v10478_v60  ;;  %v1784_v3 = vadd.f32 %v12445_v11, %v1685_v5  ;;  %v1788_v37 = vadd.f32 %v12450_v2, %v1689_v32  ;;  %v1553_v44 = vmul.f32 %v12485_v63, %v16291_v4  ;;  %v10486_v51 = vld [vmem:[%s16233_s4 + $0x194] ss:$8 sps:$4 sm:$0xff]   ;;  %v10487_v5 = vld [vmem:[%s16233_s4 + $0x1a0] ss:$8 sps:$4 sm:$0xff]  }
 0x1b7   : > { %v1820_v21 = vpack.c.bf16 %v1785_v9, %v1785_v9  ;;  %2538 = vmatprep.subr.bf16.mxu1 %v10483_v55  ;;  %v1738_v36 = vadd.f32 %v12551_v38, %v1639_v52  ;;  %v1645_v42 = vmul.f32 %v12374_v58, %v12634_v0  ;;  %v1561_v27 = vmul.f32 %v12516_v10, %v16292_v47  ;;  %v16297_v55 = vld [vmem:[#allocation16_spill] sm:$0xff]  ;;  %v16298_v32 = vld [vmem:[#allocation31_spill] sm:$0xff]  ;;  %v16301_v47 = vld [vmem:[#allocation25_spill] sm:$0xff] }
 0x1b8   : > { %v1824_v11 = vpack.c.bf16 %v1789_v12, %v1789_v12  ;;  %v1731_v2 = vadd.f32 %v12551_v38, %v12617_v6  ;;  %v1741_v59 = vadd.f32 %v12710_v23, %v1642_v8  ;;  %v1652_v35 = vmul.f32 %v12374_v58, %v1553_v44  ;;  %v10484_v6 = vld [vmem:[%s16233_s4 + $0x190] ss:$8 sps:$4 sm:$0xff]   ;;  %v10492_v4 = vld [vmem:[%s16233_s4 + $0x1b4] ss:$8 sps:$4 sm:$0xff]  }
 0x1b9   : > { %2513 = vmatprep.mubr.bf16.mxu1 %v1820_v21  ;;  %v1819_v52 = vpack.c.bf16 %v1784_v3, %v1784_v3  ;;  %v12735_v33 = vadd.f32 %v12386_v56, %v1645_v42  ;;  %v1568_v14 = vmul.f32 %v12558_v30, %v16293_v28  ;;  %v1660_v0 = vmul.f32 %v12526_v40, %v1561_v27  ;;  %v16299_v3 = vld [vmem:[#allocation12_spill] sm:$0xff] }
 0x1ba   : > { %2675 = vmatprep.mubr.bf16.mxu0 %v1824_v11  ;;  %2539 = vmatpush1.bf16.msra.mxu1 %v10481_v20  ;;  %v1823_v46 = vpack.c.bf16 %v1788_v37, %v1788_v37  ;;  %v12744_v7 = vadd.f32 %v12386_v56, %v1652_v35  ;;  %v1560_v25 = vmul.f32 %v12516_v10, %v16294_v61  ;;  %v10495_v61 = vld [vmem:[%s16233_s4 + $0x1c4] ss:$8 sps:$4 sm:$0xff]  }
 0x1bb   : > { %v1794_v8 = vpack.c.bf16 %v1738_v36, %v1731_v2  ;;  %2540 = vmatprep.subr.bf16.mxu1 %v10486_v51  ;;  %v1667_v49 = vmul.f32 %v12526_v40, %v1568_v14  ;;  %v1567_v15 = vmul.f32 %v12558_v30, %v16295_v62  ;;  %v1575_v22 = vmul.f32 %v12593_v50, %v16296_v41  ;;  %v16300_v36 = vld [vmem:[#allocation15_spill] sm:$0xff]  ;;  %v16302_v14 = vld [vmem:[#allocation18_spill] sm:$0xff] }
 0x1bc   : > { %2514 = vmatmul.mubr.bf16.gmra.mrb[16].mxu1 %v1819_v52  ;;  %2676 = vmatmul.mubr.bf16.gmra.mrb[16].mxu0 %v1823_v46  ;;  %v1800_v16 = vpack.c.bf16 %v12744_v7, %v12735_v33  ;;  %v12759_v54 = vadd.f32 %v12551_v38, %v1660_v0  ;;  %v1659_v60 = vmul.f32 %v12374_v58, %v1560_v25 }
 0x1bd   : > { %2554 = vmatprep.mubr.bf16.mxu1 %v1794_v8  ;;  %2716 = vmatprep.mubr.bf16.mxu0 %v11252_v45  ;;  %v12764_v19 = vadd.f32 %v12551_v38, %v1667_v49  ;;  %v1666_v24 = vmul.f32 %v12374_v58, %v1567_v15  ;;  %v1582_v18 = vmul.f32 %v12624_v13, %v16297_v55  ;;  %v10493_v15 = vld [vmem:[%s16233_s4 + $0x1c0] ss:$8 sps:$4 sm:$0xff]   ;;  %v16304_v55 = vld [vmem:[#allocation11_spill] sm:$0xff] }
 0x1be   : > { %2541 = vmatpush1.bf16.msra.mxu1 %v10484_v6  ;;  %v1557_v9 = vmul.f32 %v12485_v63, %v16298_v32  ;;  %v12775_v12 = vadd.f32 %v12386_v56, %v1659_v60  ;;  %v1674_v20 = vmul.f32 %v12526_v40, %v1575_v22  ;;  %v1574_v37 = vmul.f32 %v12593_v50, %v16299_v3  ;;  %v16303_v22 = vld [vmem:[#allocation9_spill] sm:$0xff]  ;;  %v10498_v60 = vld [vmem:[%s16233_s4 + $0x1d4] ss:$8 sps:$4 sm:$0xff]  }
 0x1bf   : > { %2542 = vmatprep.subr.bf16.mxu1 %v10489_v34  ;;  %v1808_v44 = vpack.c.bf16 %v12764_v19, %v12759_v54  ;;  %v12786_v21 = vadd.f32 %v12386_v56, %v1666_v24  ;;  %v1681_v63 = vmul.f32 %v12526_v40, %v1582_v18  ;;  %v1581_v51 = vmul.f32 %v12624_v13, %v16300_v36  ;;  %v16305_v3 = vld [vmem:[#allocation17_spill] sm:$0xff] }
 0x1c0   : > { %v1734_v42 = vadd.f32 %v12710_v23, %v1635_v53  ;;  %v1550_v27 = vmul.f32 %v12437_v29, %v16301_v47  ;;  %v12795_v11 = vadd.f32 %v12551_v38, %v1674_v20  ;;  %v1673_v2 = vmul.f32 %v12374_v58, %v1574_v37  ;;  %v10490_v29 = vld [vmem:[%s16233_s4 + $0x1b0] ss:$8 sps:$4 sm:$0xff]   ;;  %v16306_v36 = vld [vmem:[#allocation13_spill] sm:$0xff] }
 0x1c1   : > { %v1807_v35 = vpack.c.bf16 %v12786_v21, %v12775_v12  ;;  %v12801_v52 = vadd.f32 %v12551_v38, %v1681_v63  ;;  %v1680_v28 = vmul.f32 %v12374_v58, %v1581_v51  ;;  %v1588_v0 = vmul.f32 %v12671_v26, %v16302_v14  ;;  %v10502_v47 = vld [vmem:[%s16233_s4 + $0x1f0] ss:$8 sps:$4 sm:$0xff]   ;;  %v1924_v19 = vld [vmem:[%s16309_s22] sm:$0x3] }
 0x1c2   : > { %2543 = vmatpush1.bf16.msra.mxu1 %v10487_v5  ;;  %v1797_v53 = vpack.c.bf16 %v1741_v59, %v1734_v42  ;;  %v1656_v46 = vmul.f32 %v12556_v1, %v1557_v9  ;;  %v12811_v6 = vadd.f32 %v12386_v56, %v1673_v2  ;;  %v1649_v34 = vmul.f32 %v12556_v1, %v1550_v27  ;;  %v10496_v5 = vld [vmem:[%s16233_s4 + $0x1d0] ss:$8 sps:$4 sm:$0xff]  }
 0x1c3   : > { %2544 = vmatprep.subr.bf16.mxu1 %v10492_v4  ;;  %v1815_v25 = vpack.c.bf16 %v12801_v52, %v12795_v11  ;;  %v1779_v8 = vadd.f32 %v12386_v56, %v1680_v28  ;;  %v1687_v59 = vmul.f32 %v12374_v58, %v1588_v0  ;;  %v1571_v58 = vmul.f32 %v12558_v30, %v16303_v22  ;;  %v10501_v30 = vld [vmem:[%s16233_s4 + $0x1e4] ss:$8 sps:$4 sm:$0xff]   ;;  %v10504_v4 = vld [vmem:[%s16233_s4 + $0x1f4] ss:$8 sps:$4 sm:$0xff]  }
 0x1c4   : > { %9353 = vmatmul.mubr.msk.bf16.vlgmr.msra.gmra.mrb[0].mxu0 %vm1209_vm0, %v1797_v53  ;;  %v1755_v41 = vadd.f32 %v12710_v23, %v1656_v46  ;;  %v1748_v24 = vadd.f32 %v12710_v23, %v1649_v34  ;;  %v1585_v37 = vmul.f32 %v12624_v13, %v16305_v3  ;;  %v1578_v51 = vmul.f32 %v12593_v50, %v16306_v36  ;;  %v16307_v2 = vld [vmem:[#allocation34_spill] sm:$0xff]  ;;  %v16310_v21 = vld [vmem:[#allocation36_spill] sm:$0xff] }
 0x1c5   : > { %2726 = vmatprep.mubr.bf16.mxu0 %v11252_v45  ;;  %v1814_v49 = vpack.c.bf16 %v1779_v8, %v12811_v6  ;;  %v1786_v62 = vadd.f32 %v12386_v56, %v1687_v59  ;;  %v1564_v56 = vmul.f32 %v12516_v10, %v16304_v55  ;;  %v1670_v32 = vmul.f32 %v12556_v1, %v1571_v58  ;;  %v10499_v10 = vld [vmem:[%s16233_s4 + $0x1e0] ss:$8 sps:$4 sm:$0xff]  }
 0x1c6   : > { %2545 = vmatpush1.bf16.msra.mxu1 %v10490_v29  ;;  %v1804_v18 = vpack.c.bf16 %v1755_v41, %v1748_v24  ;;  %v1684_v27 = vmul.f32 %v12556_v1, %v1585_v37  ;;  %v1677_v13 = vmul.f32 %v12556_v1, %v1578_v51  ;;  %v1592_v50 = vmul.f32 %v12671_v26, %v16307_v2  ;;  %v16311_v29 = vld [vmem:[#allocation35_spill] sm:$0xff] }
 0x1c7   : > { %2546 = vmatprep.subr.bf16.mxu1 %v10495_v61  ;;  %v1663_v9 = vmul.f32 %v12556_v1, %v1564_v56  ;;  %v1769_v20 = vadd.f32 %v12710_v23, %v1670_v32  ;;  %v12901_v46 = vrot.slane %v1924_v19, %v16311_v29 }
 0x1c8   : > { %v1783_v11 = vadd.f32 %v12710_v23, %v1684_v27  ;;  %v1776_v52 = vadd.f32 %v12710_v23, %v1677_v13  ;;  %v1691_v14 = vmul.f32 %v12556_v1, %v1592_v50  ;;  %v1589_v1 = vmul.f32 %v12671_v26, %v16308_v39 }
 0x1c9   : > { %v1762_v63 = vadd.f32 %v12710_v23, %v1663_v9 }
 0x1ca   : > { %2547 = vmatpush1.bf16.msra.mxu1 %v10493_v15  ;;  %v1818_v28 = vpack.c.bf16 %v1783_v11, %v1776_v52  ;;  %v1790_v0 = vadd.f32 %v12710_v23, %v1691_v14  ;;  %v1821_v23 = vpack.c.bf16 %v1786_v62, %v1786_v62 }
 0x1cb   : > { %2548 = vmatprep.subr.bf16.mxu1 %v10498_v60  ;;  %v1811_v42 = vpack.c.bf16 %v1769_v20, %v1762_v63 }
 0x1cc   : > { %9354 = vmatmul.mubr.msk.bf16.gmra.mrb[4].mxu0 %vm1209_vm0, %v1804_v18  ;;  %v1825_v43 = vpack.c.bf16 %v1790_v0, %v1790_v0 }
 0x1cd   : > { %2736 = vmatprep.mubr.bf16.mxu0 %v11252_v45 }
 0x1ce   : > { %2549 = vmatpush1.bf16.msra.mxu1 %v10496_v5 }
 0x1cf   : > { %2550 = vmatprep.subr.bf16.mxu1 %v10501_v30 }
 0x1d2   : > { %2551 = vmatpush1.bf16.msra.mxu1 %v10499_v10 }
 0x1d3   : > { %2552 = vmatprep.subr.bf16.mxu1 %v10504_v4 }
 0x1d4   : > { %9355 = vmatmul.mubr.msk.bf16.gmra.mrb[8].mxu0 %vm1209_vm0, %v1811_v42 }
 0x1d5   : > { %2746 = vmatprep.mubr.bf16.mxu0 %v11252_v45 }
 0x1d6   : > { %2553 = vmatpush1.bf16.msra.mxu1 %v10502_v47 }
 0x1d9   : > { %2555 = vmatmul.mubr.bf16.vlgmr.msra.gmra.mrb[0].mxu1 %v1793_v17  ;;  %v1688_v17 = vmul.f32 %v12526_v40, %v1589_v1 }
 0x1da   : > { %2564 = vmatprep.mubr.bf16.mxu1 %v1801_v57 }
 0x1db   : > { %v1787_v48 = vadd.f32 %v12551_v38, %v1688_v17 }
 0x1dc   : > { %9356 = vmatmul.mubr.msk.bf16.gmra.mrb[12].mxu0 %vm1209_vm0, %v1818_v28 }
 0x1dd   : > { %2756 = vmatprep.mubr.bf16.mxu0 %v11252_v45  ;;  %v1822_v31 = vpack.c.bf16 %v1787_v48, %v1787_v48 }
 0x1e1   : > { %2565 = vmatmul.mubr.bf16.gmra.mrb[4].mxu1 %v1800_v16 }
 0x1e2   : > { %2574 = vmatprep.mubr.bf16.mxu1 %v1808_v44 }
 0x1e4   : > { %9357 = vmatmul.mubr.msk.bf16.gmra.mrb[16].mxu0 %vm1209_vm0, %v1825_v43 }
 0x1e9   : > { %2575 = vmatmul.mubr.bf16.gmra.mrb[8].mxu1 %v1807_v35  ;;  %v12898_v35 = vrot.slane %v1924_v19, %v16310_v21 }
 0x1ea   : > { %2584 = vmatprep.mubr.bf16.mxu1 %v1815_v25 }
 0x1f1   : > { %2585 = vmatmul.mubr.bf16.gmra.mrb[12].mxu1 %v1814_v49 }
 0x1f2   : > { %2594 = vmatprep.mubr.bf16.mxu1 %v1822_v31 }
 0x1f9   : > { %2595 = vmatmul.mubr.bf16.gmra.mrb[16].mxu1 %v1821_v23 }
 0x297   : > { %v2718_v57 = vpop.f32.mrb[0].mxu0 }
 0x298   : > { %v2720_v33 = vpop.f32.mrb[1].mxu0 }
 0x299   : > { %v2722_v7 = vpop.f32.mrb[2].mxu0 }
 0x29a   : > { %v2724_v16 = vpop.f32.mrb[3].mxu0 }
 0x29f   : > { %v2728_v54 = vpop.f32.mrb[4].mxu0 }
 0x2a0   : > { %v2730_v26 = vpop.f32.mrb[5].mxu0 }
 0x2a1   : > { %v2732_v45 = vpop.f32.mrb[6].mxu0 }
 0x2a2   : > { %v2734_v40 = vpop.f32.mrb[7].mxu0 }
 0x2a7   : > { %v2738_v12 = vpop.f32.mrb[8].mxu0 }
 0x2a8   : > { %v2740_v44 = vpop.f32.mrb[9].mxu0 }
 0x2a9   : > { %v2742_v38 = vpop.f32.mrb[10].mxu0 }
 0x2aa   : > { %v2744_v53 = vpop.f32.mrb[11].mxu0 }
 0x2ac   : > { %v2556_v6 = vpop.f32.mrb[0].mxu1 }
 0x2ad   : > { %v10169_v61 = vadd.f32 %v2556_v6, %v12898_v35  ;;  %v2558_v25 = vpop.f32.mrb[1].mxu1 }
 0x2ae   : > { %v10171_v8 = vadd.f32 %v2558_v25, %v12901_v46  ;;  %v2560_v59 = vpop.f32.mrb[2].mxu1 }
 0x2af   : > { %v12905_v34 = vadd.f32 %v10169_v61, %v2718_v57  ;;  %v2748_v49 = vpop.f32.mrb[12].mxu0  ;;  %v10173_v62 = vadd.f32 %v2560_v59, %v12898_v35  ;;  %v2562_v15 = vpop.f32.mrb[3].mxu1 }
 0x2b0   : > { %v12908_v41 = vadd.f32 %v10171_v8, %v2720_v33  ;;  %v2750_v22 = vpop.f32.mrb[13].mxu0  ;;  %v10175_v58 = vadd.f32 %v2562_v15, %v12901_v46 }
 0x2b1   : > { %v12911_v60 = vadd.f32 %v10173_v62, %v2722_v7  ;;  %v2752_v24 = vpop.f32.mrb[14].mxu0 }
 0x2b2   : > { %v12913_v55 = vadd.f32 %v10175_v58, %v2724_v16  ;;  %v2754_v56 = vpop.f32.mrb[15].mxu0  ;;  %v2768_v18 = vsel %vm2767_vm1, %v12908_v41, 0.0 }
 0x2b3   : > { %v2769_v5 = vadd.f32 %v12905_v34, %v2768_v18 }
 0x2b4   : > { %v2566_v32 = vpop.f32.mrb[4].mxu1  ;;  %v2772_v30 = vsel %vm2767_vm1, %v12913_v55, 0.0 }
 0x2b5   : > { %v10177_v9 = vadd.f32 %v2566_v32, %v12898_v35  ;;  %2770 = vadd.xlane.f32.xlu0 %v2769_v5  ;;  %v2568_v10 = vpop.f32.mrb[5].mxu1  ;;  %v2773_v20 = vadd.f32 %v12911_v60, %v2772_v30 }
 0x2b6   : > { %v10179_v3 = vadd.f32 %v2568_v10, %v12901_v46  ;;  %v2570_v37 = vpop.f32.mrb[6].mxu1 }
 0x2b7   : > { %v12923_v4 = vadd.f32 %v10177_v9, %v2728_v54  ;;  %v2758_v63 = vpop.f32.mrb[16].mxu0  ;;  %v10181_v36 = vadd.f32 %v2570_v37, %v12898_v35  ;;  %2774 = vadd.xlane.f32.xlu1 %v2773_v20  ;;  %v2572_v51 = vpop.f32.mrb[7].mxu1 }
 0x2b8   : > { %v12926_v42 = vadd.f32 %v10179_v3, %v2730_v26  ;;  %v2760_v47 = vpop.f32.mrb[17].mxu0  ;;  %v10183_v27 = vadd.f32 %v2572_v51, %v12901_v46 }
 0x2b9   : > { %v12929_v13 = vadd.f32 %v10181_v36, %v2732_v45  ;;  %v2762_v11 = vpop.f32.mrb[18].mxu0 }
 0x2ba   : > { %v12931_v2 = vadd.f32 %v10183_v27, %v2734_v40  ;;  %v2763_v50 = vpop.f32.mrb[19].mxu0  ;;  %v2776_v52 = vsel %vm2767_vm1, %v12926_v42, 0.0 }
 0x2bb   : > { %v2777_v28 = vadd.f32 %v12923_v4, %v2776_v52 }
 0x2bc   : > { %v2576_v14 = vpop.f32.mrb[8].mxu1  ;;  %v2780_v0 = vsel %vm2767_vm1, %v12931_v2, 0.0 }
 0x2bd   : > { %v10185_v43 = vadd.f32 %v2576_v14, %v12898_v35  ;;  %2778 = vadd.xlane.f32.xlu0 %v2777_v28  ;;  %v2578_v39 = vpop.f32.mrb[9].mxu1  ;;  %v2781_v1 = vadd.f32 %v12929_v13, %v2780_v0 }
 0x2be   : > { %v10187_v17 = vadd.f32 %v2578_v39, %v12901_v46  ;;  %v2580_v48 = vpop.f32.mrb[10].mxu1 }
 0x2bf   : > { %v12941_v31 = vadd.f32 %v10185_v43, %v2738_v12  ;;  %v10189_v23 = vadd.f32 %v2580_v48, %v12898_v35  ;;  %2782 = vadd.xlane.f32.xlu1 %v2781_v1  ;;  %v2582_v57 = vpop.f32.mrb[11].mxu1 }
 0x2c0   : > { %v12944_v33 = vadd.f32 %v10187_v17, %v2740_v44  ;;  %v10191_v7 = vadd.f32 %v2582_v57, %v12901_v46 }
 0x2c1   : > { %v12947_v16 = vadd.f32 %v10189_v23, %v2742_v38 }
 0x2c2   : > { %v12949_v54 = vadd.f32 %v10191_v7, %v2744_v53  ;;  %v2784_v26 = vsel %vm2767_vm1, %v12944_v33, 0.0 }
 0x2c3   : > { %v2785_v45 = vadd.f32 %v12941_v31, %v2784_v26 }
 0x2c4   : > { %v2586_v40 = vpop.f32.mrb[12].mxu1  ;;  %v2788_v19 = vsel %vm2767_vm1, %v12949_v54, 0.0 }
 0x2c5   : > { %v10193_v12 = vadd.f32 %v2586_v40, %v12898_v35  ;;  %2786 = vadd.xlane.f32.xlu0 %v2785_v45  ;;  %v2588_v44 = vpop.f32.mrb[13].mxu1  ;;  %v2789_v6 = vadd.f32 %v12947_v16, %v2788_v19 }
 0x2c6   : > { %v10195_v38 = vadd.f32 %v2588_v44, %v12901_v46  ;;  %v2590_v61 = vpop.f32.mrb[14].mxu1 }
 0x2c7   : > { %v12959_v53 = vadd.f32 %v10193_v12, %v2748_v49  ;;  %v10197_v25 = vadd.f32 %v2590_v61, %v12898_v35  ;;  %2790 = vadd.xlane.f32.xlu1 %v2789_v6  ;;  %v2592_v8 = vpop.f32.mrb[15].mxu1 }
 0x2c8   : > { %v12962_v59 = vadd.f32 %v10195_v38, %v2750_v22  ;;  %v10199_v62 = vadd.f32 %v2592_v8, %v12901_v46 }
 0x2c9   : > { %v12965_v15 = vadd.f32 %v10197_v25, %v2752_v24 }
 0x2ca   : > { %v12967_v58 = vadd.f32 %v10199_v62, %v2754_v56  ;;  %v2792_v18 = vsel %vm2767_vm1, %v12962_v59, 0.0 }
 0x2cb   : > { %v2793_v5 = vadd.f32 %v12959_v53, %v2792_v18 }
 0x2cc   : > { %v2596_v32 = vpop.f32.mrb[16].mxu1  ;;  %v2796_v49 = vsel %vm2767_vm1, %v12967_v58, 0.0 }
 0x2cd   : > { %v10201_v30 = vadd.f32 %v2596_v32, %v12898_v35  ;;  %2794 = vadd.xlane.f32.xlu0 %v2793_v5  ;;  %v2598_v22 = vpop.f32.mrb[17].mxu1  ;;  %v2797_v9 = vadd.f32 %v12965_v15, %v2796_v49 }
 0x2ce   : > { %v10203_v24 = vadd.f32 %v2598_v22, %v12901_v46  ;;  %v2600_v10 = vpop.f32.mrb[18].mxu1 }
 0x2cf   : > { %v12977_v56 = vadd.f32 %v10201_v30, %v2758_v63  ;;  %2798 = vadd.xlane.f32.xlu1 %v2797_v9  ;;  %v2601_v20 = vpop.f32.mrb[19].mxu1 }
 0x2d0   : > { %v12979_v3 = vadd.f32 %v10203_v24, %v2760_v47 }
 0x2d2   : > { %v2800_v37 = vsel %vm2767_vm1, %v12979_v3, 0.0 }
 0x2d3   : > { %v2801_v36 = vadd.f32 %v12977_v56, %v2800_v37 }
 0x2d5   : > { %2802 = vadd.xlane.f32.xlu0 %v2801_v36 }
 0x342   : > { %v2771_v35 = vpop.xlane.xlu0 %2770 }
 0x343   : > { %v2805_v51 = vmul.f32 0.0052083335, %v2771_v35 }
 0x344   : > { %v2775_v27 = vpop.xlane.xlu1 %2774 }
 0x345   : > { %v12985_v11 = vsub.f32 %v12905_v34, %v2805_v51  ;;  %v12988_v46 = vsub.f32 %v12908_v41, %v2805_v51  ;;  %v2806_v63 = vmul.f32 0.0052083335, %v2775_v27 }
 0x347   : > { %v12991_v50 = vsub.f32 %v12911_v60, %v2806_v63  ;;  %v12994_v47 = vsub.f32 %v12913_v55, %v2806_v63  ;;  %v2832_v52 = vmul.f32 %v12985_v11, %v12985_v11  ;;  %v2833_v28 = vmul.f32 %v12988_v46, %v12988_v46 }
 0x349   : > { %v2850_v14 = vsel %vm2767_vm1, %v2833_v28, 0.0  ;;  %v2834_v34 = vmul.f32 %v12991_v50, %v12991_v50  ;;  %v2835_v41 = vmul.f32 %v12994_v47, %v12994_v47 }
 0x34a   : > { %v2779_v0 = vpop.xlane.xlu0 %2778  ;;  %v2851_v60 = vadd.f32 %v2850_v14, %v2832_v52 }
 0x34b   : > { %v2807_v43 = vmul.f32 0.0052083335, %v2779_v0  ;;  %v2854_v55 = vsel %vm2767_vm1, %v2835_v41, 0.0 }
 0x34c   : > { %v2783_v39 = vpop.xlane.xlu1 %2782  ;;  %2852 = vadd.xlane.f32.xlu1 %v2851_v60  ;;  %v2855_v1 = vadd.f32 %v2854_v55, %v2834_v34 }
 0x34d   : > { %v13007_v17 = vsub.f32 %v12923_v4, %v2807_v43  ;;  %v13010_v48 = vsub.f32 %v12926_v42, %v2807_v43  ;;  %v2808_v23 = vmul.f32 0.0052083335, %v2783_v39 }
 0x34e   : > { %2856 = vadd.xlane.f32.xlu0 %v2855_v1 }
 0x34f   : > { %v13013_v57 = vsub.f32 %v12929_v13, %v2808_v23  ;;  %v13016_v7 = vsub.f32 %v12931_v2, %v2808_v23  ;;  %v2836_v26 = vmul.f32 %v13007_v17, %v13007_v17  ;;  %v2837_v45 = vmul.f32 %v13010_v48, %v13010_v48 }
 0x351   : > { %v2858_v4 = vsel %vm2767_vm1, %v2837_v45, 0.0  ;;  %v2838_v42 = vmul.f32 %v13013_v57, %v13013_v57  ;;  %v2839_v40 = vmul.f32 %v13016_v7, %v13016_v7 }
 0x352   : > { %v2787_v19 = vpop.xlane.xlu0 %2786  ;;  %v2859_v13 = vadd.f32 %v2858_v4, %v2836_v26 }
 0x353   : > { %v2809_v12 = vmul.f32 0.0052083335, %v2787_v19  ;;  %v2862_v2 = vsel %vm2767_vm1, %v2839_v40, 0.0 }
 0x354   : > { %v2791_v44 = vpop.xlane.xlu1 %2790  ;;  %2860 = vadd.xlane.f32.xlu1 %v2859_v13  ;;  %v2863_v6 = vadd.f32 %v2862_v2, %v2838_v42  ;;  %v2765_v42 = vld [vmem:[%s16312_s3] sm:$0x3] }
 0x355   : > { %v13029_v38 = vsub.f32 %v12941_v31, %v2809_v12  ;;  %v13032_v61 = vsub.f32 %v12944_v33, %v2809_v12  ;;  %v2810_v25 = vmul.f32 0.0052083335, %v2791_v44  ;;  %v2766_v13 = vld [vmem:[%s16313_s1] sm:$0x3]  ;;  %v13090_v2 = vrot.slane %v2765_v42, %v16310_v21 }
 0x356   : > { %2864 = vadd.xlane.f32.xlu0 %v2863_v6  ;;  %v13093_v44 = vrot.slane %v2765_v42, %v16311_v29 }
 0x357   : > { %v13035_v8 = vsub.f32 %v12947_v16, %v2810_v25  ;;  %v13038_v62 = vsub.f32 %v12949_v54, %v2810_v25  ;;  %v2840_v18 = vmul.f32 %v13029_v38, %v13029_v38  ;;  %v2841_v5 = vmul.f32 %v13032_v61, %v13032_v61 }
 0x358   : > { %v13096_v25 = vrot.slane %v2766_v13, %v16310_v21 }
 0x359   : > { %v2866_v31 = vsel %vm2767_vm1, %v2841_v5, 0.0  ;;  %v2842_v33 = vmul.f32 %v13035_v8, %v13035_v8  ;;  %v2843_v32 = vmul.f32 %v13038_v62, %v13038_v62 }
 0x35a   : > { %v2795_v49 = vpop.xlane.xlu0 %2794  ;;  %v2867_v16 = vadd.f32 %v2866_v31, %v2840_v18  ;;  %v13099_v18 = vrot.slane %v2766_v13, %v16311_v29  ;;  %v2989_v29 = vld [vmem:[%s16314_s8] sm:$0xff]  ;;  %v2996_v13 = vld [vmem:[%s16314_s8 + $0x38] sm:$0xff] }
 0x35b   : > { %v2811_v30 = vmul.f32 0.0052083335, %v2795_v49  ;;  %v2870_v54 = vsel %vm2767_vm1, %v2843_v32, 0.0 }
 0x35c   : > { %2868 = vadd.xlane.f32.xlu1 %v2867_v16  ;;  %v2799_v22 = vpop.xlane.xlu1 %2798  ;;  %v2871_v9 = vadd.f32 %v2870_v54, %v2842_v33 }
 0x35d   : > { %v13051_v24 = vsub.f32 %v12959_v53, %v2811_v30  ;;  %v13054_v10 = vsub.f32 %v12962_v59, %v2811_v30  ;;  %v2812_v20 = vmul.f32 0.0052083335, %v2799_v22 }
 0x35e   : > { %2872 = vadd.xlane.f32.xlu0 %v2871_v9 }
 0x35f   : > { %v13057_v37 = vsub.f32 %v12965_v15, %v2812_v20  ;;  %v13060_v36 = vsub.f32 %v12967_v58, %v2812_v20  ;;  %v2844_v35 = vmul.f32 %v13051_v24, %v13051_v24  ;;  %v2845_v51 = vmul.f32 %v13054_v10, %v13054_v10 }
 0x361   : > { %v2874_v53 = vsel %vm2767_vm1, %v2845_v51, 0.0  ;;  %v2846_v59 = vmul.f32 %v13057_v37, %v13057_v37  ;;  %v2847_v27 = vmul.f32 %v13060_v36, %v13060_v36 }
 0x362   : > { %v2803_v63 = vpop.xlane.xlu0 %2802  ;;  %v2875_v15 = vadd.f32 %v2874_v53, %v2844_v35  ;;  %v2992_v53 = vld [vmem:[%s16314_s8 + $0x18] sm:$0xff] }
 0x363   : > { %v2813_v52 = vmul.f32 0.0052083335, %v2803_v63  ;;  %v2878_v58 = vsel %vm2767_vm1, %v2847_v27, 0.0 }
 0x364   : > { %2876 = vadd.xlane.f32.xlu1 %v2875_v15  ;;  %v2879_v28 = vadd.f32 %v2878_v58, %v2846_v59 }
 0x365   : > { %v13073_v14 = vsub.f32 %v12977_v56, %v2813_v52  ;;  %v13076_v34 = vsub.f32 %v12979_v3, %v2813_v52 }
 0x366   : > { %2880 = vadd.xlane.f32.xlu0 %v2879_v28 }
 0x367   : > { %v2848_v41 = vmul.f32 %v13073_v14, %v13073_v14  ;;  %v2849_v0 = vmul.f32 %v13076_v34, %v13076_v34 }
 0x369   : > { %v2882_v60 = vsel %vm2767_vm1, %v2849_v0, 0.0 }
 0x36a   : > { %v2883_v43 = vadd.f32 %v2882_v60, %v2848_v41 }
 0x36c   : > { %2884 = vadd.xlane.f32.xlu1 %v2883_v43 }
 0x3d9   : > { %v2853_v55 = vpop.xlane.xlu1 %2852 }
 0x3da   : > { %v2886_v39 = vmul.f32 0.0052083335, %v2853_v55 }
 0x3db   : > { %v2857_v1 = vpop.xlane.xlu0 %2856 }
 0x3dc   : > { %v2895_v23 = vadd.f32 1e-05, %v2886_v39  ;;  %v2887_v56 = vmul.f32 0.0052083335, %v2857_v1 }
 0x3de   : > { %10523 = vrsqrt.f32 %v2895_v23  ;;  %v2896_v26 = vadd.f32 1e-05, %v2887_v56 }
 0x3e0   : > { %10525 = vrsqrt.f32 %v2896_v26 }
 0x3e1   : > { %v2861_v3 = vpop.xlane.xlu1 %2860 }
 0x3e2   : > { %v2888_v45 = vmul.f32 0.0052083335, %v2861_v3 }
 0x3e3   : > { %v2865_v4 = vpop.xlane.xlu0 %2864 }
 0x3e4   : > { %v2897_v40 = vadd.f32 1e-05, %v2888_v45  ;;  %v2889_v19 = vmul.f32 0.0052083335, %v2865_v4 }
 0x3e6   : > { %10527 = vrsqrt.f32 %v2897_v40  ;;  %v2898_v12 = vadd.f32 1e-05, %v2889_v19 }
 0x3e8   : > { %v10524_v6 = vpop.eup %10523  ;;  %10529 = vrsqrt.f32 %v2898_v12 }
 0x3e9   : > { %v2913_v5 = vmul.f32 %v10524_v6, %v12985_v11  ;;  %v2914_v31 = vmul.f32 %v10524_v6, %v12988_v46  ;;  %v2869_v33 = vpop.xlane.xlu1 %2868  ;;  %v2990_v11 = vld [vmem:[%s16314_s8 + $0x8] sm:$0xff] }
 0x3ea   : > { %v10526_v32 = vpop.eup %10525  ;;  %v2890_v49 = vmul.f32 0.0052083335, %v2869_v33 }
 0x3eb   : > { %v2942_v16 = vmul.f32 %v13090_v2, %v2913_v5  ;;  %v2943_v30 = vmul.f32 %v13093_v44, %v2914_v31  ;;  %v2915_v54 = vmul.f32 %v10526_v32, %v12991_v50  ;;  %v2916_v22 = vmul.f32 %v10526_v32, %v12994_v47  ;;  %v2873_v21 = vpop.xlane.xlu0 %2872  ;;  %v2991_v47 = vld [vmem:[%s16314_s8 + $0x10] sm:$0xff] }
 0x3ec   : > { %v2899_v46 = vadd.f32 1e-05, %v2890_v49  ;;  %v2891_v9 = vmul.f32 0.0052083335, %v2873_v21 }
 0x3ed   : > { %v2971_v20 = vadd.f32 %v13096_v25, %v2942_v16  ;;  %v2972_v35 = vadd.f32 %v13099_v18, %v2943_v30  ;;  %v2944_v51 = vmul.f32 %v13090_v2, %v2915_v54  ;;  %v2945_v50 = vmul.f32 %v13093_v44, %v2916_v22 }
 0x3ee   : > { %10531 = vrsqrt.f32 %v2899_v46  ;;  %v2900_v59 = vadd.f32 1e-05, %v2891_v9 }
 0x3ef   : > { %v3007_v27 = vadd.f32 %v2989_v29, %v2971_v20  ;;  %v3008_v63 = vadd.f32 %v2990_v11, %v2972_v35  ;;  %v2973_v15 = vadd.f32 %v13096_v25, %v2944_v51  ;;  %v2974_v52 = vadd.f32 %v13099_v18, %v2945_v50 }
 0x3f0   : > { %v10528_v58 = vpop.eup %10527  ;;  %10533 = vrsqrt.f32 %v2900_v59 }
 0x3f1   : > { %3025 = vst [vmem:[#allocation2] sm:$0xff] %v3007_v27  ;;  %3026 = vst.msk [vmem:[#allocation2 + $0x8] sm:$0xff] %vm2767_vm1, %v3008_v63  ;;  %v3009_v28 = vadd.f32 %v2991_v47, %v2973_v15  ;;  %v3010_v41 = vadd.f32 %v2992_v53, %v2974_v52  ;;  %v2917_v0 = vmul.f32 %v10528_v58, %v13007_v17  ;;  %v2877_v43 = vpop.xlane.xlu1 %2876  ;;  %v2993_v17 = vld [vmem:[%s16314_s8 + $0x20] sm:$0xff] }
 0x3f2   : > { %v2918_v60 = vmul.f32 %v10528_v58, %v13010_v48  ;;  %v10530_v55 = vpop.eup %10529  ;;  %v2892_v39 = vmul.f32 0.0052083335, %v2877_v43  ;;  %v2994_v48 = vld [vmem:[%s16314_s8 + $0x28] sm:$0xff] }
 0x3f3   : > { %3027 = vst [vmem:[#allocation2 + $0x10] sm:$0xff] %v3009_v28  ;;  %3028 = vst.msk [vmem:[#allocation2 + $0x18] sm:$0xff] %vm2767_vm1, %v3010_v41  ;;  %v2946_v1 = vmul.f32 %v13090_v2, %v2917_v0  ;;  %v2919_v56 = vmul.f32 %v10530_v55, %v13013_v57  ;;  %v2920_v26 = vmul.f32 %v10530_v55, %v13016_v7  ;;  %v2881_v3 = vpop.xlane.xlu0 %2880  ;;  %v2995_v7 = vld [vmem:[%s16314_s8 + $0x30] sm:$0xff] }
 0x3f4   : > { %v2947_v23 = vmul.f32 %v13093_v44, %v2918_v60  ;;  %v2901_v45 = vadd.f32 1e-05, %v2892_v39  ;;  %v2893_v4 = vmul.f32 0.0052083335, %v2881_v3 }
 0x3f5   : > { %v2975_v42 = vadd.f32 %v13096_v25, %v2946_v1  ;;  %v2948_v19 = vmul.f32 %v13090_v2, %v2919_v56  ;;  %v2949_v57 = vmul.f32 %v13093_v44, %v2920_v26 }
 0x3f6   : > { %v2976_v40 = vadd.f32 %v13099_v18, %v2947_v23  ;;  %10535 = vrsqrt.f32 %v2901_v45  ;;  %v2902_v12 = vadd.f32 1e-05, %v2893_v4  ;;  %v3001_v23 = vld [vmem:[%s16314_s8 + $0x60] sm:$0xff] }
 0x3f7   : > { %v3011_v6 = vadd.f32 %v2993_v17, %v2975_v42  ;;  %v2977_v31 = vadd.f32 %v13096_v25, %v2948_v19  ;;  %v2978_v33 = vadd.f32 %v13099_v18, %v2949_v57 }
 0x3f8   : > { %v3012_v5 = vadd.f32 %v2994_v48, %v2976_v40  ;;  %v10532_v32 = vpop.eup %10531  ;;  %10537 = vrsqrt.f32 %v2902_v12 }
 0x3f9   : > { %3029 = vst [vmem:[#allocation2 + $0x20] sm:$0xff] %v3011_v6  ;;  %v3013_v49 = vadd.f32 %v2995_v7, %v2977_v31  ;;  %v3014_v16 = vadd.f32 %v2996_v13, %v2978_v33  ;;  %v2921_v30 = vmul.f32 %v10532_v32, %v13029_v38  ;;  %v2922_v54 = vmul.f32 %v10532_v32, %v13032_v61  ;;  %v2885_v22 = vpop.xlane.xlu1 %2884  ;;  %v2997_v38 = vld [vmem:[%s16314_s8 + $0x40] sm:$0xff]  ;;  %v2998_v61 = vld [vmem:[%s16314_s8 + $0x48] sm:$0xff] }
 0x3fa   : > { %3030 = vst.msk [vmem:[#allocation2 + $0x28] sm:$0xff] %vm2767_vm1, %v3012_v5  ;;  %v10534_v21 = vpop.eup %10533  ;;  %v2894_v29 = vmul.f32 0.0052083335, %v2885_v22  ;;  %v3005_v6 = vld [vmem:[%s16314_s8 + $0x80] sm:$0xff]  ;;  %v3006_v5 = vld [vmem:[%s16314_s8 + $0x88] sm:$0xff] }
 0x3fb   : > { %3031 = vst [vmem:[#allocation2 + $0x30] sm:$0xff] %v3013_v49  ;;  %3032 = vst.msk [vmem:[#allocation2 + $0x38] sm:$0xff] %vm2767_vm1, %v3014_v16  ;;  %v2950_v11 = vmul.f32 %v13090_v2, %v2921_v30  ;;  %v2951_v46 = vmul.f32 %v13093_v44, %v2922_v54  ;;  %v2923_v9 = vmul.f32 %v10534_v21, %v13035_v8  ;;  %v2999_v8 = vld [vmem:[%s16314_s8 + $0x50] sm:$0xff] }
 0x3fc   : > { %v2924_v20 = vmul.f32 %v10534_v21, %v13038_v62  ;;  %v2903_v35 = vadd.f32 1e-05, %v2894_v29  ;;  %v3000_v62 = vld [vmem:[%s16314_s8 + $0x58] sm:$0xff] }
 0x3fd   : > { %v2979_v51 = vadd.f32 %v13096_v25, %v2950_v11  ;;  %v2980_v50 = vadd.f32 %v13099_v18, %v2951_v46  ;;  %v2952_v47 = vmul.f32 %v13090_v2, %v2923_v9 }
 0x3fe   : > { %v2953_v53 = vmul.f32 %v13093_v44, %v2924_v20  ;;  %10539 = vrsqrt.f32 %v2903_v35 }
 0x3ff   : > { %v3015_v59 = vadd.f32 %v2997_v38, %v2979_v51  ;;  %v3016_v27 = vadd.f32 %v2998_v61, %v2980_v50  ;;  %v2981_v63 = vadd.f32 %v13096_v25, %v2952_v47 }
 0x400   : > { %v2982_v15 = vadd.f32 %v13099_v18, %v2953_v53  ;;  %v10536_v52 = vpop.eup %10535 }
 0x401   : > { %3033 = vst [vmem:[#allocation2 + $0x40] sm:$0xff] %v3015_v59  ;;  %3034 = vst.msk [vmem:[#allocation2 + $0x48] sm:$0xff] %vm2767_vm1, %v3016_v27  ;;  %v3017_v58 = vadd.f32 %v2999_v8, %v2981_v63  ;;  %v2925_v41 = vmul.f32 %v10536_v52, %v13051_v24  ;;  %v2926_v0 = vmul.f32 %v10536_v52, %v13054_v10  ;;  %v3002_v24 = vld [vmem:[%s16314_s8 + $0x68] sm:$0xff] }
 0x402   : > { %v3018_v28 = vadd.f32 %v3000_v62, %v2982_v15  ;;  %v10538_v60 = vpop.eup %10537 }
 0x403   : > { %3035 = vst [vmem:[#allocation2 + $0x50] sm:$0xff] %v3017_v58  ;;  %v2954_v43 = vmul.f32 %v13090_v2, %v2925_v41  ;;  %v2955_v55 = vmul.f32 %v13093_v44, %v2926_v0  ;;  %v2927_v39 = vmul.f32 %v10538_v60, %v13057_v37  ;;  %v2928_v1 = vmul.f32 %v10538_v60, %v13060_v36  ;;  %v3003_v37 = vld [vmem:[%s16314_s8 + $0x70] sm:$0xff]  ;;  %v3004_v36 = vld [vmem:[%s16314_s8 + $0x78] sm:$0xff] }
 0x404   : > { %3036 = vst.msk [vmem:[#allocation2 + $0x58] sm:$0xff] %vm2767_vm1, %v3018_v28 }
 0x405   : > { %v2983_v10 = vadd.f32 %v13096_v25, %v2954_v43  ;;  %v2984_v56 = vadd.f32 %v13099_v18, %v2955_v55  ;;  %v2956_v26 = vmul.f32 %v13090_v2, %v2927_v39  ;;  %v2957_v3 = vmul.f32 %v13093_v44, %v2928_v1 }
 0x407   : > { %v3019_v17 = vadd.f32 %v3001_v23, %v2983_v10  ;;  %v3020_v48 = vadd.f32 %v3002_v24, %v2984_v56  ;;  %v2985_v45 = vadd.f32 %v13096_v25, %v2956_v26  ;;  %v2986_v4 = vadd.f32 %v13099_v18, %v2957_v3 }
 0x408   : > { %v10540_v42 = vpop.eup %10539 }
 0x409   : > { %3037 = vst [vmem:[#allocation2 + $0x60] sm:$0xff] %v3019_v17  ;;  %3038 = vst.msk [vmem:[#allocation2 + $0x68] sm:$0xff] %vm2767_vm1, %v3020_v48  ;;  %v3021_v40 = vadd.f32 %v3003_v37, %v2985_v45  ;;  %v3022_v19 = vadd.f32 %v3004_v36, %v2986_v4  ;;  %v2929_v57 = vmul.f32 %v10540_v42, %v13073_v14 }
 0x40a   : > { %v2930_v7 = vmul.f32 %v10540_v42, %v13076_v34 }
 0x40b   : > { %3039 = vst [vmem:[#allocation2 + $0x70] sm:$0xff] %v3021_v40  ;;  %3040 = vst.msk [vmem:[#allocation2 + $0x78] sm:$0xff] %vm2767_vm1, %v3022_v19  ;;  %v2958_v13 = vmul.f32 %v13090_v2, %v2929_v57 }
 0x40c   : > { %v2959_v12 = vmul.f32 %v13093_v44, %v2930_v7 }
 0x40d   : > { %v2987_v31 = vadd.f32 %v13096_v25, %v2958_v13 }
 0x40e   : > { %v2988_v14 = vadd.f32 %v13099_v18, %v2959_v12 }
 0x40f   : > { %v3023_v34 = vadd.f32 %v3005_v6, %v2987_v31 }
 0x410   : > { %v3024_v33 = vadd.f32 %v3006_v5, %v2988_v14 }
 0x411   : > { %3041 = vst [vmem:[#allocation2 + $0x80] sm:$0xff] %v3023_v34 }
 0x412   : > { %3042 = vst.msk [vmem:[#allocation2 + $0x88] sm:$0xff] %vm2767_vm1, %v3024_v33 }
 0x413 PF: > { %v13218_v2 = vld [vmem:[#allocation2] sm:$0xff]  ;;  %v13220_v44 = vld [vmem:[#allocation2 + $0x8] sm:$0xff]  ;;  %vm3063_vm2 = vcmask 523264   ;;  %v13228_v25 = vld [vmem:[#allocation2 + $0x10] sm:$0xff]  ;;  %v16139_v1 = vmov 0   ;;  %s16318_s11 = sld [smem:[#allocation94_spill]]  ;;  %s16320_s12 = scalar_lea.vmem %s16071_s10, %s11411_s26 }
 0x414   : > { %v13222_v32 = vld [vmem:[#allocation2 + $0x20] sm:$0xff]  ;;  %v3064_v49 = vsel %vm3063_vm2, %v13220_v44, 0.0  ;;  %v13226_v16 = vld [vmem:[#allocation2 + $0x28] sm:$0xff]  ;;  %v13230_v18 = vld [vmem:[#allocation2 + $0x18] sm:$0xff]  ;;  %3406 = vmatprep.subr.bf16.mxu0 %v16139_v1  ;;  %3574 = vmatprep.subr.bf16.mxu1 %v16139_v1  ;;  %vm11255_vm3 = vmmov 0   ;;  %vm4078_vm4 = vcmask 1043456  }
 0x415   : > { %v3065_v30 = vadd.f32 %v3064_v49, %v13218_v2  ;;  %v3072_v54 = vsel %vm3063_vm2, %v13226_v16, 0.0  ;;  %v3068_v22 = vsel %vm3063_vm2, %v13230_v18, 0.0  ;;  %v13237_v21 = vld [vmem:[#allocation2 + $0x30] sm:$0xff]  ;;  %v13239_v29 = vld [vmem:[#allocation2 + $0x38] sm:$0xff]  ;;  %v13244_v9 = vld [vmem:[#allocation2 + $0x48] sm:$0xff]  ;;  %s16325_s13 = sld [smem:[#allocation87_spill]] }
 0x416   : > { %v3073_v11 = vadd.f32 %v3072_v54, %v13222_v32  ;;  %v3076_v46 = vsel %vm3063_vm2, %v13239_v29, 0.0  ;;  %v13246_v20 = vld [vmem:[#allocation2 + $0x58] sm:$0xff]  ;;  %v3069_v38 = vadd.f32 %v3068_v22, %v13228_v25  ;;  %v13249_v61 = vld [vmem:[#allocation2 + $0x40] sm:$0xff]  ;;  %v3056_v35 = vld [vmem:[#allocation2 + $0x68] sm:$0xff]  ;;  %v3080_v50 = vsel %vm3063_vm2, %v13244_v9, 0.0  ;;  %p9923_p6 = scmp.ne.s32.totalorder %s11242_s6, 11 }
 0x417   : > { %3066 = vadd.xlane.f32.xlu0 %v3065_v30  ;;  %v3077_v51 = vadd.f32 %v3076_v46, %v13237_v21  ;;  %v13254_v47 = vld [vmem:[#allocation2 + $0x50] sm:$0xff]  ;;  %v3084_v53 = vsel %vm3063_vm2, %v13246_v20, 0.0  ;;  %v3088_v8 = vsel %vm3063_vm2, %v3056_v35, 0.0  ;;  %v3058_v62 = vld [vmem:[#allocation2 + $0x78] sm:$0xff]  ;;  %v13261_v15 = vld [vmem:[#allocation2 + $0x60] sm:$0xff]  ;;  %v3081_v52 = vadd.f32 %v3080_v50, %v13249_v61  ;;  %s16456_s7 = sld [smem:[#allocation99_spill]] (!%p9923_p6) }
 0x418   : > { %3074 = vadd.xlane.f32.xlu1 %v3073_v11  ;;  %v3092_v27 = vsel %vm3063_vm2, %v3058_v62, 0.0  ;;  %v13264_v58 = vld [vmem:[#allocation2 + $0x70] sm:$0xff]  ;;  %v3085_v28 = vadd.f32 %v3084_v53, %v13254_v47  ;;  %v13267_v41 = vld [vmem:[#allocation2 + $0x80] sm:$0xff]  ;;  %v3089_v0 = vadd.f32 %v3088_v8, %v13261_v15  ;;  %v10543_v23 = vld [vmem:[%s11424_s24 + $0x8] sm:$0xff]   ;;  %vm3953_vm5 = vcmask 588800  }
 0x419   : > { %v3060_v59 = vld [vmem:[#allocation2 + $0x88] sm:$0xff]  ;;  %v3093_v60 = vadd.f32 %v3092_v27, %v13264_v58  ;;  %v10541_v55 = vld [vmem:[%s11424_s24] sm:$0xff]   ;;  %v10545_v10 = vld [vmem:[%s11424_s24 + $0x10] sm:$0xff]   ;;  %s16319_s1 = scalar_lea.vmem %s16318_s11, %s11411_s26  ;;  %s16459_s11 = sld [smem:[#allocation100_spill]] (!%p9923_p6)  ;;  %vm8956_vm6 = vcmask (!%p9923_p6), 7168  }
 0x41a   : > { %v3096_v63 = vsel %vm3063_vm2, %v3060_v59, 0.0  ;;  %v10542_v39 = vld [vmem:[%s11429_s25] sm:$0xff]   ;;  %3407 = vmatpush1.bf16.msra.mxu0 %v10541_v55  ;;  %v10544_v24 = vld [vmem:[%s11429_s25 + $0x8] sm:$0xff]   ;;  %v10546_v56 = vld [vmem:[%s11429_s25 + $0x10] sm:$0xff]  }
 0x41b   : > { %3070 = vadd.xlane.f32.xlu0 %v3069_v38  ;;  %v3097_v43 = vadd.f32 %v3096_v63, %v13267_v41  ;;  %3575 = vmatpush1.bf16.msra.mxu1 %v10542_v39  ;;  %v10547_v26 = vld [vmem:[%s11424_s24 + $0x18] sm:$0xff]   ;;  %v10549_v37 = vld [vmem:[%s11424_s24 + $0x20] sm:$0xff]  }
 0x41c   : > { %3078 = vadd.xlane.f32.xlu1 %v3077_v51  ;;  %3408 = vmatprep.subr.bf16.mxu0 %v16139_v1  ;;  %v10548_v3 = vld [vmem:[%s11429_s25 + $0x18] sm:$0xff]   ;;  %v10550_v36 = vld [vmem:[%s11429_s25 + $0x20] sm:$0xff]  }
 0x41d   : > { %3576 = vmatprep.subr.bf16.mxu1 %v16139_v1 }
 0x41e   : > { %3409 = vmatpush1.bf16.msra.mxu0 %v10543_v23 }
 0x41f   : > { %3082 = vadd.xlane.f32.xlu0 %v3081_v52  ;;  %3577 = vmatpush1.bf16.msra.mxu1 %v10544_v24  ;;  %v11190_v24 = vld [vmem:[#allocation2 + $0x78] sm:$0xff] }
 0x420   : > { %3086 = vadd.xlane.f32.xlu1 %v3085_v28  ;;  %3410 = vmatprep.subr.bf16.mxu0 %v16139_v1 }
 0x421   : > { %3578 = vmatprep.subr.bf16.mxu1 %v16139_v1 }
 0x422   : > { %3411 = vmatpush1.bf16.msra.mxu0 %v10545_v10 }
 0x423   : > { %3090 = vadd.xlane.f32.xlu0 %v3089_v0  ;;  %3579 = vmatpush1.bf16.msra.mxu1 %v10546_v56 }
 0x424   : > { %3094 = vadd.xlane.f32.xlu1 %v3093_v60  ;;  %3412 = vmatprep.subr.bf16.mxu0 %v16139_v1 }
 0x425   : > { %3580 = vmatprep.subr.bf16.mxu1 %v16139_v1 }
 0x426   : > { %3413 = vmatpush1.bf16.msra.mxu0 %v10547_v26 }
 0x427   : > { %3098 = vadd.xlane.f32.xlu0 %v3097_v43  ;;  %3581 = vmatpush1.bf16.msra.mxu1 %v10548_v3  ;;  %v11189_v43 = vld [vmem:[#allocation2 + $0x68] sm:$0xff] }
 0x428   : > { %3414 = vmatprep.subr.bf16.mxu0 %v16139_v1  ;;  %3582 = vmatprep.subr.bf16.mxu1 %v16139_v1 }
 0x42a   : > { %3415 = vmatpush1.bf16.msra.mxu0 %v10549_v37 }
 0x42b   : > { %3583 = vmatpush1.bf16.msra.mxu1 %v10550_v36  ;;  %3416 = vmatprep.subr.bf16.mxu0 %v16139_v1 }
 0x42c   : > { %3584 = vmatprep.subr.bf16.mxu1 %v16139_v1 }
 0x4a4   : > { %v3067_v17 = vpop.xlane.xlu0 %3066 }
 0x4a5   : > { %v3101_v48 = vmul.f32 0.0052083335, %v3067_v17  ;;  %v3075_v45 = vpop.xlane.xlu1 %3074 }
 0x4a6   : > { %v3103_v4 = vmul.f32 0.0052083335, %v3075_v45 }
 0x4a7   : > { %v13295_v42 = vsub.f32 %v13218_v2, %v3101_v48  ;;  %v13298_v40 = vsub.f32 %v13220_v44, %v3101_v48 }
 0x4a8   : > { %v13301_v19 = vsub.f32 %v13222_v32, %v3103_v4  ;;  %v13304_v57 = vsub.f32 %v13226_v16, %v3103_v4  ;;  %v3071_v7 = vpop.xlane.xlu0 %3070  ;;  %v11191_v4 = vld [vmem:[#allocation2 + $0x88] sm:$0xff] }
 0x4a9   : > { %v3102_v13 = vmul.f32 0.0052083335, %v3071_v7  ;;  %v3079_v12 = vpop.xlane.xlu1 %3078  ;;  %v3128_v6 = vmul.f32 %v13295_v42, %v13295_v42  ;;  %v3129_v5 = vmul.f32 %v13298_v40, %v13298_v40 }
 0x4aa   : > { %v3104_v31 = vmul.f32 0.0052083335, %v3079_v12  ;;  %v3132_v14 = vmul.f32 %v13301_v19, %v13301_v19  ;;  %v3133_v34 = vmul.f32 %v13304_v57, %v13304_v57 }
 0x4ab   : > { %v13315_v33 = vsub.f32 %v13228_v25, %v3102_v13  ;;  %v13318_v2 = vsub.f32 %v13230_v18, %v3102_v13  ;;  %v3146_v44 = vsel %vm3063_vm2, %v3129_v5, 0.0 }
 0x4ac   : > { %v13322_v32 = vsub.f32 %v13237_v21, %v3104_v31  ;;  %v13325_v49 = vsub.f32 %v13239_v29, %v3104_v31  ;;  %v3083_v16 = vpop.xlane.xlu0 %3082  ;;  %v3147_v30 = vadd.f32 %v3146_v44, %v3128_v6  ;;  %v3154_v54 = vsel %vm3063_vm2, %v3133_v34, 0.0  ;;  %v10552_v44 = vld [vmem:[%s11429_s25 + $0x28] sm:$0xff]  }
 0x4ad   : > { %v3105_v22 = vmul.f32 0.0052083335, %v3083_v16  ;;  %v3087_v11 = vpop.xlane.xlu1 %3086  ;;  %v3130_v25 = vmul.f32 %v13315_v33, %v13315_v33  ;;  %v3131_v18 = vmul.f32 %v13318_v2, %v13318_v2  ;;  %v3155_v38 = vadd.f32 %v3154_v54, %v3132_v14  ;;  %v10551_v14 = vld [vmem:[%s11424_s24 + $0x28] sm:$0xff]   ;;  %3585 = vmatpush1.bf16.msra.mxu1 %v10552_v44  ;;  %v10554_v54 = vld [vmem:[%s11429_s25 + $0x30] sm:$0xff]  }
 0x4ae   : > { %3148 = vadd.xlane.f32.xlu1 %v3147_v30  ;;  %v3106_v46 = vmul.f32 0.0052083335, %v3087_v11  ;;  %v3134_v21 = vmul.f32 %v13322_v32, %v13322_v32  ;;  %v3135_v29 = vmul.f32 %v13325_v49, %v13325_v49  ;;  %3417 = vmatpush1.bf16.msra.mxu0 %v10551_v14  ;;  %v10553_v30 = vld [vmem:[%s11424_s24 + $0x30] sm:$0xff]   ;;  %v10556_v11 = vld [vmem:[%s11429_s25 + $0x38] sm:$0xff]  }
 0x4af   : > { %v13337_v35 = vsub.f32 %v13249_v61, %v3105_v22  ;;  %v13340_v51 = vsub.f32 %v13244_v9, %v3105_v22  ;;  %v3150_v50 = vsel %vm3063_vm2, %v3131_v18, 0.0  ;;  %3418 = vmatprep.subr.bf16.mxu0 %v16139_v1  ;;  %3586 = vmatprep.subr.bf16.mxu1 %v16139_v1  ;;  %v10555_v22 = vld [vmem:[%s11424_s24 + $0x38] sm:$0xff]   ;;  %v10558_v18 = vld [vmem:[%s11429_s25 + $0x40] sm:$0xff]  }
 0x4b0   : > { %v13344_v53 = vsub.f32 %v13254_v47, %v3106_v46  ;;  %v13347_v8 = vsub.f32 %v13246_v20, %v3106_v46  ;;  %v3091_v62 = vpop.xlane.xlu0 %3090  ;;  %v3151_v59 = vadd.f32 %v3150_v50, %v3130_v25  ;;  %v3158_v27 = vsel %vm3063_vm2, %v3135_v29, 0.0  ;;  %v10557_v25 = vld [vmem:[%s11424_s24 + $0x40] sm:$0xff]   ;;  %v10559_v46 = vld [vmem:[%s11424_s24 + $0x48] sm:$0xff]   ;;  %v10562_v29 = vld [vmem:[%s11429_s25 + $0x50] sm:$0xff]  }
 0x4b1   : > { %v3107_v63 = vmul.f32 0.0052083335, %v3091_v62  ;;  %v3095_v52 = vpop.xlane.xlu1 %3094  ;;  %v3136_v61 = vmul.f32 %v13337_v35, %v13337_v35  ;;  %v3137_v9 = vmul.f32 %v13340_v51, %v13340_v51  ;;  %v3159_v47 = vadd.f32 %v3158_v27, %v3134_v21  ;;  %3587 = vmatpush1.bf16.msra.mxu1 %v10554_v54  ;;  %v10561_v21 = vld [vmem:[%s11424_s24 + $0x50] sm:$0xff]   ;;  %v10563_v50 = vld [vmem:[%s11424_s24 + $0x58] sm:$0xff]  }
 0x4b2   : > { %3156 = vadd.xlane.f32.xlu1 %v3155_v38  ;;  %3152 = vadd.xlane.f32.xlu0 %v3151_v59  ;;  %v3108_v28 = vmul.f32 0.0052083335, %v3095_v52  ;;  %v3138_v20 = vmul.f32 %v13344_v53, %v13344_v53  ;;  %v3139_v0 = vmul.f32 %v13347_v8, %v13347_v8  ;;  %v10560_v38 = vld [vmem:[%s11429_s25 + $0x48] sm:$0xff]   ;;  %v10564_v62 = vld [vmem:[%s11429_s25 + $0x58] sm:$0xff]   ;;  %v3228_v52 = vlaneseq }
 0x4b3   : > { %v13359_v60 = vsub.f32 %v13261_v15, %v3107_v63  ;;  %v13361_v55 = vsub.f32 %v11189_v43, %v3107_v63  ;;  %v3162_v39 = vsel %vm3063_vm2, %v3137_v9, 0.0  ;;  %3419 = vmatpush1.bf16.msra.mxu0 %v10553_v30  ;;  %3588 = vmatprep.subr.bf16.mxu1 %v16139_v1 }
 0x4b4   : > { %v13365_v23 = vsub.f32 %v13264_v58, %v3108_v28  ;;  %v13367_v10 = vsub.f32 %v11190_v24, %v3108_v28  ;;  %v3099_v56 = vpop.xlane.xlu0 %3098  ;;  %v3163_v26 = vadd.f32 %v3162_v39, %v3136_v61  ;;  %v3166_v3 = vsel %vm3063_vm2, %v3139_v0, 0.0  ;;  %3420 = vmatprep.subr.bf16.mxu0 %v16139_v1 }
 0x4b5   : > { %v3109_v37 = vmul.f32 0.0052083335, %v3099_v56  ;;  %v3140_v15 = vmul.f32 %v13359_v60, %v13359_v60  ;;  %v3141_v36 = vmul.f32 %v13361_v55, %v13361_v55  ;;  %v3167_v17 = vadd.f32 %v3166_v3, %v3138_v20  ;;  %3589 = vmatpush1.bf16.msra.mxu1 %v10556_v11 }
 0x4b6   : > { %3160 = vadd.xlane.f32.xlu0 %v3159_v47  ;;  %3164 = vadd.xlane.f32.xlu1 %v3163_v26  ;;  %v3142_v58 = vmul.f32 %v13365_v23, %v13365_v23  ;;  %v3143_v48 = vmul.f32 %v13367_v10, %v13367_v10  ;;  %v13417_v43 = vshrl.u32 %v3228_v52, 7 }
 0x4b7   : > { %v13379_v45 = vsub.f32 %v13267_v41, %v3109_v37  ;;  %v13381_v7 = vsub.f32 %v11191_v4, %v3109_v37  ;;  %v3170_v13 = vsel %vm3063_vm2, %v3141_v36, 0.0  ;;  %3421 = vmatpush1.bf16.msra.mxu0 %v10555_v22  ;;  %3590 = vmatprep.subr.bf16.mxu1 %v16139_v1 }
 0x4b8   : > { %v3171_v12 = vadd.f32 %v3170_v13, %v3140_v15  ;;  %v3174_v6 = vsel %vm3063_vm2, %v3143_v48, 0.0  ;;  %3422 = vmatprep.subr.bf16.mxu0 %v16139_v1  ;;  %16315 = vst [vmem:[#allocation37_spill] sm:$0xff] %v13417_v43  ;;  %v13420_v15 = vsub.s32 0, %v13417_v43  ;;  %v13423_v36 = vsub.s32 1, %v13417_v43  ;;  %v3061_v48 = vld [vmem:[%s16319_s1] sm:$0x3] }
 0x4b9   : > { %v3144_v5 = vmul.f32 %v13379_v45, %v13379_v45  ;;  %v3145_v31 = vmul.f32 %v13381_v7, %v13381_v7  ;;  %v3175_v41 = vadd.f32 %v3174_v6, %v3142_v58  ;;  %3591 = vmatpush1.bf16.msra.mxu1 %v10558_v18 }
 0x4ba   : > { %3168 = vadd.xlane.f32.xlu0 %v3167_v17  ;;  %3172 = vadd.xlane.f32.xlu1 %v3171_v12  ;;  %16316 = vst [vmem:[#allocation38_spill] sm:$0xff] %v13420_v15  ;;  %16317 = vst [vmem:[#allocation39_spill] sm:$0xff] %v13423_v36 }
 0x4bb   : > { %v3178_v34 = vsel %vm3063_vm2, %v3145_v31, 0.0  ;;  %3423 = vmatpush1.bf16.msra.mxu0 %v10557_v25  ;;  %3592 = vmatprep.subr.bf16.mxu1 %v16139_v1  ;;  %v13436_v31 = vrot.slane %v3061_v48, %v13420_v15 }
 0x4bc   : > { %v3179_v16 = vadd.f32 %v3178_v34, %v3144_v5  ;;  %3424 = vmatprep.subr.bf16.mxu0 %v16139_v1  ;;  %v3062_v5 = vld [vmem:[%s16320_s12] sm:$0x3] }
 0x4bd   : > { %3593 = vmatpush1.bf16.msra.mxu1 %v10560_v38  ;;  %v13444_v11 = vrot.slane %v3062_v5, %v13420_v15  ;;  %v13447_v25 = vrot.slane %v3062_v5, %v13423_v36 }
 0x4be   : > { %3176 = vadd.xlane.f32.xlu0 %v3175_v41  ;;  %3180 = vadd.xlane.f32.xlu1 %v3179_v16  ;;  %v13439_v41 = vrot.slane %v3061_v48, %v13423_v36 }
 0x4bf   : > { %3425 = vmatpush1.bf16.msra.mxu0 %v10559_v46  ;;  %3594 = vmatprep.subr.bf16.mxu1 %v16139_v1 }
 0x4c0   : > { %3426 = vmatprep.subr.bf16.mxu0 %v16139_v1 }
 0x4c1   : > { %3595 = vmatpush1.bf16.msra.mxu1 %v10562_v29 }
 0x4c2   : > { %3596 = vmatprep.subr.bf16.mxu1 %v16139_v1 }
 0x4c3   : > { %3427 = vmatpush1.bf16.msra.mxu0 %v10561_v21 }
 0x4c4   : > { %3428 = vmatprep.subr.bf16.mxu0 %v16139_v1 }
 0x4c5   : > { %3597 = vmatpush1.bf16.msra.mxu1 %v10564_v62 }
 0x4c7   : > { %3429 = vmatpush1.bf16.msra.mxu0 %v10563_v50 }
 0x4c8   : > { %3742 = vmatprep.subr.bf16.mxu0 %v16139_v1 }
 0x53b   : > { %v3149_v59 = vpop.xlane.xlu1 %3148 }
 0x53c   : > { %v3182_v27 = vmul.f32 0.0052083335, %v3149_v59 }
 0x53e   : > { %v3191_v63 = vadd.f32 1e-05, %v3182_v27 }
 0x53f   : > { %v3157_v61 = vpop.xlane.xlu1 %3156  ;;  %v3153_v9 = vpop.xlane.xlu0 %3152 }
 0x540   : > { %10937 = vrsqrt.f32 %v3191_v63  ;;  %v3184_v28 = vmul.f32 0.0052083335, %v3157_v61  ;;  %v3183_v47 = vmul.f32 0.0052083335, %v3153_v9 }
 0x542   : > { %v3193_v20 = vadd.f32 1e-05, %v3184_v28  ;;  %v3192_v0 = vadd.f32 1e-05, %v3183_v47 }
 0x543   : > { %v3165_v39 = vpop.xlane.xlu1 %3164  ;;  %v3161_v24 = vpop.xlane.xlu0 %3160 }
 0x544   : > { %10939 = vrsqrt.f32 %v3193_v20  ;;  %v3186_v56 = vmul.f32 0.0052083335, %v3165_v39  ;;  %v3185_v26 = vmul.f32 0.0052083335, %v3161_v24 }
 0x545   : > { %10941 = vrsqrt.f32 %v3192_v0 }
 0x546   : > { %v3195_v3 = vadd.f32 1e-05, %v3186_v56  ;;  %v3194_v37 = vadd.f32 1e-05, %v3185_v26 }
 0x547   : > { %v3173_v17 = vpop.xlane.xlu1 %3172  ;;  %v3169_v58 = vpop.xlane.xlu0 %3168 }
 0x548   : > { %10943 = vrsqrt.f32 %v3195_v3  ;;  %v3188_v4 = vmul.f32 0.0052083335, %v3173_v17  ;;  %v3187_v13 = vmul.f32 0.0052083335, %v3169_v58 }
 0x549   : > { %10945 = vrsqrt.f32 %v3194_v37  ;;  %v10565_v37 = vld [vmem:[%s11434_s21] sm:$0xff]  }
 0x54a   : > { %v10938_v12 = vpop.eup %10937  ;;  %v3196_v6 = vadd.f32 1e-05, %v3187_v13  ;;  %v3197_v16 = vadd.f32 1e-05, %v3188_v4 }
 0x54b   : > { %v3209_v14 = vmul.f32 %v10938_v12, %v13295_v42  ;;  %v3210_v34 = vmul.f32 %v10938_v12, %v13298_v40  ;;  %v3177_v44 = vpop.xlane.xlu0 %3176  ;;  %v3181_v30 = vpop.xlane.xlu1 %3180 }
 0x54c   : > { %v3189_v54 = vmul.f32 0.0052083335, %v3177_v44  ;;  %10947 = vrsqrt.f32 %v3196_v6  ;;  %v3190_v21 = vmul.f32 0.0052083335, %v3181_v30  ;;  %v10566_v6 = vld [vmem:[%s11434_s21 + $0x8] sm:$0xff]  }
 0x54d   : > { %v3238_v38 = vmul.f32 %v13436_v31, %v3209_v14  ;;  %v3239_v42 = vmul.f32 %v13439_v41, %v3210_v34  ;;  %10949 = vrsqrt.f32 %v3197_v16 }
 0x54e   : > { %v10940_v22 = vpop.eup %10939  ;;  %v3198_v18 = vadd.f32 1e-05, %v3189_v54  ;;  %v3199_v9 = vadd.f32 1e-05, %v3190_v21  ;;  %v10567_v54 = vld [vmem:[%s11434_s21 + $0x10] sm:$0xff]  }
 0x54f   : > { %v10942_v46 = vpop.eup %10941  ;;  %v3214_v40 = vmul.f32 %v10940_v22, %v13304_v57  ;;  %v3267_v52 = vadd.f32 %v13444_v11, %v3238_v38  ;;  %v3268_v61 = vadd.f32 %v13447_v25, %v3239_v42  ;;  %v3213_v20 = vmul.f32 %v10940_v22, %v13301_v19 }
 0x550   : > { %v3211_v29 = vmul.f32 %v10942_v46, %v13315_v33  ;;  %v3212_v50 = vmul.f32 %v10942_v46, %v13318_v2  ;;  %10951 = vrsqrt.f32 %v3198_v18 }
 0x551   : > { %v3243_v57 = vmul.f32 %v13439_v41, %v3214_v40  ;;  %10953 = vrsqrt.f32 %v3199_v9  ;;  %v10568_v40 = vld [vmem:[%s11434_s21 + $0x18] sm:$0xff]  }
 0x552   : > { %v10944_v62 = vpop.eup %10943  ;;  %v3240_v59 = vmul.f32 %v13436_v31, %v3211_v29  ;;  %v3241_v27 = vmul.f32 %v13439_v41, %v3212_v50 }
 0x553   : > { %v10946_v63 = vpop.eup %10945  ;;  %v3218_v24 = vmul.f32 %v10944_v62, %v13340_v51  ;;  %v3272_v17 = vadd.f32 %v13447_v25, %v3243_v57  ;;  %v3217_v44 = vmul.f32 %v10944_v62, %v13337_v35 }
 0x554   : > { %v3269_v33 = vadd.f32 %v13444_v11, %v3240_v59  ;;  %v3270_v2 = vadd.f32 %v13447_v25, %v3241_v27  ;;  %v3215_v28 = vmul.f32 %v10946_v63, %v13322_v32  ;;  %v3216_v47 = vmul.f32 %v10946_v63, %v13325_v49  ;;  %v10569_v63 = vld [vmem:[%s11434_s21 + $0x20] sm:$0xff]  }
 0x555   : > { %v3242_v49 = vmul.f32 %v13436_v31, %v3213_v20  ;;  %v3247_v58 = vmul.f32 %v13439_v41, %v3218_v24  ;;  %v3246_v46 = vmul.f32 %v13436_v31, %v3217_v44  ;;  %v10573_v24 = vld [vmem:[%s11434_s21 + $0x40] sm:$0xff]   ;;  %v10592_v44 = vld [vmem:[%s11434_s21 + $0x78] sm:$0xff]  }
 0x556   : > { %v13464_v0 = vpack.c.bf16 %v3269_v33, %v3267_v52  ;;  %v13466_v39 = vpack.c.bf16 %v3270_v2, %v3268_v61  ;;  %v3245_v56 = vmul.f32 %v13439_v41, %v3216_v47  ;;  %v10948_v26 = vpop.eup %10947  ;;  %v3244_v3 = vmul.f32 %v13436_v31, %v3215_v28 }
 0x557   : > { %v3220_v19 = vmul.f32 %v10948_v26, %v13347_v8  ;;  %v10950_v51 = vpop.eup %10949  ;;  %v3219_v12 = vmul.f32 %v10948_v26, %v13344_v53  ;;  %v3271_v34 = vadd.f32 %v13444_v11, %v3242_v49  ;;  %v3276_v53 = vadd.f32 %v13447_v25, %v3247_v58  ;;  %v10576_v26 = vld [vmem:[%s11434_s21 + $0x58] sm:$0xff]   ;;  %v10582_v49 = vld [vmem:[%s11424_s24 + $0x88] sm:$0xff]  }
 0x558   : > { %v3274_v32 = vadd.f32 %v13447_v25, %v3245_v56  ;;  %9370 = vmatprep.mubr.msk.bf16.mxu0 %vm3063_vm2, %v13466_v39  ;;  %9387 = vmatprep.mubr.msk.bf16.mxu1 %vm3063_vm2, %v13466_v39  ;;  %v3273_v13 = vadd.f32 %v13444_v11, %v3244_v3  ;;  %v3222_v16 = vmul.f32 %v10950_v51, %v13361_v55  ;;  %v10575_v56 = vld [vmem:[%s11434_s21 + $0x50] sm:$0xff]   ;;  %v10577_v3 = vld [vmem:[%s11424_s24 + $0x60] sm:$0xff]   ;;  %v10584_v58 = vld [vmem:[%s11424_s24 + $0x98] sm:$0xff]  }
 0x559   : > { %3439 = vmatmul.mubr.bf16.vlgmr.msra.gmra.mrb[0].mxu0 %v13464_v0  ;;  %v3249_v4 = vmul.f32 %v13439_v41, %v3220_v19  ;;  %3607 = vmatmul.mubr.bf16.vlgmr.msra.gmra.mrb[0].mxu1 %v13464_v0  ;;  %v3275_v50 = vadd.f32 %v13444_v11, %v3246_v46  ;;  %v3221_v62 = vmul.f32 %v10950_v51, %v13359_v60  ;;  %v10581_v19 = vld [vmem:[%s11424_s24 + $0x80] sm:$0xff]   ;;  %v10583_v51 = vld [vmem:[%s11424_s24 + $0x90] sm:$0xff]  }
 0x55a   : > { %v13482_v48 = vpack.c.bf16 %v3274_v32, %v3272_v17  ;;  %v10952_v8 = vpop.eup %10951  ;;  %3743 = vmatpush1.bf16.msra.mxu0 %v10565_v37  ;;  %v13500_v30 = vpack.c.bf16 %v3273_v13, %v3271_v34  ;;  %v3251_v55 = vmul.f32 %v13439_v41, %v3222_v16  ;;  %v10578_v37 = vld [vmem:[%s11424_s24 + $0x68] sm:$0xff]   ;;  %v10579_v17 = vld [vmem:[%s11424_s24 + $0x70] sm:$0xff]   ;;  %v10580_v32 = vld [vmem:[%s11424_s24 + $0x78] sm:$0xff]  }
 0x55b   : > { %v3278_v5 = vadd.f32 %v13447_v25, %v3249_v4  ;;  %v3224_v14 = vmul.f32 %v10952_v8, %v13367_v10  ;;  %3744 = vmatprep.subr.bf16.mxu0 %v16139_v1  ;;  %v3248_v10 = vmul.f32 %v13436_v31, %v3219_v12  ;;  %v10954_v18 = vpop.eup %10953  ;;  %v3223_v42 = vmul.f32 %v10952_v8, %v13365_v23  ;;  %v10585_v4 = vld [vmem:[%s11424_s24 + $0xa0] sm:$0xff]   ;;  %v10586_v8 = vld [vmem:[%s11424_s24 + $0xa8] sm:$0xff]   ;;  %v10587_v13 = vld [vmem:[%s11424_s24 + $0xb0] sm:$0xff]  }
 0x55c   : > { %9371 = vmatprep.mubr.msk.bf16.mxu0 %vm3063_vm2, %v13482_v48  ;;  %9388 = vmatprep.mubr.msk.bf16.mxu1 %vm3063_vm2, %v13482_v48  ;;  %v3226_v21 = vmul.f32 %v10954_v18, %v13381_v7  ;;  %v3280_v59 = vadd.f32 %v13447_v25, %v3251_v55  ;;  %v3250_v61 = vmul.f32 %v13436_v31, %v3221_v62  ;;  %v10588_v12 = vld [vmem:[%s11424_s24 + $0xb8] sm:$0xff]   ;;  %v10591_v34 = vld [vmem:[%s11434_s21 + $0x70] sm:$0xff]   ;;  %v10594_v16 = vld [vmem:[%s11434_s21 + $0x88] sm:$0xff]  }
 0x55d   : > { %v13504_v22 = vpack.c.bf16 %v3278_v5, %v3276_v53  ;;  %v3253_v35 = vmul.f32 %v13439_v41, %v3224_v14  ;;  %v3277_v38 = vadd.f32 %v13444_v11, %v3248_v10  ;;  %v3252_v23 = vmul.f32 %v13436_v31, %v3223_v42  ;;  %v10589_v5 = vld [vmem:[%s11434_s21 + $0x60] sm:$0xff]   ;;  %v10590_v14 = vld [vmem:[%s11434_s21 + $0x68] sm:$0xff]   ;;  %v10595_v10 = vld [vmem:[%s11434_s21 + $0x90] sm:$0xff]  }
 0x55e   : > { %3745 = vmatpush1.bf16.msra.mxu0 %v10566_v6  ;;  %v3255_v52 = vmul.f32 %v13439_v41, %v3226_v21  ;;  %v3225_v60 = vmul.f32 %v10954_v18, %v13379_v45  ;;  %v10570_v41 = vld [vmem:[%s11434_s21 + $0x28] sm:$0xff]   ;;  %v3279_v33 = vadd.f32 %v13444_v11, %v3250_v61  ;;  %v10571_v45 = vld [vmem:[%s11434_s21 + $0x30] sm:$0xff]   ;;  %v16141_v6 = vmov 0.0   ;;  %v10593_v53 = vld [vmem:[%s11434_s21 + $0x80] sm:$0xff]  }
 0x55f   : > { %3746 = vmatprep.subr.bf16.mxu0 %v16139_v1  ;;  %v3282_v29 = vadd.f32 %v13447_v25, %v3253_v35  ;;  %v13525_v27 = vpack.c.bf16 %v3277_v38, %v3275_v50  ;;  %v3281_v57 = vadd.f32 %v13444_v11, %v3252_v23  ;;  %9989 = vmatprep.subr.bf16.mxu1 %v16141_v6  ;;  %v10597_v35 = vld [vmem:[%s11434_s21 + $0xa0] sm:$0xff]   ;;  %v10598_v18 = vld [vmem:[%s11434_s21 + $0xa8] sm:$0xff]   ;;  %v10599_v46 = vld [vmem:[%s11434_s21 + $0xb0] sm:$0xff]  }
 0x560   : > { %v3284_v9 = vadd.f32 %v13447_v25, %v3255_v52  ;;  %v3254_v2 = vmul.f32 %v13436_v31, %v3225_v60  ;;  %v10572_v31 = vld [vmem:[%s11434_s21 + $0x38] sm:$0xff]   ;;  %v10601_v38 = vld [vmem:[%s11424_s24 + $0xc0] sm:$0xff]   ;;  %v10602_v42 = vld [vmem:[%s11424_s24 + $0xc8] sm:$0xff]  }
 0x561   : > { %3447 = vmatmul.mubr.bf16.gmra.mrb[4].mxu0 %v13500_v30  ;;  %3615 = vmatmul.mubr.bf16.gmra.mrb[4].mxu1 %v13500_v30  ;;  %v13530_v7 = vpack.c.bf16 %v3282_v29, %v3280_v59  ;;  %v13547_v28 = vpack.c.bf16 %v3281_v57, %v3279_v33  ;;  %v10600_v55 = vld [vmem:[%s11434_s21 + $0xb8] sm:$0xff]   ;;  %v10605_v29 = vld [vmem:[%s11424_s24 + $0xe0] sm:$0xff]   ;;  %v10606_v50 = vld [vmem:[%s11424_s24 + $0xe8] sm:$0xff]  }
 0x562   : > { %9372 = vmatprep.mubr.msk.bf16.mxu0 %vm3063_vm2, %v13504_v22  ;;  %3747 = vmatpush1.bf16.msra.mxu0 %v10567_v54  ;;  %v13550_v47 = vpack.c.bf16 %v3284_v9, %v3284_v9  ;;  %v3283_v25 = vadd.f32 %v13444_v11, %v3254_v2  ;;  %v10574_v11 = vld [vmem:[%s11434_s21 + $0x48] sm:$0xff]   ;;  %v10596_v54 = vld [vmem:[%s11434_s21 + $0x98] sm:$0xff]   ;;  %v10607_v62 = vld [vmem:[%s11424_s24 + $0xf0] sm:$0xff]  }
 0x563   : > { %9389 = vmatprep.mubr.msk.bf16.mxu1 %vm3063_vm2, %v13504_v22  ;;  %3748 = vmatprep.subr.bf16.mxu0 %v16139_v1  ;;  %16321 = vst [vmem:[#allocation40_spill] sm:$0xff] %v13530_v7  ;;  %16322 = vst [vmem:[#allocation41_spill] sm:$0xff] %v13547_v28  ;;  %v10604_v21 = vld [vmem:[%s11424_s24 + $0xd8] sm:$0xff]   ;;  %v10609_v23 = vld [vmem:[%s11424_s24 + $0x100] sm:$0xff]  }
 0x564   : > { %16323 = vst [vmem:[#allocation42_spill] sm:$0xff] %v13550_v47  ;;  %v13562_v20 = vpack.c.bf16 %v3283_v25, %v3283_v25  ;;  %v10608_v59 = vld [vmem:[%s11424_s24 + $0xf8] sm:$0xff]   ;;  %v10611_v52 = vld [vmem:[%s11424_s24 + $0x110] sm:$0xff]   ;;  %v10613_v60 = vld [vmem:[%s11429_s25 + $0xc0] sm:$0xff]  }
 0x565   : > { %v10612_v61 = vld [vmem:[%s11424_s24 + $0x118] sm:$0xff]   ;;  %v10614_v57 = vld [vmem:[%s11429_s25 + $0xc8] sm:$0xff]   ;;  %v10617_v33 = vld [vmem:[%s11429_s25 + $0xe0] sm:$0xff]  }
 0x566   : > { %3749 = vmatpush1.bf16.msra.mxu0 %v10568_v40  ;;  %16324 = vst [vmem:[#allocation43_spill] sm:$0xff] %v13562_v20  ;;  %v10603_v40 = vld [vmem:[%s11424_s24 + $0xd0] sm:$0xff]   ;;  %v10616_v9 = vld [vmem:[%s11429_s25 + $0xd8] sm:$0xff]   ;;  %v10618_v2 = vld [vmem:[%s11429_s25 + $0xe8] sm:$0xff]  }
 0x567   : > { %3750 = vmatprep.subr.bf16.mxu0 %v16139_v1 }
 0x569   : > { %3455 = vmatmul.mubr.bf16.gmra.mrb[8].mxu0 %v13525_v27  ;;  %3623 = vmatmul.mubr.bf16.gmra.mrb[8].mxu1 %v13525_v27 }
 0x56a   : > { %9373 = vmatprep.mubr.msk.bf16.mxu0 %vm3063_vm2, %v13530_v7  ;;  %3751 = vmatpush1.bf16.msra.mxu0 %v10569_v63  ;;  %v10610_v63 = vld [vmem:[%s11424_s24 + $0x108] sm:$0xff]  }
 0x56b   : > { %9390 = vmatprep.mubr.msk.bf16.mxu1 %vm3063_vm2, %v13530_v7  ;;  %3752 = vmatprep.subr.bf16.mxu0 %v16139_v1 }
 0x56e   : > { %3753 = vmatpush1.bf16.msra.mxu0 %v10570_v41  ;;  %v10615_v41 = vld [vmem:[%s11429_s25 + $0xd0] sm:$0xff]  }
 0x56f   : > { %3754 = vmatprep.subr.bf16.mxu0 %v16139_v1 }
 0x571   : > { %3463 = vmatmul.mubr.bf16.gmra.mrb[12].mxu0 %v13547_v28  ;;  %3631 = vmatmul.mubr.bf16.gmra.mrb[12].mxu1 %v13547_v28 }
 0x572   : > { %9374 = vmatprep.mubr.msk.bf16.mxu0 %vm3063_vm2, %v13550_v47  ;;  %3755 = vmatpush1.bf16.msra.mxu0 %v10571_v45 }
 0x573   : > { %9391 = vmatprep.mubr.msk.bf16.mxu1 %vm3063_vm2, %v13550_v47  ;;  %3756 = vmatprep.subr.bf16.mxu0 %v16139_v1 }
 0x576   : > { %3757 = vmatpush1.bf16.msra.mxu0 %v10572_v31 }
 0x577   : > { %3758 = vmatprep.subr.bf16.mxu0 %v16139_v1 }
 0x579   : > { %3471 = vmatmul.mubr.bf16.gmra.mrb[16].mxu0 %v13562_v20  ;;  %3639 = vmatmul.mubr.bf16.gmra.mrb[16].mxu1 %v13562_v20 }
 0x57a   : > { %9404 = vmatprep.mubr.msk.bf16.mxu0 %vm3063_vm2, %v13466_v39  ;;  %3759 = vmatpush1.bf16.msra.mxu0 %v10573_v24 }
 0x57b   : > { %3760 = vmatprep.subr.bf16.mxu0 %v16139_v1  ;;  %9999 = vmatprep.mubr.msk.bf16.mxu1 %vm11255_vm3, %v16141_v6 }
 0x57e   : > { %3761 = vmatpush1.bf16.msra.mxu0 %v10574_v11 }
 0x57f   : > { %3762 = vmatprep.subr.bf16.mxu0 %v16139_v1 }
 0x582   : > { %3763 = vmatpush1.bf16.msra.mxu0 %v10575_v56 }
 0x583   : > { %3764 = vmatprep.subr.bf16.mxu0 %v16139_v1 }
 0x586   : > { %3765 = vmatpush1.bf16.msra.mxu0 %v10576_v26 }
 0x587   : > { %4264 = vmatprep.subr.bf16.mxu0 %v16139_v1 }
 0x589   : > { %3775 = vmatmul.mubr.bf16.vlgmr.msra.gmra.mrb[20].mxu0 %v13464_v0 }
 0x58a   : > { %9405 = vmatprep.mubr.msk.bf16.mxu0 %vm3063_vm2, %v13482_v48  ;;  %4265 = vmatpush1.bf16.msra.mxu0 %v10577_v3 }
 0x58b   : > { %4266 = vmatprep.subr.bf16.mxu0 %v16139_v1 }
 0x58e   : > { %4267 = vmatpush1.bf16.msra.mxu0 %v10578_v37  ;;  %v10619_v37 = vld [vmem:[%s11429_s25 + $0xf0] sm:$0xff]  }
 0x58f   : > { %4268 = vmatprep.subr.bf16.mxu0 %v16139_v1 }
 0x591   : > { %3783 = vmatmul.mubr.bf16.gmra.mrb[24].mxu0 %v13500_v30 }
 0x592   : > { %9406 = vmatprep.mubr.msk.bf16.mxu0 %vm3063_vm2, %v13504_v22  ;;  %4269 = vmatpush1.bf16.msra.mxu0 %v10579_v17 }
 0x593   : > { %4270 = vmatprep.subr.bf16.mxu0 %v16139_v1 }
 0x596   : > { %4271 = vmatpush1.bf16.msra.mxu0 %v10580_v32 }
 0x597   : > { %4272 = vmatprep.subr.bf16.mxu0 %v16139_v1 }
 0x599   : > { %3791 = vmatmul.mubr.bf16.gmra.mrb[28].mxu0 %v13525_v27 }
 0x59a   : > { %9407 = vmatprep.mubr.msk.bf16.mxu0 %vm3063_vm2, %v13530_v7  ;;  %4273 = vmatpush1.bf16.msra.mxu0 %v10581_v19 }
 0x59b   : > { %4274 = vmatprep.subr.bf16.mxu0 %v16139_v1 }
 0x59e   : > { %4275 = vmatpush1.bf16.msra.mxu0 %v10582_v49  ;;  %v10620_v49 = vld [vmem:[%s11429_s25 + $0xf8] sm:$0xff]  }
 0x59f   : > { %4276 = vmatprep.subr.bf16.mxu0 %v16139_v1 }
 0x5a1   : > { %3799 = vmatmul.mubr.bf16.gmra.mrb[32].mxu0 %v13547_v28 }
 0x5a2   : > { %9408 = vmatprep.mubr.msk.bf16.mxu0 %vm3063_vm2, %v13550_v47  ;;  %4277 = vmatpush1.bf16.msra.mxu0 %v10583_v51 }
 0x5a3   : > { %4278 = vmatprep.subr.bf16.mxu0 %v16139_v1 }
 0x5a6   : > { %4279 = vmatpush1.bf16.msra.mxu0 %v10584_v58 }
 0x5a7   : > { %4280 = vmatprep.subr.bf16.mxu0 %v16139_v1 }
 0x5a9   : > { %3807 = vmatmul.mubr.bf16.gmra.mrb[36].mxu0 %v13562_v20 }
 0x5aa   : > { %4281 = vmatpush1.bf16.msra.mxu0 %v10585_v4  ;;  %9455 = vmatprep.mubr.msk.bf16.mxu0 %vm3063_vm2, %v13466_v39 }
 0x5ab   : > { %4282 = vmatprep.subr.bf16.mxu0 %v16139_v1 }
 0x5ae   : > { %4283 = vmatpush1.bf16.msra.mxu0 %v10586_v8 }
 0x5af   : > { %4284 = vmatprep.subr.bf16.mxu0 %v16139_v1 }
 0x5b2   : > { %4285 = vmatpush1.bf16.msra.mxu0 %v10587_v13 }
 0x5b3   : > { %4286 = vmatprep.subr.bf16.mxu0 %v16139_v1 }
 0x5b6   : > { %4287 = vmatpush1.bf16.msra.mxu0 %v10588_v12 }
 0x5b7   : > { %4602 = vmatprep.subr.bf16.mxu0 %v16139_v1 }
 0x5b9   : > { %4297 = vmatmul.mubr.bf16.vlgmr.msra.gmra.mrb[40].mxu0 %v13464_v0 }
 0x5ba   : > { %9456 = vmatprep.mubr.msk.bf16.mxu0 %vm3063_vm2, %v13482_v48  ;;  %4603 = vmatpush1.bf16.msra.mxu0 %v10589_v5 }
 0x5bb   : > { %4604 = vmatprep.subr.bf16.mxu0 %v16139_v1 }
 0x5be   : > { %4605 = vmatpush1.bf16.msra.mxu0 %v10590_v14 }
 0x5bf   : > { %4606 = vmatprep.subr.bf16.mxu0 %v16139_v1 }
 0x5c1   : > { %4305 = vmatmul.mubr.bf16.gmra.mrb[44].mxu0 %v13500_v30 }
 0x5c2   : > { %9457 = vmatprep.mubr.msk.bf16.mxu0 %vm3063_vm2, %v13504_v22  ;;  %4607 = vmatpush1.bf16.msra.mxu0 %v10591_v34  ;;  %v10621_v34 = vld [vmem:[%s11429_s25 + $0x100] sm:$0xff]  }
 0x5c3   : > { %4608 = vmatprep.subr.bf16.mxu0 %v16139_v1 }
 0x5c6   : > { %4609 = vmatpush1.bf16.msra.mxu0 %v10592_v44 }
 0x5c7   : > { %4610 = vmatprep.subr.bf16.mxu0 %v16139_v1 }
 0x5c9   : > { %4313 = vmatmul.mubr.bf16.gmra.mrb[48].mxu0 %v13525_v27 }
 0x5ca   : > { %9458 = vmatprep.mubr.msk.bf16.mxu0 %vm3063_vm2, %v13530_v7  ;;  %4611 = vmatpush1.bf16.msra.mxu0 %v10593_v53 }
 0x5cb   : > { %4612 = vmatprep.subr.bf16.mxu0 %v16139_v1 }
 0x5ce   : > { %4613 = vmatpush1.bf16.msra.mxu0 %v10594_v16 }
 0x5cf   : > { %4614 = vmatprep.subr.bf16.mxu0 %v16139_v1 }
 0x5d1   : > { %4321 = vmatmul.mubr.bf16.gmra.mrb[52].mxu0 %v13547_v28 }
 0x5d2   : > { %9459 = vmatprep.mubr.msk.bf16.mxu0 %vm3063_vm2, %v13550_v47  ;;  %4615 = vmatpush1.bf16.msra.mxu0 %v10595_v10  ;;  %v10622_v10 = vld [vmem:[%s11429_s25 + $0x108] sm:$0xff]  }
 0x5d3   : > { %4616 = vmatprep.subr.bf16.mxu0 %v16139_v1 }
 0x5d6   : > { %4617 = vmatpush1.bf16.msra.mxu0 %v10596_v54 }
 0x5d7   : > { %4618 = vmatprep.subr.bf16.mxu0 %v16139_v1 }
 0x5d9   : > { %4329 = vmatmul.mubr.bf16.gmra.mrb[56].mxu0 %v13562_v20 }
 0x5da   : > { %4619 = vmatpush1.bf16.msra.mxu0 %v10597_v35  ;;  %9537 = vmatprep.mubr.msk.bf16.mxu0 %vm3063_vm2, %v13466_v39 }
 0x5db   : > { %4620 = vmatprep.subr.bf16.mxu0 %v16139_v1 }
 0x5de   : > { %4621 = vmatpush1.bf16.msra.mxu0 %v10598_v18 }
 0x5df   : > { %4622 = vmatprep.subr.bf16.mxu0 %v16139_v1 }
 0x5e2   : > { %4623 = vmatpush1.bf16.msra.mxu0 %v10599_v46 }
 0x5e3   : > { %4624 = vmatprep.subr.bf16.mxu0 %v16139_v1 }
 0x5e6   : > { %4625 = vmatpush1.bf16.msra.mxu0 %v10600_v55 }
 0x5e7   : > { %5386 = vmatprep.subr.bf16.mxu0 %v16139_v1 }
 0x5e9   : > { %4635 = vmatmul.mubr.bf16.vlgmr.msra.gmra.mrb[60].mxu0 %v13464_v0 }
 0x5ea   : > { %9538 = vmatprep.mubr.msk.bf16.mxu0 %vm3063_vm2, %v13482_v48  ;;  %5387 = vmatpush1.bf16.msra.mxu0 %v10601_v38 }
 0x5eb   : > { %5388 = vmatprep.subr.bf16.mxu0 %v16139_v1 }
 0x5ee   : > { %5389 = vmatpush1.bf16.msra.mxu0 %v10602_v42 }
 0x5ef   : > { %5390 = vmatprep.subr.bf16.mxu0 %v16139_v1 }
 0x5f1   : > { %4643 = vmatmul.mubr.bf16.gmra.mrb[64].mxu0 %v13500_v30 }
 0x5f2   : > { %9539 = vmatprep.mubr.msk.bf16.mxu0 %vm3063_vm2, %v13504_v22  ;;  %5391 = vmatpush1.bf16.msra.mxu0 %v10603_v40 }
 0x5f3   : > { %5392 = vmatprep.subr.bf16.mxu0 %v16139_v1 }
 0x5f6   : > { %5393 = vmatpush1.bf16.msra.mxu0 %v10604_v21  ;;  %v10623_v21 = vld [vmem:[%s11429_s25 + $0x110] sm:$0xff]  }
 0x5f7   : > { %5394 = vmatprep.subr.bf16.mxu0 %v16139_v1 }
 0x5f9   : > { %4651 = vmatmul.mubr.bf16.gmra.mrb[68].mxu0 %v13525_v27 }
 0x5fa   : > { %9540 = vmatprep.mubr.msk.bf16.mxu0 %vm3063_vm2, %v13530_v7  ;;  %5395 = vmatpush1.bf16.msra.mxu0 %v10605_v29 }
 0x5fb   : > { %5396 = vmatprep.subr.bf16.mxu0 %v16139_v1 }
 0x5fe   : > { %5397 = vmatpush1.bf16.msra.mxu0 %v10606_v50 }
 0x5ff   : > { %5398 = vmatprep.subr.bf16.mxu0 %v16139_v1 }
 0x601   : > { %4659 = vmatmul.mubr.bf16.gmra.mrb[72].mxu0 %v13547_v28 }
 0x602   : > { %9541 = vmatprep.mubr.msk.bf16.mxu0 %vm3063_vm2, %v13550_v47  ;;  %5399 = vmatpush1.bf16.msra.mxu0 %v10607_v62 }
 0x603   : > { %5400 = vmatprep.subr.bf16.mxu0 %v16139_v1 }
 0x606   : > { %5401 = vmatpush1.bf16.msra.mxu0 %v10608_v59  ;;  %v10624_v59 = vld [vmem:[%s11429_s25 + $0x118] sm:$0xff]  }
 0x607   : > { %5402 = vmatprep.subr.bf16.mxu0 %v16139_v1 }
 0x609   : > { %4667 = vmatmul.mubr.bf16.gmra.mrb[76].mxu0 %v13562_v20 }
 0x60a   : > { %5403 = vmatpush1.bf16.msra.mxu0 %v10609_v23  ;;  %9622 = vmatprep.mubr.msk.bf16.mxu0 %vm3063_vm2, %v13466_v39 }
 0x60b   : > { %5404 = vmatprep.subr.bf16.mxu0 %v16139_v1 }
 0x60e   : > { %5405 = vmatpush1.bf16.msra.mxu0 %v10610_v63 }
 0x60f   : > { %5406 = vmatprep.subr.bf16.mxu0 %v16139_v1 }
 0x612   : > { %5407 = vmatpush1.bf16.msra.mxu0 %v10611_v52 }
 0x613   : > { %5408 = vmatprep.subr.bf16.mxu0 %v16139_v1 }
 0x616   : > { %5409 = vmatpush1.bf16.msra.mxu0 %v10612_v61 }
 0x617   : > { %5555 = vmatprep.subr.bf16.mxu0 %v16139_v1 }
 0x619   : > { %5419 = vmatmul.mubr.bf16.vlgmr.msra.gmra.mrb[80].mxu0 %v13464_v0 }
 0x61a   : > { %9623 = vmatprep.mubr.msk.bf16.mxu0 %vm3063_vm2, %v13482_v48  ;;  %5556 = vmatpush1.bf16.msra.mxu0 %v10613_v60 }
 0x61b   : > { %5557 = vmatprep.subr.bf16.mxu0 %v16139_v1 }
 0x61e   : > { %5558 = vmatpush1.bf16.msra.mxu0 %v10614_v57 }
 0x61f   : > { %5559 = vmatprep.subr.bf16.mxu0 %v16139_v1 }
 0x621   : > { %5427 = vmatmul.mubr.bf16.gmra.mrb[84].mxu0 %v13500_v30 }
 0x622   : > { %9624 = vmatprep.mubr.msk.bf16.mxu0 %vm3063_vm2, %v13504_v22  ;;  %5560 = vmatpush1.bf16.msra.mxu0 %v10615_v41 }
 0x623   : > { %5561 = vmatprep.subr.bf16.mxu0 %v16139_v1 }
 0x626   : > { %5562 = vmatpush1.bf16.msra.mxu0 %v10616_v9 }
 0x627   : > { %5563 = vmatprep.subr.bf16.mxu0 %v16139_v1 }
 0x629   : > { %5435 = vmatmul.mubr.bf16.gmra.mrb[88].mxu0 %v13525_v27 }
 0x62a   : > { %9625 = vmatprep.mubr.msk.bf16.mxu0 %vm3063_vm2, %v13530_v7  ;;  %5564 = vmatpush1.bf16.msra.mxu0 %v10617_v33 }
 0x62b   : > { %5565 = vmatprep.subr.bf16.mxu0 %v16139_v1 }
 0x62c   : > { %v13716_v45 = vpop.f32.mrb[0].mxu0  ;;  %v3608_v25 = vpop.f32.mrb[0].mxu1 }
 0x62d   : > { %v3442_v31 = vpop.f32.mrb[1].mxu0  ;;  %v3610_v24 = vpop.f32.mrb[1].mxu1 }
 0x62e   : > { %v13719_v11 = vpop.f32.mrb[2].mxu0  ;;  %5566 = vmatpush1.bf16.msra.mxu0 %v10618_v2  ;;  %v3611_v26 = vpop.f32.mrb[2].mxu1 }
 0x62f   : > { %v3814_v56 = vpack.c.bf16 %v13719_v11, %v13716_v45  ;;  %v3445_v3 = vpop.f32.mrb[3].mxu0  ;;  %v3819_v17 = vpack.c.bf16 %v3611_v26, %v3608_v25  ;;  %v3613_v32 = vpop.f32.mrb[3].mxu1  ;;  %5567 = vmatprep.subr.bf16.mxu0 %v16139_v1 }
 0x631   : > { %v3840_v19 = vsel %vm3063_vm2, %v3819_v17, 0  ;;  %5443 = vmatmul.mubr.bf16.gmra.mrb[92].mxu0 %v13547_v28 }
 0x632   : > { %9626 = vmatprep.mubr.msk.bf16.mxu0 %vm3063_vm2, %v13550_v47  ;;  %5568 = vmatpush1.bf16.msra.mxu0 %v10619_v37 }
 0x633   : > { %9990 = vmatpush3.bf16.xpose.msra.mxu1 %v3840_v19  ;;  %5569 = vmatprep.subr.bf16.mxu0 %v16139_v1 }
 0x634   : > { %v13730_v51 = vpop.f32.mrb[4].mxu0  ;;  %v3616_v58 = vpop.f32.mrb[4].mxu1  ;;  %9991 = vmatprep.subr.bf16.mxu1 %v16141_v6 }
 0x635   : > { %v3450_v4 = vpop.f32.mrb[5].mxu0  ;;  %v3618_v8 = vpop.f32.mrb[5].mxu1 }
 0x636   : > { %v13734_v13 = vpop.f32.mrb[6].mxu0  ;;  %5570 = vmatpush1.bf16.msra.mxu0 %v10620_v49  ;;  %v3619_v5 = vpop.f32.mrb[6].mxu1 }
 0x637   : > { %v3815_v12 = vpack.c.bf16 %v13734_v13, %v13730_v51  ;;  %v3453_v14 = vpop.f32.mrb[7].mxu0  ;;  %v3820_v44 = vpack.c.bf16 %v3619_v5, %v3616_v58  ;;  %v3621_v53 = vpop.f32.mrb[7].mxu1  ;;  %5571 = vmatprep.subr.bf16.mxu0 %v16139_v1 }
 0x639   : > { %v3843_v16 = vsel %vm3063_vm2, %v3820_v44, 0  ;;  %5451 = vmatmul.mubr.bf16.gmra.mrb[96].mxu0 %v13562_v20 }
 0x63a   : > { %5572 = vmatpush1.bf16.msra.mxu0 %v10621_v34  ;;  %9663 = vmatprep.mubr.msk.bf16.mxu0 %vm3063_vm2, %v13466_v39 }
 0x63b   : > { %9992 = vmatpush3.bf16.xpose.msra.mxu1 %v3843_v16  ;;  %5573 = vmatprep.subr.bf16.mxu0 %v16139_v1 }
 0x63c   : > { %v13745_v54 = vpop.f32.mrb[8].mxu0  ;;  %v3624_v35 = vpop.f32.mrb[8].mxu1  ;;  %9993 = vmatprep.subr.bf16.mxu1 %v16141_v6 }
 0x63d   : > { %v3458_v18 = vpop.f32.mrb[9].mxu0  ;;  %v3626_v46 = vpop.f32.mrb[9].mxu1 }
 0x63e   : > { %v13749_v55 = vpop.f32.mrb[10].mxu0  ;;  %5574 = vmatpush1.bf16.msra.mxu0 %v10622_v10  ;;  %v3627_v42 = vpop.f32.mrb[10].mxu1 }
 0x63f   : > { %v3816_v38 = vpack.c.bf16 %v13749_v55, %v13745_v54  ;;  %v3461_v40 = vpop.f32.mrb[11].mxu0  ;;  %v3821_v29 = vpack.c.bf16 %v3627_v42, %v3624_v35  ;;  %v3629_v50 = vpop.f32.mrb[11].mxu1  ;;  %5575 = vmatprep.subr.bf16.mxu0 %v16139_v1 }
 0x641   : > { %v3846_v62 = vsel %vm3063_vm2, %v3821_v29, 0 }
 0x642   : > { %5576 = vmatpush1.bf16.msra.mxu0 %v10623_v21 }
 0x643   : > { %9994 = vmatpush3.bf16.xpose.msra.mxu1 %v3846_v62  ;;  %5577 = vmatprep.subr.bf16.mxu0 %v16139_v1 }
 0x644   : > { %v13757_v23 = vpop.f32.mrb[12].mxu0  ;;  %v3632_v63 = vpop.f32.mrb[12].mxu1  ;;  %9995 = vmatprep.subr.bf16.mxu1 %v16141_v6 }
 0x645   : > { %v3466_v52 = vpop.f32.mrb[13].mxu0  ;;  %v3634_v61 = vpop.f32.mrb[13].mxu1 }
 0x646   : > { %v3467_v60 = vpop.f32.mrb[14].mxu0  ;;  %5578 = vmatpush1.bf16.msra.mxu0 %v10624_v59  ;;  %v3635_v41 = vpop.f32.mrb[14].mxu1 }
 0x647   : > { %v3817_v57 = vpack.c.bf16 %v3467_v60, %v13757_v23  ;;  %v3469_v9 = vpop.f32.mrb[15].mxu0  ;;  %v3822_v33 = vpack.c.bf16 %v3635_v41, %v3632_v63  ;;  %v3637_v2 = vpop.f32.mrb[15].mxu1  ;;  %10109 = vmatprep.subr.bf16.mxu0 %v16141_v6 }
 0x649   : > { %v3849_v25 = vsel %vm3063_vm2, %v3822_v33, 0  ;;  %5588 = vmatmul.mubr.bf16.vlgmr.msra.gmra.mrb[100].mxu0 %v13464_v0 }
 0x64a   : > { %9664 = vmatprep.mubr.msk.bf16.mxu0 %vm3063_vm2, %v13482_v48 }
 0x64b   : > { %9996 = vmatpush3.bf16.xpose.msra.mxu1 %v3849_v25 }
 0x64c   : > { %v3472_v31 = vpop.f32.mrb[16].mxu0  ;;  %v3640_v24 = vpop.f32.mrb[16].mxu1  ;;  %9997 = vmatprep.subr.bf16.mxu1 %v16141_v6 }
 0x64d   : > { %v3474_v26 = vpop.f32.mrb[17].mxu0  ;;  %v3642_v3 = vpop.f32.mrb[17].mxu1  ;;  %v3823_v17 = vpack.c.bf16 %v3640_v24, %v3640_v24 }
 0x64e   : > { %v3475_v37 = vpop.f32.mrb[18].mxu0  ;;  %v3643_v32 = vpop.f32.mrb[18].mxu1 }
 0x64f   : > { %v3476_v19 = vpop.f32.mrb[19].mxu0  ;;  %v3644_v49 = vpop.f32.mrb[19].mxu1  ;;  %v3852_v58 = vsel %vm3063_vm2, %v3823_v17, 0 }
 0x651   : > { %5596 = vmatmul.mubr.bf16.gmra.mrb[104].mxu0 %v13500_v30 }
 0x652   : > { %9665 = vmatprep.mubr.msk.bf16.mxu0 %vm3063_vm2, %v13504_v22 }
 0x653   : > { %9998 = vmatpush3.bf16.xpose.msra.mxu1 %v3852_v58 }
 0x654   : > { %10019 = vmatprep.subr.bf16.mxu1 %v16141_v6 }
 0x659   : > { %5604 = vmatmul.mubr.bf16.gmra.mrb[108].mxu0 %v13525_v27 }
 0x65a   : > { %10000 = vmatmul.mubr.msk.bf16.vlgmr.msra.gmra.mrb[20].mxu1 %vm3063_vm2, %v3814_v56  ;;  %9666 = vmatprep.mubr.msk.bf16.mxu0 %vm3063_vm2, %v13530_v7 }
 0x65b   : > { %10003 = vmatprep.mubr.msk.bf16.mxu1 %vm11255_vm3, %v16141_v6 }
 0x65c   : > { %v3776_v4 = vpop.f32.mrb[20].mxu0 }
 0x65d   : > { %v3778_v8 = vpop.f32.mrb[21].mxu0 }
 0x65e   : > { %v3779_v5 = vpop.f32.mrb[22].mxu0 }
 0x65f   : > { %v4058_v14 = vpack.c.bf16 %v3779_v5, %v3776_v4  ;;  %v3781_v34 = vpop.f32.mrb[23].mxu0 }
 0x661   : > { %10020 = vmatpush3.bf16.msra.mxu1 %v4058_v14  ;;  %5612 = vmatmul.mubr.bf16.gmra.mrb[112].mxu0 %v13547_v28 }
 0x662   : > { %10004 = vmatmul.mubr.msk.bf16.gmra.mrb[24].mxu1 %vm3063_vm2, %v3815_v12  ;;  %9667 = vmatprep.mubr.msk.bf16.mxu0 %vm3063_vm2, %v13550_v47 }
 0x663   : > { %10021 = vmatprep.subr.bf16.mxu1 %v16141_v6  ;;  %10007 = vmatprep.mubr.msk.bf16.mxu1 %vm11255_vm3, %v16141_v6 }
 0x664   : > { %v3784_v45 = vpop.f32.mrb[24].mxu0 }
 0x665   : > { %v3786_v11 = vpop.f32.mrb[25].mxu0 }
 0x666   : > { %v3787_v56 = vpop.f32.mrb[26].mxu0 }
 0x667   : > { %v4059_v44 = vpack.c.bf16 %v3787_v56, %v3784_v45  ;;  %v3789_v53 = vpop.f32.mrb[27].mxu0 }
 0x669   : > { %10022 = vmatpush3.bf16.msra.mxu1 %v4059_v44  ;;  %5620 = vmatmul.mubr.bf16.gmra.mrb[116].mxu0 %v13562_v20 }
 0x66a   : > { %10008 = vmatmul.mubr.msk.bf16.gmra.mrb[28].mxu1 %vm3063_vm2, %v3816_v38  ;;  %10023 = vmatprep.subr.bf16.mxu1 %v16141_v6  ;;  %v3818_v38 = vpack.c.bf16 %v3472_v31, %v3472_v31 }
 0x66b   : > { %10011 = vmatprep.mubr.msk.bf16.mxu1 %vm11255_vm3, %v16141_v6  ;;  %10119 = vmatprep.mubr.msk.bf16.mxu0 %vm11255_vm3, %v16141_v6 }
 0x66c   : > { %v3792_v51 = vpop.f32.mrb[28].mxu0 }
 0x66d   : > { %v3794_v13 = vpop.f32.mrb[29].mxu0 }
 0x66e   : > { %v3795_v12 = vpop.f32.mrb[30].mxu0 }
 0x66f   : > { %v4060_v16 = vpack.c.bf16 %v3795_v12, %v3792_v51  ;;  %v3797_v10 = vpop.f32.mrb[31].mxu0  ;;  %v13924_v51 = vld [vmem:[%s16325_s13 + $0x18] sm:$0xff] }
 0x671   : > { %10024 = vmatpush3.bf16.msra.mxu1 %v4060_v16 }
 0x672   : > { %10012 = vmatmul.mubr.msk.bf16.gmra.mrb[32].mxu1 %vm3063_vm2, %v3817_v57  ;;  %10025 = vmatprep.subr.bf16.mxu1 %v16141_v6 }
 0x673   : > { %10015 = vmatprep.mubr.msk.bf16.mxu1 %vm11255_vm3, %v16141_v6 }
 0x674   : > { %v3800_v54 = vpop.f32.mrb[32].mxu0 }
 0x675   : > { %v3802_v35 = vpop.f32.mrb[33].mxu0 }
 0x676   : > { %v3803_v18 = vpop.f32.mrb[34].mxu0 }
 0x677   : > { %v4061_v46 = vpack.c.bf16 %v3803_v18, %v3800_v54  ;;  %v3805_v55 = vpop.f32.mrb[35].mxu0 }
 0x679   : > { %10026 = vmatpush3.bf16.msra.mxu1 %v4061_v46 }
 0x67a   : > { %10016 = vmatmul.mubr.msk.bf16.gmra.mrb[36].mxu1 %vm3063_vm2, %v3818_v38  ;;  %10027 = vmatprep.subr.bf16.mxu1 %v16141_v6 }
 0x67b   : > { %10029 = vmatprep.mubr.msk.bf16.mxu1 %vm11255_vm3, %v16141_v6 }
 0x67c   : > { %v3808_v42 = vpop.f32.mrb[36].mxu0 }
 0x67d   : > { %v4062_v40 = vpack.c.bf16 %v3808_v42, %v3808_v42  ;;  %v3810_v21 = vpop.f32.mrb[37].mxu0 }
 0x67e   : > { %v3811_v29 = vpop.f32.mrb[38].mxu0 }
 0x67f   : > { %v4080_v50 = vsel %vm4078_vm4, %v4062_v40, 0  ;;  %v3812_v62 = vpop.f32.mrb[39].mxu0 }
 0x680   : > { %10028 = vmatpush3.bf16.msra.mxu1 %v4080_v50 }
 0x681   : > { %4433 = vmatprep.subr.bf16.mxu1 %v16139_v1 }
 0x68c   : > { %v13812_v59 = vpop.f32.mrb[40].mxu0 }
 0x68d   : > { %v4300_v23 = vpop.f32.mrb[41].mxu0 }
 0x68e   : > { %v13814_v63 = vpop.f32.mrb[42].mxu0 }
 0x68f   : > { %v4303_v61 = vpop.f32.mrb[43].mxu0 }
 0x694   : > { %v13818_v60 = vpop.f32.mrb[44].mxu0 }
 0x695   : > { %v4308_v57 = vpop.f32.mrb[45].mxu0 }
 0x696   : > { %v13820_v41 = vpop.f32.mrb[46].mxu0 }
 0x697   : > { %v4311_v33 = vpop.f32.mrb[47].mxu0 }
 0x69c   : > { %v13824_v2 = vpop.f32.mrb[48].mxu0 }
 0x69d   : > { %v4316_v25 = vpop.f32.mrb[49].mxu0 }
 0x69e   : > { %v13826_v31 = vpop.f32.mrb[50].mxu0 }
 0x69f   : > { %v4319_v26 = vpop.f32.mrb[51].mxu0 }
 0x6a4   : > { %v13830_v3 = vpop.f32.mrb[52].mxu0 }
 0x6a5   : > { %v4324_v37 = vpop.f32.mrb[53].mxu0 }
 0x6a6   : > { %v13832_v17 = vpop.f32.mrb[54].mxu0 }
 0x6a7   : > { %v4327_v19 = vpop.f32.mrb[55].mxu0 }
 0x6ac   : > { %v13836_v49 = vpop.f32.mrb[56].mxu0 }
 0x6ad   : > { %v4332_v58 = vpop.f32.mrb[57].mxu0 }
 0x6ae   : > { %v4333_v4 = vpop.f32.mrb[58].mxu0 }
 0x6af   : > { %v4334_v8 = vpop.f32.mrb[59].mxu0 }
 0x6bc   : > { %v13838_v5 = vpop.f32.mrb[60].mxu0 }
 0x6bd   : > { %v4638_v14 = vpop.f32.mrb[61].mxu0 }
 0x6be   : > { %v13840_v34 = vpop.f32.mrb[62].mxu0 }
 0x6bf   : > { %v4641_v11 = vpop.f32.mrb[63].mxu0 }
 0x6c4   : > { %v13844_v56 = vpop.f32.mrb[64].mxu0 }
 0x6c5   : > { %v4646_v44 = vpop.f32.mrb[65].mxu0 }
 0x6c6   : > { %v13846_v53 = vpop.f32.mrb[66].mxu0 }
 0x6c7   : > { %v4649_v13 = vpop.f32.mrb[67].mxu0 }
 0x6cc   : > { %v13850_v12 = vpop.f32.mrb[68].mxu0 }
 0x6cd   : > { %v4654_v16 = vpop.f32.mrb[69].mxu0 }
 0x6ce   : > { %v13852_v10 = vpop.f32.mrb[70].mxu0 }
 0x6cf   : > { %v4657_v35 = vpop.f32.mrb[71].mxu0 }
 0x6d4   : > { %v13856_v18 = vpop.f32.mrb[72].mxu0 }
 0x6d5   : > { %v4662_v46 = vpop.f32.mrb[73].mxu0 }
 0x6d6   : > { %v13858_v55 = vpop.f32.mrb[74].mxu0  ;;  %v13946_v46 = vld [vmem:[%s16325_s13 + $0x28] sm:$0xff] }
 0x6d7   : > { %v4665_v42 = vpop.f32.mrb[75].mxu0 }
 0x6dc   : > { %v13862_v40 = vpop.f32.mrb[76].mxu0 }
 0x6dd   : > { %v4670_v21 = vpop.f32.mrb[77].mxu0 }
 0x6de   : > { %v4671_v29 = vpop.f32.mrb[78].mxu0 }
 0x6df   : > { %v4672_v50 = vpop.f32.mrb[79].mxu0 }
 0x6ec   : > { %v13864_v62 = vpop.f32.mrb[80].mxu0 }
 0x6ed   : > { %v5422_v23 = vpop.f32.mrb[81].mxu0 }
 0x6ee   : > { %v13866_v61 = vpop.f32.mrb[82].mxu0 }
 0x6ef   : > { %v5796_v57 = vpack.c.bf16 %v13866_v61, %v13864_v62  ;;  %v5425_v33 = vpop.f32.mrb[83].mxu0  ;;  %v13988_v62 = vld [vmem:[%s16325_s13 + $0x40] sm:$0xff] }
 0x6f4   : > { %v13870_v25 = vpop.f32.mrb[84].mxu0 }
 0x6f5   : > { %v5430_v26 = vpop.f32.mrb[85].mxu0 }
 0x6f6   : > { %v13872_v37 = vpop.f32.mrb[86].mxu0 }
 0x6f7   : > { %v5433_v58 = vpop.f32.mrb[87].mxu0 }
 0x6fc   : > { %v13876_v4 = vpop.f32.mrb[88].mxu0 }
 0x6fd   : > { %v5438_v8 = vpop.f32.mrb[89].mxu0 }
 0x6fe   : > { %v13878_v14 = vpop.f32.mrb[90].mxu0 }
 0x6ff   : > { %v5441_v44 = vpop.f32.mrb[91].mxu0  ;;  %v16328_v43 = vpack.c.bf16 %v13878_v14, %v13876_v4 }
 0x704   : > { %v13882_v13 = vpop.f32.mrb[92].mxu0 }
 0x705   : > { %v5446_v16 = vpop.f32.mrb[93].mxu0 }
 0x706   : > { %v13884_v35 = vpop.f32.mrb[94].mxu0 }
 0x707   : > { %v5449_v42 = vpop.f32.mrb[95].mxu0 }
 0x70c   : > { %v13888_v21 = vpop.f32.mrb[96].mxu0 }
 0x70d   : > { %v5454_v29 = vpop.f32.mrb[97].mxu0 }
 0x70e   : > { %v5455_v50 = vpop.f32.mrb[98].mxu0 }
 0x70f   : > { %v5456_v23 = vpop.f32.mrb[99].mxu0 }
 0x71c   : > { %v5589_v33 = vpop.f32.mrb[100].mxu0 }
 0x71d   : > { %v5591_v26 = vpop.f32.mrb[101].mxu0 }
 0x71e   : > { %v5592_v58 = vpop.f32.mrb[102].mxu0 }
 0x71f   : > { %v5801_v8 = vpack.c.bf16 %v5592_v58, %v5589_v33  ;;  %v5594_v32 = vpop.f32.mrb[103].mxu0 }
 0x720   : > { %v13897_v32 = vld [vmem:[%s16325_s13] sm:$0xff] }
 0x721   : > { %v5822_v44 = vsel %vm3063_vm2, %v5801_v8, 0 }
 0x722   : > { %10110 = vmatpush3.bf16.xpose.msra.mxu0 %v5822_v44 }
 0x723   : > { %10111 = vmatprep.subr.bf16.mxu0 %v16141_v6 }
 0x724   : > { %v5597_v16 = vpop.f32.mrb[104].mxu0 }
 0x725   : > { %v5599_v24 = vpop.f32.mrb[105].mxu0 }
 0x726   : > { %v5600_v38 = vpop.f32.mrb[106].mxu0 }
 0x727   : > { %v5802_v54 = vpack.c.bf16 %v5600_v38, %v5597_v16  ;;  %v5602_v42 = vpop.f32.mrb[107].mxu0 }
 0x729   : > { %v5825_v9 = vsel %vm3063_vm2, %v5802_v54, 0 }
 0x72a   : > { %10112 = vmatpush3.bf16.xpose.msra.mxu0 %v5825_v9  ;;  %v13902_v9 = vld [vmem:[%s16325_s13 + $0x8] sm:$0xff] }
 0x72b   : > { %10113 = vmatprep.subr.bf16.mxu0 %v16141_v6 }
 0x72c   : > { %v5605_v29 = vpop.f32.mrb[108].mxu0 }
 0x72d   : > { %v3888_v50 = vpop.f32.mrb[20].mxu1  ;;  %v5607_v23 = vpop.f32.mrb[109].mxu0 }
 0x72e   : > { %v3926_v33 = vmul.f32 0.125, %v3888_v50  ;;  %v10001_v26 = vpop.f32.mrb[21].mxu1  ;;  %v5608_v58 = vpop.f32.mrb[110].mxu0 }
 0x72f   : > { %v5803_v24 = vpack.c.bf16 %v5608_v58, %v5605_v29  ;;  %v3891_v8 = vpop.f32.mrb[22].mxu1  ;;  %v5610_v38 = vpop.f32.mrb[111].mxu0 }
 0x730   : > { %v3927_v54 = vmul.f32 0.125, %v3891_v8  ;;  %v10002_v44 = vpop.f32.mrb[23].mxu1  ;;  %v13905_v16 = vadd.f32 %v13897_v32, %v3926_v33 }
 0x731   : > { %v5828_v42 = vsel %vm3063_vm2, %v5803_v24, 0  ;;  %v13919_v24 = vld [vmem:[%s16325_s13 + $0x10] sm:$0xff] }
 0x732   : > { %10114 = vmatpush3.bf16.xpose.msra.mxu0 %v5828_v42  ;;  %v3954_v50 = vsel %vm3953_vm5, %v13905_v16, -inf  ;;  %v13911_v29 = vadd.f32 %v13902_v9, %v3927_v54 }
 0x733   : > { %3955 = vmax.xlane.f32.xlu0 %v3954_v50  ;;  %10115 = vmatprep.subr.bf16.mxu0 %v16141_v6 }
 0x734   : > { %v5613_v23 = vpop.f32.mrb[112].mxu0  ;;  %v3957_v26 = vsel %vm3953_vm5, %v13911_v29, -inf }
 0x735   : > { %3958 = vmax.xlane.f32.xlu1 %v3957_v26  ;;  %v3896_v58 = vpop.f32.mrb[24].mxu1  ;;  %v5615_v33 = vpop.f32.mrb[113].mxu0 }
 0x736   : > { %v3928_v8 = vmul.f32 0.125, %v3896_v58  ;;  %v10005_v38 = vpop.f32.mrb[25].mxu1  ;;  %v5616_v44 = vpop.f32.mrb[114].mxu0 }
 0x737   : > { %v5804_v54 = vpack.c.bf16 %v5616_v44, %v5613_v23  ;;  %v3899_v42 = vpop.f32.mrb[26].mxu1  ;;  %v5618_v50 = vpop.f32.mrb[115].mxu0 }
 0x738   : > { %v3929_v45 = vmul.f32 0.125, %v3899_v42  ;;  %v10006_v26 = vpop.f32.mrb[27].mxu1  ;;  %v13927_v33 = vadd.f32 %v13919_v24, %v3928_v8 }
 0x739   : > { %v5831_v52 = vsel %vm3063_vm2, %v5804_v54, 0 }
 0x73a   : > { %10116 = vmatpush3.bf16.xpose.msra.mxu0 %v5831_v52  ;;  %v3960_v58 = vsel %vm3953_vm5, %v13927_v33, -inf  ;;  %v13933_v23 = vadd.f32 %v13924_v51, %v3929_v45  ;;  %v13941_v52 = vld [vmem:[%s16325_s13 + $0x20] sm:$0xff] }
 0x73b   : > { %3961 = vmax.xlane.f32.xlu0 %v3960_v58  ;;  %10117 = vmatprep.subr.bf16.mxu0 %v16141_v6 }
 0x73c   : > { %v5621_v38 = vpop.f32.mrb[116].mxu0  ;;  %v3963_v44 = vsel %vm3953_vm5, %v13933_v23, -inf }
 0x73d   : > { %v5805_v42 = vpack.c.bf16 %v5621_v38, %v5621_v38  ;;  %3964 = vmax.xlane.f32.xlu1 %v3963_v44  ;;  %v3904_v8 = vpop.f32.mrb[28].mxu1  ;;  %v5623_v50 = vpop.f32.mrb[117].mxu0 }
 0x73e   : > { %v3930_v54 = vmul.f32 0.125, %v3904_v8  ;;  %v10009_v26 = vpop.f32.mrb[29].mxu1  ;;  %v5624_v45 = vpop.f32.mrb[118].mxu0 }
 0x73f   : > { %v3907_v1 = vpop.f32.mrb[30].mxu1  ;;  %v5625_v58 = vpop.f32.mrb[119].mxu0  ;;  %v5834_v50 = vsel %vm3063_vm2, %v5805_v42, 0 }
 0x740   : > { %v3931_v11 = vmul.f32 0.125, %v3907_v1  ;;  %v10010_v38 = vpop.f32.mrb[31].mxu1  ;;  %v13949_v44 = vadd.f32 %v13941_v52, %v3930_v54  ;;  %v13962_v1 = vld [vmem:[%s16325_s13 + $0x30] sm:$0xff] }
 0x742   : > { %10118 = vmatpush3.bf16.xpose.msra.mxu0 %v5834_v50  ;;  %v3966_v8 = vsel %vm3953_vm5, %v13949_v44, -inf  ;;  %v13955_v26 = vadd.f32 %v13946_v46, %v3931_v11  ;;  %v13967_v50 = vld [vmem:[%s16325_s13 + $0x38] sm:$0xff] }
 0x743   : > { %3967 = vmax.xlane.f32.xlu0 %v3966_v8 }
 0x744   : > { %v3969_v45 = vsel %vm3953_vm5, %v13955_v26, -inf }
 0x745   : > { %3970 = vmax.xlane.f32.xlu1 %v3969_v45  ;;  %v3912_v58 = vpop.f32.mrb[32].mxu1 }
 0x746   : > { %v3932_v54 = vmul.f32 0.125, %v3912_v58  ;;  %v10013_v42 = vpop.f32.mrb[33].mxu1 }
 0x747   : > { %v3915_v38 = vpop.f32.mrb[34].mxu1 }
 0x748   : > { %v3933_v11 = vmul.f32 0.125, %v3915_v38  ;;  %v10014_v8 = vpop.f32.mrb[35].mxu1  ;;  %v13970_v19 = vadd.f32 %v13962_v1, %v3932_v54 }
 0x749   : > { %10120 = vmatmul.mubr.msk.bf16.vlgmr.msra.gmra.mrb[120].mxu0 %vm3063_vm2, %v5796_v57 }
 0x74a   : > { %v3972_v45 = vsel %vm3953_vm5, %v13970_v19, -inf  ;;  %v13979_v58 = vadd.f32 %v13967_v50, %v3933_v11  ;;  %10123 = vmatprep.mubr.msk.bf16.mxu0 %vm11255_vm3, %v16141_v6  ;;  %v16326_v6 = vpack.c.bf16 %v13872_v37, %v13870_v25 }
 0x74b   : > { %3973 = vmax.xlane.f32.xlu0 %v3972_v45 }
 0x74c   : > { %v3975_v42 = vsel %vm3953_vm5, %v13979_v58, -inf }
 0x74d   : > { %3976 = vmax.xlane.f32.xlu1 %v3975_v42  ;;  %v3920_v54 = vpop.f32.mrb[36].mxu1  ;;  %v16327_v42 = vmov 0.0  }
 0x74e   : > { %v3934_v61 = vmul.f32 0.125, %v3920_v54  ;;  %v10017_v57 = vpop.f32.mrb[37].mxu1  ;;  %v16329_v54 = vpack.c.bf16 %v13884_v35, %v13882_v13 }
 0x74f   : > { %v3923_v38 = vpop.f32.mrb[38].mxu1 }
 0x750   : > { %v10018_v8 = vpop.f32.mrb[39].mxu1  ;;  %v3952_v11 = vadd.f32 %v13988_v62, %v3934_v61 }
 0x751   : > { %10124 = vmatmul.mubr.msk.bf16.gmra.mrb[124].mxu0 %vm3063_vm2, %v16326_v6  ;;  %v5800_v6 = vpack.c.bf16 %v13888_v21, %v13888_v21 }
 0x752   : > { %v3978_v45 = vsel %vm3953_vm5, %v3952_v11, -inf  ;;  %10127 = vmatprep.mubr.msk.bf16.mxu0 %vm11255_vm3, %v16327_v42 }
 0x753   : > { %3979 = vmax.xlane.f32.xlu0 %v3978_v45 }
 0x759   : > { %10128 = vmatmul.mubr.msk.bf16.gmra.mrb[128].mxu0 %vm3063_vm2, %v16328_v43 }
 0x75a   : > { %10131 = vmatprep.mubr.msk.bf16.mxu0 %vm11255_vm3, %v16327_v42 }
 0x761   : > { %10132 = vmatmul.mubr.msk.bf16.gmra.mrb[132].mxu0 %vm3063_vm2, %v16329_v54 }
 0x762   : > { %10135 = vmatprep.mubr.msk.bf16.mxu0 %vm11255_vm3, %v16327_v42 }
 0x769   : > { %10136 = vmatmul.mubr.msk.bf16.gmra.mrb[136].mxu0 %vm3063_vm2, %v5800_v6 }
 0x7c0   : > { %v3956_v25 = vpop.xlane.xlu0 %3955 }
 0x7c1   : > { %v3981_v37 = vsub.f32 %v13905_v16, %v3956_v25 }
 0x7c2   : > { %v3959_v43 = vpop.xlane.xlu1 %3958 }
 0x7c3   : > { %v3990_v4 = vmul.f32 1.442695, %v3981_v37  ;;  %v3982_v14 = vsub.f32 %v13911_v29, %v3959_v43 }
 0x7c5   : > { %10955 = vpow2.f32 %v3990_v4  ;;  %v3992_v61 = vmul.f32 1.442695, %v3982_v14 }
 0x7c7   : > { %10957 = vpow2.f32 %v3992_v61 }
 0x7c8   : > { %v3962_v13 = vpop.xlane.xlu0 %3961 }
 0x7c9   : > { %v3983_v35 = vsub.f32 %v13927_v33, %v3962_v13 }
 0x7ca   : > { %v3965_v57 = vpop.xlane.xlu1 %3964 }
 0x7cb   : > { %v3994_v38 = vmul.f32 1.442695, %v3983_v35  ;;  %v3984_v8 = vsub.f32 %v13933_v23, %v3965_v57 }
 0x7cd   : > { %10959 = vpow2.f32 %v3994_v38  ;;  %v3996_v21 = vmul.f32 1.442695, %v3984_v8 }
 0x7cf   : > { %v14017_v45 = vpop.eup %10955  ;;  %10961 = vpow2.f32 %v3996_v21 }
 0x7d0   : > { %v3968_v16 = vpop.xlane.xlu0 %3967  ;;  %v4008_v54 = vsel %vm3953_vm5, %v14017_v45, 0.0 }
 0x7d1   : > { %v14021_v29 = vpop.eup %10957  ;;  %v3985_v6 = vsub.f32 %v13949_v44, %v3968_v16  ;;  %4009 = vadd.xlane.f32.xlu1 %v4008_v54 }
 0x7d2   : > { %v3971_v25 = vpop.xlane.xlu1 %3970  ;;  %v4011_v33 = vsel %vm3953_vm5, %v14021_v29, 0.0 }
 0x7d3   : > { %v3998_v37 = vmul.f32 1.442695, %v3985_v6  ;;  %v3986_v23 = vsub.f32 %v13955_v26, %v3971_v25  ;;  %4012 = vadd.xlane.f32.xlu0 %v4011_v33 }
 0x7d5   : > { %10963 = vpow2.f32 %v3998_v37  ;;  %v4000_v43 = vmul.f32 1.442695, %v3986_v23 }
 0x7d7   : > { %v14027_v4 = vpop.eup %10959  ;;  %10965 = vpow2.f32 %v4000_v43 }
 0x7d8   : > { %v3974_v14 = vpop.xlane.xlu0 %3973  ;;  %v4014_v61 = vsel %vm3953_vm5, %v14027_v4, 0.0 }
 0x7d9   : > { %v14031_v13 = vpop.eup %10961  ;;  %v3987_v44 = vsub.f32 %v13970_v19, %v3974_v14  ;;  %4015 = vadd.xlane.f32.xlu1 %v4014_v61 }
 0x7da   : > { %v3977_v35 = vpop.xlane.xlu1 %3976  ;;  %v4017_v57 = vsel %vm3953_vm5, %v14031_v13, 0.0 }
 0x7db   : > { %v4002_v26 = vmul.f32 1.442695, %v3987_v44  ;;  %v3988_v38 = vsub.f32 %v13979_v58, %v3977_v35  ;;  %4018 = vadd.xlane.f32.xlu0 %v4017_v57 }
 0x7dd   : > { %10967 = vpow2.f32 %v4002_v26  ;;  %v4004_v8 = vmul.f32 1.442695, %v3988_v38 }
 0x7df   : > { %v14037_v21 = vpop.eup %10963  ;;  %10969 = vpow2.f32 %v4004_v8 }
 0x7e0   : > { %v3980_v16 = vpop.xlane.xlu0 %3979  ;;  %v4020_v54 = vsel %vm3953_vm5, %v14037_v21, 0.0 }
 0x7e1   : > { %v14041_v6 = vpop.eup %10965  ;;  %v3989_v19 = vsub.f32 %v3952_v11, %v3980_v16  ;;  %4021 = vadd.xlane.f32.xlu1 %v4020_v54 }
 0x7e2   : > { %v4023_v25 = vsel %vm3953_vm5, %v14041_v6, 0.0 }
 0x7e3   : > { %v4006_v33 = vmul.f32 1.442695, %v3989_v19  ;;  %4024 = vadd.xlane.f32.xlu0 %v4023_v25 }
 0x7e5   : > { %10971 = vpow2.f32 %v4006_v33 }
 0x7e7   : > { %v14045_v58 = vpop.eup %10967 }
 0x7e8   : > { %v4026_v37 = vsel %vm3953_vm5, %v14045_v58, 0.0 }
 0x7e9   : > { %v14049_v23 = vpop.eup %10969  ;;  %4027 = vadd.xlane.f32.xlu1 %v4026_v37 }
 0x7ea   : > { %v4029_v43 = vsel %vm3953_vm5, %v14049_v23, 0.0 }
 0x7eb   : > { %4030 = vadd.xlane.f32.xlu0 %v4029_v43 }
 0x7ef   : > { %v14053_v11 = vpop.eup %10971 }
 0x7f0   : > { %v4032_v14 = vsel %vm3953_vm5, %v14053_v11, 0.0 }
 0x7f1   : > { %4033 = vadd.xlane.f32.xlu1 %v4032_v14 }
 0x81c   : > { %v14057_v61 = vpop.f32.mrb[120].mxu0 }
 0x81d   : > { %v10121_v44 = vpop.f32.mrb[121].mxu0 }
 0x81e   : > { %v14059_v35 = vpop.f32.mrb[122].mxu0 }
 0x81f   : > { %v10122_v57 = vpop.f32.mrb[123].mxu0 }
 0x824   : > { %v14061_v26 = vpop.f32.mrb[124].mxu0 }
 0x825   : > { %v10125_v38 = vpop.f32.mrb[125].mxu0 }
 0x826   : > { %v14063_v8 = vpop.f32.mrb[126].mxu0 }
 0x827   : > { %16330 = vst [vmem:[#allocation44_spill] sm:$0xff] %v14063_v8  ;;  %v10126_v16 = vpop.f32.mrb[127].mxu0 }
 0x82c   : > { %v14065_v54 = vpop.f32.mrb[128].mxu0 }
 0x82d   : > { %v10129_v19 = vpop.f32.mrb[129].mxu0 }
 0x82e   : > { %v14067_v25 = vpop.f32.mrb[130].mxu0 }
 0x82f   : > { %16331 = vst [vmem:[#allocation45_spill] sm:$0xff] %v14067_v25  ;;  %v10130_v33 = vpop.f32.mrb[131].mxu0 }
 0x834   : > { %v14069_v37 = vpop.f32.mrb[132].mxu0 }
 0x835   : > { %v10133_v43 = vpop.f32.mrb[133].mxu0 }
 0x836   : > { %v14071_v14 = vpop.f32.mrb[134].mxu0 }
 0x837   : > { %16332 = vst [vmem:[#allocation46_spill] sm:$0xff] %v14071_v14  ;;  %v10134_v44 = vpop.f32.mrb[135].mxu0 }
 0x83c   : > { %v14073_v36 = vpop.f32.mrb[136].mxu0 }
 0x83d   : > { %16333 = vst [vmem:[#allocation47_spill] sm:$0xff] %v14073_v36  ;;  %v10137_v57 = vpop.f32.mrb[137].mxu0  ;;  %v10625_v36 = vld [vmem:[%s11429_s25 + $0x60] sm:$0xff]  }
 0x83e   : > { %v5905_v38 = vpop.f32.mrb[138].mxu0 }
 0x83f   : > { %v10138_v15 = vpop.f32.mrb[139].mxu0 }
 0x85e   : > { %v4010_v8 = vpop.xlane.xlu1 %4009 }
 0x85f   : > { %10973 = vrcp.f32 %v4010_v8 }
 0x860   : > { %v4013_v16 = vpop.xlane.xlu0 %4012 }
 0x861   : > { %10975 = vrcp.f32 %v4013_v16  ;;  %v10626_v16 = vld [vmem:[%s11429_s25 + $0x68] sm:$0xff]  }
 0x866   : > { %v4016_v19 = vpop.xlane.xlu1 %4015 }
 0x867   : > { %10977 = vrcp.f32 %v4016_v19  ;;  %v16334_v19 = vmov 0  }
 0x868   : > { %v4019_v33 = vpop.xlane.xlu0 %4018 }
 0x869   : > { %v10974_v25 = vpop.eup %10973  ;;  %10979 = vrcp.f32 %v4019_v33 }
 0x86a   : > { %v4044_v14 = vmul.f32 %v10974_v25, %v14017_v45 }
 0x86b   : > { %v10976_v43 = vpop.eup %10975 }
 0x86c   : > { %v4045_v44 = vmul.f32 %v10976_v43, %v14021_v29 }
 0x86e   : > { %v4053_v57 = vpack.c.bf16 %v4045_v44, %v4044_v14  ;;  %v4022_v38 = vpop.xlane.xlu1 %4021  ;;  %v10627_v14 = vld [vmem:[%s11429_s25 + $0x70] sm:$0xff]  }
 0x86f   : > { %10981 = vrcp.f32 %v4022_v38 }
 0x870   : > { %v4025_v15 = vpop.xlane.xlu0 %4024  ;;  %10030 = vmatmul.mubr.msk.bf16.vlgmr.msra.gmra.mrb[40].mxu1 %vm3953_vm5, %v4053_v57  ;;  %v10628_v57 = vld [vmem:[%s11429_s25 + $0x78] sm:$0xff]  }
 0x871   : > { %v10978_v8 = vpop.eup %10977  ;;  %10983 = vrcp.f32 %v4025_v15  ;;  %4434 = vmatpush1.bf16.msra.mxu1 %v10625_v36  ;;  %10033 = vmatprep.mubr.msk.bf16.mxu1 %vm11255_vm3, %v16327_v42  ;;  %v10629_v15 = vld [vmem:[%s11429_s25 + $0x80] sm:$0xff]  }
 0x872   : > { %4435 = vmatprep.subr.bf16.mxu1 %v16334_v19  ;;  %v4046_v29 = vmul.f32 %v10978_v8, %v14027_v4 }
 0x873   : > { %v10980_v45 = vpop.eup %10979 }
 0x874   : > { %v4047_v25 = vmul.f32 %v10980_v45, %v14031_v13 }
 0x875   : > { %4436 = vmatpush1.bf16.msra.mxu1 %v10626_v16 }
 0x876   : > { %v4028_v33 = vpop.xlane.xlu1 %4027  ;;  %4437 = vmatprep.subr.bf16.mxu1 %v16334_v19  ;;  %v4054_v43 = vpack.c.bf16 %v4047_v25, %v4046_v29  ;;  %v10630_v29 = vld [vmem:[%s11429_s25 + $0x88] sm:$0xff]  }
 0x877   : > { %10985 = vrcp.f32 %v4028_v33 }
 0x878   : > { %v4031_v36 = vpop.xlane.xlu0 %4030  ;;  %10034 = vmatmul.mubr.msk.bf16.gmra.mrb[44].mxu1 %vm3953_vm5, %v4054_v43 }
 0x879   : > { %v10982_v44 = vpop.eup %10981  ;;  %10987 = vrcp.f32 %v4031_v36  ;;  %4438 = vmatpush1.bf16.msra.mxu1 %v10627_v14  ;;  %10037 = vmatprep.mubr.msk.bf16.mxu1 %vm11255_vm3, %v16327_v42  ;;  %v10631_v14 = vld [vmem:[%s11429_s25 + $0x90] sm:$0xff]   ;;  %v10632_v36 = vld [vmem:[%s11429_s25 + $0x98] sm:$0xff]  }
 0x87a   : > { %4439 = vmatprep.subr.bf16.mxu1 %v16334_v19  ;;  %v4048_v13 = vmul.f32 %v10982_v44, %v14037_v21 }
 0x87b   : > { %v10984_v4 = vpop.eup %10983 }
 0x87c   : > { %v4049_v38 = vmul.f32 %v10984_v4, %v14041_v6  ;;  %v10635_v4 = vld [vmem:[%s11429_s25 + $0xb0] sm:$0xff]  }
 0x87d   : > { %4440 = vmatpush1.bf16.msra.mxu1 %v10628_v57  ;;  %v10634_v57 = vld [vmem:[%s11429_s25 + $0xa8] sm:$0xff]  }
 0x87e   : > { %v4034_v8 = vpop.xlane.xlu1 %4033  ;;  %4441 = vmatprep.subr.bf16.mxu1 %v16334_v19  ;;  %v4055_v16 = vpack.c.bf16 %v4049_v38, %v4048_v13 }
 0x87f   : > { %10989 = vrcp.f32 %v4034_v8 }
 0x880   : > { %10038 = vmatmul.mubr.msk.bf16.gmra.mrb[48].mxu1 %vm3953_vm5, %v4055_v16 }
 0x881   : > { %v10986_v45 = vpop.eup %10985  ;;  %4442 = vmatpush1.bf16.msra.mxu1 %v10629_v15  ;;  %10041 = vmatprep.mubr.msk.bf16.mxu1 %vm11255_vm3, %v16327_v42 }
 0x882   : > { %4443 = vmatprep.subr.bf16.mxu1 %v16334_v19  ;;  %v4050_v6 = vmul.f32 %v10986_v45, %v14045_v58 }
 0x883   : > { %v10988_v21 = vpop.eup %10987 }
 0x884   : > { %v4051_v25 = vmul.f32 %v10988_v21, %v14049_v23  ;;  %v10633_v23 = vld [vmem:[%s11429_s25 + $0xa0] sm:$0xff]  }
 0x885   : > { %4444 = vmatpush1.bf16.msra.mxu1 %v10630_v29 }
 0x886   : > { %4445 = vmatprep.subr.bf16.mxu1 %v16334_v19  ;;  %v4056_v33 = vpack.c.bf16 %v4051_v25, %v4050_v6 }
 0x888   : > { %10042 = vmatmul.mubr.msk.bf16.gmra.mrb[52].mxu1 %vm3953_vm5, %v4056_v33 }
 0x889   : > { %v10990_v43 = vpop.eup %10989  ;;  %4446 = vmatpush1.bf16.msra.mxu1 %v10631_v14  ;;  %10045 = vmatprep.mubr.msk.bf16.mxu1 %vm11255_vm3, %v16327_v42 }
 0x88a   : > { %4447 = vmatprep.subr.bf16.mxu1 %v16334_v19  ;;  %v4052_v58 = vmul.f32 %v10990_v43, %v14053_v11  ;;  %v10636_v11 = vld [vmem:[%s11429_s25 + $0xb8] sm:$0xff]  }
 0x88c   : > { %v4057_v44 = vpack.c.bf16 %v4052_v58, %v4052_v58 }
 0x88d   : > { %4448 = vmatpush1.bf16.msra.mxu1 %v10632_v36 }
 0x88e   : > { %4449 = vmatprep.subr.bf16.mxu1 %v16334_v19 }
 0x890   : > { %10046 = vmatmul.mubr.msk.bf16.gmra.mrb[56].mxu1 %vm3953_vm5, %v4057_v44 }
 0x891   : > { %4450 = vmatpush1.bf16.msra.mxu1 %v10633_v23  ;;  %9496 = vmatprep.mubr.msk.bf16.mxu1 %vm3063_vm2, %v13466_v39 }
 0x892   : > { %4451 = vmatprep.subr.bf16.mxu1 %v16334_v19 }
 0x895   : > { %4452 = vmatpush1.bf16.msra.mxu1 %v10634_v57 }
 0x896   : > { %4453 = vmatprep.subr.bf16.mxu1 %v16334_v19 }
 0x899   : > { %4454 = vmatpush1.bf16.msra.mxu1 %v10635_v4 }
 0x89a   : > { %4455 = vmatprep.subr.bf16.mxu1 %v16334_v19 }
 0x89d   : > { %4456 = vmatpush1.bf16.msra.mxu1 %v10636_v11 }
 0x89e   : > { %10049 = vmatprep.subr.bf16.mxu1 %v16327_v42 }
 0x8a0   : > { %4466 = vmatmul.mubr.bf16.vlgmr.msra.gmra.mrb[60].mxu1 %v13464_v0 }
 0x8a1   : > { %9497 = vmatprep.mubr.msk.bf16.mxu1 %vm3063_vm2, %v13482_v48 }
 0x8a8   : > { %4474 = vmatmul.mubr.bf16.gmra.mrb[64].mxu1 %v13500_v30 }
 0x8a9   : > { %9498 = vmatprep.mubr.msk.bf16.mxu1 %vm3063_vm2, %v13504_v22 }
 0x8b0   : > { %4482 = vmatmul.mubr.bf16.gmra.mrb[68].mxu1 %v13525_v27 }
 0x8b1   : > { %9499 = vmatprep.mubr.msk.bf16.mxu1 %vm3063_vm2, %v13530_v7 }
 0x8b8   : > { %4490 = vmatmul.mubr.bf16.gmra.mrb[72].mxu1 %v13547_v28 }
 0x8b9   : > { %9500 = vmatprep.mubr.msk.bf16.mxu1 %vm3063_vm2, %v13550_v47 }
 0x8c0   : > { %4498 = vmatmul.mubr.bf16.gmra.mrb[76].mxu1 %v13562_v20 }
 0x8c1   : > { %10059 = vmatprep.mubr.msk.bf16.mxu1 %vm11255_vm3, %v16327_v42 }
 0x943   : > { %v14138_v13 = vpop.f32.mrb[40].mxu1 }
 0x944   : > { %v10031_v38 = vpop.f32.mrb[41].mxu1 }
 0x945   : > { %v14140_v15 = vpop.f32.mrb[42].mxu1 }
 0x946   : > { %v10032_v16 = vpop.f32.mrb[43].mxu1 }
 0x94b   : > { %v14144_v45 = vpop.f32.mrb[44].mxu1 }
 0x94c   : > { %v10035_v29 = vpop.f32.mrb[45].mxu1 }
 0x94d   : > { %v14146_v21 = vpop.f32.mrb[46].mxu1 }
 0x94e   : > { %v10036_v25 = vpop.f32.mrb[47].mxu1 }
 0x953   : > { %v14150_v14 = vpop.f32.mrb[48].mxu1 }
 0x954   : > { %v10039_v33 = vpop.f32.mrb[49].mxu1 }
 0x955   : > { %v14152_v43 = vpop.f32.mrb[50].mxu1 }
 0x956   : > { %v10040_v58 = vpop.f32.mrb[51].mxu1 }
 0x95b   : > { %v14156_v23 = vpop.f32.mrb[52].mxu1 }
 0x95c   : > { %v10043_v44 = vpop.f32.mrb[53].mxu1 }
 0x95d   : > { %v14158_v57 = vpop.f32.mrb[54].mxu1 }
 0x95e   : > { %v10044_v11 = vpop.f32.mrb[55].mxu1 }
 0x963   : > { %v14162_v38 = vpop.f32.mrb[56].mxu1 }
 0x964   : > { %v10047_v16 = vpop.f32.mrb[57].mxu1 }
 0x965   : > { %v4151_v29 = vpop.f32.mrb[58].mxu1 }
 0x966   : > { %v10048_v25 = vpop.f32.mrb[59].mxu1 }
 0x973   : > { %v4467_v33 = vpop.f32.mrb[60].mxu1 }
 0x974   : > { %v4469_v6 = vpop.f32.mrb[61].mxu1 }
 0x975   : > { %v4470_v8 = vpop.f32.mrb[62].mxu1 }
 0x976   : > { %v4679_v20 = vpack.c.bf16 %v4470_v8, %v4467_v33  ;;  %v4472_v36 = vpop.f32.mrb[63].mxu1 }
 0x978   : > { %v4700_v58 = vsel %vm3063_vm2, %v4679_v20, 0 }
 0x979   : > { %10050 = vmatpush3.bf16.xpose.msra.mxu1 %v4700_v58 }
 0x97a   : > { %10051 = vmatprep.subr.bf16.mxu1 %v16327_v42 }
 0x97b   : > { %v4475_v44 = vpop.f32.mrb[64].mxu1 }
 0x97c   : > { %v4477_v47 = vpop.f32.mrb[65].mxu1 }
 0x97d   : > { %v4478_v28 = vpop.f32.mrb[66].mxu1 }
 0x97e   : > { %v4680_v4 = vpack.c.bf16 %v4478_v28, %v4475_v44  ;;  %v4480_v11 = vpop.f32.mrb[67].mxu1 }
 0x980   : > { %v4703_v7 = vsel %vm3063_vm2, %v4680_v4, 0 }
 0x981   : > { %10052 = vmatpush3.bf16.xpose.msra.mxu1 %v4703_v7 }
 0x982   : > { %10053 = vmatprep.subr.bf16.mxu1 %v16327_v42 }
 0x983   : > { %v4483_v16 = vpop.f32.mrb[68].mxu1 }
 0x984   : > { %v4485_v6 = vpop.f32.mrb[69].mxu1 }
 0x985   : > { %v4486_v29 = vpop.f32.mrb[70].mxu1 }
 0x986   : > { %v4681_v8 = vpack.c.bf16 %v4486_v29, %v4483_v16  ;;  %v4488_v36 = vpop.f32.mrb[71].mxu1 }
 0x987   : > { %v16336_v36 = vpack.c.bf16 %v13840_v34, %v13838_v5  ;;  %v4912_v5 = vpack.c.bf16 %v13862_v40, %v13862_v40  ;;  %v16340_v34 = vpack.c.bf16 %v13858_v55, %v13856_v18 }
 0x988   : > { %v4706_v20 = vsel %vm3063_vm2, %v4681_v8, 0  ;;  %v16335_v8 = vpack.c.bf16 %v13814_v63, %v13812_v59  ;;  %v16338_v59 = vpack.c.bf16 %v13820_v41, %v13818_v60  ;;  %v16339_v63 = vpack.c.bf16 %v13852_v10, %v13850_v12 }
 0x989   : > { %10054 = vmatpush3.bf16.xpose.msra.mxu1 %v4706_v20  ;;  %v16337_v20 = vpack.c.bf16 %v13846_v53, %v13844_v56  ;;  %v4929_v60 = vsel %vm4078_vm4, %v4912_v5, 0  ;;  %v16341_v41 = vpack.c.bf16 %v13826_v31, %v13824_v2  ;;  %v16342_v56 = vpack.c.bf16 %v13832_v17, %v13830_v3 }
 0x98a   : > { %10055 = vmatprep.subr.bf16.mxu1 %v16327_v42  ;;  %v4678_v53 = vpack.c.bf16 %v13836_v49, %v13836_v49 }
 0x98b   : > { %v4491_v25 = vpop.f32.mrb[72].mxu1 }
 0x98c   : > { %v4493_v47 = vpop.f32.mrb[73].mxu1 }
 0x98d   : > { %v4494_v33 = vpop.f32.mrb[74].mxu1 }
 0x98e   : > { %v4682_v28 = vpack.c.bf16 %v4494_v33, %v4491_v25  ;;  %v4496_v58 = vpop.f32.mrb[75].mxu1 }
 0x990   : > { %v4709_v4 = vsel %vm3063_vm2, %v4682_v28, 0 }
 0x991   : > { %10056 = vmatpush3.bf16.xpose.msra.mxu1 %v4709_v4 }
 0x992   : > { %10057 = vmatprep.subr.bf16.mxu1 %v16327_v42 }
 0x993   : > { %v4499_v7 = vpop.f32.mrb[76].mxu1 }
 0x994   : > { %v4683_v44 = vpack.c.bf16 %v4499_v7, %v4499_v7  ;;  %v4501_v11 = vpop.f32.mrb[77].mxu1 }
 0x995   : > { %v4502_v16 = vpop.f32.mrb[78].mxu1 }
 0x996   : > { %v4503_v6 = vpop.f32.mrb[79].mxu1  ;;  %v4712_v29 = vsel %vm3063_vm2, %v4683_v44, 0 }
 0x999   : > { %10058 = vmatpush3.bf16.xpose.msra.mxu1 %v4712_v29 }
 0x99a   : > { %10079 = vmatprep.subr.bf16.mxu1 %v16327_v42 }
 0x9a0   : > { %10060 = vmatmul.mubr.msk.bf16.vlgmr.msra.gmra.mrb[80].mxu1 %vm3063_vm2, %v16335_v8 }
 0x9a1   : > { %10080 = vmatpush3.bf16.msra.mxu1 %v16336_v36  ;;  %10063 = vmatprep.mubr.msk.bf16.mxu1 %vm11255_vm3, %v16327_v42 }
 0x9a2   : > { %10081 = vmatprep.subr.bf16.mxu1 %v16327_v42 }
 0x9a5   : > { %10082 = vmatpush3.bf16.msra.mxu1 %v16337_v20 }
 0x9a6   : > { %10083 = vmatprep.subr.bf16.mxu1 %v16327_v42 }
 0x9a8   : > { %10064 = vmatmul.mubr.msk.bf16.gmra.mrb[84].mxu1 %vm3063_vm2, %v16338_v59 }
 0x9a9   : > { %10084 = vmatpush3.bf16.msra.mxu1 %v16339_v63  ;;  %10067 = vmatprep.mubr.msk.bf16.mxu1 %vm11255_vm3, %v16327_v42 }
 0x9aa   : > { %10085 = vmatprep.subr.bf16.mxu1 %v16327_v42 }
 0x9ad   : > { %10086 = vmatpush3.bf16.msra.mxu1 %v16340_v34 }
 0x9ae   : > { %10087 = vmatprep.subr.bf16.mxu1 %v16327_v42 }
 0x9b0   : > { %10068 = vmatmul.mubr.msk.bf16.gmra.mrb[88].mxu1 %vm3063_vm2, %v16341_v41 }
 0x9b1   : > { %10088 = vmatpush3.bf16.msra.mxu1 %v4929_v60  ;;  %10071 = vmatprep.mubr.msk.bf16.mxu1 %vm11255_vm3, %v16327_v42 }
 0x9b8   : > { %10072 = vmatmul.mubr.msk.bf16.gmra.mrb[92].mxu1 %vm3063_vm2, %v16342_v56 }
 0x9b9   : > { %10075 = vmatprep.mubr.msk.bf16.mxu1 %vm11255_vm3, %v16327_v42 }
 0x9c0   : > { %10076 = vmatmul.mubr.msk.bf16.gmra.mrb[96].mxu1 %vm3063_vm2, %v4678_v53 }
 0x9c1   : > { %10089 = vmatprep.mubr.msk.bf16.mxu1 %vm11255_vm3, %v16327_v42 }
 0xa73   : > { %v4748_v2 = vpop.f32.mrb[80].mxu1 }
 0xa74   : > { %v4786_v31 = vmul.f32 0.125, %v4748_v2  ;;  %v10061_v12 = vpop.f32.mrb[81].mxu1 }
 0xa75   : > { %v4751_v10 = vpop.f32.mrb[82].mxu1 }
 0xa76   : > { %v4787_v18 = vmul.f32 0.125, %v4751_v10  ;;  %v10062_v55 = vpop.f32.mrb[83].mxu1  ;;  %v4795_v3 = vadd.f32 %v4786_v31, %v13897_v32 }
 0xa78   : > { %v4804_v17 = vsel %vm3953_vm5, %v4795_v3, -inf  ;;  %v4796_v40 = vadd.f32 %v4787_v18, %v13902_v9 }
 0xa79   : > { %4805 = vmax.xlane.f32.xlu0 %v4804_v17 }
 0xa7a   : > { %v4807_v49 = vsel %vm3953_vm5, %v4796_v40, -inf }
 0xa7b   : > { %4808 = vmax.xlane.f32.xlu1 %v4807_v49  ;;  %v4756_v25 = vpop.f32.mrb[84].mxu1 }
 0xa7c   : > { %v4788_v47 = vmul.f32 0.125, %v4756_v25  ;;  %v10065_v33 = vpop.f32.mrb[85].mxu1 }
 0xa7d   : > { %v4759_v28 = vpop.f32.mrb[86].mxu1 }
 0xa7e   : > { %v4789_v58 = vmul.f32 0.125, %v4759_v28  ;;  %v10066_v4 = vpop.f32.mrb[87].mxu1  ;;  %v4797_v7 = vadd.f32 %v4788_v47, %v13919_v24 }
 0xa80   : > { %v4810_v44 = vsel %vm3953_vm5, %v4797_v7, -inf  ;;  %v4798_v11 = vadd.f32 %v4789_v58, %v13924_v51 }
 0xa81   : > { %4811 = vmax.xlane.f32.xlu0 %v4810_v44 }
 0xa82   : > { %v4813_v16 = vsel %vm3953_vm5, %v4798_v11, -inf }
 0xa83   : > { %4814 = vmax.xlane.f32.xlu1 %v4813_v16  ;;  %v4764_v6 = vpop.f32.mrb[88].mxu1 }
 0xa84   : > { %v4790_v29 = vmul.f32 0.125, %v4764_v6  ;;  %v10069_v8 = vpop.f32.mrb[89].mxu1 }
 0xa85   : > { %v4767_v36 = vpop.f32.mrb[90].mxu1 }
 0xa86   : > { %v4791_v20 = vmul.f32 0.125, %v4767_v36  ;;  %v10070_v59 = vpop.f32.mrb[91].mxu1  ;;  %v4799_v63 = vadd.f32 %v4790_v29, %v13941_v52 }
 0xa88   : > { %v4816_v5 = vsel %vm3953_vm5, %v4799_v63, -inf  ;;  %v4800_v34 = vadd.f32 %v4791_v20, %v13946_v46 }
 0xa89   : > { %4817 = vmax.xlane.f32.xlu0 %v4816_v5 }
 0xa8a   : > { %v4819_v60 = vsel %vm3953_vm5, %v4800_v34, -inf }
 0xa8b   : > { %4820 = vmax.xlane.f32.xlu1 %v4819_v60  ;;  %v4772_v41 = vpop.f32.mrb[92].mxu1 }
 0xa8c   : > { %v4792_v56 = vmul.f32 0.125, %v4772_v41  ;;  %v10073_v53 = vpop.f32.mrb[93].mxu1 }
 0xa8d   : > { %v4775_v2 = vpop.f32.mrb[94].mxu1 }
 0xa8e   : > { %v4793_v31 = vmul.f32 0.125, %v4775_v2  ;;  %v10074_v12 = vpop.f32.mrb[95].mxu1  ;;  %v4801_v10 = vadd.f32 %v4792_v56, %v13962_v1 }
 0xa90   : > { %v4822_v18 = vsel %vm3953_vm5, %v4801_v10, -inf  ;;  %v4802_v55 = vadd.f32 %v4793_v31, %v13967_v50 }
 0xa91   : > { %4823 = vmax.xlane.f32.xlu0 %v4822_v18 }
 0xa92   : > { %v4825_v17 = vsel %vm3953_vm5, %v4802_v55, -inf }
 0xa93   : > { %4826 = vmax.xlane.f32.xlu1 %v4825_v17  ;;  %v4780_v49 = vpop.f32.mrb[96].mxu1 }
 0xa94   : > { %v4794_v25 = vmul.f32 0.125, %v4780_v49  ;;  %v10077_v47 = vpop.f32.mrb[97].mxu1 }
 0xa95   : > { %v4783_v33 = vpop.f32.mrb[98].mxu1 }
 0xa96   : > { %v10078_v28 = vpop.f32.mrb[99].mxu1  ;;  %v4803_v58 = vadd.f32 %v4794_v25, %v13988_v62 }
 0xa98   : > { %v4828_v4 = vsel %vm3953_vm5, %v4803_v58, -inf }
 0xa99   : > { %4829 = vmax.xlane.f32.xlu0 %v4828_v4 }
 0xb06   : > { %v4806_v44 = vpop.xlane.xlu0 %4805 }
 0xb07   : > { %v4831_v16 = vsub.f32 %v4795_v3, %v4806_v44 }
 0xb08   : > { %v4809_v6 = vpop.xlane.xlu1 %4808 }
 0xb09   : > { %v4840_v29 = vmul.f32 1.442695, %v4831_v16  ;;  %v4832_v8 = vsub.f32 %v4796_v40, %v4809_v6 }
 0xb0b   : > { %10991 = vpow2.f32 %v4840_v29  ;;  %v4842_v36 = vmul.f32 1.442695, %v4832_v8 }
 0xb0d   : > { %10993 = vpow2.f32 %v4842_v36 }
 0xb0e   : > { %v4812_v20 = vpop.xlane.xlu0 %4811 }
 0xb0f   : > { %v4833_v59 = vsub.f32 %v4797_v7, %v4812_v20 }
 0xb10   : > { %v4815_v5 = vpop.xlane.xlu1 %4814 }
 0xb11   : > { %v4844_v60 = vmul.f32 1.442695, %v4833_v59  ;;  %v4834_v41 = vsub.f32 %v4798_v11, %v4815_v5 }
 0xb13   : > { %10995 = vpow2.f32 %v4844_v60  ;;  %v4846_v56 = vmul.f32 1.442695, %v4834_v41 }
 0xb15   : > { %v14240_v53 = vpop.eup %10991  ;;  %10997 = vpow2.f32 %v4846_v56  ;;  %v5910_v56 = vmul.f32 0.125, %v14061_v26  ;;  %v16343_v26 = vld [vmem:[#allocation44_spill] sm:$0xff] }
 0xb16   : > { %v4818_v2 = vpop.xlane.xlu0 %4817  ;;  %v4858_v3 = vsel %vm3953_vm5, %v14240_v53, 0.0 }
 0xb17   : > { %v14244_v31 = vpop.eup %10993  ;;  %v4835_v40 = vsub.f32 %v4799_v63, %v4818_v2  ;;  %4859 = vadd.xlane.f32.xlu1 %v4858_v3  ;;  %v5909_v3 = vmul.f32 0.125, %v14059_v35  ;;  %v5914_v35 = vmul.f32 0.125, %v14069_v37 }
 0xb18   : > { %v4821_v12 = vpop.xlane.xlu1 %4820  ;;  %v4861_v7 = vsel %vm3953_vm5, %v14244_v31, 0.0 }
 0xb19   : > { %v4848_v18 = vmul.f32 1.442695, %v4835_v40  ;;  %v4836_v17 = vsub.f32 %v4800_v34, %v4821_v12  ;;  %4862 = vadd.xlane.f32.xlu0 %v4861_v7  ;;  %v14282_v12 = vadd.f32 %v5910_v56, %v13919_v24 }
 0xb1b   : > { %10999 = vpow2.f32 %v4848_v18  ;;  %v4850_v11 = vmul.f32 1.442695, %v4836_v17  ;;  %v5911_v18 = vmul.f32 0.125, %v16343_v26  ;;  %v14290_v17 = vadd.f32 %v5909_v3, %v13902_v9  ;;  %v16345_v9 = vld [vmem:[#allocation47_spill] sm:$0xff] }
 0xb1d   : > { %v14248_v49 = vpop.eup %10995  ;;  %11001 = vpow2.f32 %v4850_v11  ;;  %v16344_v11 = vld [vmem:[#allocation45_spill] sm:$0xff] }
 0xb1e   : > { %v4824_v25 = vpop.xlane.xlu0 %4823  ;;  %v4864_v47 = vsel %vm3953_vm5, %v14248_v49, 0.0 }
 0xb1f   : > { %v14252_v33 = vpop.eup %10997  ;;  %v4837_v63 = vsub.f32 %v4801_v10, %v4824_v25  ;;  %4865 = vadd.xlane.f32.xlu1 %v4864_v47  ;;  %v5913_v25 = vmul.f32 0.125, %v16344_v11  ;;  %v5929_v47 = vsel %vm3953_vm5, %v14290_v17, -inf }
 0xb20   : > { %v4827_v28 = vpop.xlane.xlu1 %4826  ;;  %v4867_v4 = vsel %vm3953_vm5, %v14252_v33, 0.0 }
 0xb21   : > { %v4852_v44 = vmul.f32 1.442695, %v4837_v63  ;;  %v4838_v34 = vsub.f32 %v4802_v55, %v4827_v28  ;;  %4868 = vadd.xlane.f32.xlu0 %v4867_v4  ;;  %v5908_v55 = vmul.f32 0.125, %v14057_v61  ;;  %v5912_v61 = vmul.f32 0.125, %v14065_v54 }
 0xb22   : > { %v5932_v54 = vsel %vm3953_vm5, %v14282_v12, -inf  ;;  %v14302_v63 = vadd.f32 %v5911_v18, %v13924_v51  ;;  %v5916_v28 = vmul.f32 0.125, %v16345_v9  ;;  %v14308_v4 = vadd.f32 %v5914_v35, %v13962_v1 }
 0xb23   : > { %11003 = vpow2.f32 %v4852_v44  ;;  %v4854_v16 = vmul.f32 1.442695, %v4838_v34  ;;  %v14275_v2 = vadd.f32 %v5908_v55, %v13897_v32  ;;  %v14296_v24 = vadd.f32 %v5912_v61, %v13941_v52  ;;  %v16346_v52 = vld [vmem:[#allocation46_spill] sm:$0xff] }
 0xb24   : > { %v5915_v44 = vmul.f32 0.125, %v16346_v52  ;;  %v5935_v34 = vsel %vm3953_vm5, %v14302_v63, -inf  ;;  %v5944_v51 = vsel %vm3953_vm5, %v14308_v4, -inf }
 0xb25   : > { %v14256_v6 = vpop.eup %10999  ;;  %11005 = vpow2.f32 %v4854_v16  ;;  %v5926_v40 = vsel %vm3953_vm5, %v14275_v2, -inf  ;;  %v5938_v37 = vsel %vm3953_vm5, %v14296_v24, -inf  ;;  %v14314_v16 = vadd.f32 %v5913_v25, %v13946_v46 }
 0xb26   : > { %v4830_v29 = vpop.xlane.xlu0 %4829  ;;  %v4870_v8 = vsel %vm3953_vm5, %v14256_v6, 0.0 }
 0xb27   : > { %v14260_v36 = vpop.eup %11001  ;;  %v4839_v10 = vsub.f32 %v4803_v58, %v4830_v29  ;;  %4871 = vadd.xlane.f32.xlu1 %v4870_v8  ;;  %v14319_v29 = vadd.f32 %v5916_v28, %v13988_v62  ;;  %v5941_v1 = vsel %vm3953_vm5, %v14314_v16, -inf  ;;  %v14324_v8 = vadd.f32 %v5915_v44, %v13967_v50 }
 0xb28   : > { %v4873_v20 = vsel %vm3953_vm5, %v14260_v36, 0.0 }
 0xb29   : > { %v4856_v59 = vmul.f32 1.442695, %v4839_v10  ;;  %4874 = vadd.xlane.f32.xlu0 %v4873_v20  ;;  %v5950_v10 = vsel %vm3953_vm5, %v14319_v29, -inf  ;;  %v5947_v46 = vsel %vm3953_vm5, %v14324_v8, -inf }
 0xb2b   : > { %11007 = vpow2.f32 %v4856_v59 }
 0xb2d   : > { %v14265_v5 = vpop.eup %11003 }
 0xb2e   : > { %v4876_v60 = vsel %vm3953_vm5, %v14265_v5, 0.0 }
 0xb2f   : > { %v14269_v41 = vpop.eup %11005  ;;  %4877 = vadd.xlane.f32.xlu1 %v4876_v60 }
 0xb30   : > { %v4879_v58 = vsel %vm3953_vm5, %v14269_v41, 0.0 }
 0xb31   : > { %4880 = vadd.xlane.f32.xlu0 %v4879_v58 }
 0xb35   : > { %v14284_v7 = vpop.eup %11007  ;;  %5927 = vmax.xlane.f32.xlu0 %v5926_v40 }
 0xb36   : > { %v4882_v32 = vsel %vm3953_vm5, %v14284_v7, 0.0 }
 0xb37   : > { %4883 = vadd.xlane.f32.xlu1 %v4882_v32 }
 0xb39   : > { %5933 = vmax.xlane.f32.xlu0 %v5932_v54 }
 0xb3b   : > { %5930 = vmax.xlane.f32.xlu1 %v5929_v47 }
 0xb3d   : > { %5939 = vmax.xlane.f32.xlu0 %v5938_v37 }
 0xb3f   : > { %5936 = vmax.xlane.f32.xlu1 %v5935_v34 }
 0xb41   : > { %5945 = vmax.xlane.f32.xlu0 %v5944_v51 }
 0xb43   : > { %5942 = vmax.xlane.f32.xlu1 %v5941_v1 }
 0xb45   : > { %5951 = vmax.xlane.f32.xlu0 %v5950_v10 }
 0xb47   : > { %5948 = vmax.xlane.f32.xlu1 %v5947_v46 }
 0xba4   : > { %v4860_v20 = vpop.xlane.xlu1 %4859 }
 0xba5   : > { %11009 = vrcp.f32 %v4860_v20 }
 0xba6   : > { %v4863_v62 = vpop.xlane.xlu0 %4862 }
 0xba7   : > { %11011 = vrcp.f32 %v4863_v62 }
 0xbac   : > { %v4866_v59 = vpop.xlane.xlu1 %4865 }
 0xbad   : > { %11013 = vrcp.f32 %v4866_v59 }
 0xbae   : > { %v4869_v55 = vpop.xlane.xlu0 %4868 }
 0xbaf   : > { %v11010_v60 = vpop.eup %11009  ;;  %11015 = vrcp.f32 %v4869_v55 }
 0xbb0   : > { %v4894_v56 = vmul.f32 %v11010_v60, %v14240_v53 }
 0xbb1   : > { %v11012_v50 = vpop.eup %11011 }
 0xbb2   : > { %v4895_v58 = vmul.f32 %v11012_v50, %v14244_v31 }
 0xbb4   : > { %v4903_v3 = vpack.c.bf16 %v4895_v58, %v4894_v56  ;;  %v4872_v61 = vpop.xlane.xlu1 %4871 }
 0xbb5   : > { %11017 = vrcp.f32 %v4872_v61 }
 0xbb6   : > { %v4875_v40 = vpop.xlane.xlu0 %4874  ;;  %10090 = vmatmul.mubr.msk.bf16.vlgmr.msra.gmra.mrb[100].mxu1 %vm3953_vm5, %v4903_v3 }
 0xbb7   : > { %v11014_v26 = vpop.eup %11013  ;;  %11019 = vrcp.f32 %v4875_v40  ;;  %10093 = vmatprep.mubr.msk.bf16.mxu1 %vm11255_vm3, %v16327_v42 }
 0xbb8   : > { %v4896_v32 = vmul.f32 %v11014_v26, %v14248_v49 }
 0xbb9   : > { %v11016_v18 = vpop.eup %11015 }
 0xbba   : > { %v4897_v35 = vmul.f32 %v11016_v18, %v14252_v33 }
 0xbbc   : > { %v4878_v54 = vpop.xlane.xlu1 %4877  ;;  %v4904_v53 = vpack.c.bf16 %v4897_v35, %v4896_v32 }
 0xbbd   : > { %11021 = vrcp.f32 %v4878_v54 }
 0xbbe   : > { %v4881_v31 = vpop.xlane.xlu0 %4880  ;;  %10094 = vmatmul.mubr.msk.bf16.gmra.mrb[104].mxu1 %vm3953_vm5, %v4904_v53 }
 0xbbf   : > { %v11018_v11 = vpop.eup %11017  ;;  %11023 = vrcp.f32 %v4881_v31  ;;  %10097 = vmatprep.mubr.msk.bf16.mxu1 %vm11255_vm3, %v16327_v42 }
 0xbc0   : > { %v4898_v9 = vmul.f32 %v11018_v11, %v14256_v6 }
 0xbc1   : > { %v11020_v25 = vpop.eup %11019 }
 0xbc2   : > { %v5928_v47 = vpop.xlane.xlu0 %5927  ;;  %v4899_v28 = vmul.f32 %v11020_v25, %v14260_v36 }
 0xbc3   : > { %v5953_v49 = vsub.f32 %v14275_v2, %v5928_v47 }
 0xbc4   : > { %v4884_v33 = vpop.xlane.xlu1 %4883  ;;  %v4905_v37 = vpack.c.bf16 %v4899_v28, %v4898_v9 }
 0xbc5   : > { %v5962_v52 = vmul.f32 1.442695, %v5953_v49  ;;  %11025 = vrcp.f32 %v4884_v33 }
 0xbc6   : > { %10098 = vmatmul.mubr.msk.bf16.gmra.mrb[108].mxu1 %vm3953_vm5, %v4905_v37  ;;  %v5934_v44 = vpop.xlane.xlu0 %5933 }
 0xbc7   : > { %v11022_v34 = vpop.eup %11021  ;;  %11027 = vpow2.f32 %v5962_v52  ;;  %v5955_v51 = vsub.f32 %v14282_v12, %v5934_v44  ;;  %10101 = vmatprep.mubr.msk.bf16.mxu1 %vm11255_vm3, %v16327_v42 }
 0xbc8   : > { %v5931_v1 = vpop.xlane.xlu1 %5930  ;;  %v4900_v46 = vmul.f32 %v11022_v34, %v14265_v5 }
 0xbc9   : > { %v11024_v6 = vpop.eup %11023  ;;  %v5966_v10 = vmul.f32 1.442695, %v5955_v51  ;;  %v5954_v36 = vsub.f32 %v14290_v17, %v5931_v1  ;;  %v10637_v1 = vld [vmem:[%s11447_s30 + $0x40] ss:$8 sps:$4 sm:$0xff]  }
 0xbca   : > { %v5940_v2 = vpop.xlane.xlu0 %5939  ;;  %v4901_v20 = vmul.f32 %v11024_v6, %v14269_v41  ;;  %v10639_v6 = vld [vmem:[%s11447_s30 + $0x44] ss:$8 sps:$4 sm:$0xff]  }
 0xbcb   : > { %11029 = vpow2.f32 %v5966_v10  ;;  %v5964_v62 = vmul.f32 1.442695, %v5954_v36  ;;  %v5957_v59 = vsub.f32 %v14296_v24, %v5940_v2  ;;  %v10642_v10 = vld [vmem:[%s11447_s30 + $0x54] ss:$8 sps:$4 sm:$0xff]   ;;  %5072 = vmatprep.subr.bf16.mxu1 %v10639_v6  ;;  %v10640_v36 = vld [vmem:[%s11447_s30 + $0x50] ss:$8 sps:$4 sm:$0xff]  }
 0xbcc   : > { %v5937_v55 = vpop.xlane.xlu1 %5936  ;;  %v4906_v60 = vpack.c.bf16 %v4901_v20, %v4900_v46  ;;  %5073 = vmatpush1.bf16.msra.mxu1 %v10637_v1  ;;  %v10645_v2 = vld [vmem:[%s11447_s30 + $0x64] ss:$8 sps:$4 sm:$0xff]   ;;  %v10643_v46 = vld [vmem:[%s11447_s30 + $0x60] ss:$8 sps:$4 sm:$0xff]   ;;  %v10648_v20 = vld [vmem:[%s11447_s30 + $0x74] ss:$8 sps:$4 sm:$0xff]  }
 0xbcd   : > { %11031 = vpow2.f32 %v5964_v62  ;;  %v5970_v12 = vmul.f32 1.442695, %v5957_v59  ;;  %v5956_v50 = vsub.f32 %v14302_v63, %v5937_v55  ;;  %5074 = vmatprep.subr.bf16.mxu1 %v10642_v10  ;;  %v10646_v62 = vld [vmem:[%s11447_s30 + $0x70] ss:$8 sps:$4 sm:$0xff]   ;;  %v10651_v59 = vld [vmem:[%s11447_s30 + $0x4] ss:$8 sps:$4 sm:$0xff]  }
 0xbce   : > { %10102 = vmatmul.mubr.msk.bf16.gmra.mrb[112].mxu1 %vm3953_vm5, %v4906_v60  ;;  %v5946_v56 = vpop.xlane.xlu0 %5945 }
 0xbcf   : > { %v11026_v58 = vpop.eup %11025  ;;  %11033 = vpow2.f32 %v5970_v12  ;;  %v5968_v17 = vmul.f32 1.442695, %v5956_v50  ;;  %v5959_v5 = vsub.f32 %v14308_v4, %v5946_v56  ;;  %10105 = vmatprep.mubr.msk.bf16.mxu1 %vm11255_vm3, %v16327_v42  ;;  %v10649_v50 = vld [vmem:[%s11447_s30] ss:$8 sps:$4 sm:$0xff]  }
 0xbd0   : > { %v5943_v41 = vpop.xlane.xlu1 %5942  ;;  %v4902_v24 = vmul.f32 %v11026_v58, %v14284_v7  ;;  %5075 = vmatpush1.bf16.msra.mxu1 %v10640_v36  ;;  %v10661_v36 = vld [vmem:[%s11434_s21 + $0xc0] sm:$0xff]  }
 0xbd1   : > { %v14357_v3 = vpop.eup %11027  ;;  %11035 = vpow2.f32 %v5968_v17  ;;  %v5974_v61 = vmul.f32 1.442695, %v5959_v5  ;;  %v5958_v63 = vsub.f32 %v14314_v16, %v5943_v41  ;;  %5076 = vmatprep.subr.bf16.mxu1 %v10645_v2  ;;  %v10654_v17 = vld [vmem:[%s11447_s30 + $0x14] ss:$8 sps:$4 sm:$0xff]   ;;  %v10652_v5 = vld [vmem:[%s11447_s30 + $0x10] ss:$8 sps:$4 sm:$0xff]   ;;  %v16347_v2 = vpack.c.bf16 %v14140_v15, %v14138_v13 }
 0xbd2   : > { %v5952_v40 = vpop.xlane.xlu0 %5951  ;;  %v5980_v26 = vsel %vm3953_vm5, %v14357_v3, 0.0  ;;  %v4907_v35 = vpack.c.bf16 %v4902_v24, %v4902_v24  ;;  %v10657_v41 = vld [vmem:[%s11447_s30 + $0x24] ss:$8 sps:$4 sm:$0xff]   ;;  %v10664_v13 = vld [vmem:[%s11434_s21 + $0xd8] sm:$0xff]  }
 0xbd3   : > { %11037 = vpow2.f32 %v5974_v61  ;;  %v5972_v18 = vmul.f32 1.442695, %v5958_v63  ;;  %v5961_v4 = vsub.f32 %v14319_v29, %v5952_v40  ;;  %5981 = vadd.xlane.f32.xlu1 %v5980_v26  ;;  %v10655_v40 = vld [vmem:[%s11447_s30 + $0x20] ss:$8 sps:$4 sm:$0xff]  }
 0xbd4   : > { %v5949_v32 = vpop.xlane.xlu1 %5948  ;;  %5077 = vmatpush1.bf16.msra.mxu1 %v10643_v46  ;;  %v10662_v46 = vld [vmem:[%s11434_s21 + $0xc8] sm:$0xff]   ;;  %v10665_v15 = vld [vmem:[%s11434_s21 + $0xe0] sm:$0xff]  }
 0xbd5   : > { %v14363_v54 = vpop.eup %11029  ;;  %11039 = vpow2.f32 %v5972_v18  ;;  %v5978_v7 = vmul.f32 1.442695, %v5961_v4  ;;  %v5960_v53 = vsub.f32 %v14324_v8, %v5949_v32  ;;  %5078 = vmatprep.subr.bf16.mxu1 %v10648_v20  ;;  %v10660_v4 = vld [vmem:[%s11447_s30 + $0x34] ss:$8 sps:$4 sm:$0xff]   ;;  %v10658_v32 = vld [vmem:[%s11447_s30 + $0x30] ss:$8 sps:$4 sm:$0xff]  }
 0xbd6   : > { %10106 = vmatmul.mubr.msk.bf16.gmra.mrb[116].mxu1 %vm3953_vm5, %v4907_v35  ;;  %v5986_v16 = vsel %vm3953_vm5, %v14363_v54, 0.0  ;;  %v10663_v20 = vld [vmem:[%s11434_s21 + $0xd0] sm:$0xff]  }
 0xbd7   : > { %v14369_v31 = vpop.eup %11031  ;;  %11041 = vpow2.f32 %v5978_v7  ;;  %v5976_v11 = vmul.f32 1.442695, %v5960_v53  ;;  %5987 = vadd.xlane.f32.xlu1 %v5986_v16  ;;  %5104 = vmatprep.mubr.bf16.mxu1 %v16334_v19 }
 0xbd8   : > { %v5983_v29 = vsel %vm3953_vm5, %v14369_v31, 0.0  ;;  %5079 = vmatpush1.bf16.msra.mxu1 %v10646_v62  ;;  %v16348_v62 = vpack.c.bf16 %v14146_v21, %v14144_v45  ;;  %v10666_v45 = vld [vmem:[%s11434_s21 + $0xe8] sm:$0xff]   ;;  %v10667_v21 = vld [vmem:[%s11434_s21 + $0xf0] sm:$0xff]  }
 0xbd9   : > { %v14374_v25 = vpop.eup %11033  ;;  %11043 = vpow2.f32 %v5976_v11  ;;  %5984 = vadd.xlane.f32.xlu0 %v5983_v29  ;;  %5208 = vmatprep.subr.bf16.mxu1 %v10651_v59  ;;  %v16349_v59 = vpack.c.bf16 %v14152_v43, %v14150_v14  ;;  %v10668_v14 = vld [vmem:[%s11434_s21 + $0xf8] sm:$0xff]   ;;  %v10669_v43 = vld [vmem:[%s11434_s21 + $0x100] sm:$0xff]  }
 0xbda   : > { %v5992_v8 = vsel %vm3953_vm5, %v14374_v25, 0.0 }
 0xbdb   : > { %v14378_v47 = vpop.eup %11035  ;;  %5993 = vadd.xlane.f32.xlu1 %v5992_v8 }
 0xbdc   : > { %v5989_v9 = vsel %vm3953_vm5, %v14378_v47, 0.0 }
 0xbdd   : > { %v14382_v28 = vpop.eup %11037  ;;  %5990 = vadd.xlane.f32.xlu0 %v5989_v9 }
 0xbde   : > { %v5998_v49 = vsel %vm3953_vm5, %v14382_v28, 0.0 }
 0xbdf   : > { %v14386_v33 = vpop.eup %11039  ;;  %5999 = vadd.xlane.f32.xlu1 %v5998_v49 }
 0xbe0   : > { %v5995_v37 = vsel %vm3953_vm5, %v14386_v33, 0.0 }
 0xbe1   : > { %v14390_v52 = vpop.eup %11041  ;;  %5996 = vadd.xlane.f32.xlu0 %v5995_v37 }
 0xbe2   : > { %v6004_v44 = vsel %vm3953_vm5, %v14390_v52, 0.0 }
 0xbe3   : > { %v14394_v34 = vpop.eup %11043  ;;  %6005 = vadd.xlane.f32.xlu1 %v6004_v44 }
 0xbe4   : > { %v6001_v51 = vsel %vm3953_vm5, %v14394_v34, 0.0 }
 0xbe5   : > { %6002 = vadd.xlane.f32.xlu0 %v6001_v51 }
 0xc89   : > { %v4965_v55 = vpop.f32.mrb[100].mxu1 }
 0xc8a   : > { %v10091_v60 = vpop.f32.mrb[101].mxu1 }
 0xc8b   : > { %v4968_v12 = vpop.f32.mrb[102].mxu1  ;;  %v4158_v60 = vpack.c.bf16 %v14162_v38, %v14162_v38  ;;  %v16352_v38 = vld [vmem:[#allocation41_spill] sm:$0xff] }
 0xc8c   : > { %v5003_v56 = vpack.c.bf16 %v4968_v12, %v4965_v55  ;;  %v10092_v58 = vpop.f32.mrb[103].mxu1  ;;  %v16350_v55 = vpack.c.bf16 %v14158_v57, %v14156_v23  ;;  %v10670_v23 = vld [vmem:[%s11434_s21 + $0x108] sm:$0xff]   ;;  %v10671_v57 = vld [vmem:[%s11434_s21 + $0x110] sm:$0xff]   ;;  %v10672_v12 = vld [vmem:[%s11434_s21 + $0x118] sm:$0xff]   ;;  %s16460_s21 = sld [smem:[#allocation101_spill]] (!%p9923_p6) }
 0xc8e   : > { %9568 = vmatmul.mubr.msk.bf16.vlgmr.msra.gmra.mrb[120].mxu1 %vm3063_vm2, %v5003_v56  ;;  %v16354_v56 = vld [vmem:[#allocation43_spill] sm:$0xff] }
 0xc8f   : > { %5209 = vmatpush1.bf16.msra.mxu1 %v10649_v50  ;;  %5114 = vmatprep.mubr.bf16.mxu1 %v16334_v19  ;;  %v16353_v50 = vld [vmem:[#allocation42_spill] sm:$0xff] }
 0xc90   : > { %5210 = vmatprep.subr.bf16.mxu1 %v10654_v17 }
 0xc91   : > { %v4973_v24 = vpop.f32.mrb[104].mxu1 }
 0xc92   : > { %v10095_v61 = vpop.f32.mrb[105].mxu1 }
 0xc93   : > { %v4976_v63 = vpop.f32.mrb[106].mxu1  ;;  %5211 = vmatpush1.bf16.msra.mxu1 %v10652_v5 }
 0xc94   : > { %v5004_v26 = vpack.c.bf16 %v4976_v63, %v4973_v24  ;;  %v10096_v18 = vpop.f32.mrb[107].mxu1  ;;  %5212 = vmatprep.subr.bf16.mxu1 %v10657_v41 }
 0xc96   : > { %9569 = vmatmul.mubr.msk.bf16.gmra.mrb[124].mxu1 %vm3063_vm2, %v5004_v26 }
 0xc97   : > { %5124 = vmatprep.mubr.bf16.mxu1 %v16334_v19  ;;  %5213 = vmatpush1.bf16.msra.mxu1 %v10655_v40 }
 0xc98   : > { %5214 = vmatprep.subr.bf16.mxu1 %v10660_v4 }
 0xc99   : > { %v4981_v35 = vpop.f32.mrb[108].mxu1 }
 0xc9a   : > { %v10099_v7 = vpop.f32.mrb[109].mxu1 }
 0xc9b   : > { %v4984_v53 = vpop.f32.mrb[110].mxu1  ;;  %5215 = vmatpush1.bf16.msra.mxu1 %v10658_v32 }
 0xc9c   : > { %v5005_v16 = vpack.c.bf16 %v4984_v53, %v4981_v35  ;;  %v10100_v11 = vpop.f32.mrb[111].mxu1  ;;  %5724 = vmatprep.subr.bf16.mxu1 %v16334_v19 }
 0xc9d   : > { %v5985_v11 = vpop.xlane.xlu0 %5984 }
 0xc9e   : > { %9570 = vmatmul.mubr.msk.bf16.gmra.mrb[128].mxu1 %vm3063_vm2, %v5005_v16  ;;  %11045 = vrcp.f32 %v5985_v11 }
 0xc9f   : > { %5134 = vmatprep.mubr.bf16.mxu1 %v16334_v19 }
 0xca1   : > { %v4989_v29 = vpop.f32.mrb[112].mxu1 }
 0xca2   : > { %v10103_v8 = vpop.f32.mrb[113].mxu1 }
 0xca3   : > { %v4992_v9 = vpop.f32.mrb[114].mxu1 }
 0xca4   : > { %v5006_v49 = vpack.c.bf16 %v4992_v9, %v4989_v29  ;;  %v10104_v37 = vpop.f32.mrb[115].mxu1  ;;  %v5982_v9 = vpop.xlane.xlu1 %5981 }
 0xca5   : > { %11047 = vrcp.f32 %v5982_v9 }
 0xca6   : > { %9571 = vmatmul.mubr.msk.bf16.gmra.mrb[132].mxu1 %vm3063_vm2, %v5006_v49 }
 0xca7   : > { %5144 = vmatprep.mubr.bf16.mxu1 %v16334_v19 }
 0xca9   : > { %v4997_v44 = vpop.f32.mrb[116].mxu1 }
 0xcaa   : > { %v10107_v51 = vpop.f32.mrb[117].mxu1  ;;  %v5007_v6 = vpack.c.bf16 %v4997_v44, %v4997_v44 }
 0xcab   : > { %v5000_v1 = vpop.f32.mrb[118].mxu1  ;;  %v5991_v51 = vpop.xlane.xlu0 %5990 }
 0xcac   : > { %v10108_v10 = vpop.f32.mrb[119].mxu1  ;;  %11049 = vrcp.f32 %v5991_v51 }
 0xcad   : > { %v5988_v10 = vpop.xlane.xlu1 %5987 }
 0xcae   : > { %9572 = vmatmul.mubr.msk.bf16.gmra.mrb[136].mxu1 %vm3063_vm2, %v5007_v6  ;;  %11051 = vrcp.f32 %v5988_v10 }
 0xcaf   : > { %5240 = vmatprep.mubr.bf16.mxu1 %v16334_v19 }
 0xcb6   : > { %9581 = vmatmul.mubr.msk.bf16.vlgmr.msra.gmra.mrb[120].mxu1 %vm3063_vm2, %v16347_v2 }
 0xcb7   : > { %5725 = vmatpush1.bf16.msra.mxu1 %v10661_v36  ;;  %5250 = vmatprep.mubr.bf16.mxu1 %v16334_v19 }
 0xcb8   : > { %5726 = vmatprep.subr.bf16.mxu1 %v16334_v19 }
 0xcbb   : > { %5727 = vmatpush1.bf16.msra.mxu1 %v10662_v46  ;;  %v11046_v46 = vpop.eup %11045 }
 0xcbc   : > { %5728 = vmatprep.subr.bf16.mxu1 %v16334_v19 }
 0xcbe   : > { %9582 = vmatmul.mubr.msk.bf16.gmra.mrb[124].mxu1 %vm3063_vm2, %v16348_v62 }
 0xcbf   : > { %5729 = vmatpush1.bf16.msra.mxu1 %v10663_v20  ;;  %5260 = vmatprep.mubr.bf16.mxu1 %v16334_v19  ;;  %v11048_v20 = vpop.eup %11047 }
 0xcc0   : > { %5730 = vmatprep.subr.bf16.mxu1 %v16334_v19 }
 0xcc3   : > { %5731 = vmatpush1.bf16.msra.mxu1 %v10664_v13  ;;  %v6017_v13 = vmul.f32 %v11046_v46, %v14369_v31  ;;  %v11050_v31 = vpop.eup %11049 }
 0xcc4   : > { %5732 = vmatprep.subr.bf16.mxu1 %v16334_v19 }
 0xcc6   : > { %9583 = vmatmul.mubr.msk.bf16.gmra.mrb[128].mxu1 %vm3063_vm2, %v16349_v59 }
 0xcc7   : > { %5733 = vmatpush1.bf16.msra.mxu1 %v10665_v15  ;;  %5270 = vmatprep.mubr.bf16.mxu1 %v16334_v19  ;;  %v5997_v15 = vpop.xlane.xlu0 %5996 }
 0xcc8   : > { %5734 = vmatprep.subr.bf16.mxu1 %v16334_v19  ;;  %11053 = vrcp.f32 %v5997_v15 }
 0xccb   : > { %5735 = vmatpush1.bf16.msra.mxu1 %v10666_v45 }
 0xccc   : > { %5736 = vmatprep.subr.bf16.mxu1 %v16334_v19 }
 0xcce   : > { %9584 = vmatmul.mubr.msk.bf16.gmra.mrb[132].mxu1 %vm3063_vm2, %v16350_v55 }
 0xccf   : > { %5737 = vmatpush1.bf16.msra.mxu1 %v10667_v21  ;;  %5280 = vmatprep.mubr.bf16.mxu1 %v16334_v19  ;;  %v10675_v21 = vld [vmem:[%s11447_s30 + $0x84] ss:$8 sps:$4 sm:$0xff]  }
 0xcd0   : > { %5738 = vmatprep.subr.bf16.mxu1 %v16334_v19 }
 0xcd3   : > { %5739 = vmatpush1.bf16.msra.mxu1 %v10668_v14  ;;  %v6016_v14 = vmul.f32 %v11048_v20, %v14357_v3  ;;  %v10676_v3 = vld [vmem:[%s11447_s30 + $0x90] ss:$8 sps:$4 sm:$0xff]  }
 0xcd4   : > { %5740 = vmatprep.subr.bf16.mxu1 %v16334_v19 }
 0xcd6   : > { %9585 = vmatmul.mubr.msk.bf16.gmra.mrb[140].mxu1 %vm3063_vm2, %v4158_v60 }
 0xcd7   : > { %5741 = vmatpush1.bf16.msra.mxu1 %v10669_v43  ;;  %9704 = vmatprep.mubr.msk.bf16.mxu1 %vm3063_vm2, %v13466_v39  ;;  %v16351_v39 = vld [vmem:[#allocation40_spill] sm:$0xff]  ;;  %v5994_v43 = vpop.xlane.xlu1 %5993 }
 0xcd8   : > { %5742 = vmatprep.subr.bf16.mxu1 %v16334_v19  ;;  %11055 = vrcp.f32 %v5994_v43 }
 0xcdb   : > { %5743 = vmatpush1.bf16.msra.mxu1 %v10670_v23 }
 0xcdc   : > { %5744 = vmatprep.subr.bf16.mxu1 %v16334_v19 }
 0xcdf   : > { %5745 = vmatpush1.bf16.msra.mxu1 %v10671_v57  ;;  %v10673_v57 = vld [vmem:[%s11447_s30 + $0x80] ss:$8 sps:$4 sm:$0xff]  }
 0xce0   : > { %5746 = vmatprep.subr.bf16.mxu1 %v16334_v19 }
 0xce3   : > { %5747 = vmatpush1.bf16.msra.mxu1 %v10672_v12  ;;  %v6025_v12 = vpack.c.bf16 %v6017_v13, %v6016_v14 }
 0xce4   : > { %10139 = vmatprep.subr.bf16.mxu1 %v16327_v42 }
 0xce6   : > { %5757 = vmatmul.mubr.bf16.vlgmr.msra.gmra.mrb[144].mxu1 %v13464_v0 }
 0xce7   : > { %9705 = vmatprep.mubr.msk.bf16.mxu1 %vm3063_vm2, %v13482_v48 }
 0xcee   : > { %5765 = vmatmul.mubr.bf16.gmra.mrb[148].mxu1 %v13500_v30 }
 0xcef   : > { %9706 = vmatprep.mubr.msk.bf16.mxu1 %vm3063_vm2, %v13504_v22 }
 0xcf6   : > { %5773 = vmatmul.mubr.bf16.gmra.mrb[152].mxu1 %v13525_v27 }
 0xcf7   : > { %9707 = vmatprep.mubr.msk.bf16.mxu1 %vm3063_vm2, %v16351_v39  ;;  %v10678_v39 = vld [vmem:[%s11447_s30 + $0x94] ss:$8 sps:$4 sm:$0xff]  }
 0xcfe   : > { %5781 = vmatmul.mubr.bf16.gmra.mrb[156].mxu1 %v16352_v38  ;;  %v11052_v38 = vpop.eup %11051 }
 0xcff   : > { %9708 = vmatprep.mubr.msk.bf16.mxu1 %vm3063_vm2, %v16353_v50  ;;  %v6003_v50 = vpop.xlane.xlu0 %6002 }
 0xd00   : > { %11057 = vrcp.f32 %v6003_v50 }
 0xd06   : > { %5789 = vmatmul.mubr.bf16.gmra.mrb[160].mxu1 %v16354_v56  ;;  %v6019_v56 = vmul.f32 %v11050_v31, %v14378_v47  ;;  %v11195_v31 = vld [vmem:[#allocation2 + $0x10] sm:$0xff] }
 0xd07   : > { %10149 = vmatprep.mubr.msk.bf16.mxu1 %vm11255_vm3, %v16327_v42 }
 0xd81   : > { %v5146_v0 = vpop.f32.mrb[136].mxu1 }
 0xd82   : > { %v5148_v48 = vpop.f32.mrb[137].mxu1 }
 0xd83   : > { %v5150_v30 = vpop.f32.mrb[138].mxu1 }
 0xd84   : > { %v5151_v58 = vpop.f32.mrb[139].mxu1  ;;  %v6018_v30 = vmul.f32 %v11052_v38, %v14363_v54 }
 0xd85   : > { %v10679_v58 = vld [vmem:[%s11447_s30 + $0xa0] ss:$8 sps:$4 sm:$0xff]  }
 0xda9   : > { %v5282_v22 = vpop.f32.mrb[140].mxu1 }
 0xdaa   : > { %v14489_v17 = vadd.f32 %v5282_v22, %v5146_v0  ;;  %v5284_v27 = vpop.f32.mrb[141].mxu1  ;;  %v10681_v0 = vld [vmem:[%s11447_s30 + $0xa4] ss:$8 sps:$4 sm:$0xff]   ;;  %v6026_v22 = vpack.c.bf16 %v6019_v56, %v6018_v30 }
 0xdab   : > { %v14491_v5 = vadd.f32 %v5284_v27, %v5148_v48  ;;  %v5286_v41 = vpop.f32.mrb[142].mxu1  ;;  %v6000_v48 = vpop.xlane.xlu1 %5999  ;;  %v11196_v30 = vld [vmem:[#allocation2 + $0x28] sm:$0xff] }
 0xdac   : > { %v5287_v24 = vpop.f32.mrb[143].mxu1  ;;  %v11054_v27 = vpop.eup %11053  ;;  %11059 = vrcp.f32 %v6000_v48 }
 0xdad   : > { %v11056_v41 = vpop.eup %11055  ;;  %v6021_v24 = vmul.f32 %v11054_v27, %v14386_v33  ;;  %v11197_v27 = vld [vmem:[#allocation2 + $0x20] sm:$0xff] }
 0xdaf   : > { %v6006_v47 = vpop.xlane.xlu1 %6005 }
 0xdb0   : > { %11061 = vrcp.f32 %v6006_v47 }
 0xdb9   : > { %v5758_v61 = vpop.f32.mrb[144].mxu1 }
 0xdba   : > { %v5760_v63 = vpop.f32.mrb[145].mxu1 }
 0xdbb   : > { %v5761_v40 = vpop.f32.mrb[146].mxu1  ;;  %v11058_v63 = vpop.eup %11057 }
 0xdbc   : > { %v6030_v26 = vpack.c.bf16 %v5761_v40, %v5758_v61  ;;  %v5763_v18 = vpop.f32.mrb[147].mxu1  ;;  %v6020_v61 = vmul.f32 %v11056_v41, %v14374_v25  ;;  %v11060_v40 = vpop.eup %11059 }
 0xdbd   : > { %v6022_v18 = vmul.f32 %v11060_v40, %v14382_v28 }
 0xdbe   : > { %10140 = vmatpush3.bf16.msra.mxu1 %v6030_v26  ;;  %v6027_v54 = vpack.c.bf16 %v6021_v24, %v6020_v61  ;;  %v6023_v26 = vmul.f32 %v11058_v63, %v14394_v34  ;;  %v11198_v24 = vld [vmem:[#allocation2 + $0x38] sm:$0xff]  ;;  %v11199_v63 = vld [vmem:[#allocation2 + $0x30] sm:$0xff] }
 0xdbf   : > { %10141 = vmatprep.subr.bf16.mxu1 %v16327_v42 }
 0xdc1   : > { %v5766_v4 = vpop.f32.mrb[148].mxu1 }
 0xdc2   : > { %v5768_v32 = vpop.f32.mrb[149].mxu1 }
 0xdc3   : > { %v5769_v35 = vpop.f32.mrb[150].mxu1  ;;  %v11062_v32 = vpop.eup %11061 }
 0xdc4   : > { %v6031_v7 = vpack.c.bf16 %v5769_v35, %v5766_v4  ;;  %v5771_v53 = vpop.f32.mrb[151].mxu1  ;;  %v6028_v4 = vpack.c.bf16 %v6023_v26, %v6022_v18  ;;  %v6024_v25 = vmul.f32 %v11062_v32, %v14390_v52  ;;  %v10684_v35 = vld [vmem:[%s11447_s30 + $0xb4] ss:$8 sps:$4 sm:$0xff]  }
 0xdc6   : > { %10142 = vmatpush3.bf16.msra.mxu1 %v6031_v7  ;;  %v6029_v33 = vpack.c.bf16 %v6024_v25, %v6024_v25  ;;  %v10682_v7 = vld [vmem:[%s11447_s30 + $0xb0] ss:$8 sps:$4 sm:$0xff]   ;;  %s16373_s30 = scalar_lea.vmem %s16076_s15, %s11411_s26 }
 0xdc7   : > { %10143 = vmatprep.subr.bf16.mxu1 %v16327_v42 }
 0xdc9   : > { %v5774_v16 = vpop.f32.mrb[152].mxu1 }
 0xdca   : > { %v5776_v29 = vpop.f32.mrb[153].mxu1 }
 0xdcb   : > { %v5777_v8 = vpop.f32.mrb[154].mxu1 }
 0xdcc   : > { %v6032_v49 = vpack.c.bf16 %v5777_v8, %v5774_v16  ;;  %v5779_v37 = vpop.f32.mrb[155].mxu1 }
 0xdce   : > { %10144 = vmatpush3.bf16.msra.mxu1 %v6032_v49 }
 0xdcf   : > { %10145 = vmatprep.subr.bf16.mxu1 %v16327_v42 }
 0xdd1   : > { %v5782_v44 = vpop.f32.mrb[156].mxu1 }
 0xdd2   : > { %v5784_v1 = vpop.f32.mrb[157].mxu1 }
 0xdd3   : > { %v5785_v6 = vpop.f32.mrb[158].mxu1 }
 0xdd4   : > { %v6033_v36 = vpack.c.bf16 %v5785_v6, %v5782_v44  ;;  %v5787_v2 = vpop.f32.mrb[159].mxu1 }
 0xdd6   : > { %10146 = vmatpush3.bf16.msra.mxu1 %v6033_v36 }
 0xdd7   : > { %10147 = vmatprep.subr.bf16.mxu1 %v16327_v42 }
 0xdd9   : > { %v5790_v62 = vpop.f32.mrb[160].mxu1 }
 0xdda   : > { %v6034_v59 = vpack.c.bf16 %v5790_v62, %v5790_v62  ;;  %v5792_v45 = vpop.f32.mrb[161].mxu1 }
 0xddb   : > { %v5793_v55 = vpop.f32.mrb[162].mxu1 }
 0xddc   : > { %v6051_v60 = vsel %vm4078_vm4, %v6034_v59, 0  ;;  %v5794_v23 = vpop.f32.mrb[163].mxu1  ;;  %v11192_v55 = vld [vmem:[#allocation2 + $0x8] sm:$0xff] }
 0xddd   : > { %10148 = vmatpush3.bf16.msra.mxu1 %v6051_v60  ;;  %v11193_v60 = vld [vmem:[#allocation2] sm:$0xff] }
 0xdde   : > { %6194 = vmatprep.subr.bf16.mxu1 %v10675_v21 }
 0xde0   : > { %10150 = vmatmul.mubr.msk.bf16.vlgmr.msra.gmra.mrb[164].mxu1 %vm3953_vm5, %v6025_v12  ;;  %v11194_v12 = vld [vmem:[#allocation2 + $0x18] sm:$0xff] }
 0xde1   : > { %10153 = vmatprep.mubr.msk.bf16.mxu1 %vm11255_vm3, %v16327_v42  ;;  %6195 = vmatpush1.bf16.msra.mxu1 %v10673_v57 }
 0xde2   : > { %6196 = vmatprep.subr.bf16.mxu1 %v10678_v39 }
 0xde5   : > { %6197 = vmatpush1.bf16.msra.mxu1 %v10676_v3 }
 0xde6   : > { %6198 = vmatprep.subr.bf16.mxu1 %v10681_v0 }
 0xde8   : > { %10154 = vmatmul.mubr.msk.bf16.gmra.mrb[168].mxu1 %vm3953_vm5, %v6026_v22 }
 0xde9   : > { %10157 = vmatprep.mubr.msk.bf16.mxu1 %vm11255_vm3, %v16327_v42  ;;  %6199 = vmatpush1.bf16.msra.mxu1 %v10679_v58 }
 0xdea   : > { %6200 = vmatprep.subr.bf16.mxu1 %v10684_v35 }
 0xded   : > { %6201 = vmatpush1.bf16.msra.mxu1 %v10682_v7 }
 0xdf0   : > { %10158 = vmatmul.mubr.msk.bf16.gmra.mrb[172].mxu1 %vm3953_vm5, %v6027_v54 }
 0xdf1   : > { %10161 = vmatprep.mubr.msk.bf16.mxu1 %vm11255_vm3, %v16327_v42 }
 0xdf8   : > { %10162 = vmatmul.mubr.msk.bf16.gmra.mrb[176].mxu1 %vm3953_vm5, %v6028_v4 }
 0xdf9   : > { %10165 = vmatprep.mubr.msk.bf16.mxu1 %vm11255_vm3, %v16327_v42 }
 0xe00   : > { %10166 = vmatmul.mubr.msk.bf16.gmra.mrb[180].mxu1 %vm3953_vm5, %v6029_v33  ;;  %v11200_v33 = vld [vmem:[#allocation2 + $0x48] sm:$0xff] }
 0xe01   : > { %6226 = vmatprep.mubr.bf16.mxu1 %v16334_v19 }
 0xeb3   : > { %v6087_v34 = vpop.f32.mrb[164].mxu1 }
 0xeb4   : > { %v10151_v28 = vpop.f32.mrb[165].mxu1 }
 0xeb5   : > { %v6090_v53 = vpop.f32.mrb[166].mxu1 }
 0xeb6   : > { %v6125_v16 = vpack.c.bf16 %v6090_v53, %v6087_v34  ;;  %v10152_v11 = vpop.f32.mrb[167].mxu1  ;;  %v11201_v34 = vld [vmem:[#allocation2 + $0x40] sm:$0xff] }
 0xeb8   : > { %9735 = vmatmul.mubr.msk.bf16.vlgmr.msra.gmra.mrb[120].mxu1 %vm3063_vm2, %v6125_v16  ;;  %v11202_v16 = vld [vmem:[#allocation2 + $0x58] sm:$0xff] }
 0xeb9   : > { %6236 = vmatprep.mubr.bf16.mxu1 %v16334_v19 }
 0xebb   : > { %v6095_v42 = vpop.f32.mrb[168].mxu1 }
 0xebc   : > { %v10155_v52 = vpop.f32.mrb[169].mxu1 }
 0xebd   : > { %v6098_v29 = vpop.f32.mrb[170].mxu1  ;;  %v11203_v52 = vld [vmem:[#allocation2 + $0x50] sm:$0xff] }
 0xebe   : > { %v6126_v8 = vpack.c.bf16 %v6098_v29, %v6095_v42  ;;  %v10156_v9 = vpop.f32.mrb[171].mxu1 }
 0xec0   : > { %9736 = vmatmul.mubr.msk.bf16.gmra.mrb[124].mxu1 %vm3063_vm2, %v6126_v8 }
 0xec1   : > { %6246 = vmatprep.mubr.bf16.mxu1 %v16334_v19 }
 0xec3   : > { %v6103_v49 = vpop.f32.mrb[172].mxu1 }
 0xec4   : > { %v10159_v37 = vpop.f32.mrb[173].mxu1 }
 0xec5   : > { %v6106_v44 = vpop.f32.mrb[174].mxu1 }
 0xec6   : > { %v6127_v51 = vpack.c.bf16 %v6106_v44, %v6103_v49  ;;  %v10160_v1 = vpop.f32.mrb[175].mxu1 }
 0xec8   : > { %9737 = vmatmul.mubr.msk.bf16.gmra.mrb[128].mxu1 %vm3063_vm2, %v6127_v51  ;;  %v11204_v51 = vld [vmem:[#allocation2 + $0x68] sm:$0xff] }
 0xec9   : > { %6256 = vmatprep.mubr.bf16.mxu1 %v16334_v19 }
 0xecb   : > { %v6111_v6 = vpop.f32.mrb[176].mxu1 }
 0xecc   : > { %v10163_v10 = vpop.f32.mrb[177].mxu1 }
 0xecd   : > { %v6114_v36 = vpop.f32.mrb[178].mxu1  ;;  %v11205_v10 = vld [vmem:[#allocation2 + $0x60] sm:$0xff] }
 0xece   : > { %v6128_v2 = vpack.c.bf16 %v6114_v36, %v6111_v6  ;;  %v10164_v46 = vpop.f32.mrb[179].mxu1 }
 0xecf   : > { %v11206_v46 = vld [vmem:[#allocation2 + $0x78] sm:$0xff] }
 0xed0   : > { %9738 = vmatmul.mubr.msk.bf16.gmra.mrb[132].mxu1 %vm3063_vm2, %v6128_v2 }
 0xed1   : > { %6266 = vmatprep.mubr.bf16.mxu1 %v16334_v19 }
 0xed3   : > { %v6119_v20 = vpop.f32.mrb[180].mxu1 }
 0xed4   : > { %v10167_v62 = vpop.f32.mrb[181].mxu1  ;;  %v6129_v15 = vpack.c.bf16 %v6119_v20, %v6119_v20 }
 0xed5   : > { %v6122_v13 = vpop.f32.mrb[182].mxu1 }
 0xed6   : > { %v10168_v59 = vpop.f32.mrb[183].mxu1  ;;  %v11207_v13 = vld [vmem:[#allocation2 + $0x70] sm:$0xff] }
 0xed8   : > { %9739 = vmatmul.mubr.msk.bf16.gmra.mrb[184].mxu1 %vm3063_vm2, %v6129_v15 }
 0xf8b   : > { %v6228_v45 = vpop.f32.mrb[120].mxu1 }
 0xf8c   : > { %v6230_v21 = vpop.f32.mrb[121].mxu1  ;;  %v14540_v23 = vadd.f32 %v11193_v60, %v6228_v45 }
 0xf8d   : > { %v14538_v14 = vadd.f32 %v11192_v55, %v6230_v21  ;;  %v6232_v43 = vpop.f32.mrb[122].mxu1 }
 0xf8e   : > { %16356 = vst [vmem:[#allocation45_spill] sm:$0xff] %v14540_v23  ;;  %v6234_v57 = vpop.f32.mrb[123].mxu1  ;;  %v14546_v38 = vadd.f32 %v11195_v31, %v6232_v43  ;;  %v11208_v31 = vld [vmem:[#allocation2 + $0x88] sm:$0xff] }
 0xf8f   : > { %16355 = vst [vmem:[#allocation44_spill] sm:$0xff] %v14538_v14  ;;  %v14542_v39 = vadd.f32 %v11194_v12, %v6234_v57  ;;  %v6313_v19 = vsel %vm3063_vm2, %v14538_v14, 0.0 }
 0xf90   : > { %16358 = vst [vmem:[#allocation46_spill] sm:$0xff] %v14546_v38  ;;  %v6314_v3 = vadd.f32 %v6313_v19, %v14540_v23 }
 0xf91   : > { %16357 = vst [vmem:[#allocation47_spill] sm:$0xff] %v14542_v39  ;;  %v6317_v50 = vsel %vm3063_vm2, %v14542_v39, 0.0 }
 0xf92   : > { %6315 = vadd.xlane.f32.xlu0 %v6314_v3  ;;  %v6318_v56 = vadd.f32 %v6317_v50, %v14546_v38  ;;  %v11209_v50 = vld [vmem:[#allocation2 + $0x80] sm:$0xff] }
 0xf93   : > { %v6238_v0 = vpop.f32.mrb[124].mxu1 }
 0xf94   : > { %6319 = vadd.xlane.f32.xlu1 %v6318_v56  ;;  %v6240_v48 = vpop.f32.mrb[125].mxu1  ;;  %v14554_v41 = vadd.f32 %v11197_v27, %v6238_v0  ;;  %v10693_v27 = vld [vmem:[%s11456_s27 + $0x34] ss:$24 sps:$4 sm:$0xff]  }
 0xf95   : > { %v14552_v58 = vadd.f32 %v11196_v30, %v6240_v48  ;;  %v6242_v22 = vpop.f32.mrb[126].mxu1  ;;  %v10687_v48 = vld [vmem:[%s11456_s27 + $0x4] ss:$24 sps:$4 sm:$0xff]   ;;  %v10688_v30 = vld [vmem:[%s11456_s27 + $0x10] ss:$24 sps:$4 sm:$0xff]  }
 0xf96   : > { %16360 = vst [vmem:[#allocation41_spill] sm:$0xff] %v14554_v41  ;;  %v6244_v47 = vpop.f32.mrb[127].mxu1  ;;  %v14560_v40 = vadd.f32 %v11199_v63, %v6242_v22  ;;  %v10690_v22 = vld [vmem:[%s11456_s27 + $0x14] ss:$24 sps:$4 sm:$0xff]   ;;  %7022 = vmatprep.subr.bf16.mxu0 %v10687_v48  ;;  %v10699_v63 = vld [vmem:[%s11456_s27 + $0x64] ss:$24 sps:$4 sm:$0xff]  }
 0xf97   : > { %16359 = vst [vmem:[#allocation40_spill] sm:$0xff] %v14552_v58  ;;  %v14556_v61 = vadd.f32 %v11198_v24, %v6244_v47  ;;  %v6321_v54 = vsel %vm3063_vm2, %v14552_v58, 0.0  ;;  %v10696_v47 = vld [vmem:[%s11456_s27 + $0x44] ss:$24 sps:$4 sm:$0xff]   ;;  %7184 = vmatprep.subr.bf16.mxu1 %v10690_v22  ;;  %v10691_v24 = vld [vmem:[%s11456_s27 + $0x30] ss:$24 sps:$4 sm:$0xff]  }
 0xf98   : > { %16362 = vst [vmem:[#allocation43_spill] sm:$0xff] %v14560_v40  ;;  %v6322_v26 = vadd.f32 %v6321_v54, %v14554_v41  ;;  %7185 = vmatpush1.bf16.msra.mxu1 %v10688_v30  ;;  %v10694_v54 = vld [vmem:[%s11456_s27 + $0x40] ss:$24 sps:$4 sm:$0xff]  }
 0xf99   : > { %16361 = vst [vmem:[#allocation42_spill] sm:$0xff] %v14556_v61  ;;  %v6325_v18 = vsel %vm3063_vm2, %v14556_v61, 0.0  ;;  %7186 = vmatprep.subr.bf16.mxu1 %v10696_v47 }
 0xf9a   : > { %6323 = vadd.xlane.f32.xlu0 %v6322_v26  ;;  %v6326_v4 = vadd.f32 %v6325_v18, %v14560_v40  ;;  %v10702_v26 = vld [vmem:[%s11456_s27 + $0x74] ss:$24 sps:$4 sm:$0xff]   ;;  %v10697_v18 = vld [vmem:[%s11456_s27 + $0x60] ss:$24 sps:$4 sm:$0xff]  }
 0xf9b   : > { %v6248_v32 = vpop.f32.mrb[128].mxu1 }
 0xf9c   : > { %6327 = vadd.xlane.f32.xlu1 %v6326_v4  ;;  %v6250_v25 = vpop.f32.mrb[129].mxu1  ;;  %v14568_v28 = vadd.f32 %v11201_v34, %v6248_v32  ;;  %7187 = vmatpush1.bf16.msra.mxu1 %v10694_v54  ;;  %v10700_v4 = vld [vmem:[%s11456_s27 + $0x70] ss:$24 sps:$4 sm:$0xff]   ;;  %v10705_v32 = vld [vmem:[%s11456_s27 + $0x94] ss:$24 sps:$4 sm:$0xff]  }
 0xf9d   : > { %v14566_v35 = vadd.f32 %v11200_v33, %v6250_v25  ;;  %v6252_v7 = vpop.f32.mrb[130].mxu1  ;;  %7188 = vmatprep.subr.bf16.mxu1 %v10702_v26  ;;  %v10708_v25 = vld [vmem:[%s11456_s27 + $0xa4] ss:$24 sps:$4 sm:$0xff]   ;;  %v10703_v33 = vld [vmem:[%s11456_s27 + $0x90] ss:$24 sps:$4 sm:$0xff]  }
 0xf9e   : > { %16364 = vst [vmem:[#allocation49_spill] sm:$0xff] %v14568_v28  ;;  %v6254_v53 = vpop.f32.mrb[131].mxu1  ;;  %v14574_v29 = vadd.f32 %v11203_v52, %v6252_v7  ;;  %v10706_v7 = vld [vmem:[%s11456_s27 + $0xa0] ss:$24 sps:$4 sm:$0xff]   ;;  %v10711_v34 = vld [vmem:[%s11456_s27 + $0xc4] ss:$24 sps:$4 sm:$0xff]  }
 0xf9f   : > { %16363 = vst [vmem:[#allocation48_spill] sm:$0xff] %v14566_v35  ;;  %v14570_v11 = vadd.f32 %v11202_v16, %v6254_v53  ;;  %v6329_v42 = vsel %vm3063_vm2, %v14566_v35, 0.0  ;;  %v10714_v53 = vld [vmem:[%s11456_s27 + $0xd4] ss:$24 sps:$4 sm:$0xff]   ;;  %v10709_v16 = vld [vmem:[%s11456_s27 + $0xc0] ss:$24 sps:$4 sm:$0xff]  }
 0xfa0   : > { %16366 = vst [vmem:[#allocation51_spill] sm:$0xff] %v14574_v29  ;;  %v6330_v8 = vadd.f32 %v6329_v42, %v14568_v28  ;;  %7189 = vmatpush1.bf16.msra.mxu1 %v10700_v4  ;;  %v10712_v42 = vld [vmem:[%s11456_s27 + $0xd0] ss:$24 sps:$4 sm:$0xff]   ;;  %v10717_v52 = vld [vmem:[%s11456_s27 + $0xf4] ss:$24 sps:$4 sm:$0xff]  }
 0xfa1   : > { %16365 = vst [vmem:[#allocation50_spill] sm:$0xff] %v14570_v11  ;;  %v6333_v9 = vsel %vm3063_vm2, %v14570_v11, 0.0  ;;  %7190 = vmatprep.subr.bf16.mxu1 %v10708_v25 }
 0xfa2   : > { %6331 = vadd.xlane.f32.xlu0 %v6330_v8  ;;  %v6334_v49 = vadd.f32 %v6333_v9, %v14574_v29  ;;  %v10720_v8 = vld [vmem:[%s11456_s27 + $0x104] ss:$24 sps:$4 sm:$0xff]   ;;  %v10715_v9 = vld [vmem:[%s11456_s27 + $0xf0] ss:$24 sps:$4 sm:$0xff]  }
 0xfa3   : > { %v6258_v37 = vpop.f32.mrb[132].mxu1 }
 0xfa4   : > { %6335 = vadd.xlane.f32.xlu1 %v6334_v49  ;;  %v6260_v44 = vpop.f32.mrb[133].mxu1  ;;  %v14582_v36 = vadd.f32 %v11205_v10, %v6258_v37  ;;  %7191 = vmatpush1.bf16.msra.mxu1 %v10706_v7  ;;  %v10718_v49 = vld [vmem:[%s11456_s27 + $0x100] ss:$24 sps:$4 sm:$0xff]  }
 0xfa5   : > { %v14580_v1 = vadd.f32 %v11204_v51, %v6260_v44  ;;  %v6262_v6 = vpop.f32.mrb[134].mxu1  ;;  %7192 = vmatprep.subr.bf16.mxu1 %v10714_v53 }
 0xfa6   : > { %16368 = vst [vmem:[#allocation53_spill] sm:$0xff] %v14582_v36  ;;  %v6264_v2 = vpop.f32.mrb[135].mxu1  ;;  %v14588_v15 = vadd.f32 %v11207_v13, %v6262_v6 }
 0xfa7   : > { %16367 = vst [vmem:[#allocation52_spill] sm:$0xff] %v14580_v1  ;;  %v14584_v20 = vadd.f32 %v11206_v46, %v6264_v2  ;;  %v6337_v62 = vsel %vm3063_vm2, %v14580_v1, 0.0 }
 0xfa8   : > { %16370 = vst [vmem:[#allocation55_spill] sm:$0xff] %v14588_v15  ;;  %v6338_v59 = vadd.f32 %v6337_v62, %v14582_v36  ;;  %7193 = vmatpush1.bf16.msra.mxu1 %v10712_v42 }
 0xfa9   : > { %16369 = vst [vmem:[#allocation54_spill] sm:$0xff] %v14584_v20  ;;  %v6341_v45 = vsel %vm3063_vm2, %v14584_v20, 0.0  ;;  %7194 = vmatprep.subr.bf16.mxu1 %v10720_v8 }
 0xfaa   : > { %6339 = vadd.xlane.f32.xlu0 %v6338_v59  ;;  %v6342_v21 = vadd.f32 %v6341_v45, %v14588_v15 }
 0xfab   : > { %v6268_v55 = vpop.f32.mrb[184].mxu1 }
 0xfac   : > { %v6291_v43 = vadd.f32 %v6268_v55, %v14489_v17  ;;  %6343 = vadd.xlane.f32.xlu1 %v6342_v21  ;;  %v6270_v60 = vpop.f32.mrb[185].mxu1  ;;  %7195 = vmatpush1.bf16.msra.mxu1 %v10718_v49  ;;  %v10723_v49 = vld [vmem:[%s11456_s27 + $0x124] ss:$24 sps:$4 sm:$0xff]  }
 0xfad   : > { %v6292_v57 = vadd.f32 %v6270_v60, %v14491_v5  ;;  %v6272_v12 = vpop.f32.mrb[186].mxu1  ;;  %v10685_v5 = vld [vmem:[%s11456_s27] ss:$24 sps:$4 sm:$0xff]  }
 0xfae   : > { %v6273_v19 = vpop.f32.mrb[187].mxu1  ;;  %v14598_v56 = vadd.f32 %v11209_v50, %v6291_v43  ;;  %7023 = vmatpush1.bf16.msra.mxu0 %v10685_v5 }
 0xfaf   : > { %v14596_v3 = vadd.f32 %v11208_v31, %v6292_v57  ;;  %7024 = vmatprep.subr.bf16.mxu0 %v10693_v27 }
 0xfb0   : > { %16372 = vst [vmem:[#allocation57_spill] sm:$0xff] %v14598_v56 }
 0xfb1   : > { %16371 = vst [vmem:[#allocation56_spill] sm:$0xff] %v14596_v3  ;;  %v6345_v17 = vsel %vm3063_vm2, %v14596_v3, 0.0 }
 0xfb2   : > { %v6346_v0 = vadd.f32 %v6345_v17, %v14598_v56  ;;  %7025 = vmatpush1.bf16.msra.mxu0 %v10691_v24 }
 0xfb3   : > { %7026 = vmatprep.subr.bf16.mxu0 %v10699_v63 }
 0xfb4   : > { %6347 = vadd.xlane.f32.xlu0 %v6346_v0 }
 0xfb6   : > { %7027 = vmatpush1.bf16.msra.mxu0 %v10697_v18 }
 0xfb7   : > { %7028 = vmatprep.subr.bf16.mxu0 %v10705_v32 }
 0xfba   : > { %7029 = vmatpush1.bf16.msra.mxu0 %v10703_v33 }
 0xfbb   : > { %7030 = vmatprep.subr.bf16.mxu0 %v10711_v34 }
 0xfbe   : > { %7031 = vmatpush1.bf16.msra.mxu0 %v10709_v16 }
 0xfbf   : > { %7032 = vmatprep.subr.bf16.mxu0 %v10717_v52 }
 0xfc2   : > { %7033 = vmatpush1.bf16.msra.mxu0 %v10715_v9 }
 0xfc3   : > { %7034 = vmatprep.subr.bf16.mxu0 %v10723_v49  ;;  %v10739_v49 = vld [vmem:[%s11456_s27 + $0x1b0] ss:$24 sps:$4 sm:$0xff]  }
0x101f   : > { %v6316_v37 = vpop.xlane.xlu0 %6315 }
0x1020   : > { %v6349_v44 = vmul.f32 0.0052083335, %v6316_v37 }
0x1021   : > { %v6320_v51 = vpop.xlane.xlu1 %6319 }
0x1022   : > { %v14628_v6 = vsub.f32 %v14540_v23, %v6349_v44  ;;  %v14631_v10 = vsub.f32 %v14538_v14, %v6349_v44  ;;  %v6350_v2 = vmul.f32 0.0052083335, %v6320_v51  ;;  %v10721_v51 = vld [vmem:[%s11456_s27 + $0x120] ss:$24 sps:$4 sm:$0xff]  }
0x1023   : > { %7035 = vmatpush1.bf16.msra.mxu0 %v10721_v51 }
0x1024   : > { %v14634_v46 = vsub.f32 %v14546_v38, %v6350_v2  ;;  %v14637_v62 = vsub.f32 %v14542_v39, %v6350_v2  ;;  %v6376_v13 = vmul.f32 %v14628_v6, %v14628_v6  ;;  %v6377_v59 = vmul.f32 %v14631_v10, %v14631_v10  ;;  %v10726_v2 = vld [vmem:[%s11456_s27 + $0x134] ss:$24 sps:$4 sm:$0xff]  }
0x1025   : > { %7196 = vmatprep.subr.bf16.mxu1 %v10726_v2  ;;  %v10742_v2 = vld [vmem:[%s11456_s27 + $0x1c0] ss:$24 sps:$4 sm:$0xff]  }
0x1026   : > { %v6394_v45 = vsel %vm3063_vm2, %v6377_v59, 0.0  ;;  %v6378_v21 = vmul.f32 %v14634_v46, %v14634_v46  ;;  %v6379_v55 = vmul.f32 %v14637_v62, %v14637_v62 }
0x1027   : > { %v6324_v43 = vpop.xlane.xlu0 %6323  ;;  %v6395_v60 = vadd.f32 %v6394_v45, %v6376_v13  ;;  %v10724_v45 = vld [vmem:[%s11456_s27 + $0x130] ss:$24 sps:$4 sm:$0xff]  }
0x1028   : > { %v6351_v57 = vmul.f32 0.0052083335, %v6324_v43  ;;  %v6398_v12 = vsel %vm3063_vm2, %v6379_v55, 0.0  ;;  %7197 = vmatpush1.bf16.msra.mxu1 %v10724_v45  ;;  %v10747_v45 = vld [vmem:[%s11456_s27 + $0x1e4] ss:$24 sps:$4 sm:$0xff]  }
0x1029   : > { %v6328_v19 = vpop.xlane.xlu1 %6327  ;;  %6396 = vadd.xlane.f32.xlu1 %v6395_v60  ;;  %v6399_v31 = vadd.f32 %v6398_v12, %v6378_v21  ;;  %v10729_v12 = vld [vmem:[%s11456_s27 + $0x154] ss:$24 sps:$4 sm:$0xff]  }
0x102a   : > { %v14650_v50 = vsub.f32 %v14554_v41, %v6351_v57  ;;  %v14653_v17 = vsub.f32 %v14552_v58, %v6351_v57  ;;  %v6352_v0 = vmul.f32 0.0052083335, %v6328_v19  ;;  %v10727_v19 = vld [vmem:[%s11456_s27 + $0x150] ss:$24 sps:$4 sm:$0xff]   ;;  %7036 = vmatprep.subr.bf16.mxu0 %v10729_v12 }
0x102b   : > { %6400 = vadd.xlane.f32.xlu0 %v6399_v31  ;;  %v10732_v31 = vld [vmem:[%s11456_s27 + $0x164] ss:$24 sps:$4 sm:$0xff]   ;;  %7037 = vmatpush1.bf16.msra.mxu0 %v10727_v19  ;;  %v10748_v12 = vld [vmem:[%s11456_s27 + $0x1f0] ss:$24 sps:$4 sm:$0xff]  }
0x102c   : > { %v14656_v5 = vsub.f32 %v14560_v40, %v6352_v0  ;;  %v14659_v48 = vsub.f32 %v14556_v61, %v6352_v0  ;;  %v6380_v30 = vmul.f32 %v14650_v50, %v14650_v50  ;;  %v6381_v22 = vmul.f32 %v14653_v17, %v14653_v17  ;;  %7198 = vmatprep.subr.bf16.mxu1 %v10732_v31  ;;  %v10753_v31 = vld [vmem:[%s11456_s27 + $0x214] ss:$24 sps:$4 sm:$0xff]  }
0x102e   : > { %v6402_v27 = vsel %vm3063_vm2, %v6381_v22, 0.0  ;;  %v6382_v47 = vmul.f32 %v14656_v5, %v14656_v5  ;;  %v6383_v24 = vmul.f32 %v14659_v48, %v14659_v48 }
0x102f   : > { %v6332_v54 = vpop.xlane.xlu0 %6331  ;;  %v6403_v63 = vadd.f32 %v6402_v27, %v6380_v30 }
0x1030   : > { %v6353_v26 = vmul.f32 0.0052083335, %v6332_v54  ;;  %v6406_v18 = vsel %vm3063_vm2, %v6383_v24, 0.0 }
0x1031   : > { %v6336_v4 = vpop.xlane.xlu1 %6335  ;;  %6404 = vadd.xlane.f32.xlu1 %v6403_v63  ;;  %v6407_v32 = vadd.f32 %v6406_v18, %v6382_v47  ;;  %v10730_v47 = vld [vmem:[%s11456_s27 + $0x160] ss:$24 sps:$4 sm:$0xff]  }
0x1032   : > { %v14672_v25 = vsub.f32 %v14568_v28, %v6353_v26  ;;  %v14675_v33 = vsub.f32 %v14566_v35, %v6353_v26  ;;  %v6354_v7 = vmul.f32 0.0052083335, %v6336_v4  ;;  %v10735_v26 = vld [vmem:[%s11456_s27 + $0x184] ss:$24 sps:$4 sm:$0xff]   ;;  %7199 = vmatpush1.bf16.msra.mxu1 %v10730_v47  ;;  %v10733_v4 = vld [vmem:[%s11456_s27 + $0x180] ss:$24 sps:$4 sm:$0xff]  }
0x1033   : > { %6408 = vadd.xlane.f32.xlu0 %v6407_v32  ;;  %v10738_v32 = vld [vmem:[%s11456_s27 + $0x194] ss:$24 sps:$4 sm:$0xff]   ;;  %7038 = vmatprep.subr.bf16.mxu0 %v10735_v26  ;;  %v10754_v47 = vld [vmem:[%s11456_s27 + $0x220] ss:$24 sps:$4 sm:$0xff]  }
0x1034   : > { %v14678_v34 = vsub.f32 %v14574_v29, %v6354_v7  ;;  %v14681_v53 = vsub.f32 %v14570_v11, %v6354_v7  ;;  %v6384_v16 = vmul.f32 %v14672_v25, %v14672_v25  ;;  %v6385_v42 = vmul.f32 %v14675_v33, %v14675_v33  ;;  %7039 = vmatpush1.bf16.msra.mxu0 %v10733_v4 }
0x1035   : > { %7200 = vmatprep.subr.bf16.mxu1 %v10738_v32 }
0x1036   : > { %v6410_v52 = vsel %vm3063_vm2, %v6385_v42, 0.0  ;;  %v6386_v8 = vmul.f32 %v14678_v34, %v14678_v34  ;;  %v6387_v9 = vmul.f32 %v14681_v53, %v14681_v53 }
0x1037   : > { %v6340_v37 = vpop.xlane.xlu0 %6339  ;;  %v6411_v44 = vadd.f32 %v6410_v52, %v6384_v16  ;;  %v10736_v16 = vld [vmem:[%s11456_s27 + $0x190] ss:$24 sps:$4 sm:$0xff]  }
0x1038   : > { %v6355_v13 = vmul.f32 0.0052083335, %v6340_v37  ;;  %v6414_v59 = vsel %vm3063_vm2, %v6387_v9, 0.0  ;;  %v10741_v9 = vld [vmem:[%s11456_s27 + $0x1b4] ss:$24 sps:$4 sm:$0xff]   ;;  %7201 = vmatpush1.bf16.msra.mxu1 %v10736_v16 }
0x1039   : > { %6412 = vadd.xlane.f32.xlu1 %v6411_v44  ;;  %v6344_v21 = vpop.xlane.xlu1 %6343  ;;  %v6415_v55 = vadd.f32 %v6414_v59, %v6386_v8  ;;  %v10744_v37 = vld [vmem:[%s11456_s27 + $0x1c4] ss:$24 sps:$4 sm:$0xff]   ;;  %7040 = vmatprep.subr.bf16.mxu0 %v10741_v9 }
0x103a   : > { %v14698_v43 = vsub.f32 %v14582_v36, %v6355_v13  ;;  %v14701_v60 = vsub.f32 %v14580_v1, %v6355_v13  ;;  %v6356_v57 = vmul.f32 0.0052083335, %v6344_v21  ;;  %7041 = vmatpush1.bf16.msra.mxu0 %v10739_v49  ;;  %7202 = vmatprep.subr.bf16.mxu1 %v10744_v37  ;;  %v10745_v21 = vld [vmem:[%s11456_s27 + $0x1e0] ss:$24 sps:$4 sm:$0xff]  }
0x103b   : > { %6416 = vadd.xlane.f32.xlu0 %v6415_v55  ;;  %v10750_v55 = vld [vmem:[%s11456_s27 + $0x1f4] ss:$24 sps:$4 sm:$0xff]   ;;  %7042 = vmatprep.subr.bf16.mxu0 %v10747_v45  ;;  %v16375_v45 = vld [vmem:[#allocation39_spill] sm:$0xff] }
0x103c   : > { %v14707_v0 = vsub.f32 %v14588_v15, %v6356_v57  ;;  %v14710_v30 = vsub.f32 %v14584_v20, %v6356_v57  ;;  %v6388_v22 = vmul.f32 %v14698_v43, %v14698_v43  ;;  %v6389_v27 = vmul.f32 %v14701_v60, %v14701_v60  ;;  %7203 = vmatpush1.bf16.msra.mxu1 %v10742_v2  ;;  %v16374_v2 = vld [vmem:[#allocation38_spill] sm:$0xff] }
0x103d   : > { %7204 = vmatprep.subr.bf16.mxu1 %v10750_v55 }
0x103e   : > { %v6418_v24 = vsel %vm3063_vm2, %v6389_v27, 0.0  ;;  %v6390_v54 = vmul.f32 %v14707_v0, %v14707_v0  ;;  %v6391_v63 = vmul.f32 %v14710_v30, %v14710_v30  ;;  %7043 = vmatpush1.bf16.msra.mxu0 %v10745_v21  ;;  %v10756_v27 = vld [vmem:[%s11456_s27 + $0x224] ss:$24 sps:$4 sm:$0xff]  }
0x103f   : > { %v6419_v18 = vadd.f32 %v6418_v24, %v6388_v22  ;;  %v10751_v22 = vld [vmem:[%s11456_s27 + $0x210] ss:$24 sps:$4 sm:$0xff]   ;;  %7044 = vmatprep.subr.bf16.mxu0 %v10753_v31  ;;  %v10759_v24 = vld [vmem:[%s11456_s27 + $0xc] ss:$24 sps:$4 sm:$0xff]  }
0x1040   : > { %v6422_v7 = vsel %vm3063_vm2, %v6391_v63, 0.0  ;;  %7205 = vmatpush1.bf16.msra.mxu1 %v10748_v12 }
0x1041   : > { %6420 = vadd.xlane.f32.xlu1 %v6419_v18  ;;  %v6348_v42 = vpop.xlane.xlu0 %6347  ;;  %v6423_v52 = vadd.f32 %v6422_v7, %v6390_v54  ;;  %7206 = vmatprep.subr.bf16.mxu1 %v10756_v27  ;;  %v10795_v54 = vld [vmem:[%s11466_s2 + $0x4] ss:$8 sps:$4 sm:$0xff]  }
0x1042   : > { %v6357_v8 = vmul.f32 0.0052083335, %v6348_v42  ;;  %7045 = vmatpush1.bf16.msra.mxu0 %v10751_v22 }
0x1043   : > { %6424 = vadd.xlane.f32.xlu0 %v6423_v52  ;;  %7103 = vmatprep.subr.bf16.mxu0 %v10759_v24 }
0x1044   : > { %v14731_v44 = vsub.f32 %v14598_v56, %v6357_v8  ;;  %v14734_v51 = vsub.f32 %v14596_v3, %v6357_v8  ;;  %7207 = vmatpush1.bf16.msra.mxu1 %v10754_v47  ;;  %v6311_v8 = vld [vmem:[%s16373_s30] sm:$0x3] }
0x1045   : > { %8369 = vmatprep.subr.bf16.mxu1 %v10795_v54  ;;  %v14766_v21 = vrot.slane %v6311_v8, %v16375_v45 }
0x1046   : > { %v6392_v13 = vmul.f32 %v14731_v44, %v14731_v44  ;;  %v6393_v59 = vmul.f32 %v14734_v51, %v14734_v51 }
0x1048   : > { %v6426_v57 = vsel %vm3063_vm2, %v6393_v59, 0.0  ;;  %v6312_v59 = vld [vmem:[%s982_s29] sm:$0x3] }
0x1049   : > { %v6427_v19 = vadd.f32 %v6426_v57, %v6392_v13  ;;  %v14758_v13 = vrot.slane %v6311_v8, %v16374_v2  ;;  %v14771_v27 = vrot.slane %v6312_v59, %v16374_v2  ;;  %v14774_v47 = vrot.slane %v6312_v59, %v16375_v45 }
0x104b   : > { %6428 = vadd.xlane.f32.xlu1 %v6427_v19 }
0x10b6   : > { %v6397_v63 = vpop.xlane.xlu1 %6396 }
0x10b7   : > { %v6430_v26 = vmul.f32 0.0052083335, %v6397_v63 }
0x10b8   : > { %v6401_v18 = vpop.xlane.xlu0 %6400 }
0x10b9   : > { %v6439_v4 = vadd.f32 1e-05, %v6430_v26  ;;  %v6431_v32 = vmul.f32 0.0052083335, %v6401_v18 }
0x10bb   : > { %11063 = vrsqrt.f32 %v6439_v4  ;;  %v6440_v7 = vadd.f32 1e-05, %v6431_v32 }
0x10bd   : > { %11065 = vrsqrt.f32 %v6440_v7 }
0x10be   : > { %v6405_v16 = vpop.xlane.xlu1 %6404 }
0x10bf   : > { %v6432_v42 = vmul.f32 0.0052083335, %v6405_v16 }
0x10c0   : > { %v6409_v52 = vpop.xlane.xlu0 %6408 }
0x10c1   : > { %v6441_v9 = vadd.f32 1e-05, %v6432_v42  ;;  %v6433_v49 = vmul.f32 0.0052083335, %v6409_v52 }
0x10c3   : > { %11067 = vrsqrt.f32 %v6441_v9  ;;  %v6442_v37 = vadd.f32 1e-05, %v6433_v49 }
0x10c5   : > { %v11064_v55 = vpop.eup %11063  ;;  %11069 = vrsqrt.f32 %v6442_v37  ;;  %v10757_v37 = vld [vmem:[%s11456_s27 + $0x8] ss:$24 sps:$4 sm:$0xff]  }
0x10c6   : > { %v6457_v57 = vmul.f32 %v11064_v55, %v14628_v6  ;;  %v6458_v12 = vmul.f32 %v11064_v55, %v14631_v10  ;;  %v6413_v19 = vpop.xlane.xlu1 %6412 }
0x10c7   : > { %v11066_v31 = vpop.eup %11065  ;;  %v6434_v22 = vmul.f32 0.0052083335, %v6413_v19 }
0x10c8   : > { %v6486_v24 = vmul.f32 %v14758_v13, %v6457_v57  ;;  %v6459_v54 = vmul.f32 %v11066_v31, %v14634_v46  ;;  %v6460_v63 = vmul.f32 %v11066_v31, %v14637_v62  ;;  %v6417_v26 = vpop.xlane.xlu0 %6416  ;;  %v6487_v6 = vmul.f32 %v14766_v21, %v6458_v12  ;;  %v10793_v57 = vld [vmem:[%s11466_s2] ss:$8 sps:$4 sm:$0xff]   ;;  %v10762_v31 = vld [vmem:[%s11456_s27 + $0x3c] ss:$24 sps:$4 sm:$0xff]  }
0x10c9   : > { %v6443_v10 = vadd.f32 1e-05, %v6434_v22  ;;  %v6435_v18 = vmul.f32 0.0052083335, %v6417_v26  ;;  %v10798_v22 = vld [vmem:[%s11466_s2 + $0x14] ss:$8 sps:$4 sm:$0xff]  }
0x10ca   : > { %v6488_v4 = vmul.f32 %v14758_v13, %v6459_v54  ;;  %v6489_v32 = vmul.f32 %v14766_v21, %v6460_v63  ;;  %v6516_v16 = vadd.f32 %v14774_v47, %v6487_v6  ;;  %v6515_v62 = vadd.f32 %v14771_v27, %v6486_v24  ;;  %v10760_v6 = vld [vmem:[%s11456_s27 + $0x38] ss:$24 sps:$4 sm:$0xff]  }
0x10cb   : > { %11071 = vrsqrt.f32 %v6443_v10  ;;  %v6444_v7 = vadd.f32 1e-05, %v6435_v18 }
0x10cc   : > { %v6518_v46 = vadd.f32 %v14774_v47, %v6489_v32  ;;  %v6517_v42 = vadd.f32 %v14771_v27, %v6488_v4  ;;  %v10796_v32 = vld [vmem:[%s11466_s2 + $0x10] ss:$8 sps:$4 sm:$0xff]  }
0x10cd   : > { %v11068_v52 = vpop.eup %11067  ;;  %11073 = vrsqrt.f32 %v6444_v7 }
0x10ce   : > { %v6462_v8 = vmul.f32 %v11068_v52, %v14653_v17  ;;  %v6421_v9 = vpop.xlane.xlu1 %6420  ;;  %v14787_v49 = vpack.c.bf16 %v6518_v46, %v6516_v16  ;;  %v14790_v59 = vpack.c.bf16 %v6517_v42, %v6515_v62  ;;  %v6461_v55 = vmul.f32 %v11068_v52, %v14650_v50 }
0x10cf   : > { %v11070_v12 = vpop.eup %11069  ;;  %v6436_v19 = vmul.f32 0.0052083335, %v6421_v9  ;;  %v10763_v9 = vld [vmem:[%s11456_s27 + $0x68] ss:$24 sps:$4 sm:$0xff]  }
0x10d0   : > { %v6464_v24 = vmul.f32 %v11070_v12, %v14659_v48  ;;  %9812 = vmatprep.mubr.msk.bf16.mxu0 %vm3063_vm2, %v14787_v49  ;;  %9822 = vmatprep.mubr.msk.bf16.mxu1 %vm3063_vm2, %v14787_v49  ;;  %v6425_v17 = vpop.xlane.xlu0 %6424  ;;  %v6491_v54 = vmul.f32 %v14766_v21, %v6462_v8  ;;  %v6463_v50 = vmul.f32 %v11070_v12, %v14656_v5  ;;  %v10765_v5 = vld [vmem:[%s11456_s27 + $0x6c] ss:$24 sps:$4 sm:$0xff]  }
0x10d1   : > { %v6445_v63 = vadd.f32 1e-05, %v6436_v19  ;;  %v6437_v26 = vmul.f32 0.0052083335, %v6425_v17  ;;  %7055 = vmatmul.mubr.bf16.vlgmr.msra.gmra.mrb[140].mxu0 %v14790_v59  ;;  %7217 = vmatmul.mubr.bf16.vlgmr.msra.gmra.mrb[188].mxu1 %v14790_v59  ;;  %v6490_v48 = vmul.f32 %v14758_v13, %v6461_v55  ;;  %v10768_v19 = vld [vmem:[%s11456_s27 + $0x9c] ss:$24 sps:$4 sm:$0xff]  }
0x10d2   : > { %7104 = vmatpush1.bf16.msra.mxu0 %v10757_v37  ;;  %v6493_v10 = vmul.f32 %v14766_v21, %v6464_v24  ;;  %v6492_v18 = vmul.f32 %v14758_v13, %v6463_v50  ;;  %8370 = vmatpush1.bf16.msra.mxu1 %v10793_v57  ;;  %v6520_v7 = vadd.f32 %v14774_v47, %v6491_v54  ;;  %v10801_v57 = vld [vmem:[%s11466_s2 + $0x24] ss:$8 sps:$4 sm:$0xff]   ;;  %v10804_v17 = vld [vmem:[%s11466_s2 + $0x34] ss:$8 sps:$4 sm:$0xff]   ;;  %v10766_v50 = vld [vmem:[%s11456_s27 + $0x98] ss:$24 sps:$4 sm:$0xff]  }
0x10d3   : > { %11075 = vrsqrt.f32 %v6445_v63  ;;  %v6446_v4 = vadd.f32 1e-05, %v6437_v26  ;;  %7105 = vmatprep.subr.bf16.mxu0 %v10762_v31  ;;  %8371 = vmatprep.subr.bf16.mxu1 %v10798_v22  ;;  %v6519_v46 = vadd.f32 %v14771_v27, %v6490_v48  ;;  %v10799_v31 = vld [vmem:[%s11466_s2 + $0x20] ss:$8 sps:$4 sm:$0xff]  }
0x10d4   : > { %v6522_v16 = vadd.f32 %v14774_v47, %v6493_v10  ;;  %v6521_v62 = vadd.f32 %v14771_v27, %v6492_v18 }
0x10d5   : > { %v11072_v42 = vpop.eup %11071  ;;  %11077 = vrsqrt.f32 %v6446_v4 }
0x10d6   : > { %v6466_v52 = vmul.f32 %v11072_v42, %v14675_v33  ;;  %7106 = vmatpush1.bf16.msra.mxu0 %v10760_v6  ;;  %v14816_v8 = vpack.c.bf16 %v6522_v16, %v6520_v7  ;;  %v14819_v37 = vpack.c.bf16 %v6521_v62, %v6519_v46  ;;  %v6465_v55 = vmul.f32 %v11072_v42, %v14672_v25  ;;  %v10771_v6 = vld [vmem:[%s11456_s27 + $0xcc] ss:$24 sps:$4 sm:$0xff]   ;;  %v10769_v46 = vld [vmem:[%s11456_s27 + $0xc8] ss:$24 sps:$4 sm:$0xff]  }
0x10d7   : > { %v11074_v12 = vpop.eup %11073  ;;  %7107 = vmatprep.subr.bf16.mxu0 %v10765_v5  ;;  %8372 = vmatpush1.bf16.msra.mxu1 %v10796_v32 }
0x10d8   : > { %v6468_v22 = vmul.f32 %v11074_v12, %v14681_v53  ;;  %v6429_v24 = vpop.xlane.xlu1 %6428  ;;  %9813 = vmatprep.mubr.msk.bf16.mxu0 %vm3063_vm2, %v14816_v8  ;;  %9823 = vmatprep.mubr.msk.bf16.mxu1 %vm3063_vm2, %v14816_v8  ;;  %v6495_v33 = vmul.f32 %v14766_v21, %v6466_v52  ;;  %v6467_v25 = vmul.f32 %v11074_v12, %v14678_v34  ;;  %v10802_v34 = vld [vmem:[%s11466_s2 + $0x30] ss:$8 sps:$4 sm:$0xff]   ;;  %v10807_v52 = vld [vmem:[%s11466_s2 + $0x44] ss:$8 sps:$4 sm:$0xff]  }
0x10d9   : > { %v6438_v54 = vmul.f32 0.0052083335, %v6429_v24  ;;  %7065 = vmatmul.mubr.bf16.gmra.mrb[144].mxu0 %v14819_v37  ;;  %7227 = vmatmul.mubr.bf16.gmra.mrb[192].mxu1 %v14819_v37  ;;  %v6494_v53 = vmul.f32 %v14758_v13, %v6465_v55  ;;  %v10774_v55 = vld [vmem:[%s11456_s27 + $0xfc] ss:$24 sps:$4 sm:$0xff]  }
0x10da   : > { %7108 = vmatpush1.bf16.msra.mxu0 %v10763_v9  ;;  %v6497_v63 = vmul.f32 %v14766_v21, %v6468_v22  ;;  %v6496_v26 = vmul.f32 %v14758_v13, %v6467_v25  ;;  %8373 = vmatprep.subr.bf16.mxu1 %v10801_v57  ;;  %v6524_v10 = vadd.f32 %v14774_v47, %v6495_v33  ;;  %v10805_v57 = vld [vmem:[%s11466_s2 + $0x40] ss:$8 sps:$4 sm:$0xff]   ;;  %v10777_v33 = vld [vmem:[%s11456_s27 + $0x12c] ss:$24 sps:$4 sm:$0xff]  }
0x10db   : > { %v6447_v48 = vadd.f32 1e-05, %v6438_v54  ;;  %7109 = vmatprep.subr.bf16.mxu0 %v10768_v19  ;;  %8374 = vmatpush1.bf16.msra.mxu1 %v10799_v31  ;;  %v6523_v4 = vadd.f32 %v14771_v27, %v6494_v53  ;;  %v10810_v19 = vld [vmem:[%s11466_s2 + $0x54] ss:$8 sps:$4 sm:$0xff]  }
0x10dc   : > { %v6526_v18 = vadd.f32 %v14774_v47, %v6497_v63  ;;  %v6525_v5 = vadd.f32 %v14771_v27, %v6496_v26  ;;  %8375 = vmatprep.subr.bf16.mxu1 %v10804_v17  ;;  %v10775_v63 = vld [vmem:[%s11456_s27 + $0x128] ss:$24 sps:$4 sm:$0xff]  }
0x10dd   : > { %v11076_v32 = vpop.eup %11075  ;;  %11079 = vrsqrt.f32 %v6447_v48  ;;  %v10813_v48 = vld [vmem:[%s11466_s2 + $0x64] ss:$8 sps:$4 sm:$0xff]  }
0x10de   : > { %v6470_v7 = vmul.f32 %v11076_v32, %v14701_v60  ;;  %7110 = vmatpush1.bf16.msra.mxu0 %v10766_v50  ;;  %v14846_v16 = vpack.c.bf16 %v6526_v18, %v6524_v10  ;;  %v14849_v62 = vpack.c.bf16 %v6525_v5, %v6523_v4  ;;  %v6469_v42 = vmul.f32 %v11076_v32, %v14698_v43  ;;  %v10811_v10 = vld [vmem:[%s11466_s2 + $0x60] ss:$8 sps:$4 sm:$0xff]   ;;  %v10816_v5 = vld [vmem:[%s11466_s2 + $0x74] ss:$8 sps:$4 sm:$0xff]   ;;  %v10778_v32 = vld [vmem:[%s11456_s27 + $0x158] ss:$24 sps:$4 sm:$0xff]  }
0x10df   : > { %v11078_v9 = vpop.eup %11077  ;;  %7111 = vmatprep.subr.bf16.mxu0 %v10771_v6  ;;  %8376 = vmatpush1.bf16.msra.mxu1 %v10802_v34  ;;  %v10780_v34 = vld [vmem:[%s11456_s27 + $0x15c] ss:$24 sps:$4 sm:$0xff]  }
0x10e0   : > { %v6472_v12 = vmul.f32 %v11078_v9, %v14710_v30  ;;  %9814 = vmatprep.mubr.msk.bf16.mxu0 %vm3063_vm2, %v14846_v16  ;;  %9824 = vmatprep.mubr.msk.bf16.mxu1 %vm3063_vm2, %v14846_v16  ;;  %v6499_v60 = vmul.f32 %v14766_v21, %v6470_v7  ;;  %v6471_v43 = vmul.f32 %v11078_v9, %v14707_v0  ;;  %v10772_v30 = vld [vmem:[%s11456_s27 + $0xf8] ss:$24 sps:$4 sm:$0xff]  }
0x10e1   : > { %7075 = vmatmul.mubr.bf16.gmra.mrb[148].mxu0 %v14849_v62  ;;  %7237 = vmatmul.mubr.bf16.gmra.mrb[196].mxu1 %v14849_v62  ;;  %v6498_v31 = vmul.f32 %v14758_v13, %v6469_v42  ;;  %v10808_v0 = vld [vmem:[%s11466_s2 + $0x50] ss:$8 sps:$4 sm:$0xff]  }
0x10e2   : > { %7112 = vmatpush1.bf16.msra.mxu0 %v10769_v46  ;;  %v6501_v22 = vmul.f32 %v14766_v21, %v6472_v12  ;;  %v6500_v24 = vmul.f32 %v14758_v13, %v6471_v43  ;;  %8377 = vmatprep.subr.bf16.mxu1 %v10807_v52  ;;  %v6528_v25 = vadd.f32 %v14774_v47, %v6499_v60  ;;  %v10814_v42 = vld [vmem:[%s11466_s2 + $0x70] ss:$8 sps:$4 sm:$0xff]   ;;  %v10792_v12 = vld [vmem:[%s11456_s27 + $0x21c] ss:$24 sps:$4 sm:$0xff]  }
0x10e3   : > { %7113 = vmatprep.subr.bf16.mxu0 %v10774_v55  ;;  %8378 = vmatpush1.bf16.msra.mxu1 %v10805_v57  ;;  %v6527_v54 = vadd.f32 %v14771_v27, %v6498_v31  ;;  %v10781_v55 = vld [vmem:[%s11456_s27 + $0x188] ss:$24 sps:$4 sm:$0xff]   ;;  %v10790_v60 = vld [vmem:[%s11456_s27 + $0x218] ss:$24 sps:$4 sm:$0xff]   ;;  %v10828_v43 = vld [vmem:[%s11466_s2 + $0xb4] ss:$8 sps:$4 sm:$0xff]  }
0x10e4   : > { %v6530_v17 = vadd.f32 %v14774_v47, %v6501_v22  ;;  %v6529_v53 = vadd.f32 %v14771_v27, %v6500_v24  ;;  %8379 = vmatprep.subr.bf16.mxu1 %v10810_v19  ;;  %v10826_v19 = vld [vmem:[%s11466_s2 + $0xb0] ss:$8 sps:$4 sm:$0xff]   ;;  %v10831_v31 = vld [vmem:[%s11466_s2 + $0x104] ss:$8 sps:$4 sm:$0xff]   ;;  %v10832_v24 = vld [vmem:[%s11466_s2 + $0xc0] ss:$8 sps:$4 sm:$0xff]  }
0x10e5   : > { %v10834_v22 = vld [vmem:[%s11466_s2 + $0xc4] ss:$8 sps:$4 sm:$0xff]  }
0x10e6   : > { %7114 = vmatpush1.bf16.msra.mxu0 %v10772_v30  ;;  %v6540_v50 = vpack.c.bf16 %v6530_v17, %v6528_v25  ;;  %v6539_v26 = vpack.c.bf16 %v6529_v53, %v6527_v54  ;;  %v10829_v30 = vld [vmem:[%s11466_s2 + $0x100] ss:$8 sps:$4 sm:$0xff]   ;;  %v10840_v25 = vld [vmem:[%s11466_s2 + $0xd4] ss:$8 sps:$4 sm:$0xff]   ;;  %v10838_v17 = vld [vmem:[%s11466_s2 + $0xd0] ss:$8 sps:$4 sm:$0xff]  }
0x10e7   : > { %v11080_v6 = vpop.eup %11079  ;;  %7115 = vmatprep.subr.bf16.mxu0 %v10777_v33  ;;  %8380 = vmatpush1.bf16.msra.mxu1 %v10808_v0  ;;  %v10837_v33 = vld [vmem:[%s11466_s2 + $0x114] ss:$8 sps:$4 sm:$0xff]   ;;  %v10835_v0 = vld [vmem:[%s11466_s2 + $0x110] ss:$8 sps:$4 sm:$0xff]   ;;  %v10843_v54 = vld [vmem:[%s11466_s2 + $0x124] ss:$8 sps:$4 sm:$0xff]  }
0x10e8   : > { %v6474_v18 = vmul.f32 %v11080_v6, %v14734_v51  ;;  %9815 = vmatprep.mubr.msk.bf16.mxu0 %vm3063_vm2, %v6540_v50  ;;  %9825 = vmatprep.mubr.msk.bf16.mxu1 %vm3063_vm2, %v6540_v50  ;;  %v6473_v4 = vmul.f32 %v11080_v6, %v14731_v44  ;;  %v10783_v51 = vld [vmem:[%s11456_s27 + $0x18c] ss:$24 sps:$4 sm:$0xff]   ;;  %v10841_v53 = vld [vmem:[%s11466_s2 + $0x120] ss:$8 sps:$4 sm:$0xff]   ;;  %v10852_v6 = vld [vmem:[%s11466_s2 + $0xf4] ss:$8 sps:$4 sm:$0xff]  }
0x10e9   : > { %7085 = vmatmul.mubr.bf16.gmra.mrb[152].mxu0 %v6539_v26  ;;  %7247 = vmatmul.mubr.bf16.gmra.mrb[200].mxu1 %v6539_v26 }
0x10ea   : > { %7116 = vmatpush1.bf16.msra.mxu0 %v10775_v63  ;;  %v6503_v7 = vmul.f32 %v14766_v21, %v6474_v18  ;;  %v6502_v46 = vmul.f32 %v14758_v13, %v6473_v4  ;;  %8381 = vmatprep.subr.bf16.mxu1 %v10813_v48  ;;  %v10786_v13 = vld [vmem:[%s11456_s27 + $0x1bc] ss:$24 sps:$4 sm:$0xff]   ;;  %v10784_v21 = vld [vmem:[%s11456_s27 + $0x1b8] ss:$24 sps:$4 sm:$0xff]   ;;  %v10844_v63 = vld [vmem:[%s11466_s2 + $0xe0] ss:$8 sps:$4 sm:$0xff]  }
0x10eb   : > { %7117 = vmatprep.subr.bf16.mxu0 %v10780_v34  ;;  %8382 = vmatpush1.bf16.msra.mxu1 %v10811_v10  ;;  %v10847_v48 = vld [vmem:[%s11466_s2 + $0x130] ss:$8 sps:$4 sm:$0xff]   ;;  %v10855_v10 = vld [vmem:[%s11466_s2 + $0x144] ss:$8 sps:$4 sm:$0xff]   ;;  %v10853_v18 = vld [vmem:[%s11466_s2 + $0x140] ss:$8 sps:$4 sm:$0xff]  }
0x10ec   : > { %v6532_v52 = vadd.f32 %v14774_v47, %v6503_v7  ;;  %v6531_v44 = vadd.f32 %v14771_v27, %v6502_v46  ;;  %8383 = vmatprep.subr.bf16.mxu1 %v10816_v5  ;;  %v10789_v27 = vld [vmem:[%s11456_s27 + $0x1ec] ss:$24 sps:$4 sm:$0xff]   ;;  %v10787_v47 = vld [vmem:[%s11456_s27 + $0x1e8] ss:$24 sps:$4 sm:$0xff]   ;;  %v10850_v34 = vld [vmem:[%s11466_s2 + $0xf0] ss:$8 sps:$4 sm:$0xff]  }
0x10ed   : > { %v10856_v4 = vld [vmem:[%s11466_s2 + $0x150] ss:$8 sps:$4 sm:$0xff]   ;;  %v10858_v5 = vld [vmem:[%s11466_s2 + $0x154] ss:$8 sps:$4 sm:$0xff]   ;;  %v10859_v7 = vld [vmem:[%s11466_s2 + $0x160] ss:$8 sps:$4 sm:$0xff]  }
0x10ee   : > { %7118 = vmatpush1.bf16.msra.mxu0 %v10778_v32  ;;  %v6542_v9 = vpack.c.bf16 %v6532_v52, %v6532_v52  ;;  %v6541_v57 = vpack.c.bf16 %v6531_v44, %v6531_v44  ;;  %v10861_v32 = vld [vmem:[%s11466_s2 + $0x164] ss:$8 sps:$4 sm:$0xff]   ;;  %v10862_v46 = vld [vmem:[%s11466_s2 + $0x170] ss:$8 sps:$4 sm:$0xff]   ;;  %v10865_v52 = vld [vmem:[%s11466_s2 + $0x180] ss:$8 sps:$4 sm:$0xff]  }
0x10ef   : > { %7119 = vmatprep.subr.bf16.mxu0 %v10783_v51  ;;  %8384 = vmatpush1.bf16.msra.mxu1 %v10814_v42  ;;  %v10864_v51 = vld [vmem:[%s11466_s2 + $0x174] ss:$8 sps:$4 sm:$0xff]   ;;  %v10867_v42 = vld [vmem:[%s11466_s2 + $0x184] ss:$8 sps:$4 sm:$0xff]   ;;  %v10868_v44 = vld [vmem:[%s11466_s2 + $0x190] ss:$8 sps:$4 sm:$0xff]  }
0x10f0   : > { %9816 = vmatprep.mubr.msk.bf16.mxu0 %vm3063_vm2, %v6542_v9  ;;  %9826 = vmatprep.mubr.msk.bf16.mxu1 %vm3063_vm2, %v6542_v9 }
0x10f1   : > { %7095 = vmatmul.mubr.bf16.gmra.mrb[156].mxu0 %v6541_v57  ;;  %7257 = vmatmul.mubr.bf16.gmra.mrb[204].mxu1 %v6541_v57 }
0x10f2   : > { %7120 = vmatpush1.bf16.msra.mxu0 %v10781_v55  ;;  %9817 = vmatprep.mubr.msk.bf16.mxu0 %vm3063_vm2, %v14787_v49  ;;  %v10819_v49 = vld [vmem:[%s11466_s2 + $0x84] ss:$8 sps:$4 sm:$0xff]  }
0x10f3   : > { %7121 = vmatprep.subr.bf16.mxu0 %v10786_v13  ;;  %8385 = vmatprep.subr.bf16.mxu1 %v10819_v49  ;;  %v10873_v55 = vld [vmem:[%s11466_s2 + $0x1a4] ss:$8 sps:$4 sm:$0xff]   ;;  %v10874_v13 = vld [vmem:[%s11466_s2 + $0x1b0] ss:$8 sps:$4 sm:$0xff]  }
0x10f4   : > { %v10885_v49 = vld [vmem:[%s11466_s2 + $0x1e4] ss:$8 sps:$4 sm:$0xff]  }
0x10f6   : > { %7122 = vmatpush1.bf16.msra.mxu0 %v10784_v21  ;;  %v10876_v21 = vld [vmem:[%s11466_s2 + $0x1b4] ss:$8 sps:$4 sm:$0xff]  }
0x10f7   : > { %7123 = vmatprep.subr.bf16.mxu0 %v10789_v27  ;;  %v10877_v27 = vld [vmem:[%s11466_s2 + $0x1c0] ss:$8 sps:$4 sm:$0xff]  }
0x10fa   : > { %7124 = vmatpush1.bf16.msra.mxu0 %v10787_v47  ;;  %v10879_v47 = vld [vmem:[%s11466_s2 + $0x1c4] ss:$8 sps:$4 sm:$0xff]  }
0x10fb   : > { %7125 = vmatprep.subr.bf16.mxu0 %v10792_v12  ;;  %v10880_v12 = vld [vmem:[%s11466_s2 + $0x1d0] ss:$8 sps:$4 sm:$0xff]  }
0x10fe   : > { %7126 = vmatpush1.bf16.msra.mxu0 %v10790_v60  ;;  %v10882_v60 = vld [vmem:[%s11466_s2 + $0x1d4] ss:$8 sps:$4 sm:$0xff]  }
0x10ff   : > { %8450 = vmatprep.subr.bf16.mxu0 %v10831_v31 }
0x1101   : > { %7136 = vmatmul.mubr.bf16.vlgmr.msra.gmra.mrb[160].mxu0 %v14790_v59  ;;  %v10817_v59 = vld [vmem:[%s11466_s2 + $0x80] ss:$8 sps:$4 sm:$0xff]  }
0x1102   : > { %9818 = vmatprep.mubr.msk.bf16.mxu0 %vm3063_vm2, %v14816_v8  ;;  %8386 = vmatpush1.bf16.msra.mxu1 %v10817_v59  ;;  %v10822_v8 = vld [vmem:[%s11466_s2 + $0x94] ss:$8 sps:$4 sm:$0xff]   ;;  %v10883_v59 = vld [vmem:[%s11466_s2 + $0x1e0] ss:$8 sps:$4 sm:$0xff]  }
0x1103   : > { %8387 = vmatprep.subr.bf16.mxu1 %v10822_v8  ;;  %8451 = vmatpush1.bf16.msra.mxu0 %v10829_v30  ;;  %v10888_v8 = vld [vmem:[%s11466_s2 + $0x1f4] ss:$8 sps:$4 sm:$0xff]  }
0x1104   : > { %8452 = vmatprep.subr.bf16.mxu0 %v10837_v33 }
0x1107   : > { %8453 = vmatpush1.bf16.msra.mxu0 %v10835_v0 }
0x1108   : > { %8454 = vmatprep.subr.bf16.mxu0 %v10843_v54 }
0x1109   : > { %7146 = vmatmul.mubr.bf16.gmra.mrb[164].mxu0 %v14819_v37  ;;  %v10820_v37 = vld [vmem:[%s11466_s2 + $0x90] ss:$8 sps:$4 sm:$0xff]  }
0x110a   : > { %9819 = vmatprep.mubr.msk.bf16.mxu0 %vm3063_vm2, %v14846_v16  ;;  %8388 = vmatpush1.bf16.msra.mxu1 %v10820_v37  ;;  %v10825_v16 = vld [vmem:[%s11466_s2 + $0xa4] ss:$8 sps:$4 sm:$0xff]   ;;  %v10886_v37 = vld [vmem:[%s11466_s2 + $0x1f0] ss:$8 sps:$4 sm:$0xff]  }
0x110b   : > { %8389 = vmatprep.subr.bf16.mxu1 %v10825_v16  ;;  %8455 = vmatpush1.bf16.msra.mxu0 %v10841_v53  ;;  %v10891_v16 = vld [vmem:[%s11466_s2 + $0x204] ss:$8 sps:$4 sm:$0xff]  }
0x1111   : > { %7156 = vmatmul.mubr.bf16.gmra.mrb[168].mxu0 %v14849_v62  ;;  %v10823_v62 = vld [vmem:[%s11466_s2 + $0xa0] ss:$8 sps:$4 sm:$0xff]  }
0x1112   : > { %9820 = vmatprep.mubr.msk.bf16.mxu0 %vm3063_vm2, %v6540_v50  ;;  %8390 = vmatpush1.bf16.msra.mxu1 %v10823_v62  ;;  %v10846_v50 = vld [vmem:[%s11466_s2 + $0xe4] ss:$8 sps:$4 sm:$0xff]   ;;  %v16376_v62 = vld [vmem:[#allocation37_spill] sm:$0xff] }
0x1113   : > { %8391 = vmatprep.subr.bf16.mxu1 %v10828_v43  ;;  %v6635_v43 = vsub.s32 4, %v16376_v62 }
0x1116   : > { %8392 = vmatpush1.bf16.msra.mxu1 %v10826_v19  ;;  %v6615_v19 = vld [vmem:[%s11461_s5] sm:$0x3f]  ;;  %s16434_s5 = scalar_lea.vmem %s16081_s20, %s11411_s26 }
0x1117   : > { %8393 = vmatprep.subr.bf16.mxu1 %v10834_v22  ;;  %v14963_v31 = vrot.slane %v6615_v19, %v16374_v2  ;;  %v14965_v30 = vrot.slane %v6615_v19, %v6635_v43  ;;  %v6639_v22 = vsub.s32 5, %v16376_v62  ;;  %v14969_v0 = vrot.slane %v6615_v19, %v16375_v45 }
0x1119   : > { %7166 = vmatmul.mubr.bf16.gmra.mrb[172].mxu0 %v6539_v26  ;;  %v10849_v26 = vld [vmem:[%s11466_s2 + $0x134] ss:$8 sps:$4 sm:$0xff]   ;;  %16377 = vst [vmem:[#allocation37_spill] sm:$0xff] %v14965_v30 }
0x111a   : > { %9821 = vmatprep.mubr.msk.bf16.mxu0 %vm3063_vm2, %v6542_v9  ;;  %8394 = vmatpush1.bf16.msra.mxu1 %v10832_v24  ;;  %v10870_v9 = vld [vmem:[%s11466_s2 + $0x194] ss:$8 sps:$4 sm:$0xff]  }
0x111b   : > { %8395 = vmatprep.subr.bf16.mxu1 %v10840_v25  ;;  %8456 = vmatprep.subr.bf16.mxu0 %v10849_v26 }
0x111c   : > { %8457 = vmatpush1.bf16.msra.mxu0 %v10847_v48 }
0x111d   : > { %8458 = vmatprep.subr.bf16.mxu0 %v10855_v10 }
0x111e   : > { %8396 = vmatpush1.bf16.msra.mxu1 %v10838_v17 }
0x111f   : > { %8397 = vmatprep.subr.bf16.mxu1 %v10846_v50  ;;  %v14973_v50 = vrot.slane %v6615_v19, %v6639_v22 }
0x1120   : > { %8459 = vmatpush1.bf16.msra.mxu0 %v10853_v18 }
0x1121   : > { %7176 = vmatmul.mubr.bf16.gmra.mrb[176].mxu0 %v6541_v57  ;;  %8460 = vmatprep.subr.bf16.mxu0 %v10858_v5  ;;  %v10871_v57 = vld [vmem:[%s11466_s2 + $0x1a0] ss:$8 sps:$4 sm:$0xff]   ;;  %16378 = vst [vmem:[#allocation58_spill] sm:$0xff] %v14973_v50 }
0x1122   : > { %8398 = vmatpush1.bf16.msra.mxu1 %v10844_v63 }
0x1123   : > { %8399 = vmatprep.subr.bf16.mxu1 %v10852_v6 }
0x1124   : > { %8461 = vmatpush1.bf16.msra.mxu0 %v10856_v4 }
0x1125   : > { %8462 = vmatprep.subr.bf16.mxu0 %v10861_v32 }
0x1126   : > { %8400 = vmatpush1.bf16.msra.mxu1 %v10850_v34 }
0x1128   : > { %8463 = vmatpush1.bf16.msra.mxu0 %v10859_v7 }
0x1129   : > { %8464 = vmatprep.subr.bf16.mxu0 %v10864_v51 }
0x112c   : > { %8465 = vmatpush1.bf16.msra.mxu0 %v10862_v46 }
0x112d   : > { %8466 = vmatprep.subr.bf16.mxu0 %v10867_v42 }
0x1130   : > { %8467 = vmatpush1.bf16.msra.mxu0 %v10865_v52  ;;  %v6627_v52 = vsub.s32 2, %v16376_v62 }
0x1131   : > { %8468 = vmatprep.subr.bf16.mxu0 %v10870_v9 }
0x1134   : > { %8469 = vmatpush1.bf16.msra.mxu0 %v10868_v44 }
0x1135   : > { %8470 = vmatprep.subr.bf16.mxu0 %v10873_v55 }
0x1138   : > { %8471 = vmatpush1.bf16.msra.mxu0 %v10871_v57 }
0x1139   : > { %8472 = vmatprep.subr.bf16.mxu0 %v10876_v21  ;;  %v6631_v21 = vsub.s32 3, %v16376_v62 }
0x113c   : > { %8473 = vmatpush1.bf16.msra.mxu0 %v10874_v13 }
0x113d   : > { %8474 = vmatprep.subr.bf16.mxu0 %v10879_v47 }
0x1140   : > { %8475 = vmatpush1.bf16.msra.mxu0 %v10877_v27 }
0x1141   : > { %8476 = vmatprep.subr.bf16.mxu0 %v10882_v60 }
0x1144   : > { %8477 = vmatpush1.bf16.msra.mxu0 %v10880_v12 }
0x1145   : > { %8478 = vmatprep.subr.bf16.mxu0 %v10885_v49 }
0x1148   : > { %8479 = vmatpush1.bf16.msra.mxu0 %v10883_v59 }
0x1149   : > { %8480 = vmatprep.subr.bf16.mxu0 %v10888_v8 }
0x114c   : > { %8481 = vmatpush1.bf16.msra.mxu0 %v10886_v37 }
0x114d   : > { %8531 = vmatprep.subr.bf16.mxu0 %v10891_v16 }
0x11a4   : > { %v7056_v24 = vpop.f32.mrb[140].mxu0  ;;  %v7218_v33 = vpop.f32.mrb[188].mxu1 }
0x11a5   : > { %v7057_v25 = vadd.f32 %v7056_v24, %v14963_v31  ;;  %v7219_v17 = vadd.f32 %v7218_v33, %v14965_v30  ;;  %v7058_v54 = vpop.f32.mrb[141].mxu0  ;;  %v7220_v53 = vpop.f32.mrb[189].mxu1 }
0x11a6   : > { %v7060_v63 = vpop.f32.mrb[142].mxu0  ;;  %v7222_v26 = vpop.f32.mrb[190].mxu1  ;;  %v14976_v34 = vadd.f32 %v7058_v54, %v14969_v0  ;;  %v14981_v46 = vadd.f32 %v7220_v53, %v14973_v50  ;;  %v14999_v53 = vrot.slane %v6615_v19, %v6627_v52 }
0x11a7   : > { %v7319_v48 = vmul.f32 0.044715, %v7057_v25  ;;  %v7323_v6 = vmul.f32 0.044715, %v7219_v17  ;;  %v7061_v10 = vadd.f32 %v7060_v63, %v14963_v31  ;;  %v7223_v18 = vadd.f32 %v7222_v26, %v14965_v30  ;;  %v7062_v4 = vpop.f32.mrb[143].mxu0  ;;  %v7224_v5 = vpop.f32.mrb[191].mxu1 }
0x11a8   : > { %v7320_v9 = vmul.f32 0.044715, %v14976_v34  ;;  %v14987_v12 = vadd.f32 %v7062_v4, %v14969_v0  ;;  %v14990_v60 = vadd.f32 %v7224_v5, %v14973_v50  ;;  %v7324_v8 = vmul.f32 0.044715, %v14981_v46 }
0x11a9   : > { %v7373_v32 = vmul.f32 %v7319_v48, %v7057_v25  ;;  %v7377_v7 = vmul.f32 %v7323_v6, %v7219_v17  ;;  %v7325_v51 = vmul.f32 0.044715, %v7061_v10  ;;  %v7329_v42 = vmul.f32 0.044715, %v7223_v18 }
0x11aa   : > { %16379 = vst [vmem:[#allocation59_spill] sm:$0xff] %v14990_v60  ;;  %v15001_v63 = vmul.f32 0.5, %v7057_v25  ;;  %v7374_v48 = vmul.f32 %v7320_v9, %v14976_v34  ;;  %v15004_v6 = vrot.slane %v6615_v19, %v6631_v21  ;;  %v7326_v5 = vmul.f32 0.044715, %v14987_v12 }
0x11ab   : > { %v7427_v44 = vmul.f32 %v7373_v32, %v7057_v25  ;;  %v7379_v55 = vmul.f32 %v7325_v51, %v7061_v10  ;;  %v7431_v27 = vmul.f32 %v7377_v7, %v7219_v17  ;;  %v7383_v47 = vmul.f32 %v7329_v42, %v7223_v18 }
0x11ac   : > { %v7066_v57 = vpop.f32.mrb[144].mxu0  ;;  %v7228_v13 = vpop.f32.mrb[192].mxu1  ;;  %v7330_v32 = vmul.f32 0.044715, %v14990_v60  ;;  %v15011_v51 = vmul.f32 0.5, %v7219_v17  ;;  %v7378_v42 = vmul.f32 %v7324_v8, %v14981_v46  ;;  %v15014_v52 = vmul.f32 0.5, %v7061_v10 }
0x11ad   : > { %v7068_v49 = vpop.f32.mrb[145].mxu0  ;;  %v7230_v59 = vpop.f32.mrb[193].mxu1  ;;  %v7433_v37 = vmul.f32 %v7379_v55, %v7061_v10  ;;  %v7437_v22 = vmul.f32 %v7383_v47, %v7223_v18  ;;  %v14994_v24 = vadd.f32 %v7066_v57, %v14963_v31  ;;  %v14997_v62 = vadd.f32 %v7228_v13, %v14965_v30 }
0x11ae   : > { %v7070_v16 = vpop.f32.mrb[146].mxu0  ;;  %v7232_v43 = vpop.f32.mrb[194].mxu1  ;;  %v7481_v26 = vadd.f32 %v7427_v44, %v7057_v25  ;;  %v7485_v4 = vadd.f32 %v7431_v27, %v7219_v17  ;;  %v15009_v7 = vadd.f32 %v7068_v49, %v14969_v0  ;;  %16381 = vst [vmem:[#allocation61_spill] sm:$0xff] %v15011_v51  ;;  %v15019_v9 = vadd.f32 %v7230_v59, %v14973_v50 }
0x11af   : > { %16380 = vst [vmem:[#allocation60_spill] sm:$0xff] %v14997_v62  ;;  %v7072_v33 = vpop.f32.mrb[147].mxu0  ;;  %v7234_v54 = vpop.f32.mrb[195].mxu1  ;;  %v7487_v55 = vadd.f32 %v7433_v37, %v7061_v10  ;;  %v7491_v25 = vadd.f32 %v7437_v22, %v7223_v18  ;;  %v7331_v44 = vmul.f32 0.044715, %v14994_v24  ;;  %v15022_v13 = vmul.f32 %v7374_v48, %v14976_v34 }
0x11b0   : > { %v7335_v19 = vmul.f32 0.044715, %v14997_v62  ;;  %16382 = vst [vmem:[#allocation62_spill] sm:$0xff] %v15019_v9  ;;  %v7535_v57 = vmul.f32 0.7978846, %v7481_v26  ;;  %v15024_v21 = vmul.f32 0.5, %v7223_v18  ;;  %v15027_v17 = vadd.f32 %v7070_v16, %v14963_v31 }
0x11b1   : > { %v7539_v10 = vmul.f32 0.7978846, %v7485_v4  ;;  %v7380_v49 = vmul.f32 %v7326_v5, %v14987_v12  ;;  %v7384_v8 = vmul.f32 %v7330_v32, %v14990_v60  ;;  %v7332_v37 = vmul.f32 0.044715, %v15009_v7 }
0x11b2   : > { %16383 = vst [vmem:[#allocation63_spill] sm:$0xff] %v15024_v21  ;;  %v15033_v26 = vmul.f32 %v7378_v42, %v14981_v46  ;;  %v7541_v48 = vmul.f32 0.7978846, %v7487_v55  ;;  %v15036_v18 = vadd.f32 %v7232_v43, %v14965_v30  ;;  %v15039_v16 = vadd.f32 %v7072_v33, %v14969_v0 }
0x11b3   : > { %v7545_v56 = vmul.f32 0.7978846, %v7491_v25  ;;  %v7385_v5 = vmul.f32 %v7331_v44, %v14994_v24  ;;  %v7389_v32 = vmul.f32 %v7335_v19, %v14997_v62  ;;  %v7336_v20 = vmul.f32 0.044715, %v15019_v9 }
0x11b4   : > { %v7076_v27 = vpop.f32.mrb[148].mxu0  ;;  %v7238_v47 = vpop.f32.mrb[196].mxu1  ;;  %16384 = vst [vmem:[#allocation64_spill] sm:$0xff] %v15033_v26  ;;  %16385 = vst [vmem:[#allocation65_spill] sm:$0xff] %v15036_v18  ;;  %11081 = vtanh.f32 %v7535_v57  ;;  %v7337_v42 = vmul.f32 0.044715, %v15027_v17  ;;  %v15046_v43 = vadd.f32 %v7234_v54, %v14973_v50  ;;  %v15052_v55 = vmul.f32 %v7380_v49, %v14987_v12 }
0x11b5   : > { %v7078_v59 = vpop.f32.mrb[149].mxu0  ;;  %v7240_v22 = vpop.f32.mrb[197].mxu1  ;;  %v15049_v33 = vadd.f32 %v7076_v27, %v14963_v31  ;;  %11083 = vtanh.f32 %v7539_v10  ;;  %v15055_v25 = vmul.f32 %v7384_v8, %v14990_v60  ;;  %v7386_v44 = vmul.f32 %v7332_v37, %v15009_v7 }
0x11b6   : > { %v7080_v3 = vpop.f32.mrb[150].mxu0  ;;  %v7242_v4 = vpop.f32.mrb[198].mxu1  ;;  %16386 = vst [vmem:[#allocation66_spill] sm:$0xff] %v15046_v43  ;;  %11085 = vtanh.f32 %v7541_v48  ;;  %v7341_v19 = vmul.f32 0.044715, %v15036_v18  ;;  %v15061_v54 = vadd.f32 %v7238_v47, %v14965_v30  ;;  %v15064_v27 = vmul.f32 %v7385_v5, %v14994_v24 }
0x11b7   : > { %v7082_v15 = vpop.f32.mrb[151].mxu0  ;;  %v7244_v1 = vpop.f32.mrb[199].mxu1  ;;  %16387 = vst [vmem:[#allocation67_spill] sm:$0xff] %v15055_v25  ;;  %v7338_v57 = vmul.f32 0.044715, %v15039_v16  ;;  %11087 = vtanh.f32 %v7545_v56  ;;  %v15067_v10 = vmul.f32 %v7389_v32, %v14997_v62  ;;  %v7390_v49 = vmul.f32 %v7336_v20, %v15019_v9 }
0x11b8   : > { %16388 = vst [vmem:[#allocation68_spill] sm:$0xff] %v15061_v54  ;;  %v7391_v8 = vmul.f32 %v7337_v42, %v15027_v17  ;;  %v7342_v37 = vmul.f32 0.044715, %v15046_v43  ;;  %v7343_v48 = vmul.f32 0.044715, %v15049_v33  ;;  %v15074_v36 = vadd.f32 %v7078_v59, %v14969_v0 }
0x11b9   : > { %16389 = vst [vmem:[#allocation69_spill] sm:$0xff] %v15067_v10  ;;  %v15077_v56 = vmul.f32 %v7386_v44, %v15009_v7  ;;  %v15080_v5 = vadd.f32 %v7240_v22, %v14973_v50  ;;  %v15083_v32 = vadd.f32 %v7080_v3, %v14963_v31  ;;  %v15086_v20 = vadd.f32 %v7242_v4, %v14965_v30 }
0x11ba   : > { %v7395_v35 = vmul.f32 %v7341_v19, %v15036_v18  ;;  %v7392_v59 = vmul.f32 %v7338_v57, %v15039_v16  ;;  %v7347_v28 = vmul.f32 0.044715, %v15061_v54  ;;  %v15092_v44 = vadd.f32 %v7082_v15, %v14969_v0 }
0x11bb   : > { %16390 = vst [vmem:[#allocation70_spill] sm:$0xff] %v15086_v20  ;;  %v15095_v40 = vmul.f32 %v7390_v49, %v15019_v9  ;;  %v15098_v3 = vadd.f32 %v7244_v1, %v14973_v50  ;;  %v15107_v41 = vmul.f32 %v7391_v8, %v15027_v17  ;;  %v7396_v15 = vmul.f32 %v7342_v37, %v15046_v43 }
0x11bc   : > { %v7086_v47 = vpop.f32.mrb[152].mxu0  ;;  %v7248_v11 = vpop.f32.mrb[200].mxu1  ;;  %v7397_v39 = vmul.f32 %v7343_v48, %v15049_v33  ;;  %v7344_v49 = vmul.f32 0.044715, %v15074_v36  ;;  %v7348_v1 = vmul.f32 0.044715, %v15080_v5  ;;  %v15119_v23 = vmul.f32 %v7395_v35, %v15036_v18 }
0x11bd   : > { %v7088_v42 = vpop.f32.mrb[153].mxu0  ;;  %v7250_v29 = vpop.f32.mrb[201].mxu1  ;;  %16391 = vst [vmem:[#allocation71_spill] sm:$0xff] %v15095_v40  ;;  %16392 = vst [vmem:[#allocation72_spill] sm:$0xff] %v15098_v3  ;;  %v15101_v4 = vadd.f32 %v7086_v47, %v14963_v31  ;;  %v15104_v19 = vadd.f32 %v7248_v11, %v14965_v30  ;;  %v7349_v38 = vmul.f32 0.044715, %v15083_v32  ;;  %v15122_v8 = vmul.f32 %v7392_v59, %v15039_v16 }
0x11be   : > { %v7090_v61 = vpop.f32.mrb[154].mxu0  ;;  %v7252_v22 = vpop.f32.mrb[202].mxu1  ;;  %v7353_v47 = vmul.f32 0.044715, %v15086_v20  ;;  %v15116_v11 = vadd.f32 %v7088_v42, %v14969_v0  ;;  %16394 = vst [vmem:[#allocation74_spill] sm:$0xff] %v15119_v23  ;;  %v7401_v37 = vmul.f32 %v7347_v28, %v15061_v54  ;;  %v15135_v23 = vmul.f32 %v7396_v15, %v15046_v43 }
0x11bf   : > { %16393 = vst [vmem:[#allocation73_spill] sm:$0xff] %v15104_v19  ;;  %v7092_v57 = vpop.f32.mrb[155].mxu0  ;;  %v7254_v58 = vpop.f32.mrb[203].mxu1  ;;  %v7350_v48 = vmul.f32 0.044715, %v15092_v44  ;;  %v15132_v62 = vadd.f32 %v7090_v61, %v14963_v31  ;;  %v7398_v59 = vmul.f32 %v7344_v49, %v15074_v36  ;;  %v15140_v18 = vadd.f32 %v7250_v29, %v14973_v50 }
0x11c0   : > { %v11082_v14 = vpop.eup %11081  ;;  %v7354_v2 = vmul.f32 0.044715, %v15098_v3  ;;  %v7355_v10 = vmul.f32 0.044715, %v15101_v4  ;;  %v7359_v42 = vmul.f32 0.044715, %v15104_v19  ;;  %v15147_v51 = vmul.f32 %v7397_v39, %v15049_v33 }
0x11c1   : > { %v15126_v45 = vpop.eup %11083  ;;  %16396 = vst [vmem:[#allocation76_spill] sm:$0xff] %v15135_v23  ;;  %v7356_v28 = vmul.f32 0.044715, %v15116_v11  ;;  %v7402_v61 = vmul.f32 %v7348_v1, %v15080_v5  ;;  %v7403_v15 = vmul.f32 %v7349_v38, %v15083_v32  ;;  %v7407_v23 = vmul.f32 %v7353_v47, %v15086_v20 }
0x11c2   : > { %16395 = vst [vmem:[#allocation75_spill] sm:$0xff] %v15126_v45  ;;  %v11086_v35 = vpop.eup %11085  ;;  %v7404_v29 = vmul.f32 %v7350_v48, %v15092_v44  ;;  %v7361_v45 = vmul.f32 0.044715, %v15132_v62  ;;  %v15163_v1 = vmul.f32 %v7401_v37, %v15061_v54  ;;  %v7408_v38 = vmul.f32 %v7354_v2, %v15098_v3 }
0x11c3   : > { %v15144_v21 = vpop.eup %11087  ;;  %v7409_v47 = vmul.f32 %v7355_v10, %v15101_v4  ;;  %v7452_v26 = vmul.f32 %v7398_v59, %v15074_v36  ;;  %v15178_v2 = vmul.f32 %v7403_v15, %v15083_v32  ;;  %v15182_v37 = vadd.f32 %v7254_v58, %v14973_v50 }
0x11c4   : > { %v7096_v40 = vpop.f32.mrb[156].mxu0  ;;  %v15142_v9 = vpop.f32.mrb[204].mxu1  ;;  %16398 = vst [vmem:[#allocation78_spill] sm:$0xff] %v15144_v21  ;;  %16400 = vst [vmem:[#allocation80_spill] sm:$0xff] %v15163_v1  ;;  %v7415_v59 = vmul.f32 %v7361_v45, %v15132_v62  ;;  %v7494_v50 = vadd.f32 %v15077_v56, %v15009_v7  ;;  %v7272_v56 = vmul.f32 0.5, %v14987_v12 }
0x11c5   : > { %16397 = vst [vmem:[#allocation77_spill] sm:$0xff] %v15142_v9  ;;  %v7098_v49 = vpop.f32.mrb[157].mxu0  ;;  %v15152_v43 = vpop.f32.mrb[205].mxu1  ;;  %v15157_v9 = vadd.f32 %v7092_v57, %v14969_v0  ;;  %v15160_v21 = vadd.f32 %v7096_v40, %v14963_v31  ;;  %v7410_v57 = vmul.f32 %v7356_v28, %v15116_v11  ;;  %v7360_v40 = vmul.f32 0.044715, %v15140_v18 }
0x11c6   : > { %16399 = vst [vmem:[#allocation79_spill] sm:$0xff] %v15152_v43  ;;  %v7100_v39 = vpop.f32.mrb[158].mxu0  ;;  %v7262_v25 = vpop.f32.mrb[206].mxu1  ;;  %v7413_v43 = vmul.f32 %v7359_v42, %v15104_v19  ;;  %v15172_v31 = vadd.f32 %v7252_v22, %v14965_v30  ;;  %v7458_v42 = vmul.f32 %v7404_v29, %v15092_v44  ;;  %v15191_v28 = vmul.f32 %v7408_v38, %v15098_v3 }
0x11c7   : > { %v7101_v48 = vpop.f32.mrb[159].mxu0  ;;  %v7263_v60 = vpop.f32.mrb[207].mxu1  ;;  %v15175_v25 = vmul.f32 %v7402_v61, %v15080_v5  ;;  %v7362_v10 = vmul.f32 0.044715, %v15157_v9  ;;  %v7367_v22 = vmul.f32 0.044715, %v15160_v21  ;;  %v15194_v61 = vmul.f32 %v7409_v47, %v15101_v4 }
0x11c8   : > { %v15185_v60 = vmul.f32 %v7407_v23, %v15086_v20  ;;  %16403 = vst [vmem:[#allocation83_spill] sm:$0xff] %v15191_v28  ;;  %v15197_v15 = vmul.f32 %v7413_v43, %v15104_v19  ;;  %v15200_v58 = vadd.f32 %v7098_v49, %v14969_v0  ;;  %v15203_v23 = vmul.f32 %v7410_v57, %v15116_v11 }
0x11c9   : > { %16401 = vst [vmem:[#allocation81_spill] sm:$0xff] %v15175_v25  ;;  %v15206_v29 = vmul.f32 %v7360_v40, %v15140_v18  ;;  %v15209_v45 = vmul.f32 0.044715, %v15172_v31  ;;  %v7482_v39 = vadd.f32 %v15022_v13, %v14976_v34  ;;  %v7416_v38 = vmul.f32 %v7362_v10, %v15157_v9 }
0x11ca   : > { %16402 = vst [vmem:[#allocation82_spill] sm:$0xff] %v15185_v60  ;;  %16404 = vst [vmem:[#allocation84_spill] sm:$0xff] %v15197_v15  ;;  %v15215_v43 = vmul.f32 0.044715, %v15182_v37  ;;  %v7488_v0 = vadd.f32 %v15052_v55, %v14987_v12  ;;  %v7643_v49 = vadd.f32 1.0, %v11082_v14  ;;  %v15220_v47 = vmul.f32 %v7415_v59, %v15132_v62 }
0x11cb   : > { %v15223_v48 = vmul.f32 %v7367_v22, %v15160_v21  ;;  %v7536_v57 = vmul.f32 0.7978846, %v7482_v39  ;;  %v7649_v40 = vadd.f32 1.0, %v11086_v35  ;;  %v7368_v30 = vmul.f32 0.044715, %v15200_v58 }
0x11cc   : > { %v15227_v13 = vmul.f32 0.5, %v14976_v34  ;;  %v7542_v10 = vmul.f32 0.7978846, %v7488_v0  ;;  %v15232_v14 = vmul.f32 %v7643_v49, %v15001_v63  ;;  %v7500_v59 = vadd.f32 %v15122_v8, %v15039_v16 }
0x11cd   : > { %11089 = vtanh.f32 %v7536_v57  ;;  %v15235_v55 = vmul.f32 %v7649_v40, %v15014_v52  ;;  %v15240_v35 = vmul.f32 %v7416_v38, %v15157_v9  ;;  %v7548_v34 = vmul.f32 0.7978846, %v7494_v50 }
0x11ce   : > { %11091 = vtanh.f32 %v7542_v10  ;;  %v7493_v22 = vadd.f32 %v15064_v27, %v14994_v24  ;;  %v7554_v39 = vmul.f32 0.7978846, %v7500_v59  ;;  %v7499_v52 = vadd.f32 %v15107_v41, %v15027_v17 }
0x11cf   : > { %v15250_v0 = vmul.f32 %v7368_v30, %v15200_v58  ;;  %11093 = vtanh.f32 %v7548_v34  ;;  %v7506_v38 = vadd.f32 %v7452_v26, %v15074_v36  ;;  %v15254_v50 = vmul.f32 0.5, %v15009_v7 }
0x11d0   : > { %v7547_v8 = vmul.f32 0.7978846, %v7493_v22  ;;  %11095 = vtanh.f32 %v7554_v39  ;;  %v7553_v27 = vmul.f32 0.7978846, %v7499_v52  ;;  %v7512_v49 = vadd.f32 %v7458_v42, %v15092_v44 }
0x11d1   : > { %v15258_v57 = vmul.f32 0.5, %v15039_v16  ;;  %v7560_v40 = vmul.f32 0.7978846, %v7506_v38  ;;  %v7505_v59 = vadd.f32 %v15147_v51, %v15049_v33  ;;  %v15267_v34 = vmul.f32 0.5, %v14994_v24 }
0x11d2   : > { %11097 = vtanh.f32 %v7547_v8  ;;  %v7566_v7 = vmul.f32 0.7978846, %v7512_v49  ;;  %v7283_v39 = vmul.f32 0.5, %v15027_v17  ;;  %v7511_v8 = vadd.f32 %v15178_v2, %v15083_v32 }
0x11d3   : > { %11099 = vtanh.f32 %v7553_v27  ;;  %v7559_v24 = vmul.f32 0.7978846, %v7505_v59  ;;  %v7290_v49 = vmul.f32 0.5, %v15074_v36  ;;  %v15281_v2 = vmul.f32 0.5, %v15049_v33 }
0x11d4   : > { %v7137_v12 = vpop.f32.mrb[160].mxu0  ;;  %11101 = vtanh.f32 %v7560_v40  ;;  %v7565_v17 = vmul.f32 0.7978846, %v7511_v8 }
0x11d5   : > { %v7138_v41 = vadd.f32 %v7137_v12, %v14999_v53  ;;  %v7139_v30 = vpop.f32.mrb[161].mxu0  ;;  %11103 = vtanh.f32 %v7566_v7 }
0x11d6   : > { %v15262_v10 = vadd.f32 %v7139_v30, %v15004_v6  ;;  %v7141_v26 = vpop.f32.mrb[162].mxu0  ;;  %v7296_v30 = vmul.f32 0.5, %v15092_v44  ;;  %11105 = vtanh.f32 %v7559_v24 }
0x11d7   : > { %v7321_v42 = vmul.f32 0.044715, %v7138_v41  ;;  %v7142_v16 = vadd.f32 %v7141_v26, %v14999_v53  ;;  %v7143_v22 = vpop.f32.mrb[163].mxu0  ;;  %v11090_v12 = vpop.eup %11089  ;;  %11107 = vtanh.f32 %v7565_v17  ;;  %v15294_v1 = vmul.f32 0.5, %v7138_v41 }
0x11d8   : > { %v15272_v52 = vadd.f32 %v7143_v22, %v15004_v6  ;;  %v7322_v51 = vmul.f32 0.044715, %v15262_v10  ;;  %v11092_v26 = vpop.eup %11091  ;;  %v7644_v7 = vadd.f32 1.0, %v11090_v12 }
0x11d9   : > { %v7375_v38 = vmul.f32 %v7321_v42, %v7138_v41  ;;  %v7327_v27 = vmul.f32 0.044715, %v7142_v16  ;;  %v7650_v15 = vadd.f32 1.0, %v11092_v26  ;;  %v15284_v42 = vmul.f32 0.5, %v15083_v32  ;;  %v11094_v36 = vpop.eup %11093 }
0x11da   : > { %v7328_v40 = vmul.f32 0.044715, %v15272_v52  ;;  %v7698_v44 = vmul.f32 %v7644_v7, %v15227_v13  ;;  %v7376_v19 = vmul.f32 %v7322_v51, %v15262_v10  ;;  %v7656_v26 = vadd.f32 1.0, %v11094_v36 }
0x11db   : > { %v7429_v22 = vmul.f32 %v7375_v38, %v7138_v41  ;;  %v7381_v63 = vmul.f32 %v7327_v27, %v7142_v16  ;;  %v11096_v27 = vpop.eup %11095  ;;  %v7704_v24 = vmul.f32 %v7650_v15, %v7272_v56  ;;  %v15296_v13 = vmul.f32 0.5, %v7142_v16 }
0x11dc   : > { %v7147_v59 = vpop.f32.mrb[164].mxu0  ;;  %v11098_v17 = vpop.eup %11097  ;;  %v7662_v20 = vadd.f32 1.0, %v11096_v27 }
0x11dd   : > { %v7435_v8 = vmul.f32 %v7381_v63, %v7142_v16  ;;  %v15289_v12 = vadd.f32 %v7147_v59, %v14999_v53  ;;  %v7149_v38 = vpop.f32.mrb[165].mxu0  ;;  %v7483_v33 = vadd.f32 %v7429_v22, %v7138_v41  ;;  %v7382_v63 = vmul.f32 %v7328_v40, %v15272_v52  ;;  %v11100_v7 = vpop.eup %11099 }
0x11de   : > { %v15292_v60 = vadd.f32 %v7149_v38, %v15004_v6  ;;  %v7151_v32 = vpop.f32.mrb[166].mxu0  ;;  %v7752_v59 = vpack.c.bf16 %v7704_v24, %v7698_v44  ;;  %v7655_v54 = vadd.f32 1.0, %v11098_v17  ;;  %v11102_v56 = vpop.eup %11101  ;;  %v7710_v22 = vmul.f32 %v7656_v26, %v15254_v50 }
0x11df   : > { %v7153_v51 = vpop.f32.mrb[167].mxu0  ;;  %v7489_v28 = vadd.f32 %v7435_v8, %v7142_v16  ;;  %v7333_v15 = vmul.f32 0.044715, %v15289_v12  ;;  %v7716_v36 = vmul.f32 %v7662_v20, %v15258_v57  ;;  %v7661_v38 = vadd.f32 1.0, %v11100_v7  ;;  %v11104_v27 = vpop.eup %11103 }
0x11e0   : > { %v15303_v41 = vmul.f32 0.5, %v15116_v11  ;;  %8401 = vmatprep.mubr.bf16.mxu1 %v7752_v59  ;;  %v7537_v3 = vmul.f32 0.7978846, %v7483_v33  ;;  %v15306_v40 = vmul.f32 %v7376_v19, %v15262_v10  ;;  %v7668_v44 = vadd.f32 1.0, %v11102_v56  ;;  %v11106_v59 = vpop.eup %11105 }
0x11e1   : > { %v7334_v16 = vmul.f32 0.044715, %v15292_v60  ;;  %v16405_v8 = vpack.c.bf16 %v15235_v55, %v15232_v14  ;;  %v7758_v50 = vpack.c.bf16 %v7716_v36, %v7710_v22  ;;  %v7709_v20 = vmul.f32 %v7655_v54, %v15267_v34 }
0x11e2   : > { %v7715_v57 = vmul.f32 %v7661_v38, %v7283_v39  ;;  %v7674_v24 = vadd.f32 1.0, %v11104_v27  ;;  %v7543_v26 = vmul.f32 0.7978846, %v7489_v28  ;;  %v15314_v17 = vmul.f32 %v7382_v63, %v15272_v52  ;;  %v11108_v39 = vpop.eup %11107 }
0x11e3   : > { %8402 = vmatmul.mubr.bf16.vlgmr.msra.gmra.mrb[208].mxu1 %v16405_v8  ;;  %v7387_v33 = vmul.f32 %v7333_v15, %v15289_v12  ;;  %v15318_v19 = vadd.f32 %v7151_v32, %v14999_v53  ;;  %v7722_v14 = vmul.f32 %v7668_v44, %v7290_v49  ;;  %v7518_v54 = vadd.f32 %v15203_v23, %v15116_v11 }
0x11e4   : > { %v7157_v7 = vpop.f32.mrb[168].mxu0  ;;  %8411 = vmatprep.mubr.bf16.mxu1 %v7758_v50  ;;  %v7757_v56 = vpack.c.bf16 %v7715_v57, %v7709_v20  ;;  %v7728_v55 = vmul.f32 %v7674_v24, %v7296_v30  ;;  %v7667_v28 = vadd.f32 1.0, %v11106_v59  ;;  %v7388_v63 = vmul.f32 %v7334_v16, %v15292_v60 }
0x11e5   : > { %v7159_v34 = vpop.f32.mrb[169].mxu0  ;;  %v7524_v15 = vadd.f32 %v15240_v35, %v15157_v9  ;;  %v15326_v32 = vadd.f32 %v7153_v51, %v15004_v6  ;;  %11109 = vtanh.f32 %v7537_v3  ;;  %v7673_v38 = vadd.f32 1.0, %v11108_v39 }
0x11e6   : > { %v7161_v22 = vpop.f32.mrb[170].mxu0  ;;  %v7764_v36 = vpack.c.bf16 %v7728_v55, %v7722_v14  ;;  %v7572_v49 = vmul.f32 0.7978846, %v7518_v54  ;;  %11111 = vtanh.f32 %v7543_v26  ;;  %v7721_v11 = vmul.f32 %v7667_v28, %v15281_v2 }
0x11e7   : > { %v7163_v30 = vpop.f32.mrb[171].mxu0  ;;  %v7339_v23 = vmul.f32 0.044715, %v15318_v19  ;;  %v7578_v27 = vmul.f32 0.7978846, %v7524_v15  ;;  %v7727_v44 = vmul.f32 %v7673_v38, %v15284_v42  ;;  %v7517_v51 = vadd.f32 %v15194_v61, %v15101_v4 }
0x11e8   : > { %11113 = vtanh.f32 %v7572_v49  ;;  %v7340_v35 = vmul.f32 0.044715, %v15326_v32  ;;  %v15335_v3 = vmul.f32 %v7387_v33, %v15289_v12  ;;  %v15338_v16 = vmul.f32 %v7388_v63, %v15292_v60 }
0x11e9   : > { %11115 = vtanh.f32 %v7578_v27  ;;  %v7523_v2 = vadd.f32 %v15220_v47, %v15132_v62  ;;  %v7763_v8 = vpack.c.bf16 %v7727_v44, %v7721_v11  ;;  %v7308_v42 = vmul.f32 0.5, %v15157_v9 }
0x11ea   : > { %v7571_v50 = vmul.f32 0.7978846, %v7517_v51  ;;  %v15344_v20 = vadd.f32 %v7157_v7, %v14999_v53  ;;  %v7393_v61 = vmul.f32 %v7339_v23, %v15318_v19  ;;  %v7476_v24 = vmul.f32 %v15250_v0, %v15200_v58 }
0x11eb   : > { %8412 = vmatmul.mubr.bf16.gmra.mrb[212].mxu1 %v7757_v56  ;;  %v7577_v57 = vmul.f32 0.7978846, %v7523_v2  ;;  %v15350_v26 = vadd.f32 %v7159_v34, %v15004_v6  ;;  %v7394_v47 = vmul.f32 %v7340_v35, %v15326_v32  ;;  %v15354_v9 = vadd.f32 %v7161_v22, %v14999_v53 }
0x11ec   : > { %8421 = vmatprep.mubr.bf16.mxu1 %v7764_v36  ;;  %v7167_v33 = vpop.f32.mrb[172].mxu0  ;;  %11117 = vtanh.f32 %v7571_v50  ;;  %v15357_v7 = vadd.f32 %v7163_v30, %v15004_v6  ;;  %v7301_v56 = vmul.f32 0.5, %v15101_v4  ;;  %v7345_v14 = vmul.f32 0.044715, %v15344_v20 }
0x11ed   : > { %v7169_v59 = vpop.f32.mrb[173].mxu0  ;;  %11119 = vtanh.f32 %v7577_v57  ;;  %v7530_v0 = vadd.f32 %v7476_v24, %v15200_v58  ;;  %v7307_v54 = vmul.f32 0.5, %v15132_v62  ;;  %v7346_v34 = vmul.f32 0.044715, %v15350_v26 }
0x11ee   : > { %v7171_v55 = vpop.f32.mrb[174].mxu0  ;;  %v7351_v39 = vmul.f32 0.044715, %v15354_v9  ;;  %v7475_v28 = vmul.f32 %v15223_v48, %v15160_v21  ;;  %v7352_v22 = vmul.f32 0.044715, %v15357_v7  ;;  %v15369_v4 = vadd.f32 %v7167_v33, %v14999_v53 }
0x11ef   : > { %v7173_v63 = vpop.f32.mrb[175].mxu0  ;;  %v7584_v15 = vmul.f32 0.7978846, %v7530_v0  ;;  %v15372_v36 = vadd.f32 %v7169_v59, %v15004_v6  ;;  %v11110_v38 = vpop.eup %11109  ;;  %v15375_v62 = vmul.f32 %v7393_v61, %v15318_v19  ;;  %v15378_v49 = vmul.f32 %v7394_v47, %v15326_v32 }
0x11f0   : > { %v15381_v30 = vmul.f32 0.5, %v15200_v58  ;;  %v7529_v48 = vadd.f32 %v7475_v28, %v15160_v21  ;;  %v11112_v11 = vpop.eup %11111  ;;  %v7399_v23 = vmul.f32 %v7345_v14, %v15344_v20  ;;  %v7357_v27 = vmul.f32 0.044715, %v15369_v4 }
0x11f1   : > { %11121 = vtanh.f32 %v7584_v15  ;;  %v7358_v44 = vmul.f32 0.044715, %v15372_v36  ;;  %v7400_v51 = vmul.f32 %v7346_v34, %v15350_v26  ;;  %v7405_v2 = vmul.f32 %v7351_v39, %v15354_v9 }
0x11f2   : > { %v11114_v35 = vpop.eup %11113  ;;  %v7583_v50 = vmul.f32 0.7978846, %v7529_v48  ;;  %v15390_v58 = vadd.f32 %v7171_v55, %v14999_v53  ;;  %v7406_v24 = vmul.f32 %v7352_v22, %v15357_v7  ;;  %v7411_v33 = vmul.f32 %v7357_v27, %v15369_v4 }
0x11f3   : > { %8422 = vmatmul.mubr.bf16.gmra.mrb[216].mxu1 %v7763_v8  ;;  %v11116_v61 = vpop.eup %11115  ;;  %v7680_v57 = vadd.f32 1.0, %v11114_v35  ;;  %v15395_v47 = vadd.f32 %v7173_v63, %v15004_v6  ;;  %v7412_v8 = vmul.f32 %v7358_v44, %v15372_v36  ;;  %v15400_v55 = vmul.f32 %v7399_v23, %v15344_v20 }
0x11f4   : > { %v7177_v59 = vpop.f32.mrb[176].mxu0  ;;  %v7686_v14 = vadd.f32 1.0, %v11116_v61  ;;  %11123 = vtanh.f32 %v7583_v50  ;;  %v7363_v0 = vmul.f32 0.044715, %v15390_v58  ;;  %v7313_v39 = vmul.f32 0.5, %v15160_v21 }
0x11f5   : > { %v7179_v34 = vpop.f32.mrb[177].mxu0  ;;  %v7364_v28 = vmul.f32 0.044715, %v15395_v47  ;;  %v15405_v15 = vadd.f32 %v7177_v59, %v14999_v53  ;;  %v7734_v48 = vmul.f32 %v7680_v57, %v15303_v41  ;;  %v7454_v44 = vmul.f32 %v7400_v51, %v15350_v26 }
0x11f6   : > { %v7181_v63 = vpop.f32.mrb[178].mxu0  ;;  %v11118_v22 = vpop.eup %11117  ;;  %v7740_v27 = vmul.f32 %v7686_v14, %v7308_v42  ;;  %v15410_v35 = vmul.f32 %v7405_v2, %v15354_v9  ;;  %v7460_v21 = vmul.f32 %v7406_v24, %v15357_v7  ;;  %v15414_v25 = vmul.f32 %v7411_v33, %v15369_v4 }
0x11f7   : > { %v7182_v50 = vpop.f32.mrb[179].mxu0  ;;  %v11120_v23 = vpop.eup %11119  ;;  %v7679_v61 = vadd.f32 1.0, %v11118_v22  ;;  %v15417_v53 = vadd.f32 %v7179_v34, %v15004_v6  ;;  %v7466_v41 = vmul.f32 %v7412_v8, %v15372_v36  ;;  %v7417_v42 = vmul.f32 %v7363_v0, %v15390_v58 }
0x11f8   : > { %v7770_v59 = vpack.c.bf16 %v7740_v27, %v7734_v48  ;;  %v7685_v63 = vadd.f32 1.0, %v11120_v23  ;;  %v7418_v2 = vmul.f32 %v7364_v28, %v15395_v47  ;;  %v7369_v57 = vmul.f32 0.044715, %v15405_v15 }
0x11f9   : > { %v7733_v51 = vmul.f32 %v7679_v61, %v7301_v56  ;;  %v7484_v24 = vadd.f32 %v15306_v40, %v15262_v10  ;;  %v7490_v6 = vadd.f32 %v15314_v17, %v15272_v52  ;;  %v7645_v14 = vadd.f32 1.0, %v11110_v38 }
0x11fa   : > { %8431 = vmatprep.mubr.bf16.mxu1 %v7770_v59  ;;  %v7739_v33 = vmul.f32 %v7685_v63, %v7307_v54  ;;  %v7651_v34 = vadd.f32 1.0, %v11112_v11  ;;  %v7370_v8 = vmul.f32 0.044715, %v15417_v53  ;;  %v15429_v0 = vmul.f32 0.5, %v15262_v10 }
0x11fb   : > { %v11122_v22 = vpop.eup %11121  ;;  %v15432_v56 = vmul.f32 0.5, %v15272_v52  ;;  %v7538_v28 = vmul.f32 0.7978846, %v7484_v24  ;;  %v7544_v40 = vmul.f32 0.7978846, %v7490_v6  ;;  %v15435_v54 = vmul.f32 %v7645_v14, %v15294_v1 }
0x11fc   : > { %v7769_v48 = vpack.c.bf16 %v7739_v33, %v7733_v51  ;;  %v7692_v27 = vadd.f32 1.0, %v11122_v22  ;;  %v15438_v17 = vmul.f32 %v7651_v34, %v15296_v13  ;;  %v7496_v38 = vadd.f32 %v15338_v16, %v15292_v60 }
0x11fd   : > { %11125 = vtanh.f32 %v7538_v28  ;;  %v7502_v10 = vadd.f32 %v15378_v49, %v15326_v32  ;;  %v7471_v50 = vmul.f32 %v7417_v42, %v15390_v58  ;;  %v15447_v23 = vmul.f32 %v7369_v57, %v15405_v15 }
0x11fe   : > { %v11124_v11 = vpop.eup %11123  ;;  %8432 = vmatmul.mubr.bf16.gmra.mrb[220].mxu1 %v7769_v48  ;;  %v7746_v52 = vmul.f32 %v7692_v27, %v15381_v30  ;;  %11127 = vtanh.f32 %v7544_v40  ;;  %v7753_v13 = vpack.c.bf16 %v15438_v17, %v15435_v54  ;;  %v7550_v61 = vmul.f32 0.7978846, %v7496_v38 }
0x11ff   : > { %v7691_v1 = vadd.f32 1.0, %v11124_v11  ;;  %v7556_v59 = vmul.f32 0.7978846, %v7502_v10  ;;  %v7472_v63 = vmul.f32 %v7418_v2, %v15395_v47  ;;  %v7495_v49 = vadd.f32 %v15335_v3, %v15289_v12 }
0x1200   : > { %v7776_v16 = vpack.c.bf16 %v7746_v52, %v7746_v52  ;;  %v7501_v30 = vadd.f32 %v15375_v62, %v15318_v19  ;;  %v7424_v51 = vmul.f32 %v7370_v8, %v15417_v53  ;;  %11129 = vtanh.f32 %v7550_v61 }
0x1201   : > { %v7745_v42 = vmul.f32 %v7691_v1, %v7313_v39  ;;  %v7508_v57 = vadd.f32 %v7454_v44, %v15350_v26  ;;  %11131 = vtanh.f32 %v7556_v59  ;;  %v7549_v24 = vmul.f32 0.7978846, %v7495_v49  ;;  %v10889_v49 = vld [vmem:[%s11466_s2 + $0x200] ss:$8 sps:$4 sm:$0xff]  }
0x1202   : > { %8441 = vmatprep.mubr.bf16.mxu1 %v7776_v16  ;;  %v7555_v33 = vmul.f32 0.7978846, %v7501_v30  ;;  %v7514_v6 = vadd.f32 %v7460_v21, %v15357_v7  ;;  %v7280_v2 = vmul.f32 0.5, %v15292_v60  ;;  %v7286_v3 = vmul.f32 0.5, %v15326_v32 }
0x1203   : > { %v7775_v14 = vpack.c.bf16 %v7745_v42, %v7745_v42  ;;  %v7562_v34 = vmul.f32 0.7978846, %v7508_v57  ;;  %11133 = vtanh.f32 %v7549_v24  ;;  %v7507_v39 = vadd.f32 %v15400_v55, %v15344_v20 }
0x1204   : > { %v7568_v62 = vmul.f32 0.7978846, %v7514_v6  ;;  %v7513_v44 = vadd.f32 %v15410_v35, %v15354_v9  ;;  %v15466_v22 = vmul.f32 0.5, %v15289_v12  ;;  %v15469_v8 = vmul.f32 0.5, %v15318_v19 }
0x1205   : > { %11135 = vtanh.f32 %v7555_v33  ;;  %v7520_v60 = vadd.f32 %v7466_v41, %v15372_v36  ;;  %v7561_v32 = vmul.f32 0.7978846, %v7507_v39  ;;  %v7526_v28 = vadd.f32 %v7472_v63, %v15395_v47  ;;  %v16407_v39 = vld [vmem:[#allocation59_spill] sm:$0xff] }
0x1206   : > { %8442 = vmatmul.mubr.bf16.gmra.mrb[224].mxu1 %v7775_v14  ;;  %11137 = vtanh.f32 %v7562_v34  ;;  %v7567_v21 = vmul.f32 0.7978846, %v7513_v44  ;;  %v15474_v55 = vmul.f32 0.5, %v15350_v26  ;;  %v15477_v35 = vmul.f32 0.5, %v15357_v7  ;;  %v16408_v44 = vld [vmem:[#allocation67_spill] sm:$0xff] }
0x1207   : > { %v11126_v48 = vpop.eup %11125  ;;  %11139 = vtanh.f32 %v7568_v62  ;;  %v7574_v12 = vmul.f32 0.7978846, %v7520_v60  ;;  %v7580_v40 = vmul.f32 0.7978846, %v7526_v28  ;;  %v7519_v41 = vadd.f32 %v15414_v25, %v15369_v4 }
0x1208   : > { %v11128_v19 = vpop.eup %11127  ;;  %v7646_v27 = vadd.f32 1.0, %v11126_v48  ;;  %11141 = vtanh.f32 %v7561_v32  ;;  %v15482_v10 = vmul.f32 0.5, %v15344_v20  ;;  %v7525_v26 = vadd.f32 %v7471_v50, %v15390_v58 }
0x1209   : > { %v7652_v38 = vadd.f32 1.0, %v11128_v19  ;;  %11143 = vtanh.f32 %v7567_v21  ;;  %v15486_v7 = vmul.f32 0.5, %v15354_v9  ;;  %v7573_v11 = vmul.f32 0.7978846, %v7519_v41  ;;  %v16409_v19 = vld [vmem:[#allocation75_spill] sm:$0xff] }
0x120a   : > { %11145 = vtanh.f32 %v7574_v12  ;;  %v7478_v52 = vmul.f32 %v7424_v51, %v15417_v53  ;;  %v11130_v1 = vpop.eup %11129  ;;  %v7700_v61 = vmul.f32 %v7646_v27, %v15429_v0  ;;  %v7579_v20 = vmul.f32 0.7978846, %v7525_v26  ;;  %v10894_v0 = vld [vmem:[%s11466_s2 + $0x214] ss:$8 sps:$4 sm:$0xff]   ;;  %v10897_v41 = vld [vmem:[%s11466_s2 + $0x224] ss:$8 sps:$4 sm:$0xff]  }
0x120b   : > { %v7706_v25 = vmul.f32 %v7652_v38, %v15432_v56  ;;  %11147 = vtanh.f32 %v7580_v40  ;;  %v11132_v59 = vpop.eup %11131  ;;  %v7658_v16 = vadd.f32 1.0, %v11130_v1  ;;  %v7477_v9 = vmul.f32 %v15447_v23, %v15405_v15  ;;  %v16406_v23 = vld [vmem:[#allocation64_spill] sm:$0xff] }
0x120c   : > { %11149 = vtanh.f32 %v7573_v11  ;;  %v7532_v50 = vadd.f32 %v7478_v52, %v15417_v53  ;;  %v7664_v30 = vadd.f32 1.0, %v11132_v59  ;;  %v7304_v42 = vmul.f32 0.5, %v15372_v36  ;;  %v16410_v52 = vld [vmem:[#allocation78_spill] sm:$0xff] }
0x120d   : > { %v7754_v63 = vpack.c.bf16 %v7706_v25, %v7700_v61  ;;  %11151 = vtanh.f32 %v7579_v20  ;;  %v11134_v51 = vpop.eup %11133  ;;  %v7712_v57 = vmul.f32 %v7658_v16, %v7280_v2  ;;  %v7310_v56 = vmul.f32 0.5, %v15395_v47 }
0x120e   : > { %v7586_v24 = vmul.f32 0.7978846, %v7532_v50  ;;  %v7531_v33 = vadd.f32 %v7477_v9, %v15405_v15  ;;  %v7718_v14 = vmul.f32 %v7664_v30, %v7286_v3  ;;  %v7657_v34 = vadd.f32 1.0, %v11134_v51  ;;  %v10892_v3 = vld [vmem:[%s11466_s2 + $0x210] ss:$8 sps:$4 sm:$0xff]  }
0x120f   : > { %v11136_v6 = vpop.eup %11135  ;;  %8482 = vmatprep.mubr.bf16.mxu0 %v7754_v63  ;;  %v7486_v62 = vadd.f32 %v16406_v23, %v14981_v46  ;;  %v7492_v36 = vadd.f32 %v16408_v44, %v16407_v39  ;;  %v7303_v2 = vmul.f32 0.5, %v15369_v4  ;;  %v7647_v27 = vadd.f32 1.0, %v16409_v19  ;;  %v16411_v9 = vld [vmem:[#allocation61_spill] sm:$0xff]  ;;  %v16413_v44 = vld [vmem:[#allocation62_spill] sm:$0xff]  ;;  %v16417_v19 = vld [vmem:[#allocation60_spill] sm:$0xff] }
0x1210   : > { %v11138_v60 = vpop.eup %11137  ;;  %8483 = vmatmul.mubr.bf16.vlgmr.msra.gmra.mrb[180].mxu0 %v7753_v13  ;;  %v7663_v47 = vadd.f32 1.0, %v11136_v6  ;;  %11153 = vtanh.f32 %v7586_v24  ;;  %v7585_v32 = vmul.f32 0.7978846, %v7531_v33  ;;  %v7760_v28 = vpack.c.bf16 %v7718_v14, %v7712_v57  ;;  %v10900_v51 = vld [vmem:[%s11466_s2 + $0x234] ss:$8 sps:$4 sm:$0xff]  }
0x1211   : > { %v11140_v21 = vpop.eup %11139  ;;  %8532 = vmatpush1.bf16.msra.mxu0 %v10889_v49  ;;  %v7670_v48 = vadd.f32 1.0, %v11138_v60  ;;  %v7540_v12 = vmul.f32 0.7978846, %v7486_v62  ;;  %v7711_v38 = vmul.f32 %v7657_v34, %v15466_v22  ;;  %v7546_v4 = vmul.f32 0.7978846, %v7492_v36  ;;  %v16414_v36 = vld [vmem:[#allocation71_spill] sm:$0xff] }
0x1212   : > { %v11142_v40 = vpop.eup %11141  ;;  %8533 = vmatprep.subr.bf16.mxu0 %v10894_v0  ;;  %v7717_v54 = vmul.f32 %v7663_v47, %v15469_v8  ;;  %v7676_v17 = vadd.f32 1.0, %v11140_v21  ;;  %8492 = vmatprep.mubr.bf16.mxu0 %v7760_v28  ;;  %v7653_v1 = vadd.f32 1.0, %v16410_v52  ;;  %v10895_v8 = vld [vmem:[%s11466_s2 + $0x220] ss:$8 sps:$4 sm:$0xff]   ;;  %v7309_v50 = vmul.f32 0.5, %v15390_v58 }
0x1213   : > { %v11144_v13 = vpop.eup %11143  ;;  %v7724_v26 = vmul.f32 %v7670_v48, %v15474_v55  ;;  %v7669_v11 = vadd.f32 1.0, %v11142_v40  ;;  %11155 = vtanh.f32 %v7540_v12  ;;  %v15518_v63 = vmul.f32 %v7647_v27, %v16411_v9  ;;  %v16412_v55 = vld [vmem:[#allocation63_spill] sm:$0xff]  ;;  %v16415_v47 = vld [vmem:[#allocation66_spill] sm:$0xff]  ;;  %v16418_v27 = vld [vmem:[#allocation69_spill] sm:$0xff] }
0x1214   : > { %v11146_v61 = vpop.eup %11145  ;;  %v7759_v25 = vpack.c.bf16 %v7717_v54, %v7711_v38  ;;  %v7730_v20 = vmul.f32 %v7676_v17, %v15477_v35  ;;  %v7675_v59 = vadd.f32 1.0, %v11144_v13  ;;  %11157 = vtanh.f32 %v7546_v4  ;;  %v10903_v28 = vld [vmem:[%s11466_s2 + $0x244] ss:$8 sps:$4 sm:$0xff]   ;;  %v16419_v38 = vld [vmem:[#allocation65_spill] sm:$0xff]  ;;  %v16420_v54 = vld [vmem:[#allocation74_spill] sm:$0xff] }
0x1215   : > { %v11148_v22 = vpop.eup %11147  ;;  %8534 = vmatpush1.bf16.msra.mxu0 %v10892_v3  ;;  %v7682_v16 = vadd.f32 1.0, %v11146_v61  ;;  %v15521_v49 = vmul.f32 %v7653_v1, %v16412_v55  ;;  %v7723_v35 = vmul.f32 %v7669_v11, %v15482_v10  ;;  %11159 = vtanh.f32 %v7585_v32  ;;  %v16416_v32 = vld [vmem:[#allocation76_spill] sm:$0xff] }
0x1216   : > { %v11150_v30 = vpop.eup %11149  ;;  %8535 = vmatprep.subr.bf16.mxu0 %v10897_v41  ;;  %v7766_v0 = vpack.c.bf16 %v7730_v20, %v7724_v26  ;;  %v7729_v57 = vmul.f32 %v7675_v59, %v15486_v7  ;;  %v7688_v24 = vadd.f32 1.0, %v11148_v22  ;;  %v7498_v60 = vadd.f32 %v16414_v36, %v16413_v44  ;;  %v10898_v7 = vld [vmem:[%s11466_s2 + $0x230] ss:$8 sps:$4 sm:$0xff]   ;;  %v10901_v1 = vld [vmem:[%s11466_s2 + $0x240] ss:$8 sps:$4 sm:$0xff]  }
0x1217   : > { %v11152_v33 = vpop.eup %11151  ;;  %v7736_v6 = vmul.f32 %v7682_v16, %v7304_v42  ;;  %v7681_v14 = vadd.f32 1.0, %v11150_v30  ;;  %v7755_v58 = vpack.c.bf16 %v15521_v49, %v15518_v63  ;;  %v7419_v10 = vmul.f32 %v15209_v45, %v15172_v31  ;;  %v16421_v59 = vld [vmem:[#allocation81_spill] sm:$0xff]  ;;  %v16423_v16 = vld [vmem:[#allocation83_spill] sm:$0xff] }
0x1218   : > { %8493 = vmatmul.mubr.bf16.gmra.mrb[184].mxu0 %v7759_v25  ;;  %v7765_v34 = vpack.c.bf16 %v7729_v57, %v7723_v35  ;;  %v7742_v23 = vmul.f32 %v7688_v24, %v7310_v56  ;;  %v7687_v62 = vadd.f32 1.0, %v11152_v33  ;;  %v7504_v21 = vadd.f32 %v16416_v32, %v16415_v47  ;;  %v10906_v25 = vld [vmem:[%s11466_s2 + $0x254] ss:$8 sps:$4 sm:$0xff]   ;;  %v10904_v24 = vld [vmem:[%s11466_s2 + $0x250] ss:$8 sps:$4 sm:$0xff]  }
0x1219   : > { %8536 = vmatpush1.bf16.msra.mxu0 %v10895_v8  ;;  %8502 = vmatprep.mubr.bf16.mxu0 %v7766_v0  ;;  %v15533_v42 = vmul.f32 %v7681_v14, %v7303_v2  ;;  %v7552_v12 = vmul.f32 0.7978846, %v7498_v60  ;;  %v7497_v40 = vadd.f32 %v16418_v27, %v16417_v19  ;;  %v7468_v45 = vmul.f32 %v15206_v29, %v15140_v18  ;;  %v16422_v8 = vld [vmem:[#allocation72_spill] sm:$0xff]  ;;  %v16428_v27 = vld [vmem:[#allocation73_spill] sm:$0xff] }
0x121a   : > { %v11154_v3 = vpop.eup %11153  ;;  %8537 = vmatprep.subr.bf16.mxu0 %v10900_v51  ;;  %v7772_v56 = vpack.c.bf16 %v7742_v23, %v7736_v6  ;;  %v15538_v48 = vmul.f32 %v7687_v62, %v7309_v50  ;;  %v7420_v2 = vmul.f32 %v15215_v43, %v15182_v37  ;;  %v7558_v41 = vmul.f32 0.7978846, %v7504_v21  ;;  %v10909_v23 = vld [vmem:[%s11466_s2 + $0x264] ss:$8 sps:$4 sm:$0xff]   ;;  %v16426_v62 = vld [vmem:[#allocation70_spill] sm:$0xff] }
0x121b   : > { %v7503_v17 = vadd.f32 %v16420_v54, %v16419_v38  ;;  %v7694_v13 = vadd.f32 1.0, %v11154_v3  ;;  %11161 = vtanh.f32 %v7552_v12  ;;  %v7551_v26 = vmul.f32 0.7978846, %v7497_v40  ;;  %v16429_v40 = vld [vmem:[#allocation84_spill] sm:$0xff] }
0x121c   : > { %v7771_v4 = vpack.c.bf16 %v15538_v48, %v15533_v42  ;;  %v7473_v52 = vmul.f32 %v7419_v10, %v15172_v31  ;;  %v7316_v29 = vmul.f32 0.5, %v15417_v53  ;;  %11163 = vtanh.f32 %v7558_v41 }
0x121d   : > { %v11156_v11 = vpop.eup %11155  ;;  %8538 = vmatpush1.bf16.msra.mxu0 %v10898_v7  ;;  %v7557_v43 = vmul.f32 0.7978846, %v7503_v17  ;;  %11165 = vtanh.f32 %v7551_v26  ;;  %v7510_v22 = vadd.f32 %v16421_v59, %v15080_v5  ;;  %v7516_v50 = vadd.f32 %v16423_v16, %v16422_v8  ;;  %v10912_v17 = vld [vmem:[%s11466_s2 + $0x274] ss:$8 sps:$4 sm:$0xff]  }
0x121e   : > { %v11158_v61 = vpop.eup %11157  ;;  %8539 = vmatprep.subr.bf16.mxu0 %v10903_v28  ;;  %v7648_v20 = vadd.f32 1.0, %v11156_v11  ;;  %v7270_v9 = vmul.f32 0.5, %v14981_v46  ;;  %v7276_v55 = vmul.f32 0.5, %v16407_v39  ;;  %v7474_v30 = vmul.f32 %v7420_v2, %v15182_v37  ;;  %v16424_v46 = vld [vmem:[#allocation68_spill] sm:$0xff] }
0x121f   : > { %v7654_v53 = vadd.f32 1.0, %v11158_v61  ;;  %11167 = vtanh.f32 %v7557_v43  ;;  %v7748_v51 = vmul.f32 %v7694_v13, %v7316_v29  ;;  %v7564_v0 = vmul.f32 0.7978846, %v7510_v22  ;;  %v11160_v57 = vpop.eup %11159  ;;  %v16425_v39 = vld [vmem:[#allocation80_spill] sm:$0xff] }
0x1220   : > { %8503 = vmatmul.mubr.bf16.gmra.mrb[188].mxu0 %v7765_v34  ;;  %v7570_v35 = vmul.f32 0.7978846, %v7516_v50  ;;  %v15562_v33 = vmul.f32 %v7648_v20, %v7270_v9  ;;  %v7509_v14 = vadd.f32 %v16425_v39, %v16424_v46  ;;  %v16427_v34 = vld [vmem:[#allocation82_spill] sm:$0xff]  ;;  %v7522_v7 = vadd.f32 %v7468_v45, %v15140_v18  ;;  %v10915_v50 = vld [vmem:[%s11466_s2 + $0x284] ss:$8 sps:$4 sm:$0xff]  }
0x1221   : > { %8540 = vmatpush1.bf16.msra.mxu0 %v10901_v1  ;;  %8512 = vmatprep.mubr.bf16.mxu0 %v7772_v56  ;;  %v15564_v6 = vmul.f32 %v7654_v53, %v7276_v55  ;;  %11169 = vtanh.f32 %v7564_v0  ;;  %v7515_v36 = vadd.f32 %v16427_v34, %v16426_v62  ;;  %v7778_v32 = vpack.c.bf16 %v7748_v51, %v7748_v51  ;;  %v10907_v56 = vld [vmem:[%s11466_s2 + $0x260] ss:$8 sps:$4 sm:$0xff]   ;;  %v10910_v20 = vld [vmem:[%s11466_s2 + $0x270] ss:$8 sps:$4 sm:$0xff]  }
0x1222   : > { %8541 = vmatprep.subr.bf16.mxu0 %v10906_v25  ;;  %11171 = vtanh.f32 %v7570_v35  ;;  %v7563_v10 = vmul.f32 0.7978846, %v7509_v14  ;;  %v7693_v21 = vadd.f32 1.0, %v11160_v57  ;;  %v7528_v28 = vadd.f32 %v7474_v30, %v15182_v37  ;;  %v10913_v53 = vld [vmem:[%s11466_s2 + $0x280] ss:$8 sps:$4 sm:$0xff]  }
0x1223   : > { %v7756_v60 = vpack.c.bf16 %v15564_v6, %v15562_v33  ;;  %v7569_v3 = vmul.f32 0.7978846, %v7515_v36  ;;  %v7576_v12 = vmul.f32 0.7978846, %v7522_v7  ;;  %v7521_v2 = vadd.f32 %v16429_v40, %v16428_v27  ;;  %v10918_v35 = vld [vmem:[%s11466_s2 + $0x294] ss:$8 sps:$4 sm:$0xff]  }
0x1224   : > { %11173 = vtanh.f32 %v7563_v10  ;;  %v7527_v41 = vadd.f32 %v7473_v52, %v15172_v31  ;;  %v7315_v13 = vmul.f32 0.5, %v15405_v15  ;;  %v7282_v45 = vmul.f32 0.5, %v16413_v44  ;;  %v10916_v7 = vld [vmem:[%s11466_s2 + $0x290] ss:$8 sps:$4 sm:$0xff]  }
0x1225   : > { %8542 = vmatpush1.bf16.msra.mxu0 %v10904_v24  ;;  %v11162_v54 = vpop.eup %11161  ;;  %11175 = vtanh.f32 %v7569_v3  ;;  %v7582_v26 = vmul.f32 0.7978846, %v7528_v28  ;;  %v7575_v29 = vmul.f32 0.7978846, %v7521_v2  ;;  %v7288_v52 = vmul.f32 0.5, %v16415_v47 }
0x1226   : > { %8543 = vmatprep.subr.bf16.mxu0 %v10909_v23  ;;  %v11164_v11 = vpop.eup %11163  ;;  %v7660_v1 = vadd.f32 1.0, %v11162_v54  ;;  %11177 = vtanh.f32 %v7576_v12  ;;  %v7581_v43 = vmul.f32 0.7978846, %v7527_v41  ;;  %v7281_v15 = vmul.f32 0.5, %v16417_v19  ;;  %v10921_v28 = vld [vmem:[%s11466_s2 + $0x2a4] ss:$8 sps:$4 sm:$0xff]  }
0x1227   : > { %v11166_v61 = vpop.eup %11165  ;;  %v7666_v25 = vadd.f32 1.0, %v11164_v11  ;;  %11179 = vtanh.f32 %v7582_v26  ;;  %v7747_v59 = vmul.f32 %v7693_v21, %v7315_v13  ;;  %v7287_v22 = vmul.f32 0.5, %v16419_v38  ;;  %v10919_v13 = vld [vmem:[%s11466_s2 + $0x2a0] ss:$8 sps:$4 sm:$0xff]  }
0x1228   : > { %8513 = vmatmul.mubr.bf16.gmra.mrb[192].mxu0 %v7771_v4  ;;  %v7659_v16 = vadd.f32 1.0, %v11166_v61  ;;  %11181 = vtanh.f32 %v7575_v29  ;;  %v15590_v42 = vmul.f32 %v7660_v1, %v7282_v45  ;;  %v7294_v30 = vmul.f32 0.5, %v15080_v5  ;;  %v10924_v1 = vld [vmem:[%s11466_s2 + $0x2b4] ss:$8 sps:$4 sm:$0xff]  }
0x1229   : > { %v11168_v44 = vpop.eup %11167  ;;  %8544 = vmatpush1.bf16.msra.mxu0 %v10907_v56  ;;  %8522 = vmatprep.mubr.bf16.mxu0 %v7778_v32  ;;  %v15592_v47 = vmul.f32 %v7666_v25, %v7288_v52  ;;  %11183 = vtanh.f32 %v7581_v43  ;;  %v7777_v0 = vpack.c.bf16 %v7747_v59, %v7747_v59  ;;  %v7300_v24 = vmul.f32 0.5, %v16422_v8  ;;  %v16430_v61 = vld [vmem:[#allocation58_spill] sm:$0xff]  ;;  %v16431_v52 = vld [vmem:[#allocation79_spill] sm:$0xff] }
0x122a   : > { %8545 = vmatprep.subr.bf16.mxu0 %v10912_v17  ;;  %v7665_v48 = vadd.f32 1.0, %v11168_v44  ;;  %v15596_v9 = vmul.f32 %v7659_v16, %v7281_v15  ;;  %v7293_v32 = vmul.f32 0.5, %v16424_v46  ;;  %v7299_v8 = vmul.f32 0.5, %v16426_v62  ;;  %v10927_v15 = vld [vmem:[%s11466_s2 + $0x2c4] ss:$8 sps:$4 sm:$0xff]   ;;  %v16433_v16 = vld [vmem:[#allocation77_spill] sm:$0xff] }
0x122b   : > { %v11170_v19 = vpop.eup %11169  ;;  %v7762_v4 = vpack.c.bf16 %v15592_v47, %v15590_v42  ;;  %v7306_v12 = vmul.f32 0.5, %v15140_v18  ;;  %v7305_v62 = vmul.f32 0.5, %v16428_v27  ;;  %v7311_v54 = vmul.f32 0.5, %v15172_v31  ;;  %v10922_v27 = vld [vmem:[%s11466_s2 + $0x2b0] ss:$8 sps:$4 sm:$0xff]  }
0x122c   : > { %v15598_v55 = vmul.f32 %v7665_v48, %v7287_v22  ;;  %v11172_v38 = vpop.eup %11171  ;;  %v7672_v51 = vadd.f32 1.0, %v11170_v19  ;;  %v7261_v25 = vadd.f32 %v16431_v52, %v16430_v61  ;;  %v10925_v44 = vld [vmem:[%s11466_s2 + $0x2c0] ss:$8 sps:$4 sm:$0xff]   ;;  %v10930_v59 = vld [vmem:[%s11466_s2 + $0x2d4] ss:$8 sps:$4 sm:$0xff]  }
0x122d   : > { %8546 = vmatpush1.bf16.msra.mxu0 %v10910_v20  ;;  %v7678_v39 = vadd.f32 1.0, %v11172_v38  ;;  %v16432_v22 = vld [vmem:[#allocation37_spill] sm:$0xff]  ;;  %v10933_v38 = vld [vmem:[%s11466_s2 + $0x2e4] ss:$8 sps:$4 sm:$0xff]  }
0x122e   : > { %8547 = vmatprep.subr.bf16.mxu0 %v10915_v50  ;;  %v7761_v57 = vpack.c.bf16 %v15598_v55, %v15596_v9  ;;  %v11174_v14 = vpop.eup %11173  ;;  %v15606_v34 = vmul.f32 %v7672_v51, %v7294_v30  ;;  %v7372_v20 = vmul.f32 0.044715, %v7261_v25  ;;  %v7259_v50 = vadd.f32 %v16433_v16, %v16432_v22  ;;  %v10928_v48 = vld [vmem:[%s11466_s2 + $0x2d0] ss:$8 sps:$4 sm:$0xff]   ;;  %v10931_v30 = vld [vmem:[%s11466_s2 + $0x2e0] ss:$8 sps:$4 sm:$0xff]  }
0x122f   : > { %v11176_v23 = vpop.eup %11175  ;;  %v15608_v36 = vmul.f32 %v7678_v39, %v7300_v24  ;;  %v7671_v5 = vadd.f32 1.0, %v11174_v14  ;;  %v10936_v51 = vld [vmem:[%s11466_s2 + $0x2f4] ss:$8 sps:$4 sm:$0xff]   ;;  %v10934_v24 = vld [vmem:[%s11466_s2 + $0x2f0] ss:$8 sps:$4 sm:$0xff]   ;;  %s16455_s2 = sld [smem:[#allocation98_spill]] (!%p9923_p6) }
0x1230   : > { %8523 = vmatmul.mubr.bf16.gmra.mrb[196].mxu0 %v7777_v0  ;;  %v11178_v10 = vpop.eup %11177  ;;  %v7677_v21 = vadd.f32 1.0, %v11176_v23  ;;  %v7426_v19 = vmul.f32 %v7372_v20, %v7261_v25  ;;  %v7317_v42 = vmul.f32 0.5, %v7259_v50 }
0x1231   : > { %8548 = vmatpush1.bf16.msra.mxu0 %v10913_v53  ;;  %8563 = vmatprep.mubr.bf16.mxu0 %v7756_v60  ;;  %v11180_v3 = vpop.eup %11179  ;;  %v7768_v56 = vpack.c.bf16 %v15608_v36, %v15606_v34  ;;  %v7684_v40 = vadd.f32 1.0, %v11178_v10  ;;  %v7725_v33 = vmul.f32 %v7671_v5, %v7293_v32  ;;  %v7312_v60 = vmul.f32 0.5, %v15182_v37 }
0x1232   : > { %8549 = vmatprep.subr.bf16.mxu0 %v10918_v35  ;;  %v11182_v2 = vpop.eup %11181  ;;  %v7731_v6 = vmul.f32 %v7677_v21, %v7299_v8  ;;  %v7690_v46 = vadd.f32 1.0, %v11180_v3  ;;  %v7371_v53 = vmul.f32 0.044715, %v7259_v50  ;;  %v7480_v0 = vmul.f32 %v7426_v19, %v7261_v25 }
0x1233   : > { %v11184_v41 = vpop.eup %11183  ;;  %v7683_v17 = vadd.f32 1.0, %v11182_v2  ;;  %v7738_v18 = vmul.f32 %v7684_v40, %v7306_v12 }
0x1234   : > { %v7767_v45 = vpack.c.bf16 %v7731_v6, %v7725_v33  ;;  %v7744_v26 = vmul.f32 %v7690_v46, %v7312_v60  ;;  %v7689_v11 = vadd.f32 1.0, %v11184_v41  ;;  %v7425_v35 = vmul.f32 %v7371_v53, %v7259_v50 }
0x1235   : > { %8550 = vmatpush1.bf16.msra.mxu0 %v10916_v7  ;;  %v7737_v29 = vmul.f32 %v7683_v17, %v7305_v62  ;;  %v7534_v39 = vadd.f32 %v7480_v0, %v7261_v25  ;;  %v7318_v7 = vmul.f32 0.5, %v7261_v25  ;;  %v16438_v0 = vld [vmem:[#allocation44_spill] sm:$0xff] }
0x1236   : > { %8551 = vmatprep.subr.bf16.mxu0 %v10921_v28  ;;  %v7774_v37 = vpack.c.bf16 %v7744_v26, %v7738_v18  ;;  %v7743_v43 = vmul.f32 %v7689_v11, %v7311_v54  ;;  %v7479_v14 = vmul.f32 %v7425_v35, %v7259_v50  ;;  %v16435_v18 = vld [vmem:[#allocation38_spill] sm:$0xff]  ;;  %v16436_v11 = vld [vmem:[#allocation39_spill] sm:$0xff] }
0x1237   : > { %v7588_v23 = vmul.f32 0.7978846, %v7534_v39  ;;  %v16439_v39 = vld [vmem:[#allocation46_spill] sm:$0xff] }
0x1238   : > { %v7773_v31 = vpack.c.bf16 %v7743_v43, %v7737_v29  ;;  %v7533_v34 = vadd.f32 %v7479_v14, %v7259_v50 }
0x1239   : > { %8552 = vmatpush1.bf16.msra.mxu0 %v10919_v13  ;;  %11185 = vtanh.f32 %v7588_v23  ;;  %v16440_v23 = vld [vmem:[#allocation47_spill] sm:$0xff] }
0x123a   : > { %8553 = vmatprep.subr.bf16.mxu0 %v10924_v1  ;;  %v7587_v36 = vmul.f32 0.7978846, %v7533_v34 }
0x123c   : > { %11187 = vtanh.f32 %v7587_v36 }
0x123d   : > { %8554 = vmatpush1.bf16.msra.mxu0 %v10922_v27 }
0x123e   : > { %8555 = vmatprep.subr.bf16.mxu0 %v10927_v15 }
0x1241   : > { %8556 = vmatpush1.bf16.msra.mxu0 %v10925_v44 }
0x1242   : > { %8557 = vmatprep.subr.bf16.mxu0 %v10930_v59 }
0x1243   : > { %v11186_v5 = vpop.eup %11185 }
0x1244   : > { %v7696_v10 = vadd.f32 1.0, %v11186_v5 }
0x1245   : > { %8558 = vmatpush1.bf16.msra.mxu0 %v10928_v48 }
0x1246   : > { %8559 = vmatprep.subr.bf16.mxu0 %v10933_v38  ;;  %v11188_v63 = vpop.eup %11187  ;;  %v7750_v49 = vmul.f32 %v7696_v10, %v7318_v7  ;;  %v16437_v38 = vld [vmem:[#allocation45_spill] sm:$0xff] }
0x1248   : > { %v7780_v32 = vpack.c.bf16 %v7750_v49, %v7750_v49 }
0x1249   : > { %8560 = vmatpush1.bf16.msra.mxu0 %v10931_v30 }
0x124a   : > { %8561 = vmatprep.subr.bf16.mxu0 %v10936_v51 }
0x124d   : > { %8562 = vmatpush1.bf16.msra.mxu0 %v10934_v24 }
0x1250   : > { %8564 = vmatmul.mubr.bf16.vlgmr.msra.gmra.mrb[180].mxu0 %v7755_v58  ;;  %v7695_v58 = vadd.f32 1.0, %v11188_v63 }
0x1251   : > { %8573 = vmatprep.mubr.bf16.mxu0 %v7762_v4 }
0x1252   : > { %v7749_v47 = vmul.f32 %v7695_v58, %v7317_v42 }
0x1254   : > { %v7779_v4 = vpack.c.bf16 %v7749_v47, %v7749_v47  ;;  %v16441_v47 = vld [vmem:[#allocation41_spill] sm:$0xff] }
0x1258   : > { %8574 = vmatmul.mubr.bf16.gmra.mrb[184].mxu0 %v7761_v57 }
0x1259   : > { %8583 = vmatprep.mubr.bf16.mxu0 %v7768_v56 }
0x1260   : > { %8584 = vmatmul.mubr.bf16.gmra.mrb[188].mxu0 %v7767_v45  ;;  %v7877_v45 = vld [vmem:[%s16434_s5] sm:$0x3] }
0x1261   : > { %8593 = vmatprep.mubr.bf16.mxu0 %v7774_v37  ;;  %v15665_v26 = vrot.slane %v7877_v45, %v16435_v18  ;;  %v15668_v1 = vrot.slane %v7877_v45, %v16436_v11 }
0x1268   : > { %8594 = vmatmul.mubr.bf16.gmra.mrb[192].mxu0 %v7773_v31 }
0x1269   : > { %8603 = vmatprep.mubr.bf16.mxu0 %v7780_v32 }
0x1270   : > { %8604 = vmatmul.mubr.bf16.gmra.mrb[200].mxu0 %v7779_v4 }
0x12b6   : > { %v8403_v8 = vpop.f32.mrb[208].mxu1 }
0x12b7   : > { %v8405_v9 = vpop.f32.mrb[209].mxu1  ;;  %v8404_v15 = vadd.f32 %v8403_v8, %v15665_v26 }
0x12b8   : > { %v8407_v55 = vpop.f32.mrb[210].mxu1  ;;  %v8406_v44 = vadd.f32 %v8405_v9, %v15668_v1 }
0x12b9   : > { %v8409_v57 = vpop.f32.mrb[211].mxu1  ;;  %v8408_v59 = vadd.f32 %v8407_v55, %v15665_v26  ;;  %v16442_v55 = vld [vmem:[#allocation40_spill] sm:$0xff] }
0x12ba   : > { %v8410_v50 = vadd.f32 %v8409_v57, %v15668_v1 }
0x12be   : > { %v8413_v21 = vpop.f32.mrb[212].mxu1 }
0x12bf   : > { %v8415_v3 = vpop.f32.mrb[213].mxu1  ;;  %v8414_v36 = vadd.f32 %v8413_v21, %v15665_v26 }
0x12c0   : > { %v8417_v28 = vpop.f32.mrb[214].mxu1  ;;  %v8416_v5 = vadd.f32 %v8415_v3, %v15668_v1  ;;  %v16443_v3 = vld [vmem:[#allocation43_spill] sm:$0xff] }
0x12c1   : > { %v8419_v56 = vpop.f32.mrb[215].mxu1  ;;  %v8418_v7 = vadd.f32 %v8417_v28, %v15665_v26  ;;  %v16444_v28 = vld [vmem:[#allocation42_spill] sm:$0xff] }
0x12c2   : > { %v8420_v58 = vadd.f32 %v8419_v56, %v15668_v1 }
0x12c6   : > { %v8423_v12 = vpop.f32.mrb[216].mxu1 }
0x12c7   : > { %v8425_v40 = vpop.f32.mrb[217].mxu1 }
0x12c8   : > { %v15647_v2 = vpop.f32.mrb[218].mxu1 }
0x12c9   : > { %v15649_v33 = vpop.f32.mrb[219].mxu1  ;;  %v8428_v45 = vadd.f32 %v15647_v2, %v15665_v26 }
0x12d1   : > { %v15651_v6 = vpop.f32.mrb[220].mxu1 }
0x12d2   : > { %v15653_v60 = vpop.f32.mrb[221].mxu1 }
0x12d3   : > { %v15655_v46 = vpop.f32.mrb[222].mxu1 }
0x12d4   : > { %v15657_v41 = vpop.f32.mrb[223].mxu1 }
0x12d9   : > { %v8443_v62 = vpop.f32.mrb[224].mxu1 }
0x12da   : > { %v8445_v54 = vpop.f32.mrb[225].mxu1  ;;  %v8444_v37 = vadd.f32 %v8443_v62, %v15665_v26 }
0x12db   : > { %v8447_v17 = vpop.f32.mrb[226].mxu1  ;;  %v8446_v29 = vadd.f32 %v8445_v54, %v15668_v1  ;;  %v8424_v54 = vadd.f32 %v8423_v12, %v15665_v26 }
0x12dc   : > { %v8448_v13 = vpop.f32.mrb[227].mxu1  ;;  %v8426_v17 = vadd.f32 %v8425_v40, %v15668_v1  ;;  %v16446_v40 = vld [vmem:[#allocation48_spill] sm:$0xff] }
0x1303   : > { %v8524_v43 = vpop.f32.mrb[196].mxu0 }
0x1304   : > { %v15672_v27 = vadd.f32 %v8524_v43, %v8444_v37  ;;  %v8526_v31 = vpop.f32.mrb[197].mxu0  ;;  %v8430_v37 = vadd.f32 %v15649_v33, %v15668_v1  ;;  %v16448_v33 = vld [vmem:[#allocation50_spill] sm:$0xff] }
0x1305   : > { %v15674_v61 = vadd.f32 %v8526_v31, %v8446_v29  ;;  %v8528_v52 = vpop.f32.mrb[198].mxu0  ;;  %v16445_v31 = vld [vmem:[#allocation49_spill] sm:$0xff] }
0x1306   : > { %v8529_v25 = vpop.f32.mrb[199].mxu0 }
0x1323   : > { %v8565_v20 = vpop.f32.mrb[180].mxu0 }
0x1324   : > { %v10246_v22 = vadd.f32 %v8565_v20, %v8404_v15  ;;  %v8567_v16 = vpop.f32.mrb[181].mxu0  ;;  %v16447_v20 = vld [vmem:[#allocation51_spill] sm:$0xff] }
0x1325   : > { %v10248_v48 = vadd.f32 %v8567_v16, %v8406_v44  ;;  %v8569_v19 = vpop.f32.mrb[182].mxu0  ;;  %v8436_v16 = vadd.f32 %v15653_v60, %v15668_v1  ;;  %v16450_v60 = vld [vmem:[#allocation52_spill] sm:$0xff] }
0x1326   : > { %v15681_v53 = vadd.f32 %v10246_v22, %v16437_v38  ;;  %v10250_v30 = vadd.f32 %v8569_v19, %v8408_v59  ;;  %v8571_v51 = vpop.f32.mrb[183].mxu0  ;;  %v8434_v22 = vadd.f32 %v15651_v6, %v15665_v26  ;;  %v16449_v6 = vld [vmem:[#allocation53_spill] sm:$0xff] }
0x1327   : > { %v15684_v35 = vadd.f32 %v10248_v48, %v16438_v0  ;;  %v10252_v24 = vadd.f32 %v8571_v51, %v8410_v50  ;;  %v8438_v48 = vadd.f32 %v15655_v46, %v15665_v26 }
0x1328   : > { %8630 = vst [vmem:[#allocation2] sm:$0xff] %v15681_v53  ;;  %v15688_v14 = vadd.f32 %v10250_v30, %v16439_v39  ;;  %v8440_v30 = vadd.f32 %v15657_v41, %v15668_v1  ;;  %v16452_v41 = vld [vmem:[#allocation54_spill] sm:$0xff] }
0x1329   : > { %8631 = vst.msk [vmem:[#allocation2 + $0x8] sm:$0xff] %vm3063_vm2, %v15684_v35  ;;  %v15693_v34 = vadd.f32 %v10252_v24, %v16440_v23 }
0x132a   : > { %8632 = vst [vmem:[#allocation2 + $0x10] sm:$0xff] %v15688_v14 }
0x132b   : > { %8633 = vst.msk [vmem:[#allocation2 + $0x18] sm:$0xff] %vm3063_vm2, %v15693_v34  ;;  %v8575_v10 = vpop.f32.mrb[184].mxu0 }
0x132c   : > { %v10254_v63 = vadd.f32 %v8575_v10, %v8414_v36  ;;  %v8577_v49 = vpop.f32.mrb[185].mxu0  ;;  %v16451_v10 = vld [vmem:[#allocation55_spill] sm:$0xff] }
0x132d   : > { %v10256_v32 = vadd.f32 %v8577_v49, %v8416_v5  ;;  %v8579_v42 = vpop.f32.mrb[186].mxu0 }
0x132e   : > { %v15703_v4 = vadd.f32 %v10254_v63, %v16441_v47  ;;  %v10258_v8 = vadd.f32 %v8579_v42, %v8418_v7  ;;  %v8581_v9 = vpop.f32.mrb[187].mxu0 }
0x132f   : > { %v15706_v57 = vadd.f32 %v10256_v32, %v16442_v55  ;;  %v10260_v21 = vadd.f32 %v8581_v9, %v8420_v58  ;;  %v16453_v32 = vld [vmem:[#allocation57_spill] sm:$0xff]  ;;  %v8658_v55 = vsel (!%p9923_p6), %vm3063_vm2, %v15693_v34, 0.0 }
0x1330   : > { %8634 = vst [vmem:[#allocation2 + $0x20] sm:$0xff] %v15703_v4  ;;  %v15710_v62 = vadd.f32 %v10258_v8, %v16443_v3  ;;  %v16454_v8 = vld [vmem:[#allocation56_spill] sm:$0xff] }
0x1331   : > { %8635 = vst.msk [vmem:[#allocation2 + $0x28] sm:$0xff] %vm3063_vm2, %v15706_v57  ;;  %v15715_v56 = vadd.f32 %v10260_v21, %v16444_v28 }
0x1332   : > { %8636 = vst [vmem:[#allocation2 + $0x30] sm:$0xff] %v15710_v62 }
0x1333   : > { %8637 = vst.msk [vmem:[#allocation2 + $0x38] sm:$0xff] %vm3063_vm2, %v15715_v56  ;;  %v8585_v13 = vpop.f32.mrb[188].mxu0  ;;  %v8666_v21 = vsel (!%p9923_p6), %vm3063_vm2, %v15715_v56, 0.0 }
0x1334   : > { %v10262_v18 = vadd.f32 %v8585_v13, %v8424_v54  ;;  %v8587_v11 = vpop.f32.mrb[189].mxu0  ;;  %v8659_v54 = vadd.f32 (!%p9923_p6), %v8658_v55, %v15688_v14 }
0x1335   : > { %v10264_v29 = vadd.f32 %v8587_v11, %v8426_v17  ;;  %v8589_v43 = vpop.f32.mrb[190].mxu0  ;;  %v8667_v17 = vadd.f32 (!%p9923_p6), %v8666_v21, %v15710_v62 }
0x1336   : > { %v15727_v12 = vadd.f32 %v10262_v18, %v16445_v31  ;;  %v10266_v52 = vadd.f32 %v8589_v43, %v8428_v45  ;;  %v8591_v25 = vpop.f32.mrb[191].mxu0 }
0x1337   : > { %v15730_v15 = vadd.f32 %v10264_v29, %v16446_v40  ;;  %v10268_v44 = vadd.f32 %v8591_v25, %v8430_v37 }
0x1338   : > { %8638 = vst [vmem:[#allocation2 + $0x40] sm:$0xff] %v15727_v12  ;;  %v15734_v2 = vadd.f32 %v10266_v52, %v16447_v20 }
0x1339   : > { %8639 = vst.msk [vmem:[#allocation2 + $0x48] sm:$0xff] %vm3063_vm2, %v15730_v15  ;;  %v15739_v59 = vadd.f32 %v10268_v44, %v16448_v33  ;;  %v8670_v13 = vsel (!%p9923_p6), %vm3063_vm2, %v15730_v15, 0.0 }
0x133a   : > { %8640 = vst [vmem:[#allocation2 + $0x50] sm:$0xff] %v15734_v2  ;;  %v8671_v18 = vadd.f32 (!%p9923_p6), %v8670_v13, %v15727_v12 }
0x133b   : > { %8641 = vst.msk [vmem:[#allocation2 + $0x58] sm:$0xff] %vm3063_vm2, %v15739_v59  ;;  %v8595_v50 = vpop.f32.mrb[192].mxu0  ;;  %v8674_v45 = vsel (!%p9923_p6), %vm3063_vm2, %v15739_v59, 0.0 }
0x133c   : > { %v10270_v19 = vadd.f32 %v8595_v50, %v8434_v22  ;;  %v8597_v38 = vpop.f32.mrb[193].mxu0  ;;  %v8675_v11 = vadd.f32 (!%p9923_p6), %v8674_v45, %v15734_v2 }
0x133d   : > { %v10272_v51 = vadd.f32 %v8597_v38, %v8436_v16  ;;  %v8599_v0 = vpop.f32.mrb[194].mxu0 }
0x133e   : > { %v15753_v24 = vadd.f32 %v10270_v19, %v16449_v6  ;;  %v10274_v39 = vadd.f32 %v8599_v0, %v8438_v48  ;;  %v8601_v23 = vpop.f32.mrb[195].mxu0 }
0x133f   : > { %v15756_v36 = vadd.f32 %v10272_v51, %v16450_v60  ;;  %v10276_v5 = vadd.f32 %v8601_v23, %v8440_v30 }
0x1340   : > { %8642 = vst [vmem:[#allocation2 + $0x60] sm:$0xff] %v15753_v24  ;;  %v15760_v46 = vadd.f32 %v10274_v39, %v16451_v10 }
0x1341   : > { %8643 = vst.msk [vmem:[#allocation2 + $0x68] sm:$0xff] %vm3063_vm2, %v15756_v36  ;;  %v15765_v26 = vadd.f32 %v10276_v5, %v16452_v41  ;;  %v8678_v37 = vsel (!%p9923_p6), %vm3063_vm2, %v15756_v36, 0.0 }
0x1342   : > { %8644 = vst [vmem:[#allocation2 + $0x70] sm:$0xff] %v15760_v46  ;;  %v8679_v43 = vadd.f32 (!%p9923_p6), %v8678_v37, %v15753_v24 }
0x1343   : > { %8645 = vst.msk [vmem:[#allocation2 + $0x78] sm:$0xff] %vm3063_vm2, %v15765_v26  ;;  %v8605_v1 = vpop.f32.mrb[200].mxu0  ;;  %8651 = sbr.rel (%p9923_p6) target bundleno = 5420 (0x152c), region = 128  ;;  %v8682_v29 = vsel (!%p9923_p6), %vm3063_vm2, %v15765_v26, 0.0 }
0x1344   : > { %v8606_v7 = vadd.f32 %v8605_v1, %v15672_v27  ;;  %v8607_v63 = vpop.f32.mrb[201].mxu0  ;;  %v8654_v27 = vsel (!%p9923_p6), %vm3063_vm2, %v15684_v35, 0.0  ;;  %v8683_v31 = vadd.f32 (!%p9923_p6), %v8682_v29, %v15760_v46 }
0x1345   : > { %v8608_v49 = vadd.f32 %v8607_v63, %v15674_v61  ;;  %v8609_v58 = vpop.f32.mrb[202].mxu0  ;;  %v8662_v61 = vsel (!%p9923_p6), %vm3063_vm2, %v15706_v57, 0.0  ;;  %v8655_v3 = vadd.f32 (!%p9923_p6), %v8654_v27, %v15681_v53 }
0x1346   : > { %v15773_v42 = vadd.f32 %v8606_v7, %v16453_v32  ;;  %v8610_v47 = vpop.f32.mrb[203].mxu0  ;;  %v8663_v28 = vadd.f32 (!%p9923_p6), %v8662_v61, %v15703_v4 }
0x1347   : > { %v15776_v9 = vadd.f32 %v8608_v49, %v16454_v8  ;;  %8656 = vadd.xlane.f32.xlu0 (!%p9923_p6), %v8655_v3 }
0x1348   : > { %8646 = vst [vmem:[#allocation2 + $0x80] sm:$0xff] %v15773_v42  ;;  %8664 = vadd.xlane.f32.xlu1 (!%p9923_p6), %v8663_v28 }
0x1349   : > { %8647 = vst.msk [vmem:[#allocation2 + $0x88] sm:$0xff] %vm3063_vm2, %v15776_v9  ;;  %v8686_v52 = vsel (!%p9923_p6), %vm3063_vm2, %v15776_v9, 0.0 }
0x134a   : > { %v8687_v25 = vadd.f32 %v8686_v52, %v15773_v42 }
0x134b   : > { %8660 = vadd.xlane.f32.xlu0 %v8659_v54 }
0x134c   : > { %8668 = vadd.xlane.f32.xlu1 %v8667_v17 }
0x134f   : > { %8672 = vadd.xlane.f32.xlu0 %v8671_v18 }
0x1350   : > { %8676 = vadd.xlane.f32.xlu1 %v8675_v11 }
0x1353   : > { %8680 = vadd.xlane.f32.xlu0 %v8679_v43 }
0x1354   : > { %8684 = vadd.xlane.f32.xlu1 %v8683_v31 }
0x1357   : > { %8688 = vadd.xlane.f32.xlu0 %v8687_v25 }
0x13d4   : > { %v8657_v40 = vpop.xlane.xlu0 %8656 }
0x13d5   : > { %v8665_v44 = vpop.xlane.xlu1 %8664  ;;  %v8690_v20 = vmul.f32 0.0052083335, %v8657_v40 }
0x13d6   : > { %v8692_v33 = vmul.f32 0.0052083335, %v8665_v44 }
0x13d7   : > { %v15810_v22 = vsub.f32 %v15681_v53, %v8690_v20  ;;  %v15813_v16 = vsub.f32 %v15684_v35, %v8690_v20 }
0x13d8   : > { %v15816_v50 = vsub.f32 %v15703_v4, %v8692_v33  ;;  %v15819_v48 = vsub.f32 %v15706_v57, %v8692_v33  ;;  %v8661_v19 = vpop.xlane.xlu0 %8660 }
0x13d9   : > { %v8669_v38 = vpop.xlane.xlu1 %8668  ;;  %v8691_v30 = vmul.f32 0.0052083335, %v8661_v19  ;;  %v8717_v0 = vmul.f32 %v15810_v22, %v15810_v22  ;;  %v8718_v53 = vmul.f32 %v15813_v16, %v15813_v16 }
0x13da   : > { %v8693_v51 = vmul.f32 0.0052083335, %v8669_v38  ;;  %v8721_v35 = vmul.f32 %v15816_v50, %v15816_v50  ;;  %v8722_v4 = vmul.f32 %v15819_v48, %v15819_v48 }
0x13db   : > { %v15830_v6 = vsub.f32 %v15688_v14, %v8691_v30  ;;  %v15833_v57 = vsub.f32 %v15693_v34, %v8691_v30  ;;  %v8735_v5 = vsel %vm3063_vm2, %v8718_v53, 0.0 }
0x13dc   : > { %v15836_v39 = vsub.f32 %v15710_v62, %v8693_v51  ;;  %v15839_v23 = vsub.f32 %v15715_v56, %v8693_v51  ;;  %v8673_v60 = vpop.xlane.xlu0 %8672  ;;  %v8743_v41 = vsel %vm3063_vm2, %v8722_v4, 0.0  ;;  %v8736_v7 = vadd.f32 %v8735_v5, %v8717_v0 }
0x13dd   : > { %v8677_v10 = vpop.xlane.xlu1 %8676  ;;  %v8694_v1 = vmul.f32 0.0052083335, %v8673_v60  ;;  %v8744_v14 = vadd.f32 %v8743_v41, %v8721_v35  ;;  %v8719_v34 = vmul.f32 %v15830_v6, %v15830_v6  ;;  %v8720_v62 = vmul.f32 %v15833_v57, %v15833_v57 }
0x13de   : > { %v8695_v63 = vmul.f32 0.0052083335, %v8677_v10  ;;  %v8723_v56 = vmul.f32 %v15836_v39, %v15836_v39  ;;  %v8724_v49 = vmul.f32 %v15839_v23, %v15839_v23  ;;  %8737 = vadd.xlane.f32.xlu1 %v8736_v7 }
0x13df   : > { %v15852_v58 = vsub.f32 %v15727_v12, %v8694_v1  ;;  %v15855_v32 = vsub.f32 %v15730_v15, %v8694_v1  ;;  %v8739_v61 = vsel %vm3063_vm2, %v8720_v62, 0.0 }
0x13e0   : > { %v15858_v47 = vsub.f32 %v15734_v2, %v8695_v63  ;;  %v15861_v8 = vsub.f32 %v15739_v59, %v8695_v63  ;;  %v8681_v27 = vpop.xlane.xlu0 %8680  ;;  %v8747_v21 = vsel %vm3063_vm2, %v8724_v49, 0.0  ;;  %v8740_v28 = vadd.f32 %v8739_v61, %v8719_v34  ;;  %v8652_v49 = vld [vmem:[%s16455_s2] sm:$0x3] }
0x13e1   : > { %v8685_v55 = vpop.xlane.xlu1 %8684  ;;  %v8696_v3 = vmul.f32 0.0052083335, %v8681_v27  ;;  %v8748_v54 = vadd.f32 %v8747_v21, %v8723_v56  ;;  %v8725_v15 = vmul.f32 %v15852_v58, %v15852_v58  ;;  %v8726_v2 = vmul.f32 %v15855_v32, %v15855_v32 }
0x13e2   : > { %v8697_v12 = vmul.f32 0.0052083335, %v8685_v55  ;;  %v8727_v59 = vmul.f32 %v15858_v47, %v15858_v47  ;;  %v8728_v17 = vmul.f32 %v15861_v8, %v15861_v8  ;;  %8745 = vadd.xlane.f32.xlu1 %v8744_v14  ;;  %8741 = vadd.xlane.f32.xlu0 %v8740_v28  ;;  %v16457_v28 = vld [vmem:[#allocation38_spill] sm:$0xff] }
0x13e3   : > { %v15874_v13 = vsub.f32 %v15753_v24, %v8696_v3  ;;  %v15877_v45 = vsub.f32 %v15756_v36, %v8696_v3  ;;  %v8751_v29 = vsel %vm3063_vm2, %v8726_v2, 0.0  ;;  %v8653_v3 = vld [vmem:[%s16456_s7] sm:$0x3] }
0x13e4   : > { %v15880_v18 = vsub.f32 %v15760_v46, %v8697_v12  ;;  %v15883_v11 = vsub.f32 %v15765_v26, %v8697_v12  ;;  %v8689_v37 = vpop.xlane.xlu0 %8688  ;;  %v8755_v43 = vsel %vm3063_vm2, %v8728_v17, 0.0  ;;  %v8752_v52 = vadd.f32 %v8751_v29, %v8725_v15  ;;  %v8874_v2 = vld [vmem:[%s16459_s11] sm:$0x3] }
0x13e5   : > { %v8698_v31 = vmul.f32 0.0052083335, %v8689_v37  ;;  %v8729_v24 = vmul.f32 %v15874_v13, %v15874_v13  ;;  %v8756_v36 = vadd.f32 %v8755_v43, %v8727_v59  ;;  %v8730_v25 = vmul.f32 %v15877_v45, %v15877_v45 }
0x13e6   : > { %v8732_v46 = vmul.f32 %v15883_v11, %v15883_v11  ;;  %8749 = vadd.xlane.f32.xlu0 %v8748_v54  ;;  %8753 = vadd.xlane.f32.xlu1 %v8752_v52  ;;  %v8731_v44 = vmul.f32 %v15880_v18, %v15880_v18  ;;  %v15915_v12 = vrot.slane %v8652_v49, %v16457_v28  ;;  %v16458_v54 = vld [vmem:[#allocation39_spill] sm:$0xff] }
0x13e7   : > { %v15894_v26 = vsub.f32 %v15773_v42, %v8698_v31  ;;  %v15897_v40 = vsub.f32 %v15776_v9, %v8698_v31  ;;  %v8759_v20 = vsel %vm3063_vm2, %v8730_v25, 0.0  ;;  %v15918_v15 = vrot.slane %v8652_v49, %v16458_v54 }
0x13e8   : > { %v8763_v33 = vsel %vm3063_vm2, %v8732_v46, 0.0  ;;  %v8760_v19 = vadd.f32 %v8759_v20, %v8729_v24  ;;  %v15926_v24 = vrot.slane %v8653_v3, %v16457_v28 }
0x13e9   : > { %v8733_v38 = vmul.f32 %v15894_v26, %v15894_v26  ;;  %v8734_v42 = vmul.f32 %v15897_v40, %v15897_v40  ;;  %v8764_v9 = vadd.f32 %v8763_v33, %v8731_v44  ;;  %v15932_v44 = vrot.slane %v8874_v2, %v16457_v28 }
0x13ea   : > { %8757 = vadd.xlane.f32.xlu0 %v8756_v36  ;;  %8761 = vadd.xlane.f32.xlu1 %v8760_v19  ;;  %v15929_v36 = vrot.slane %v8653_v3, %v16458_v54 }
0x13eb   : > { %v8767_v30 = vsel %vm3063_vm2, %v8734_v42, 0.0 }
0x13ec   : > { %v8768_v51 = vadd.f32 %v8767_v30, %v8733_v38 }
0x13ee   : > { %8765 = vadd.xlane.f32.xlu0 %v8764_v9  ;;  %8769 = vadd.xlane.f32.xlu1 %v8768_v51 }
0x146b   : > { %v8738_v0 = vpop.xlane.xlu1 %8737 }
0x146c   : > { %v8771_v53 = vmul.f32 0.0052083335, %v8738_v0 }
0x146e   : > { %v8780_v35 = vadd.f32 1e-05, %v8771_v53 }
0x146f   : > { %v8746_v4 = vpop.xlane.xlu1 %8745  ;;  %v8742_v60 = vpop.xlane.xlu0 %8741 }
0x1470   : > { %11210 = vrsqrt.f32 %v8780_v35  ;;  %v8773_v5 = vmul.f32 0.0052083335, %v8746_v4  ;;  %v8772_v10 = vmul.f32 0.0052083335, %v8742_v60 }
0x1472   : > { %v8782_v41 = vadd.f32 1e-05, %v8773_v5  ;;  %v8781_v1 = vadd.f32 1e-05, %v8772_v10 }
0x1473   : > { %v8754_v7 = vpop.xlane.xlu1 %8753  ;;  %v8750_v63 = vpop.xlane.xlu0 %8749 }
0x1474   : > { %11212 = vrsqrt.f32 %v8782_v41  ;;  %v8775_v14 = vmul.f32 0.0052083335, %v8754_v7  ;;  %v8774_v34 = vmul.f32 0.0052083335, %v8750_v63 }
0x1475   : > { %11214 = vrsqrt.f32 %v8781_v1 }
0x1476   : > { %v8784_v62 = vadd.f32 1e-05, %v8775_v14  ;;  %v8783_v56 = vadd.f32 1e-05, %v8774_v34 }
0x1477   : > { %v8762_v27 = vpop.xlane.xlu1 %8761  ;;  %v8758_v61 = vpop.xlane.xlu0 %8757 }
0x1478   : > { %11216 = vrsqrt.f32 %v8784_v62  ;;  %v8777_v55 = vmul.f32 0.0052083335, %v8762_v27  ;;  %v8776_v21 = vmul.f32 0.0052083335, %v8758_v61 }
0x1479   : > { %11218 = vrsqrt.f32 %v8783_v56 }
0x147a   : > { %v11211_v59 = vpop.eup %11210  ;;  %v8786_v17 = vadd.f32 1e-05, %v8777_v55  ;;  %v8785_v37 = vadd.f32 1e-05, %v8776_v21 }
0x147b   : > { %v8770_v29 = vpop.xlane.xlu1 %8769  ;;  %v8766_v43 = vpop.xlane.xlu0 %8765  ;;  %v8798_v31 = vmul.f32 %v11211_v59, %v15810_v22  ;;  %v8799_v52 = vmul.f32 %v11211_v59, %v15813_v16  ;;  %v15937_v22 = vrot.slane %v8874_v2, %v16458_v54 }
0x147c   : > { %11220 = vrsqrt.f32 %v8786_v17  ;;  %v8779_v25 = vmul.f32 0.0052083335, %v8770_v29  ;;  %v8778_v46 = vmul.f32 0.0052083335, %v8766_v43 }
0x147d   : > { %11222 = vrsqrt.f32 %v8785_v37  ;;  %v8827_v20 = vmul.f32 %v15915_v12, %v8798_v31  ;;  %v8828_v33 = vmul.f32 %v15918_v15, %v8799_v52 }
0x147e   : > { %v11213_v16 = vpop.eup %11212  ;;  %v8788_v19 = vadd.f32 1e-05, %v8779_v25  ;;  %v8787_v38 = vadd.f32 1e-05, %v8778_v46 }
0x147f   : > { %v11215_v42 = vpop.eup %11214  ;;  %v8856_v9 = vadd.f32 %v15926_v24, %v8827_v20  ;;  %v8857_v30 = vadd.f32 %v15929_v36, %v8828_v33  ;;  %v8802_v51 = vmul.f32 %v11213_v16, %v15816_v50  ;;  %v8803_v0 = vmul.f32 %v11213_v16, %v15819_v48 }
0x1480   : > { %v8800_v53 = vmul.f32 %v11215_v42, %v15830_v6  ;;  %v8801_v35 = vmul.f32 %v11215_v42, %v15833_v57  ;;  %11224 = vrsqrt.f32 %v8787_v38 }
0x1481   : > { %v8886_v4 = vmul.f32 %v15932_v44, %v8856_v9  ;;  %v8887_v60 = vmul.f32 %v15937_v22, %v8857_v30  ;;  %v8831_v5 = vmul.f32 %v15915_v12, %v8802_v51  ;;  %11226 = vrsqrt.f32 %v8788_v19 }
0x1482   : > { %v11217_v10 = vpop.eup %11216  ;;  %v8829_v41 = vmul.f32 %v15915_v12, %v8800_v53  ;;  %v8830_v1 = vmul.f32 %v15918_v15, %v8801_v35  ;;  %v8832_v50 = vmul.f32 %v15918_v15, %v8803_v0 }
0x1483   : > { %v11219_v48 = vpop.eup %11218  ;;  %v8904_v6 = vsel %vm3063_vm2, %v8887_v60, 0.0  ;;  %v8860_v57 = vadd.f32 %v15926_v24, %v8831_v5  ;;  %v8806_v7 = vmul.f32 %v11217_v10, %v15852_v58  ;;  %v8807_v63 = vmul.f32 %v11217_v10, %v15855_v32 }
0x1484   : > { %v8905_v14 = vadd.f32 %v8904_v6, %v8886_v4  ;;  %v8858_v34 = vadd.f32 %v15926_v24, %v8829_v41  ;;  %v8859_v62 = vadd.f32 %v15929_v36, %v8830_v1  ;;  %v8861_v56 = vadd.f32 %v15929_v36, %v8832_v50 }
0x1485   : > { %v8890_v49 = vmul.f32 %v15932_v44, %v8860_v57  ;;  %v8804_v27 = vmul.f32 %v11219_v48, %v15836_v39  ;;  %v8805_v61 = vmul.f32 %v11219_v48, %v15839_v23  ;;  %v8835_v55 = vmul.f32 %v15915_v12, %v8806_v7 }
0x1486   : > { %v11221_v21 = vpop.eup %11220  ;;  %8906 = vadd.xlane.f32.xlu0 %v8905_v14  ;;  %v8888_v58 = vmul.f32 %v15932_v44, %v8858_v34  ;;  %v8889_v32 = vmul.f32 %v15937_v22, %v8859_v62  ;;  %v8891_v3 = vmul.f32 %v15937_v22, %v8861_v56  ;;  %v8836_v28 = vmul.f32 %v15918_v15, %v8807_v63 }
0x1487   : > { %v11223_v54 = vpop.eup %11222  ;;  %v8833_v2 = vmul.f32 %v15915_v12, %v8804_v27  ;;  %v8834_v59 = vmul.f32 %v15918_v15, %v8805_v61  ;;  %v8864_v39 = vadd.f32 %v15926_v24, %v8835_v55  ;;  %v8810_v23 = vmul.f32 %v11221_v21, %v15874_v13 }
0x1488   : > { %v8908_v17 = vsel %vm3063_vm2, %v8889_v32, 0.0  ;;  %v8912_v37 = vsel %vm3063_vm2, %v8891_v3, 0.0  ;;  %v8865_v29 = vadd.f32 %v15929_v36, %v8836_v28  ;;  %v8808_v43 = vmul.f32 %v11223_v54, %v15858_v47 }
0x1489   : > { %v8909_v31 = vadd.f32 %v8908_v17, %v8888_v58  ;;  %v8913_v52 = vadd.f32 %v8912_v37, %v8890_v49  ;;  %v8862_v25 = vadd.f32 %v15926_v24, %v8833_v2  ;;  %v8863_v46 = vadd.f32 %v15929_v36, %v8834_v59  ;;  %v9924_v2 = vld [vmem:[#allocation3] ss:$0 sm:$0xff] }
0x148a   : > { %v8894_v20 = vmul.f32 %v15932_v44, %v8864_v39  ;;  %v8895_v33 = vmul.f32 %v15937_v22, %v8865_v29  ;;  %v8809_v13 = vmul.f32 %v11223_v54, %v15861_v8  ;;  %v8837_v16 = vmul.f32 %v15915_v12, %v8808_v43  ;;  %v11225_v19 = vpop.eup %11224 }
0x148b   : > { %8910 = vadd.xlane.f32.xlu1 %v8909_v31  ;;  %8914 = vadd.xlane.f32.xlu0 %v8913_v52  ;;  %v8892_v38 = vmul.f32 %v15932_v44, %v8862_v25  ;;  %v8893_v47 = vmul.f32 %v15937_v22, %v8863_v46  ;;  %v8811_v42 = vmul.f32 %v11221_v21, %v15877_v45  ;;  %v11227_v9 = vpop.eup %11226 }
0x148c   : > { %v8920_v30 = vsel %vm3063_vm2, %v8895_v33, 0.0  ;;  %v8838_v51 = vmul.f32 %v15918_v15, %v8809_v13  ;;  %v8866_v0 = vadd.f32 %v15926_v24, %v8837_v16  ;;  %v8839_v8 = vmul.f32 %v15915_v12, %v8810_v23 }
0x148d   : > { %v8916_v53 = vsel %vm3063_vm2, %v8893_v47, 0.0  ;;  %v8921_v35 = vadd.f32 %v8920_v30, %v8894_v20  ;;  %v8840_v4 = vmul.f32 %v15918_v15, %v8811_v42  ;;  %v8812_v60 = vmul.f32 %v11225_v19, %v15880_v18 }
0x148e   : > { %v8917_v5 = vadd.f32 %v8916_v53, %v8892_v38  ;;  %v8867_v10 = vadd.f32 %v15929_v36, %v8838_v51  ;;  %v8896_v45 = vmul.f32 %v15932_v44, %v8866_v0  ;;  %v8868_v41 = vadd.f32 %v15926_v24, %v8839_v8 }
0x148f   : > { %8922 = vadd.xlane.f32.xlu0 %v8921_v35  ;;  %v8869_v1 = vadd.f32 %v15929_v36, %v8840_v4  ;;  %v8813_v50 = vmul.f32 %v11225_v19, %v15883_v11  ;;  %v8841_v48 = vmul.f32 %v15915_v12, %v8812_v60  ;;  %v8814_v6 = vmul.f32 %v11227_v9, %v15894_v26 }
0x1490   : > { %8918 = vadd.xlane.f32.xlu1 %v8917_v5  ;;  %v8897_v57 = vmul.f32 %v15937_v22, %v8867_v10  ;;  %v8898_v18 = vmul.f32 %v15932_v44, %v8868_v41  ;;  %v8815_v7 = vmul.f32 %v11227_v9, %v15897_v40 }
0x1491   : > { %v8899_v63 = vmul.f32 %v15937_v22, %v8869_v1  ;;  %v8842_v14 = vmul.f32 %v15918_v15, %v8813_v50  ;;  %v8870_v34 = vadd.f32 %v15926_v24, %v8841_v48  ;;  %v8843_v62 = vmul.f32 %v15915_v12, %v8814_v6 }
0x1492   : > { %v8924_v11 = vsel %vm3063_vm2, %v8897_v57, 0.0  ;;  %v8844_v56 = vmul.f32 %v15918_v15, %v8815_v7 }
0x1493   : > { %v8925_v26 = vadd.f32 %v8924_v11, %v8896_v45  ;;  %v8928_v49 = vsel %vm3063_vm2, %v8899_v63, 0.0  ;;  %v8871_v27 = vadd.f32 %v15929_v36, %v8842_v14  ;;  %v8900_v40 = vmul.f32 %v15932_v44, %v8870_v34 }
0x1494   : > { %v8929_v61 = vadd.f32 %v8928_v49, %v8898_v18  ;;  %v8872_v55 = vadd.f32 %v15926_v24, %v8843_v62  ;;  %v8873_v21 = vadd.f32 %v15929_v36, %v8844_v56 }
0x1495   : > { %8926 = vadd.xlane.f32.xlu1 %v8925_v26  ;;  %v8901_v58 = vmul.f32 %v15937_v22, %v8871_v27 }
0x1496   : > { %8930 = vadd.xlane.f32.xlu0 %v8929_v61  ;;  %v8902_v12 = vmul.f32 %v15932_v44, %v8872_v55  ;;  %v8903_v15 = vmul.f32 %v15937_v22, %v8873_v21 }
0x1497   : > { %v8932_v32 = vsel %vm3063_vm2, %v8901_v58, 0.0 }
0x1498   : > { %v8933_v3 = vadd.f32 %v8932_v32, %v8900_v40  ;;  %v8936_v28 = vsel %vm3063_vm2, %v8903_v15, 0.0 }
0x1499   : > { %v8937_v54 = vadd.f32 %v8936_v28, %v8902_v12 }
0x149a   : > { %8934 = vadd.xlane.f32.xlu1 %v8933_v3 }
0x149b   : > { %8938 = vadd.xlane.f32.xlu0 %v8937_v54 }
0x1513   : > { %v8907_v24 = vpop.xlane.xlu0 %8906 }
0x1514   : > { %v8947_v36 = vadd.f32 %v9924_v2, %v8907_v24 }
0x1516   : > { %8957 = vst.msk [vmem:[%s16460_s21] sm:$0xff] %vm8956_vm6, %v8947_v36 }
0x1518   : > { %v8911_v44 = vpop.xlane.xlu1 %8910  ;;  %v8915_v59 = vpop.xlane.xlu0 %8914 }
0x1519   : > { %v8948_v22 = vadd.f32 %v9924_v2, %v8911_v44  ;;  %v8949_v39 = vadd.f32 %v9924_v2, %v8915_v59 }
0x151b   : > { %8958 = vst.msk [vmem:[%s16460_s21 + $0x8] sm:$0xff] %vm8956_vm6, %v8948_v22  ;;  %8959 = vst.msk [vmem:[%s16460_s21 + $0x10] sm:$0xff] %vm8956_vm6, %v8949_v39 }
0x151c   : > { %v8923_v23 = vpop.xlane.xlu0 %8922 }
0x151d   : > { %v8919_v17 = vpop.xlane.xlu1 %8918  ;;  %v8951_v37 = vadd.f32 %v9924_v2, %v8923_v23 }
0x151e   : > { %v8950_v29 = vadd.f32 %v9924_v2, %v8919_v17 }
0x151f   : > { %8961 = vst.msk [vmem:[%s16460_s21 + $0x20] sm:$0xff] %vm8956_vm6, %v8951_v37 }
0x1520   : > { %8960 = vst.msk [vmem:[%s16460_s21 + $0x18] sm:$0xff] %vm8956_vm6, %v8950_v29 }
0x1522   : > { %v8927_v43 = vpop.xlane.xlu1 %8926 }
0x1523   : > { %v8952_v31 = vadd.f32 %v9924_v2, %v8927_v43  ;;  %v8931_v52 = vpop.xlane.xlu0 %8930 }
0x1524   : > { %v8953_v25 = vadd.f32 %v9924_v2, %v8931_v52 }
0x1525   : > { %8962 = vst.msk [vmem:[%s16460_s21 + $0x28] sm:$0xff] %vm8956_vm6, %v8952_v31 }
0x1526   : > { %8963 = vst.msk [vmem:[%s16460_s21 + $0x30] sm:$0xff] %vm8956_vm6, %v8953_v25 }
0x1527   : > { %v8935_v46 = vpop.xlane.xlu1 %8934 }
0x1528   : > { %v8954_v20 = vadd.f32 %v9924_v2, %v8935_v46  ;;  %v8939_v33 = vpop.xlane.xlu0 %8938 }
0x1529   : > { %v8955_v13 = vadd.f32 %v9924_v2, %v8939_v33 }
0x152a   : > { %8964 = vst.msk [vmem:[%s16460_s21 + $0x38] sm:$0xff] %vm8956_vm6, %v8954_v20 }
0x152b   : > { %8965 = vst.msk [vmem:[%s16460_s21 + $0x40] sm:$0xff] %vm8956_vm6, %v8955_v13 }
0x152c PF: > { %s16461_s1 = sld [smem:[#allocation5_spill]]  ;;  %s16462_s6 = sld [smem:[#allocation4_spill]] }
0x152d   : > { %s16463_s30 = sld [smem:[#allocation6_spill]] }
0x1532   : > { %s37_s7 = sadd.s32 1, %s16461_s1  }
0x1533   : > { %p34_p7 = scmp.ge.s32.totalorder %s37_s7, 14  }
0x1535   :  { %36 = sbr.rel (!%p34_p7) target bundleno = 18 (0x12), region = 202 }

</bundles_post_ra>
